<compile_context>
chip_gen: v6e
topology: v6e:2x2x1
jax: 0.10.0
libtpu: 0.0.40
codegen_flags: <defaults>
</compile_context>

<pallas_src>
import functools
import math

import numpy as np
import jax
import jax.numpy as jnp
from jax import lax
from jax.experimental import pallas as pl
from jax.experimental.pallas import tpu as pltpu


# ----------------------------------------------------------------------------
# Fused kernel: GroupNorm + QKV + attention + proj_out + residual, per batch.
# ----------------------------------------------------------------------------
def _attention_block_kernel(x_ref, gamma_ref, beta_ref, wqkv_ref, bqkv_ref,
                            wproj_ref, bproj_ref, o_ref, xn_scr, q_scr, *,
                            groups, num_heads, t_real, tq):
    C, T = x_ref.shape[1], x_ref.shape[2]         # T is the padded length
    cpg = C // groups
    H = num_heads
    ch = C // H
    cdt = wqkv_ref.dtype                           # MXU compute dtype
    eps = 1e-5
    padded = (t_real != T)

    x = x_ref[0].astype(jnp.float32)               # [C, T]

    # ---- GroupNorm (two-pass, f32; stats via lane-dim sums) -----------------
    n = float(cpg * t_real)
    s1 = jnp.sum(x, axis=1, keepdims=True)                              # [C,1]
    mean_g = jnp.sum(s1.reshape(groups, cpg), axis=1, keepdims=True) / n
    mean_c = jnp.broadcast_to(mean_g[:, None, :], (groups, cpg, 1)).reshape(C, 1)
    xm = x - mean_c
    if padded:
        col = lax.broadcasted_iota(jnp.int32, (1, T), 1)
        xm = jnp.where(col < t_real, xm, 0.0)      # padded cols out of stats
    s2 = jnp.sum(xm * xm, axis=1, keepdims=True)                        # [C,1]
    var_g = jnp.sum(s2.reshape(groups, cpg), axis=1, keepdims=True) / n
    rstd_g = lax.rsqrt(var_g + eps)
    rstd_c = jnp.broadcast_to(rstd_g[:, None, :], (groups, cpg, 1)).reshape(C, 1)
    xn = xm * (gamma_ref[...] * rstd_c) + beta_ref[...]                 # [C,T] f32
    xn_scr[...] = xn

    # ---- QKV 1x1 conv (head-major [Q|K|V] row blocks, scale pre-folded) -----
    qkv = jnp.dot(wqkv_ref[...], xn.astype(cdt),
                  preferred_element_type=jnp.float32) + bqkv_ref[...]   # [3C,T]
    q_scr[...] = qkv[:C].astype(cdt)                                    # [C,T]
    k = qkv[C:2 * C].reshape(H, ch, T).astype(cdt)                      # [H,ch,T]
    v = qkv[2 * C:].reshape(H, ch, T).astype(cdt)                       # [H,ch,T]

    wproj = wproj_ref[...]
    bproj = bproj_ref[...]
    if padded:
        key_mask = lax.broadcasted_iota(jnp.int32, (1, 1, T), 2) < t_real

    nq = T // tq

    # ---- Attention + proj_out + residual, one lane-dense query tile per iter
    def process_tile(qi, carry):
        start = pl.multiple_of(qi * tq, tq)
        q_t = q_scr[:, pl.ds(start, tq)].reshape(H, ch, tq)             # [H,ch,tq]

        # scores[h, t, s] = sum_c q[h, c, t] * k[h, c, s]   (f32 MXU accum)
        scores = lax.dot_general(q_t, k, (((1,), (1,)), ((0,), (0,))),
                                 preferred_element_type=jnp.float32)    # [H,tq,T]
        if padded:
            scores = jnp.where(key_mask, scores, jnp.float32(-1e30))

        # Softmax over keys, f32, approx reciprocal on the EUP.
        scores = scores - jnp.max(scores, axis=-1, keepdims=True)
        p = jnp.exp(scores)
        p = p * pl.reciprocal(jnp.sum(p, axis=-1, keepdims=True), approx=True)

        # a[h, c, t] = sum_s v[h, c, s] * p[h, t, s]
        a = lax.dot_general(v, p.astype(cdt), (((2,), (2,)), ((0,), (0,))),
                            preferred_element_type=jnp.float32)         # [H,ch,tq]
        a = a.reshape(C, tq)                                            # head-major

        # proj_out (1x1 conv) + residual on the normalized activations.
        h_proj = jnp.dot(wproj, a.astype(cdt),
                         preferred_element_type=jnp.float32) + bproj
        o_ref[0, :, pl.ds(start, tq)] = (
            xn_scr[:, pl.ds(start, tq)] + h_proj).astype(o_ref.dtype)
        return carry

    lax.fori_loop(0, nq, process_tile, None, unroll=(nq <= 8))


# ----------------------------------------------------------------------------
# Wrapper
# ----------------------------------------------------------------------------
def attention_block(x, gamma, beta, wqkv, bqkv, wproj, bproj, *,
                    num_heads, groups, q_tile=128,
                    compute_dtype=jnp.bfloat16):
    """Forward pass of AttentionBlock (out_channels == channels, mask=None)."""
    B, C, T = x.shape
    assert C % num_heads == 0 and C % groups == 0
    ch = C // num_heads
    scale = 1.0 / math.sqrt(math.sqrt(ch))

    # Trace-time (free) row permutation: legacy per-head [q|k|v] interleave ->
    # head-major [Q | K | V] blocks, so in-kernel q/k/v slices are contiguous.
    perm = np.empty(3 * C, dtype=np.int32)
    for which in range(3):
        for h in range(num_heads):
            for c in range(ch):
                perm[which * C + h * ch + c] = h * 3 * ch + which * ch + c
    perm = jnp.asarray(perm)

    # Fold the 1/ch**0.25 attention scale into the Q and K blocks.
    row_scale = jnp.where(jnp.arange(3 * C) < 2 * C, scale, 1.0).astype(jnp.float32)
    wqkv_hm = wqkv.astype(jnp.float32)[perm] * row_scale[:, None]
    bqkv_hm = (bqkv.astype(jnp.float32)[perm] * row_scale).reshape(3 * C, 1)
    wqkv_c = wqkv_hm.astype(compute_dtype)

    gamma2 = gamma.reshape(C, 1).astype(jnp.float32)
    beta2 = beta.reshape(C, 1).astype(jnp.float32)
    wproj_c = wproj.astype(compute_dtype)
    bproj2 = bproj.reshape(C, 1).astype(jnp.float32)

    # Pad T to a multiple of 128 so every block / store is lane-dense.
    T_pad = max(128, ((T + 127) // 128) * 128)
    x_in = x if T_pad == T else jnp.pad(x, ((0, 0), (0, 0), (0, T_pad - T)))
    tq = q_tile if (q_tile % 128 == 0 and T_pad % q_tile == 0) else 128

    out = pl.pallas_call(
        functools.partial(_attention_block_kernel, groups=groups,
                          num_heads=num_heads, t_real=T, tq=tq),
        out_shape=jax.ShapeDtypeStruct((B, C, T_pad), x.dtype),
        grid_spec=pltpu.PrefetchScalarGridSpec(
            num_scalar_prefetch=0,
            grid=(B,),
            in_specs=[
                pl.BlockSpec((1, C, T_pad), lambda b: (b, 0, 0)),   # x
                pl.BlockSpec((C, 1), lambda b: (0, 0)),             # gamma
                pl.BlockSpec((C, 1), lambda b: (0, 0)),             # beta
                pl.BlockSpec((3 * C, C), lambda b: (0, 0)),         # W_qkv (perm+scaled)
                pl.BlockSpec((3 * C, 1), lambda b: (0, 0)),         # b_qkv (perm+scaled)
                pl.BlockSpec((C, C), lambda b: (0, 0)),             # W_proj
                pl.BlockSpec((C, 1), lambda b: (0, 0)),             # b_proj
            ],
            out_specs=pl.BlockSpec((1, C, T_pad), lambda b: (b, 0, 0)),
            scratch_shapes=[
                pltpu.VMEM((C, T_pad), jnp.float32),     # xn (residual branch)
                pltpu.VMEM((C, T_pad), compute_dtype),   # q  (scale pre-folded)
            ],
        ),
        compiler_params=pltpu.CompilerParams(
            dimension_semantics=("parallel",)),
    )(x_in, gamma2, beta2, wqkv_c, bqkv_hm, wproj_c, bproj2)

    return out if T_pad == T else out[:, :, :T]


# ----------------------------------------------------------------------------
# Pure-JAX reference (mirrors AttentionBlock._forward, mask=None, qk_bias=0)
# ----------------------------------------------------------------------------
def reference_forward(x, gamma, beta, wqkv, bqkv, wproj, bproj, *,
                      num_heads, groups):
    B, C, T = x.shape
    xg = x.reshape(B, groups, C // groups, T).astype(jnp.float32)
    mean = xg.mean(axis=(2, 3), keepdims=True)
    var = ((xg - mean) ** 2).mean(axis=(2, 3), keepdims=True)
    xn = (xg - mean) / jnp.sqrt(var + 1e-5)
    xn = xn.reshape(B, C, T) * gamma[None, :, None] + beta[None, :, None]
    qkv = jnp.einsum('oc,bct->bot', wqkv, xn) + bqkv[None, :, None]
    ch = C // num_heads
    qkv_h = qkv.reshape(B * num_heads, 3 * ch, T)
    q, k, v = qkv_h[:, :ch], qkv_h[:, ch:2 * ch], qkv_h[:, 2 * ch:]
    scale = 1.0 / math.sqrt(math.sqrt(ch))
    w = jnp.einsum('bct,bcs->bts', q * scale, k * scale)
    w = jax.nn.softmax(w, axis=-1)
    a = jnp.einsum('bts,bcs->bct', w, v).reshape(B, C, T)
    h = jnp.einsum('oc,bct->bot', wproj, a) + bproj[None, :, None]
    # x_proj is Identity; PyTorch adds h to the *normalized* activations.
    return xn + h


if __name__ == "__main__":
    # Shapes consistent with the module: channels=32 -> 16 groups (per
    # normalization()), num_heads=4 -> head dim 8.  T=256 exercises two
    # lane-dense 128-wide query tiles per batch element.
    B, C, T = 2, 32, 256
    NUM_HEADS = 4
    GROUPS = 16

    key = jax.random.PRNGKey(0)
    kx, kg, kb, kw1, kb1, kw2, kb2 = jax.random.split(key, 7)

    x = jax.random.normal(kx, (B, C, T), dtype=jnp.float32)
    gamma = 1.0 + 0.1 * jax.random.normal(kg, (C,), jnp.float32)   # GroupNorm weight
    beta = 0.1 * jax.random.normal(kb, (C,), jnp.float32)          # GroupNorm bias
    wqkv = 0.15 * jax.random.normal(kw1, (3 * C, C), jnp.float32)  # Conv1d(C,3C,1).weight[:,:,0]
    bqkv = 0.1 * jax.random.normal(kb1, (3 * C,), jnp.float32)     # Conv1d(C,3C,1).bias
    # proj_out is zero-initialized in the module; use non-zero weights so the
    # attention path is actually checked.
    wproj = 0.3 * jax.random.normal(kw2, (C, C), jnp.float32)
    bproj = 0.05 * jax.random.normal(kb2, (C,), jnp.float32)

    ref = jax.block_until_ready(
        reference_forward(x, gamma, beta, wqkv, bqkv, wproj, bproj,
                          num_heads=NUM_HEADS, groups=GROUPS))

    # f32 MXU path (tight tolerance).
    out_f32 = jax.block_until_ready(
        attention_block(x, gamma, beta, wqkv, bqkv, wproj, bproj,
                        num_heads=NUM_HEADS, groups=GROUPS,
                        q_tile=128, compute_dtype=jnp.float32))
    if not bool(jnp.allclose(out_f32, ref, rtol=1e-2, atol=1e-2)):
        raise AssertionError("Pallas kernel (f32) does not match reference")

    # bf16 MXU path (f32 accumulation; looser tolerance).
    out_bf16 = jax.block_until_ready(
        attention_block(x, gamma, beta, wqkv, bqkv, wproj, bproj,
                        num_heads=NUM_HEADS, groups=GROUPS,
                        q_tile=128, compute_dtype=jnp.bfloat16))
    if not bool(jnp.allclose(out_bf16, ref, rtol=3e-2, atol=3e-2)):
        raise AssertionError("Pallas kernel (bf16) does not match reference")

    # Non-128-multiple sequence length: exercises the pad-to-128 + key-mask
    # path (GroupNorm stats and softmax ignore padded columns).
    Tp = 200
    xp = jax.random.normal(jax.random.PRNGKey(1), (B, C, Tp), dtype=jnp.float32)
    ref_p = jax.block_until_ready(
        reference_forward(xp, gamma, beta, wqkv, bqkv, wproj, bproj,
                          num_heads=NUM_HEADS, groups=GROUPS))
    out_p = jax.block_until_ready(
        attention_block(xp, gamma, beta, wqkv, bqkv, wproj, bproj,
                        num_heads=NUM_HEADS, groups=GROUPS,
                        q_tile=128, compute_dtype=jnp.float32))
    if not bool(jnp.allclose(out_p, ref_p, rtol=1e-2, atol=1e-2)):
        raise AssertionError("Pallas kernel (padded T) does not match reference")

    print("KERNEL_OK")
</pallas_src>

<mosaic_0001>
module attributes {stable_mosaic.version = 11 : i64} {
  func.func @_attention_block_kernel(%arg0: i32, %arg1: memref<1x32x256xf32, #tpu.memory_space<vmem>>, %arg2: memref<32x1xf32, #tpu.memory_space<vmem>>, %arg3: memref<32x1xf32, #tpu.memory_space<vmem>>, %arg4: memref<96x32xf32, #tpu.memory_space<vmem>>, %arg5: memref<96x1xf32, #tpu.memory_space<vmem>>, %arg6: memref<32x32xf32, #tpu.memory_space<vmem>>, %arg7: memref<32x1xf32, #tpu.memory_space<vmem>>, %arg8: memref<1x32x256xf32, #tpu.memory_space<vmem>>, %arg9: memref<32x256xf32, #tpu.memory_space<vmem>>, %arg10: memref<32x256xf32, #tpu.memory_space<vmem>>) attributes {dimension_semantics = [#tpu.dimension_semantics<parallel>], iteration_bounds = array<i64: 2>, scalar_prefetch = 0 : i64, scratch_operands = 2 : i64, tpu.core_type = #tpu.core_type<tc>, window_params = [{transform_indices = @transform_0, window_bounds = array<i64: 1, 32, 256>}, {pipeline_mode = #tpu.pipeline_mode<synchronous>, transform_indices = @transform_1, window_bounds = array<i64: 32, 1>}, {pipeline_mode = #tpu.pipeline_mode<synchronous>, transform_indices = @transform_2, window_bounds = array<i64: 32, 1>}, {pipeline_mode = #tpu.pipeline_mode<synchronous>, transform_indices = @transform_3, window_bounds = array<i64: 96, 32>}, {pipeline_mode = #tpu.pipeline_mode<synchronous>, transform_indices = @transform_4, window_bounds = array<i64: 96, 1>}, {pipeline_mode = #tpu.pipeline_mode<synchronous>, transform_indices = @transform_5, window_bounds = array<i64: 32, 32>}, {pipeline_mode = #tpu.pipeline_mode<synchronous>, transform_indices = @transform_6, window_bounds = array<i64: 32, 1>}, {transform_indices = @transform_7, window_bounds = array<i64: 1, 32, 256>}]} {
    %c0 = arith.constant 0 : index
    %c0_0 = arith.constant 0 : index
    %c0_1 = arith.constant 0 : index
    %0 = vector.load %arg1[%c0, %c0_0, %c0_1] : memref<1x32x256xf32, #tpu.memory_space<vmem>>, vector<1x32x256xf32>
    %1 = vector.shape_cast %0 : vector<1x32x256xf32> to vector<32x256xf32>
    %cst = arith.constant dense<0.000000e+00> : vector<32xf32>
    %2 = vector.multi_reduction <add>, %1, %cst [1] : vector<32x256xf32> to vector<32xf32>
    %3 = vector.shape_cast %2 : vector<32xf32> to vector<32x1xf32>
    %4 = vector.shape_cast %3 : vector<32x1xf32> to vector<16x2xf32>
    %cst_2 = arith.constant dense<0.000000e+00> : vector<16xf32>
    %5 = vector.multi_reduction <add>, %4, %cst_2 [1] : vector<16x2xf32> to vector<16xf32>
    %6 = vector.shape_cast %5 : vector<16xf32> to vector<16x1xf32>
    %cst_3 = arith.constant 5.120000e+02 : f32
    %7 = vector.broadcast %cst_3 : f32 to vector<16x1xf32>
    %8 = arith.divf %6, %7 : vector<16x1xf32>
    %9 = vector.shape_cast %8 : vector<16x1xf32> to vector<16x1x1xf32>
    %10 = vector.shape_cast %9 : vector<16x1x1xf32> to vector<16x1x1xf32>
    %11 = vector.broadcast %10 : vector<16x1x1xf32> to vector<16x2x1xf32>
    %12 = vector.shape_cast %11 : vector<16x2x1xf32> to vector<32x1xf32>
    %13 = vector.broadcast %12 : vector<32x1xf32> to vector<32x256xf32>
    %14 = arith.subf %1, %13 : vector<32x256xf32>
    %15 = arith.mulf %14, %14 : vector<32x256xf32>
    %cst_4 = arith.constant dense<0.000000e+00> : vector<32xf32>
    %16 = vector.multi_reduction <add>, %15, %cst_4 [1] : vector<32x256xf32> to vector<32xf32>
    %17 = vector.shape_cast %16 : vector<32xf32> to vector<32x1xf32>
    %18 = vector.shape_cast %17 : vector<32x1xf32> to vector<16x2xf32>
    %cst_5 = arith.constant dense<0.000000e+00> : vector<16xf32>
    %19 = vector.multi_reduction <add>, %18, %cst_5 [1] : vector<16x2xf32> to vector<16xf32>
    %20 = vector.shape_cast %19 : vector<16xf32> to vector<16x1xf32>
    %cst_6 = arith.constant 5.120000e+02 : f32
    %21 = vector.broadcast %cst_6 : f32 to vector<16x1xf32>
    %22 = arith.divf %20, %21 : vector<16x1xf32>
    %cst_7 = arith.constant 9.99999974E-6 : f32
    %23 = vector.broadcast %cst_7 : f32 to vector<16x1xf32>
    %24 = arith.addf %22, %23 : vector<16x1xf32>
    %25 = math.rsqrt %24 : vector<16x1xf32>
    %26 = vector.shape_cast %25 : vector<16x1xf32> to vector<16x1x1xf32>
    %27 = vector.shape_cast %26 : vector<16x1x1xf32> to vector<16x1x1xf32>
    %28 = vector.broadcast %27 : vector<16x1x1xf32> to vector<16x2x1xf32>
    %29 = vector.shape_cast %28 : vector<16x2x1xf32> to vector<32x1xf32>
    %c0_8 = arith.constant 0 : index
    %c0_9 = arith.constant 0 : index
    %30 = vector.load %arg2[%c0_8, %c0_9] : memref<32x1xf32, #tpu.memory_space<vmem>>, vector<32x1xf32>
    %31 = arith.mulf %30, %29 : vector<32x1xf32>
    %32 = vector.broadcast %31 : vector<32x1xf32> to vector<32x256xf32>
    %33 = arith.mulf %14, %32 : vector<32x256xf32>
    %c0_10 = arith.constant 0 : index
    %c0_11 = arith.constant 0 : index
    %34 = vector.load %arg3[%c0_10, %c0_11] : memref<32x1xf32, #tpu.memory_space<vmem>>, vector<32x1xf32>
    %35 = vector.broadcast %34 : vector<32x1xf32> to vector<32x256xf32>
    %36 = arith.addf %33, %35 : vector<32x256xf32>
    %c0_12 = arith.constant 0 : index
    %c0_13 = arith.constant 0 : index
    %37 = vector.load %arg9[%c0_12, %c0_13] : memref<32x256xf32, #tpu.memory_space<vmem>>, vector<32x256xf32>
    tpu.vector_store %arg9[%c0_12, %c0_13], %36 {strides = array<i32>} : memref<32x256xf32, #tpu.memory_space<vmem>>, vector<32x256xf32>,
    %c0_14 = arith.constant 0 : index
    %c0_15 = arith.constant 0 : index
    %38 = vector.load %arg4[%c0_14, %c0_15] : memref<96x32xf32, #tpu.memory_space<vmem>>, vector<96x32xf32>
    %cst_16 = arith.constant dense<0.000000e+00> : vector<96x256xf32>
    %39 = tpu.matmul %38, %36, %cst_16 {dimension_numbers = #tpu.dot_dimension_numbers<[1], [0], [0], [1], [0, 0, 1, 1], [], []>} : vector<96x32xf32>, vector<32x256xf32>, vector<96x256xf32> -> vector<96x256xf32>
    %c0_17 = arith.constant 0 : index
    %c0_18 = arith.constant 0 : index
    %40 = vector.load %arg5[%c0_17, %c0_18] : memref<96x1xf32, #tpu.memory_space<vmem>>, vector<96x1xf32>
    %41 = vector.broadcast %40 : vector<96x1xf32> to vector<96x256xf32>
    %42 = arith.addf %39, %41 : vector<96x256xf32>
    %43 = vector.extract_strided_slice %42 {offsets = [0, 0], sizes = [32, 256], strides = [1, 1]} : vector<96x256xf32> to vector<32x256xf32>
    %c0_19 = arith.constant 0 : index
    %c0_20 = arith.constant 0 : index
    %44 = vector.load %arg10[%c0_19, %c0_20] : memref<32x256xf32, #tpu.memory_space<vmem>>, vector<32x256xf32>
    tpu.vector_store %arg10[%c0_19, %c0_20], %43 {strides = array<i32>} : memref<32x256xf32, #tpu.memory_space<vmem>>, vector<32x256xf32>,
    %45 = vector.extract_strided_slice %42 {offsets = [32, 0], sizes = [32, 256], strides = [1, 1]} : vector<96x256xf32> to vector<32x256xf32>
    %46 = vector.shape_cast %45 : vector<32x256xf32> to vector<4x8x256xf32>
    %47 = vector.extract_strided_slice %42 {offsets = [64, 0], sizes = [32, 256], strides = [1, 1]} : vector<96x256xf32> to vector<32x256xf32>
    %48 = vector.shape_cast %47 : vector<32x256xf32> to vector<4x8x256xf32>
    %c0_21 = arith.constant 0 : index
    %c0_22 = arith.constant 0 : index
    %49 = vector.load %arg6[%c0_21, %c0_22] : memref<32x32xf32, #tpu.memory_space<vmem>>, vector<32x32xf32>
    %c0_23 = arith.constant 0 : index
    %c0_24 = arith.constant 0 : index
    %50 = vector.load %arg7[%c0_23, %c0_24] : memref<32x1xf32, #tpu.memory_space<vmem>>, vector<32x1xf32>
    %c0_i32 = arith.constant 0 : i32
    %c128_i32 = arith.constant 128 : i32
    %51 = arith.muli %c0_i32, %c128_i32 : i32
    %52 = tpu.assume_multiple %51, 128 : i32
    %c0_25 = arith.constant 0 : index
    %53 = arith.index_cast %52 : i32 to index
    %54 = vector.load %arg10[%c0_25, %53] : memref<32x256xf32, #tpu.memory_space<vmem>>, vector<32x128xf32>
    %55 = vector.shape_cast %54 : vector<32x128xf32> to vector<4x8x128xf32>
    %cst_26 = arith.constant dense<0.000000e+00> : vector<4x128x256xf32>
    %56 = tpu.matmul %55, %46, %cst_26 {dimension_numbers = #tpu.dot_dimension_numbers<[1], [1], [2], [2], [0, 0, 0, 2, 1, 2], [0], [0]>} : vector<4x8x128xf32>, vector<4x8x256xf32>, vector<4x128x256xf32> -> vector<4x128x256xf32>
    %cst_27 = arith.constant dense<0xFF800000> : vector<4x128xf32>
    %57 = vector.multi_reduction <maximumf>, %56, %cst_27 [2] : vector<4x128x256xf32> to vector<4x128xf32>
    %58 = vector.shape_cast %57 : vector<4x128xf32> to vector<4x128x1xf32>
    %59 = vector.broadcast %58 : vector<4x128x1xf32> to vector<4x128x256xf32>
    %60 = arith.subf %56, %59 : vector<4x128x256xf32>
    %61 = math.exp %60 : vector<4x128x256xf32>
    %cst_28 = arith.constant dense<0.000000e+00> : vector<4x128xf32>
    %62 = vector.multi_reduction <add>, %61, %cst_28 [2] : vector<4x128x256xf32> to vector<4x128xf32>
    %63 = vector.shape_cast %62 : vector<4x128xf32> to vector<4x128x1xf32>
    %64 = tpu.reciprocal %63 {approx = true} : vector<4x128x1xf32> -> vector<4x128x1xf32>
    %65 = vector.broadcast %64 : vector<4x128x1xf32> to vector<4x128x256xf32>
    %66 = arith.mulf %61, %65 : vector<4x128x256xf32>
    %cst_29 = arith.constant dense<0.000000e+00> : vector<4x8x128xf32>
    %67 = tpu.matmul %48, %66, %cst_29 {dimension_numbers = #tpu.dot_dimension_numbers<[2], [2], [1], [1], [0, 0, 0, 1, 1, 1], [0], [0]>} : vector<4x8x256xf32>, vector<4x128x256xf32>, vector<4x8x128xf32> -> vector<4x8x128xf32>
    %68 = vector.shape_cast %67 : vector<4x8x128xf32> to vector<32x128xf32>
    %cst_30 = arith.constant dense<0.000000e+00> : vector<32x128xf32>
    %69 = tpu.matmul %49, %68, %cst_30 {dimension_numbers = #tpu.dot_dimension_numbers<[1], [0], [0], [1], [0, 0, 1, 1], [], []>} : vector<32x32xf32>, vector<32x128xf32>, vector<32x128xf32> -> vector<32x128xf32>
    %70 = vector.broadcast %50 : vector<32x1xf32> to vector<32x128xf32>
    %71 = arith.addf %69, %70 : vector<32x128xf32>
    %c0_31 = arith.constant 0 : index
    %72 = arith.index_cast %52 : i32 to index
    %73 = vector.load %arg9[%c0_31, %72] : memref<32x256xf32, #tpu.memory_space<vmem>>, vector<32x128xf32>
    %74 = arith.addf %73, %71 : vector<32x128xf32>
    %c0_32 = arith.constant 0 : index
    %c0_33 = arith.constant 0 : index
    %75 = arith.index_cast %52 : i32 to index
    %76 = vector.load %arg8[%c0_32, %c0_33, %75] : memref<1x32x256xf32, #tpu.memory_space<vmem>>, vector<1x32x128xf32>
    %77 = vector.shape_cast %76 : vector<1x32x128xf32> to vector<32x128xf32>
    %78 = vector.shape_cast %74 : vector<32x128xf32> to vector<1x32x128xf32>
    tpu.vector_store %arg8[%c0_32, %c0_33, %75], %78 {strides = array<i32>} : memref<1x32x256xf32, #tpu.memory_space<vmem>>, vector<1x32x128xf32>,
    %c1_i32 = arith.constant 1 : i32
    %c128_i32_34 = arith.constant 128 : i32
    %79 = arith.muli %c1_i32, %c128_i32_34 : i32
    %80 = tpu.assume_multiple %79, 128 : i32
    %c0_35 = arith.constant 0 : index
    %81 = arith.index_cast %80 : i32 to index
    %82 = vector.load %arg10[%c0_35, %81] : memref<32x256xf32, #tpu.memory_space<vmem>>, vector<32x128xf32>
    %83 = vector.shape_cast %82 : vector<32x128xf32> to vector<4x8x128xf32>
    %cst_36 = arith.constant dense<0.000000e+00> : vector<4x128x256xf32>
    %84 = tpu.matmul %83, %46, %cst_36 {dimension_numbers = #tpu.dot_dimension_numbers<[1], [1], [2], [2], [0, 0, 0, 2, 1, 2], [0], [0]>} : vector<4x8x128xf32>, vector<4x8x256xf32>, vector<4x128x256xf32> -> vector<4x128x256xf32>
    %cst_37 = arith.constant dense<0xFF800000> : vector<4x128xf32>
    %85 = vector.multi_reduction <maximumf>, %84, %cst_37 [2] : vector<4x128x256xf32> to vector<4x128xf32>
    %86 = vector.shape_cast %85 : vector<4x128xf32> to vector<4x128x1xf32>
    %87 = vector.broadcast %86 : vector<4x128x1xf32> to vector<4x128x256xf32>
    %88 = arith.subf %84, %87 : vector<4x128x256xf32>
    %89 = math.exp %88 : vector<4x128x256xf32>
    %cst_38 = arith.constant dense<0.000000e+00> : vector<4x128xf32>
    %90 = vector.multi_reduction <add>, %89, %cst_38 [2] : vector<4x128x256xf32> to vector<4x128xf32>
    %91 = vector.shape_cast %90 : vector<4x128xf32> to vector<4x128x1xf32>
    %92 = tpu.reciprocal %91 {approx = true} : vector<4x128x1xf32> -> vector<4x128x1xf32>
    %93 = vector.broadcast %92 : vector<4x128x1xf32> to vector<4x128x256xf32>
    %94 = arith.mulf %89, %93 : vector<4x128x256xf32>
    %cst_39 = arith.constant dense<0.000000e+00> : vector<4x8x128xf32>
    %95 = tpu.matmul %48, %94, %cst_39 {dimension_numbers = #tpu.dot_dimension_numbers<[2], [2], [1], [1], [0, 0, 0, 1, 1, 1], [0], [0]>} : vector<4x8x256xf32>, vector<4x128x256xf32>, vector<4x8x128xf32> -> vector<4x8x128xf32>
    %96 = vector.shape_cast %95 : vector<4x8x128xf32> to vector<32x128xf32>
    %cst_40 = arith.constant dense<0.000000e+00> : vector<32x128xf32>
    %97 = tpu.matmul %49, %96, %cst_40 {dimension_numbers = #tpu.dot_dimension_numbers<[1], [0], [0], [1], [0, 0, 1, 1], [], []>} : vector<32x32xf32>, vector<32x128xf32>, vector<32x128xf32> -> vector<32x128xf32>
    %98 = vector.broadcast %50 : vector<32x1xf32> to vector<32x128xf32>
    %99 = arith.addf %97, %98 : vector<32x128xf32>
    %c0_41 = arith.constant 0 : index
    %100 = arith.index_cast %80 : i32 to index
    %101 = vector.load %arg9[%c0_41, %100] : memref<32x256xf32, #tpu.memory_space<vmem>>, vector<32x128xf32>
    %102 = arith.addf %101, %99 : vector<32x128xf32>
    %c0_42 = arith.constant 0 : index
    %c0_43 = arith.constant 0 : index
    %103 = arith.index_cast %80 : i32 to index
    %104 = vector.load %arg8[%c0_42, %c0_43, %103] : memref<1x32x256xf32, #tpu.memory_space<vmem>>, vector<1x32x128xf32>
    %105 = vector.shape_cast %104 : vector<1x32x128xf32> to vector<32x128xf32>
    %106 = vector.shape_cast %102 : vector<32x128xf32> to vector<1x32x128xf32>
    tpu.vector_store %arg8[%c0_42, %c0_43, %103], %106 {strides = array<i32>} : memref<1x32x256xf32, #tpu.memory_space<vmem>>, vector<1x32x128xf32>,
    %c2_i32 = arith.constant 2 : i32
    return
  }
  func.func @transform_0(%arg0: i32) -> (i32, i32, i32) {
    %c0_i32 = arith.constant 0 : i32
    %c0_i32_0 = arith.constant 0 : i32
    %c0_i32_1 = arith.constant 0 : i32
    return %arg0, %c0_i32, %c0_i32_0 : i32, i32, i32
  }
  func.func @transform_1(%arg0: i32) -> (i32, i32) {
    %c0_i32 = arith.constant 0 : i32
    %c0_i32_0 = arith.constant 0 : i32
    %c0_i32_1 = arith.constant 0 : i32
    return %c0_i32, %c0_i32_0 : i32, i32
  }
  func.func @transform_2(%arg0: i32) -> (i32, i32) {
    %c0_i32 = arith.constant 0 : i32
    %c0_i32_0 = arith.constant 0 : i32
    %c0_i32_1 = arith.constant 0 : i32
    return %c0_i32, %c0_i32_0 : i32, i32
  }
  func.func @transform_3(%arg0: i32) -> (i32, i32) {
    %c0_i32 = arith.constant 0 : i32
    %c0_i32_0 = arith.constant 0 : i32
    %c0_i32_1 = arith.constant 0 : i32
    return %c0_i32, %c0_i32_0 : i32, i32
  }
  func.func @transform_4(%arg0: i32) -> (i32, i32) {
    %c0_i32 = arith.constant 0 : i32
    %c0_i32_0 = arith.constant 0 : i32
    %c0_i32_1 = arith.constant 0 : i32
    return %c0_i32, %c0_i32_0 : i32, i32
  }
  func.func @transform_5(%arg0: i32) -> (i32, i32) {
    %c0_i32 = arith.constant 0 : i32
    %c0_i32_0 = arith.constant 0 : i32
    %c0_i32_1 = arith.constant 0 : i32
    return %c0_i32, %c0_i32_0 : i32, i32
  }
  func.func @transform_6(%arg0: i32) -> (i32, i32) {
    %c0_i32 = arith.constant 0 : i32
    %c0_i32_0 = arith.constant 0 : i32
    %c0_i32_1 = arith.constant 0 : i32
    return %c0_i32, %c0_i32_0 : i32, i32
  }
  func.func @transform_7(%arg0: i32) -> (i32, i32, i32) {
    %c0_i32 = arith.constant 0 : i32
    %c0_i32_0 = arith.constant 0 : i32
    %c0_i32_1 = arith.constant 0 : i32
    return %arg0, %c0_i32, %c0_i32_0 : i32, i32, i32
  }
}

</mosaic_0001>

<bundles_post_ra>
// kernel: tpu_custom_call.1
= control target key start
LH: loop header
LB: loop body
LE: loop exit
PB: predicated region body
PF: predicated region fallthrough
CT: control target
= control target key end

     0   :  { %12 = vsyncpa [#allocation5], 0  ;;  %s11033_s0 = inlined_call_operand.vmem [shape: f32[2,32,256], index: 0, kind: input, shape index: {}]   ;;  %s11034_s1 = inlined_call_operand.vmem [shape: f32[32,1], index: 1, kind: input, shape index: {}]   ;;  %s11035_s2 = inlined_call_operand.vmem [shape: f32[32,1], index: 2, kind: input, shape index: {}]   ;;  %s11036_s3 = inlined_call_operand.vmem [shape: f32[96,32], index: 3, kind: input, shape index: {}]   ;;  %s11037_s4 = inlined_call_operand.vmem [shape: f32[96,1], index: 4, kind: input, shape index: {}]   ;;  %s11038_s5 = inlined_call_operand.vmem [shape: f32[32,32], index: 5, kind: input, shape index: {}]   ;;  %s11039_s6 = inlined_call_operand.vmem [shape: f32[32,1], index: 6, kind: input, shape index: {}]   ;;  %s11040_s7 = inlined_call_operand.hbm [shape: f32[2,32,256], index: 7, kind: output, shape index: {}]  }
   0x1   :  { %14 = vsyncpa [#allocation5 + $0x1], 0  ;;  %s7580_s24 = smov 0   ;;  %s7582_s25 = smov 0  }
   0x2   :  { %s7584_s26 = smov 0   ;;  %s7586_s27 = smov 0  }
   0x3 LB: > { %s7601_s28 = sadd.s32 4294967295, %s7528_s27   ;;  %s6424_s29 = sadd.s32 4294967294, %s7528_s27   ;;  %s7528_s27 = sphi %s7586_s27, %s12126_s27   ;;  %s7524_s26 = sphi %s7584_s26, %s12125_s26   ;;  %s7520_s25 = sphi %s7582_s25, %s12124_s25   ;;  %s7516_s24 = sphi %s7580_s24, %s12123_s24  }
   0x4   : > { %s7605_s30 = sadd.s32 1, %s7528_s27   ;;  %s179_s8 = sadd.s32 1, %s7524_s26 }
   0x5   : > { %s176_s9 = ssub.s32 %s7528_s27, %s7605_s30  ;;  %p189_p0 = scmp.ne.s32.totalorder %s7524_s26, %s7520_s25 }
   0x6   : > { %p177_p1 = scmp.eq.s32.totalorder %s176_s9, 0  ;;  %p190_p2 = scmp.eq.s32.totalorder %s7601_s28, 1 }
   0x7   : > { %p195_p3 = scmp.ne.s32.totalorder %s7520_s25, %s7516_s24  ;;  %p196_p4 = scmp.eq.s32.totalorder %s6424_s29, 1 }
   0x8   : > { %s7616_s10 = scalar_select %p177_p1, %s7524_s26, %s179_s8  }
   0x9   : > { %p7618_p5 = por %p190_p2, %p189_p0  ;;  %p7622_p6 = por %p196_p4, %p195_p3 }
   0xa   : > { %p6427_p7 = scmp.ge.s32.totalorder %s7528_s27, 1  ;;  %p240_p8 = scmp.lt.s32.totalorder %s7528_s27, 3 }
   0xc   : > { %p241_p9 = pnand %p6427_p7, %p240_p8 }
   0xe   : > { %244 = sbr.rel (%p241_p9) target bundleno = 3567 (0xdef), region = 48 }
  0x13   : > { %p272_p10 = scmp.lt.s32.totalorder %s7601_s28, 1  ;;  %v7530_v12 = vmov 0   ;;  %v7531_v13 = vmov 269488144   ;;  %v304_v15 = vlaneseq  ;;  %v7532_v16 = vmov 842150450  }
  0x14   : > { %6691 = vset.pattern.permute.xlu1 %v7530_v12  ;;  %6690 = vset.pattern.permute.xlu0 %v7530_v12  ;;  %v302_v14 = vunpack.c.l.s4 %v7531_v13  ;;  %v309_v17 = vunpack.c.l.s4 %v7532_v16  ;;  %v7533_v18 = vmov 1414812756   ;;  %v7534_v20 = vmov 1983009808   ;;  %s6589_s8 = sshll.u32 %s7601_s28, 10  ;;  %s7537_s19 = smov [#allocation4]  }
  0x15   : > { %s273_s13 = scalar_select %p272_p10, %s7601_s28, 1  ;;  %v316_v19 = vunpack.c.l.s4 %v7533_v18  ;;  %v414_v21 = vunpack.c.l.s4 %v7534_v20  ;;  %v7658_v23 = vshrl.u32 %v304_v15, 7  ;;  %v7535_v26 = vmov 1987475062  }
  0x16   : > { %v303_v22 = vunpack.c.0.s8 %v302_v14  ;;  %v310_v24 = vunpack.c.0.s8 %v309_v17  ;;  %v323_v27 = vunpack.c.l.s4 %v7535_v26  ;;  %vm639_vm0 = vcmask 1041409   ;;  %s7472_s20 = sshll.u32 %s7537_s19, 4  ;;  %s7473_s20 = int_to_ptr.vmem [resolvable:$false] %s7472_s20 }
  0x17   : > { %s6588_s14 = sshll.u32 %s273_s13, 6  ;;  %v317_v25 = vunpack.c.0.s8 %v316_v19  ;;  %v415_v28 = vunpack.c.0.s8 %v414_v21  ;;  %v574_v19 = vand.u32 127, %v304_v15  ;;  %vm641_vm1 = vcmask 1042434   ;;  %s7474_s21 = scalar_lea.vmem %s7473_s20, 2048 }
  0x18   : > { %s276_s17 = scalar_lea.vmem %s11033_s0, %s6588_s14  ;;  %v7661_v29 = vsub.s32 %v303_v22, %v7658_v23  ;;  %v7664_v30 = vsub.s32 %v310_v24, %v7658_v23  ;;  %v324_v32 = vunpack.c.0.s8 %v323_v27  ;;  %vm643_vm2 = vcmask 1043459   ;;  %s269_s14 = sand.u32 1, %s7520_s25  }
  0x19   : > { %v7633_v0 = vld [vmem:[%s276_s17 + $0x20] sm:$0xff]  ;;  %v7635_v1 = vld [vmem:[%s276_s17 + $0x28] sm:$0xff]  ;;  %v7637_v2 = vld [vmem:[%s276_s17 + $0x30] sm:$0xff]  ;;  %v7667_v31 = vsub.s32 %v317_v25, %v7658_v23  ;;  %v7670_v33 = vsub.s32 %v415_v28, %v7658_v23  ;;  %v7709_v22 = vsub.s32 %v574_v19, %v7658_v23  ;;  %vm645_vm3 = vcmask 1044484   ;;  %s6428_s15 = sshll.u32 %s269_s14, 6  ;;  %s10993_s28 = scalar_lea.sflag [#allocation5], %s269_s14 }
  0x1a   : > { %v291_v3 = vadd.f32 %v7635_v1, %v7633_v0  ;;  %v7641_v4 = vld [vmem:[%s276_s17 + $0x38] sm:$0xff]  ;;  %v7643_v5 = vld [vmem:[%s276_s17] sm:$0xff]  ;;  %v7645_v6 = vld [vmem:[%s276_s17 + $0x8] sm:$0xff]  ;;  %v7675_v38 = vsub.s32 %v324_v32, %v7658_v23  ;;  %vm647_vm4 = vcmask 1045509   ;;  %vm649_vm5 = vcmask 1046534   ;;  %s10931_s16 = scalar_lea.vmem [#allocation4], %s6428_s15 }
  0x1b   : > { %v285_v7 = vadd.f32 %v7645_v6, %v7643_v5  ;;  %v7649_v8 = vld [vmem:[%s276_s17 + $0x10] sm:$0xff]  ;;  %v7651_v9 = vld [vmem:[%s276_s17 + $0x18] sm:$0xff]  ;;  %v294_v10 = vadd.f32 %v7641_v4, %v7637_v2  ;;  %vm651_vm6 = vcmask 1047559   ;;  %vm662_vm7 = vcmask 15360   ;;  %s6362_s9 = sshll.u32 %s10931_s16, 4  ;;  %s10984_s17 = scalar_lea.hbm %s11040_s7, %s6589_s8  ;;  %s10986_s9 = int_to_ptr.vmem [resolvable:$true] %s6362_s9 }
  0x1c   : > { %292 = vadd.xlane.f32.xlu0 %v291_v3  ;;  %v288_v11 = vadd.f32 %v7651_v9, %v7649_v8  ;;  %v7753_v19 = vsub.s32 7, %v7658_v23  ;;  %vm1512_vm8 = vcmask 261120   ;;  %vm1738_vm9 = vcmask 64512   ;;  %s7468_s18 = scalar_lea.vmem %s10986_s9, 1024  ;;  %p7475_p0 = scmp.lt.s32.totalorder %s10986_s9, %s7473_s20 }
  0x1d   : > { %286 = vadd.xlane.f32.xlu1 %v285_v7  ;;  %p7469_p11 = scmp.ne.s32.totalorder %s10986_s9, %s7468_s18  ;;  %p7476_p1 = scmp.lt.s32.totalorder %s7474_s21, %s7468_s18 }
  0x1f   : > { %p7470_p12 = pnand %p7469_p11, %p7618_p5  ;;  %p7477_p2 = por %p7476_p1, %p7475_p0 }
  0x20   : > { %295 = vadd.xlane.f32.xlu0 %v294_v10 }
  0x21   : > { %289 = vadd.xlane.f32.xlu1 %v288_v11  ;;  %p7471_p13 = pneg %p7470_p12 }
  0x23   : > { %p7478_p3 = pnand %p7477_p2, %p7471_p13 }
  0xa5   : > { %v293_v34 = vpop.xlane.xlu0 %292 }
  0xa6   : > { %v363_v35 = vrot.slane %v293_v34, %v7661_v29  ;;  %v370_v36 = vrot.slane %v293_v34, %v7664_v30  ;;  %v287_v37 = vpop.xlane.xlu1 %286  ;;  %v377_v39 = vrot.slane %v293_v34, %v7667_v31  ;;  %v384_v46 = vrot.slane %v293_v34, %v7675_v38 }
  0xa7   : > { %v307_v53 = vrot.slane %v287_v37, %v7661_v29  ;;  %v314_v59 = vrot.slane %v287_v37, %v7664_v30  ;;  %v321_v63 = vrot.slane %v287_v37, %v7667_v31  ;;  %v328_v7 = vrot.slane %v287_v37, %v7675_v38 }
  0xa8   : > { %v475_v40 = vrot.slane %v363_v35, %v7670_v33  ;;  %v482_v41 = vrot.slane %v370_v36, %v7670_v33  ;;  %v489_v47 = vrot.slane %v377_v39, %v7670_v33  ;;  %v496_v52 = vrot.slane %v384_v46, %v7670_v33 }
  0xa9   : > { %v296_v42 = vpop.xlane.xlu0 %295  ;;  %v419_v57 = vrot.slane %v307_v53, %v7670_v33  ;;  %v426_v61 = vrot.slane %v314_v59, %v7670_v33  ;;  %v433_v3 = vrot.slane %v321_v63, %v7670_v33  ;;  %v440_v11 = vrot.slane %v328_v7, %v7670_v33 }
  0xaa   : > { %550 = vperm.xlu0 %6690, %v475_v40   ;;  %553 = vperm.xlu1 %6691, %v482_v41   ;;  %v405_v43 = vrot.slane %v296_v42, %v7667_v31  ;;  %v412_v44 = vrot.slane %v296_v42, %v7675_v38  ;;  %v290_v45 = vpop.xlane.xlu1 %289  ;;  %v391_v49 = vrot.slane %v296_v42, %v7661_v29 }
  0xab   : > { %v342_v51 = vrot.slane %v290_v45, %v7664_v30  ;;  %v356_v55 = vrot.slane %v290_v45, %v7675_v38  ;;  %v398_v60 = vrot.slane %v296_v42, %v7664_v30  ;;  %v335_v10 = vrot.slane %v290_v45, %v7661_v29 }
  0xac   : > { %v517_v48 = vrot.slane %v405_v43, %v7670_v33  ;;  %v524_v50 = vrot.slane %v412_v44, %v7670_v33  ;;  %v503_v54 = vrot.slane %v391_v49, %v7670_v33  ;;  %v349_v13 = vrot.slane %v290_v45, %v7667_v31 }
  0xad   : > { %v454_v56 = vrot.slane %v342_v51, %v7670_v33  ;;  %v468_v58 = vrot.slane %v356_v55, %v7670_v33  ;;  %v510_v62 = vrot.slane %v398_v60, %v7670_v33  ;;  %v447_v12 = vrot.slane %v335_v10, %v7670_v33 }
  0xae   : > { %556 = vperm.xlu1 %6691, %v489_v47   ;;  %568 = vperm.xlu0 %6690, %v517_v48   ;;  %v461_v14 = vrot.slane %v349_v13, %v7670_v33 }
  0xb2   : > { %559 = vperm.xlu1 %6691, %v496_v52   ;;  %571 = vperm.xlu0 %6690, %v524_v50  }
  0xb6   : > { %562 = vperm.xlu1 %6691, %v503_v54   ;;  %541 = vperm.xlu0 %6690, %v454_v56  }
  0xba   : > { %526 = vperm.xlu1 %6691, %v419_v57   ;;  %547 = vperm.xlu0 %6690, %v468_v58  }
  0xbe   : > { %529 = vperm.xlu1 %6691, %v426_v61  }
  0xc2   : > { %565 = vperm.xlu1 %6691, %v510_v62  }
  0xc6   : > { %532 = vperm.xlu1 %6691, %v433_v3  }
  0xca   : > { %535 = vperm.xlu1 %6691, %v440_v11  }
  0xce   : > { %538 = vperm.xlu1 %6691, %v447_v12  }
  0xd2   : > { %544 = vperm.xlu1 %6691, %v461_v14  }
 0x125   : > { %v554_v16 = vpop.permute.xlu1 %553  ;;  %v551_v21 = vpop.permute.xlu0 %550 }
 0x126   : > { %v610_v26 = vrot.slane %v551_v21, %v7709_v22  ;;  %v614_v27 = vrot.slane %v554_v16, %v7709_v22  ;;  %v7744_v16 = vsub.s32 4, %v7658_v23  ;;  %v7756_v21 = vsub.s32 0, %v7658_v23 }
 0x128   : > { %v653_v35 = vsel %vm639_vm0, %v614_v27, %v610_v26  ;;  %v7765_v26 = vsub.s32 3, %v7658_v23 }
 0x129   : > { %v557_v17 = vpop.permute.xlu1 %556  ;;  %v569_v25 = vpop.permute.xlu0 %568 }
 0x12a   : > { %v618_v28 = vrot.slane %v557_v17, %v7709_v22  ;;  %v634_v42 = vrot.slane %v569_v25, %v7709_v22  ;;  %v7747_v17 = vsub.s32 5, %v7658_v23  ;;  %v7762_v25 = vsub.s32 2, %v7658_v23 }
 0x12c   : > { %v654_v36 = vsel %vm641_vm1, %v618_v28, %v653_v35 }
 0x12d   : > { %v560_v18 = vpop.permute.xlu1 %559  ;;  %v572_v37 = vpop.permute.xlu0 %571 }
 0x12e   : > { %v622_v34 = vrot.slane %v560_v18, %v7709_v22  ;;  %v638_v44 = vrot.slane %v572_v37, %v7709_v22  ;;  %v7750_v18 = vsub.s32 6, %v7658_v23 }
 0x130   : > { %v655_v40 = vsel %vm643_vm2, %v622_v34, %v654_v36 }
 0x131   : > { %v563_v20 = vpop.permute.xlu1 %562  ;;  %v542_v52 = vpop.permute.xlu0 %541 }
 0x132   : > { %v626_v15 = vrot.slane %v563_v20, %v7709_v22  ;;  %v598_v63 = vrot.slane %v542_v52, %v7709_v22 }
 0x134   : > { %v656_v43 = vsel %vm645_vm3, %v626_v15, %v655_v40 }
 0x135   : > { %v527_v24 = vpop.permute.xlu1 %526  ;;  %v548_v61 = vpop.permute.xlu0 %547 }
 0x136   : > { %v578_v54 = vrot.slane %v527_v24, %v7709_v22  ;;  %v606_v10 = vrot.slane %v548_v61, %v7709_v22  ;;  %v7759_v24 = vsub.s32 1, %v7658_v23 }
 0x139   : > { %v530_v32 = vpop.permute.xlu1 %529 }
 0x13a   : > { %v582_v50 = vrot.slane %v530_v32, %v7709_v22 }
 0x13c   : > { %v640_v56 = vsel %vm639_vm0, %v582_v50, %v578_v54 }
 0x13d   : > { %v566_v39 = vpop.permute.xlu1 %565 }
 0x13e   : > { %v630_v41 = vrot.slane %v566_v39, %v7709_v22 }
 0x140   : > { %v657_v45 = vsel %vm647_vm4, %v630_v41, %v656_v43 }
 0x141   : > { %v533_v46 = vpop.permute.xlu1 %532  ;;  %v658_v47 = vsel %vm649_vm5, %v634_v42, %v657_v45 }
 0x142   : > { %v659_v48 = vsel %vm651_vm6, %v638_v44, %v658_v47  ;;  %v586_v53 = vrot.slane %v533_v46, %v7709_v22 }
 0x143   : > { %v666_v49 = vsel %vm662_vm7, %v659_v48, 0.0 }
 0x144   : > { %667 = vadd.xlane.f32.xlu1 %v666_v49  ;;  %v642_v58 = vsel %vm641_vm1, %v586_v53, %v640_v56 }
 0x145   : > { %v536_v51 = vpop.permute.xlu1 %535 }
 0x146   : > { %v590_v55 = vrot.slane %v536_v51, %v7709_v22 }
 0x148   : > { %v644_v60 = vsel %vm643_vm2, %v590_v55, %v642_v58 }
 0x149   : > { %v539_v57 = vpop.permute.xlu1 %538 }
 0x14a   : > { %v594_v59 = vrot.slane %v539_v57, %v7709_v22 }
 0x14c   : > { %v646_v62 = vsel %vm645_vm3, %v594_v59, %v644_v60 }
 0x14d   : > { %v545_v3 = vpop.permute.xlu1 %544  ;;  %v648_v11 = vsel %vm647_vm4, %v598_v63, %v646_v62 }
 0x14e   : > { %v602_v7 = vrot.slane %v545_v3, %v7709_v22 }
 0x150   : > { %v650_v12 = vsel %vm649_vm5, %v602_v7, %v648_v11 }
 0x151   : > { %v652_v13 = vsel %vm651_vm6, %v606_v10, %v650_v12 }
 0x152   : > { %v663_v14 = vsel %vm662_vm7, %v652_v13, 0.0 }
 0x153   : > { %664 = vadd.xlane.f32.xlu0 %v663_v14 }
 0x1cd   : > { %v668_v20 = vpop.xlane.xlu1 %667 }
 0x1ce   : > { %v671_v27 = vmul.f32 0.001953125, %v668_v20 }
 0x1d0   : > { %v725_v28 = vrot.slane %v671_v27, %v7744_v16  ;;  %v729_v32 = vrot.slane %v671_v27, %v7747_v17  ;;  %v733_v34 = vrot.slane %v671_v27, %v7750_v18  ;;  %v737_v15 = vrot.slane %v671_v27, %v7753_v19 }
 0x1d1   : > { %v709_v35 = vrot.slane %v671_v27, %v7756_v21  ;;  %v713_v36 = vrot.slane %v671_v27, %v7759_v24  ;;  %v717_v37 = vrot.slane %v671_v27, %v7762_v25  ;;  %v721_v39 = vrot.slane %v671_v27, %v7765_v26 }
 0x1d2   : > { %v792_v40 = vcombine.low %v725_v28, %v729_v32  ;;  %v793_v23 = vcombine.low %v733_v34, %v737_v15 }
 0x1d3   : > { %v774_v41 = vcombine.low %v709_v35, %v713_v36  ;;  %v775_v42 = vcombine.low %v717_v37, %v721_v39 }
 0x1d4   : > { %v800_v43 = vrot.slane %v792_v40, %v7670_v33  ;;  %v807_v44 = vrot.slane %v793_v23, %v7670_v33 }
 0x1d5   : > { %v782_v45 = vrot.slane %v774_v41, %v7670_v33  ;;  %v789_v46 = vrot.slane %v775_v42, %v7670_v33 }
 0x1d6   : > { %v808_v47 = vcombine.low %v800_v43, %v807_v44  ;;  %v809_v48 = vcombine.high %v800_v43, %v807_v44 }
 0x1d7   : > { %v790_v49 = vcombine.low %v782_v45, %v789_v46  ;;  %v791_v50 = vcombine.high %v782_v45, %v789_v46 }
 0x1d8   : > { %v7780_v51 = vsub.f32 %v7637_v2, %v808_v47  ;;  %v7783_v52 = vsub.f32 %v7641_v4, %v809_v48 }
 0x1d9   : > { %v7786_v53 = vsub.f32 %v7633_v0, %v790_v49  ;;  %v7789_v54 = vsub.f32 %v7635_v1, %v791_v50 }
 0x1da   : > { %v832_v55 = vmul.f32 %v7780_v51, %v7780_v51  ;;  %v833_v56 = vmul.f32 %v7783_v52, %v7783_v52 }
 0x1db   : > { %v830_v57 = vmul.f32 %v7786_v53, %v7786_v53  ;;  %v831_v2 = vmul.f32 %v7789_v54, %v7789_v54 }
 0x1dc   : > { %v665_v4 = vpop.xlane.xlu0 %664  ;;  %v843_v58 = vadd.f32 %v833_v56, %v832_v55 }
 0x1dd   : > { %v670_v59 = vmul.f32 0.001953125, %v665_v4  ;;  %v840_v0 = vadd.f32 %v831_v2, %v830_v57 }
 0x1de   : > { %844 = vadd.xlane.f32.xlu1 %v843_v58 }
 0x1df   : > { %841 = vadd.xlane.f32.xlu0 %v840_v0  ;;  %v693_v1 = vrot.slane %v670_v59, %v7744_v16  ;;  %v697_v60 = vrot.slane %v670_v59, %v7747_v17  ;;  %v701_v61 = vrot.slane %v670_v59, %v7750_v18  ;;  %v705_v62 = vrot.slane %v670_v59, %v7753_v19 }
 0x1e0   : > { %v677_v63 = vrot.slane %v670_v59, %v7756_v21  ;;  %v681_v3 = vrot.slane %v670_v59, %v7759_v24  ;;  %v685_v7 = vrot.slane %v670_v59, %v7762_v25  ;;  %v689_v10 = vrot.slane %v670_v59, %v7765_v26 }
 0x1e1   : > { %v756_v11 = vcombine.low %v693_v1, %v697_v60  ;;  %v757_v12 = vcombine.low %v701_v61, %v705_v62 }
 0x1e2   : > { %v738_v13 = vcombine.low %v677_v63, %v681_v3  ;;  %v739_v14 = vcombine.low %v685_v7, %v689_v10 }
 0x1e3   : > { %v764_v20 = vrot.slane %v756_v11, %v7670_v33  ;;  %v771_v27 = vrot.slane %v757_v12, %v7670_v33 }
 0x1e4   : > { %v746_v28 = vrot.slane %v738_v13, %v7670_v33  ;;  %v753_v32 = vrot.slane %v739_v14, %v7670_v33 }
 0x1e5   : > { %v772_v34 = vcombine.low %v764_v20, %v771_v27  ;;  %v773_v15 = vcombine.high %v764_v20, %v771_v27 }
 0x1e6   : > { %v754_v35 = vcombine.low %v746_v28, %v753_v32  ;;  %v755_v36 = vcombine.high %v746_v28, %v753_v32 }
 0x1e7   : > { %v7812_v37 = vsub.f32 %v7649_v8, %v772_v34  ;;  %v7815_v39 = vsub.f32 %v7651_v9, %v773_v15 }
 0x1e8   : > { %v7818_v40 = vsub.f32 %v7643_v5, %v754_v35  ;;  %v7821_v23 = vsub.f32 %v7645_v6, %v755_v36 }
 0x1e9   : > { %v828_v41 = vmul.f32 %v7812_v37, %v7812_v37  ;;  %v829_v42 = vmul.f32 %v7815_v39, %v7815_v39 }
 0x1ea   : > { %v826_v43 = vmul.f32 %v7818_v40, %v7818_v40  ;;  %v827_v8 = vmul.f32 %v7821_v23, %v7821_v23 }
 0x1eb   : > { %v837_v9 = vadd.f32 %v829_v42, %v828_v41 }
 0x1ec   : > { %v834_v44 = vadd.f32 %v827_v8, %v826_v43 }
 0x1ed   : > { %838 = vadd.xlane.f32.xlu1 %v837_v9 }
 0x1ee   : > { %835 = vadd.xlane.f32.xlu0 %v834_v44 }
 0x267   : > { %v845_v50 = vpop.xlane.xlu1 %844 }
 0x268   : > { %v842_v5 = vpop.xlane.xlu0 %841  ;;  %v940_v55 = vrot.slane %v845_v50, %v7661_v29  ;;  %v947_v0 = vrot.slane %v845_v50, %v7664_v30  ;;  %v954_v62 = vrot.slane %v845_v50, %v7667_v31  ;;  %v961_v11 = vrot.slane %v845_v50, %v7675_v38 }
 0x269   : > { %v919_v6 = vrot.slane %v842_v5, %v7664_v30  ;;  %v912_v45 = vrot.slane %v842_v5, %v7661_v29  ;;  %v926_v48 = vrot.slane %v842_v5, %v7667_v31  ;;  %v933_v49 = vrot.slane %v842_v5, %v7675_v38 }
 0x26a   : > { %v1052_v2 = vrot.slane %v940_v55, %v7670_v33  ;;  %v1059_v3 = vrot.slane %v947_v0, %v7670_v33  ;;  %v1066_v14 = vrot.slane %v954_v62, %v7670_v33  ;;  %v1073_v32 = vrot.slane %v961_v11, %v7670_v33 }
 0x26b   : > { %v1031_v46 = vrot.slane %v919_v6, %v7670_v33  ;;  %v1024_v47 = vrot.slane %v912_v45, %v7670_v33  ;;  %v1038_v56 = vrot.slane %v926_v48, %v7670_v33  ;;  %v1045_v57 = vrot.slane %v933_v49, %v7670_v33 }
 0x26d   : > { %1102 = vperm.xlu1 %6691, %v1031_v46   ;;  %1099 = vperm.xlu0 %6690, %v1024_v47  }
 0x271   : > { %1105 = vperm.xlu1 %6691, %v1038_v56   ;;  %1108 = vperm.xlu0 %6690, %v1045_v57  }
 0x275   : > { %1111 = vperm.xlu1 %6691, %v1052_v2  }
 0x276   : > { %v839_v10 = vpop.xlane.xlu1 %838 }
 0x277   : > { %v836_v4 = vpop.xlane.xlu0 %835  ;;  %v884_v12 = vrot.slane %v839_v10, %v7661_v29  ;;  %v891_v20 = vrot.slane %v839_v10, %v7664_v30  ;;  %v898_v27 = vrot.slane %v839_v10, %v7667_v31  ;;  %v905_v34 = vrot.slane %v839_v10, %v7675_v38 }
 0x278   : > { %v863_v58 = vrot.slane %v836_v4, %v7664_v30  ;;  %v856_v59 = vrot.slane %v836_v4, %v7661_v29  ;;  %v870_v61 = vrot.slane %v836_v4, %v7667_v31  ;;  %v877_v7 = vrot.slane %v836_v4, %v7675_v38 }
 0x279   : > { %v996_v28 = vrot.slane %v884_v12, %v7670_v33  ;;  %v1010_v29 = vrot.slane %v898_v27, %v7670_v33  ;;  %v1003_v15 = vrot.slane %v891_v20, %v7670_v33  ;;  %v1017_v35 = vrot.slane %v905_v34, %v7670_v33 }
 0x27a   : > { %v975_v1 = vrot.slane %v863_v58, %v7670_v33  ;;  %v968_v60 = vrot.slane %v856_v59, %v7670_v33  ;;  %v982_v63 = vrot.slane %v870_v61, %v7670_v33  ;;  %v989_v13 = vrot.slane %v877_v7, %v7670_v33 }
 0x27c   : > { %1078 = vperm.xlu1 %6691, %v975_v1   ;;  %1075 = vperm.xlu0 %6690, %v968_v60  }
 0x280   : > { %1081 = vperm.xlu1 %6691, %v982_v63   ;;  %1114 = vperm.xlu0 %6690, %v1059_v3  }
 0x284   : > { %1084 = vperm.xlu1 %6691, %v989_v13   ;;  %1117 = vperm.xlu0 %6690, %v1066_v14  }
 0x288   : > { %1087 = vperm.xlu1 %6691, %v996_v28   ;;  %1120 = vperm.xlu0 %6690, %v1073_v32  }
 0x28c   : > { %1093 = vperm.xlu1 %6691, %v1010_v29   ;;  %1090 = vperm.xlu0 %6690, %v1003_v15  }
 0x290   : > { %1096 = vperm.xlu0 %6690, %v1017_v35  }
 0x2e8   : > { %v1103_v30 = vpop.permute.xlu1 %1102  ;;  %v1100_v36 = vpop.permute.xlu0 %1099 }
 0x2e9   : > { %v1161_v9 = vrot.slane %v1103_v30, %v7709_v22  ;;  %v1157_v38 = vrot.slane %v1100_v36, %v7709_v22 }
 0x2eb   : > { %v1193_v45 = vsel %vm639_vm0, %v1161_v9, %v1157_v38 }
 0x2ec   : > { %v1106_v31 = vpop.permute.xlu1 %1105  ;;  %v1109_v41 = vpop.permute.xlu0 %1108 }
 0x2ed   : > { %v1165_v44 = vrot.slane %v1106_v31, %v7709_v22  ;;  %v1169_v46 = vrot.slane %v1109_v41, %v7709_v22  ;;  %v1391_v31 = vld [vmem:[%s11035_s2 + $0x18] sm:$0xff]  ;;  %v1390_v41 = vld [vmem:[%s11035_s2 + $0x10] sm:$0xff] }
 0x2ef   : > { %v1194_v47 = vsel %vm641_vm1, %v1165_v44, %v1193_v45 }
 0x2f0   : > { %v1112_v42 = vpop.permute.xlu1 %1111  ;;  %v1195_v57 = vsel %vm643_vm2, %v1169_v46, %v1194_v47 }
 0x2f1   : > { %v1173_v48 = vrot.slane %v1112_v42, %v7709_v22 }
 0x2f3   : > { %v1196_v58 = vsel %vm645_vm3, %v1173_v48, %v1195_v57 }
 0x2f7   : > { %v1079_v43 = vpop.permute.xlu1 %1078  ;;  %v1076_v8 = vpop.permute.xlu0 %1075 }
 0x2f8   : > { %v1129_v2 = vrot.slane %v1079_v43, %v7709_v22  ;;  %v1125_v4 = vrot.slane %v1076_v8, %v7709_v22 }
 0x2fa   : > { %v1186_v7 = vsel %vm639_vm0, %v1129_v2, %v1125_v4 }
 0x2fb   : > { %v1082_v5 = vpop.permute.xlu1 %1081  ;;  %v1115_v6 = vpop.permute.xlu0 %1114 }
 0x2fc   : > { %v1177_v55 = vrot.slane %v1115_v6, %v7709_v22  ;;  %v1133_v59 = vrot.slane %v1082_v5, %v7709_v22 }
 0x2fe   : > { %v1197_v62 = vsel %vm647_vm4, %v1177_v55, %v1196_v58  ;;  %v1187_v11 = vsel %vm641_vm1, %v1133_v59, %v1186_v7  ;;  %v1282_v59 = vld [vmem:[%s11034_s1 + $0x10] sm:$0xff] }
 0x2ff   : > { %v1085_v49 = vpop.permute.xlu1 %1084  ;;  %v1118_v50 = vpop.permute.xlu0 %1117 }
 0x300   : > { %v1181_v56 = vrot.slane %v1118_v50, %v7709_v22  ;;  %v1137_v60 = vrot.slane %v1085_v49, %v7709_v22 }
 0x302   : > { %v1198_v3 = vsel %vm649_vm5, %v1181_v56, %v1197_v62  ;;  %v1188_v20 = vsel %vm643_vm2, %v1137_v60, %v1187_v11 }
 0x303   : > { %v1088_v0 = vpop.permute.xlu1 %1087  ;;  %v1121_v1 = vpop.permute.xlu0 %1120 }
 0x304   : > { %v1185_v61 = vrot.slane %v1121_v1, %v7709_v22  ;;  %v1141_v63 = vrot.slane %v1088_v0, %v7709_v22 }
 0x306   : > { %v1199_v10 = vsel %vm651_vm6, %v1185_v61, %v1198_v3  ;;  %v1189_v28 = vsel %vm645_vm3, %v1141_v63, %v1188_v20  ;;  %v1283_v61 = vld [vmem:[%s11034_s1 + $0x18] sm:$0xff] }
 0x307   : > { %v1094_v12 = vpop.permute.xlu1 %1093  ;;  %v1091_v13 = vpop.permute.xlu0 %1090  ;;  %v1205_v14 = vsel %vm662_vm7, %v1199_v10, 0.0 }
 0x308   : > { %v1145_v27 = vrot.slane %v1091_v13, %v7709_v22  ;;  %1206 = vadd.xlane.f32.xlu1 %v1205_v14  ;;  %v1149_v32 = vrot.slane %v1094_v12, %v7709_v22 }
 0x30a   : > { %v1190_v34 = vsel %vm647_vm4, %v1145_v27, %v1189_v28 }
 0x30b   : > { %v1097_v29 = vpop.permute.xlu0 %1096  ;;  %v1191_v35 = vsel %vm649_vm5, %v1149_v32, %v1190_v34 }
 0x30c   : > { %v1153_v15 = vrot.slane %v1097_v29, %v7709_v22  ;;  %v1441_v29 = vld [vmem:[%s11037_s4 + $0x8] sm:$0xff] }
 0x30e   : > { %v1192_v30 = vsel %vm651_vm6, %v1153_v15, %v1191_v35 }
 0x30f   : > { %v1202_v36 = vsel %vm662_vm7, %v1192_v30, 0.0 }
 0x310   : > { %1203 = vadd.xlane.f32.xlu0 %v1202_v36  ;;  %v1280_v36 = vld [vmem:[%s11034_s1] sm:$0xff] }
 0x319   : > { %1409 = vperm.xlu1 %6691, %v1391_v31   ;;  %v1445_v31 = vld [vmem:[%s11037_s4 + $0x28] sm:$0xff] }
 0x31d   : > { %1404 = vperm.xlu1 %6691, %v1390_v41  }
 0x391   : > { %v1207_v42 = vpop.xlane.xlu1 %1206 }
 0x392   : > { %v1209_v43 = vmul.f32 0.001953125, %v1207_v42  ;;  %v1388_v42 = vld [vmem:[%s11035_s2] sm:$0xff] }
 0x394   : > { %v1211_v22 = vadd.f32 1e-05, %v1209_v43  ;;  %v11041_v43 = vmov 0.0  }
 0x395   : > { %1613 = vmatprep.mubr.f32.mxu0 %v11041_v43  ;;  %1667 = vmatprep.mubr.f32.mxu1 %v11041_v43 }
 0x396   : > { %6692 = vrsqrt.f32 %v1211_v22  ;;  %v1442_v22 = vld [vmem:[%s11037_s4 + $0x10] sm:$0xff] }
 0x399   : > { %v1204_v8 = vpop.xlane.xlu0 %1203 }
 0x39a   : > { %v1208_v9 = vmul.f32 0.001953125, %v1204_v8  ;;  %v1440_v8 = vld [vmem:[%s11037_s4] sm:$0xff] }
 0x39c   : > { %v1210_v38 = vadd.f32 1e-05, %v1208_v9  ;;  %v1444_v9 = vld [vmem:[%s11037_s4 + $0x20] sm:$0xff] }
 0x39e   : > { %6694 = vrsqrt.f32 %v1210_v38  ;;  %v1410_v38 = vpop.permute.xlu1 %1409 }
 0x3a3   : > { %v6693_v44 = vpop.eup %6692 }
 0x3a4   : > { %v1251_v5 = vrot.slane %v6693_v44, %v7756_v21  ;;  %v1255_v6 = vrot.slane %v6693_v44, %v7759_v24  ;;  %v1259_v45 = vrot.slane %v6693_v44, %v7762_v25  ;;  %v1263_v46 = vrot.slane %v6693_v44, %v7765_v26 }
 0x3a5   : > { %v1267_v47 = vrot.slane %v6693_v44, %v7744_v16  ;;  %v1271_v48 = vrot.slane %v6693_v44, %v7747_v17  ;;  %v1275_v49 = vrot.slane %v6693_v44, %v7750_v18  ;;  %v1279_v50 = vrot.slane %v6693_v44, %v7753_v19  ;;  %v1405_v44 = vpop.permute.xlu1 %1404 }
 0x3a6   : > { %v1318_v55 = vcombine.low %v1251_v5, %v1255_v6  ;;  %v1319_v56 = vcombine.low %v1259_v45, %v1263_v46 }
 0x3a7   : > { %v1335_v57 = vcombine.low %v1267_v47, %v1271_v48  ;;  %v1336_v2 = vcombine.low %v1275_v49, %v1279_v50 }
 0x3a8   : > { %v1326_v4 = vrot.slane %v1318_v55, %v7670_v33  ;;  %v1333_v58 = vrot.slane %v1319_v56, %v7670_v33 }
 0x3a9   : > { %v1343_v0 = vrot.slane %v1335_v57, %v7670_v33  ;;  %v1350_v1 = vrot.slane %v1336_v2, %v7670_v33 }
 0x3aa   : > { %v1334_v60 = vcombine.low %v1326_v4, %v1333_v58 }
 0x3ab   : > { %v6695_v62 = vpop.eup %6694  ;;  %v1351_v63 = vcombine.low %v1343_v0, %v1350_v1  ;;  %v1428_v1 = vld [vmem:[%s11036_s3] sm:$0xff] }
 0x3ac   : > { %v1358_v3 = vmul.f32 %v1334_v60, %v1282_v59  ;;  %v1235_v7 = vrot.slane %v6695_v62, %v7744_v16  ;;  %v1239_v10 = vrot.slane %v6695_v62, %v7747_v17  ;;  %v1243_v11 = vrot.slane %v6695_v62, %v7750_v18  ;;  %v1389_v16 = vld [vmem:[%s11035_s2 + $0x8] sm:$0xff]  ;;  %v1431_v60 = vld [vmem:[%s11036_s3 + $0x18] sm:$0xff] }
 0x3ad   : > { %v1359_v12 = vmul.f32 %v1351_v63, %v1283_v61  ;;  %v1247_v13 = vrot.slane %v6695_v62, %v7753_v19  ;;  %v1219_v14 = vrot.slane %v6695_v62, %v7756_v21  ;;  %v1223_v20 = vrot.slane %v6695_v62, %v7759_v24  ;;  %v1432_v61 = vld [vmem:[%s11036_s3 + $0x20] sm:$0xff]  ;;  %v1434_v63 = vld [vmem:[%s11036_s3 + $0x30] sm:$0xff] }
 0x3ae   : > { %1372 = vperm.xlu1 %6691, %v1358_v3   ;;  %v1301_v27 = vcombine.low %v1235_v7, %v1239_v10  ;;  %v1227_v28 = vrot.slane %v6695_v62, %v7762_v25  ;;  %v1231_v32 = vrot.slane %v6695_v62, %v7765_v26  ;;  %v1281_v25 = vld [vmem:[%s11034_s1 + $0x8] sm:$0xff]  ;;  %v1435_v7 = vld [vmem:[%s11036_s3 + $0x38] sm:$0xff]  ;;  %v1438_v10 = vld [vmem:[%s11036_s3 + $0x50] sm:$0xff] }
 0x3af   : > { %1377 = vperm.xlu0 %6690, %v1359_v12   ;;  %v1302_v17 = vcombine.low %v1243_v11, %v1247_v13  ;;  %v1284_v18 = vcombine.low %v1219_v14, %v1223_v20  ;;  %v1433_v62 = vld [vmem:[%s11036_s3 + $0x28] sm:$0xff]  ;;  %v1439_v11 = vld [vmem:[%s11036_s3 + $0x58] sm:$0xff]  ;;  %v1436_v12 = vld [vmem:[%s11036_s3 + $0x40] sm:$0xff] }
 0x3b0   : > { %v1309_v34 = vrot.slane %v1301_v27, %v7670_v33  ;;  %v1285_v19 = vcombine.low %v1227_v28, %v1231_v32  ;;  %v1437_v3 = vld [vmem:[%s11036_s3 + $0x48] sm:$0xff] }
 0x3b1   : > { %v1316_v21 = vrot.slane %v1302_v17, %v7670_v33  ;;  %v1292_v24 = vrot.slane %v1284_v18, %v7670_v33 }
 0x3b2   : > { %1399 = vperm.xlu1 %6691, %v1389_v16   ;;  %v1299_v26 = vrot.slane %v1285_v19, %v7670_v33  ;;  %v1443_v33 = vld [vmem:[%s11037_s4 + $0x18] sm:$0xff] }
 0x3b3   : > { %v1317_v15 = vcombine.low %v1309_v34, %v1316_v21 }
 0x3b4   : > { %v1300_v30 = vcombine.low %v1292_v24, %v1299_v26 }
 0x3b5   : > { %v1357_v35 = vmul.f32 %v1317_v15, %v1281_v25 }
 0x3b6   : > { %1459 = vperm.xlu1 %6691, %v1441_v29   ;;  %v1356_v41 = vmul.f32 %v1300_v30, %v1280_v36 }
 0x3b7   : > { %1367 = vperm.xlu0 %6690, %v1357_v35  }
 0x3ba   : > { %1479 = vperm.xlu1 %6691, %v1445_v31  }
 0x3bb   : > { %1362 = vperm.xlu0 %6690, %v1356_v41  }
 0x3be   : > { %1469 = vperm.xlu1 %6691, %v1443_v33   ;;  %v1446_v33 = vld [vmem:[%s11037_s4 + $0x30] sm:$0xff] }
 0x3bf   : > { %1394 = vperm.xlu0 %6690, %v1388_v42   ;;  %v1447_v42 = vld [vmem:[%s11037_s4 + $0x38] sm:$0xff] }
 0x3c2   : > { %1464 = vperm.xlu1 %6691, %v1442_v22  }
 0x3c3   : > { %1454 = vperm.xlu0 %6690, %v1440_v8  }
 0x3c7   : > { %1474 = vperm.xlu0 %6690, %v1444_v9  }
 0x429   : > { %v1373_v5 = vpop.permute.xlu1 %1372 }
 0x42a   : > { %v1378_v6 = vpop.permute.xlu0 %1377  ;;  %v1385_v45 = vmul.f32 %v1373_v5, %v7789_v54  ;;  %v1384_v48 = vmul.f32 %v1373_v5, %v7786_v53 }
 0x42b   : > { %v1386_v46 = vmul.f32 %v1378_v6, %v7780_v51  ;;  %v1387_v47 = vmul.f32 %v1378_v6, %v7783_v52 }
 0x42c   : > { %v7973_v55 = vadd.f32 %v1405_v44, %v1385_v45  ;;  %v7977_v54 = vadd.f32 %v1405_v44, %v1384_v48 }
 0x42d   : > { %v7967_v49 = vadd.f32 %v1410_v38, %v1387_v47  ;;  %v7969_v50 = vadd.f32 %v1410_v38, %v1386_v46  ;;  %v1400_v56 = vpop.permute.xlu1 %1399 }
 0x42e   : > { %11394 = vst [vmem:[#allocation9_spill] sm:$0xff] %v7973_v55  ;;  %11395 = vst [vmem:[#allocation10_spill] sm:$0xff] %v7977_v54 }
 0x42f   : > { %11392 = vst [vmem:[#allocation7_spill] sm:$0xff] %v7967_v49  ;;  %11393 = vst [vmem:[#allocation8_spill] sm:$0xff] %v7969_v50  ;;  %1573 = vmatprep.subr.mxu0 %v7967_v49  ;;  %6634 = vmatprep.subr.mxu1 %v7967_v49 }
 0x430   : > { %1574 = vmatpush1.msra.mxu0 %v7969_v50  ;;  %6638 = vmatpush1.msra.mxu1 %v7969_v50 }
 0x431   : > { %1575 = vmatprep.subr.mxu0 %v7973_v55  ;;  %6635 = vmatprep.subr.mxu1 %v7973_v55  ;;  %v8068_v28 = vpop.permute.xlu1 %1459 }
 0x432   : > { %1576 = vmatpush1.msra.mxu0 %v7977_v54  ;;  %6639 = vmatpush1.msra.mxu1 %v7977_v54  ;;  %v1368_v51 = vpop.permute.xlu0 %1367  ;;  %11402 = vst [vmem:[#allocation17_spill] sm:$0xff] %v8068_v28 }
 0x433   : > { %v1382_v52 = vmul.f32 %v1368_v51, %v7812_v37  ;;  %v1383_v53 = vmul.f32 %v1368_v51, %v7815_v39 }
 0x435   : > { %v7985_v57 = vadd.f32 %v1400_v56, %v1383_v53  ;;  %v7987_v2 = vadd.f32 %v1400_v56, %v1382_v52  ;;  %v1480_v30 = vpop.permute.xlu1 %1479 }
 0x436   : > { %v1363_v4 = vpop.permute.xlu0 %1362 }
 0x437   : > { %11396 = vst [vmem:[#allocation11_spill] sm:$0xff] %v7985_v57  ;;  %11397 = vst [vmem:[#allocation12_spill] sm:$0xff] %v7987_v2  ;;  %1577 = vmatprep.subr.mxu0 %v7985_v57  ;;  %6636 = vmatprep.subr.mxu1 %v7985_v57  ;;  %v1380_v58 = vmul.f32 %v1363_v4, %v7818_v40  ;;  %v1381_v37 = vmul.f32 %v1363_v4, %v7821_v23  ;;  %v1429_v40 = vld [vmem:[%s11036_s3 + $0x8] sm:$0xff]  ;;  %v1430_v23 = vld [vmem:[%s11036_s3 + $0x10] sm:$0xff] }
 0x438   : > { %1578 = vmatpush1.msra.mxu0 %v7987_v2  ;;  %6640 = vmatpush1.msra.mxu1 %v7987_v2 }
 0x439   : > { %v8095_v22 = vpop.permute.xlu1 %1469 }
 0x43a   : > { %v1395_v59 = vpop.permute.xlu0 %1394  ;;  %11410 = vst [vmem:[#allocation25_spill] sm:$0xff] %v8095_v22 }
 0x43b   : > { %v7995_v39 = vadd.f32 %v1395_v59, %v1380_v58  ;;  %v7997_v0 = vadd.f32 %v1395_v59, %v1381_v37 }
 0x43d   : > { %11398 = vst [vmem:[#allocation13_spill] sm:$0xff] %v7995_v39  ;;  %11399 = vst [vmem:[#allocation14_spill] sm:$0xff] %v7997_v0  ;;  %1579 = vmatprep.subr.mxu0 %v7997_v0  ;;  %6637 = vmatprep.subr.mxu1 %v7997_v0  ;;  %v8097_v8 = vpop.permute.xlu1 %1464 }
 0x43e   : > { %1580 = vmatpush1.msra.mxu0 %v7995_v39  ;;  %6641 = vmatpush1.msra.mxu1 %v7995_v39  ;;  %v8061_v13 = vpop.permute.xlu0 %1454  ;;  %11411 = vst [vmem:[#allocation26_spill] sm:$0xff] %v8097_v8 }
 0x43f   : > { %6431 = vmatmul.mubr.msk.f32.vlgmr.msra.gmra.mxu0 %vm1512_vm8, %v1428_v1  ;;  %6440 = vmatmul.mubr.msk.f32.vlgmr.msra.gmra.mxu1 %vm1512_vm8, %v1437_v3  ;;  %11400 = vst [vmem:[#allocation15_spill] sm:$0xff] %v8061_v13 }
 0x440   : > { %1619 = vmatprep.mubr.f32.mxu0 %v11041_v43  ;;  %1673 = vmatprep.mubr.f32.mxu1 %v11041_v43 }
 0x442   : > { %v1475_v25 = vpop.permute.xlu0 %1474 }
 0x443   : > { %6432 = vmatmul.mubr.msk.f32.gmra.mxu0 %vm1512_vm8, %v1429_v40  ;;  %6441 = vmatmul.mubr.msk.f32.gmra.mxu1 %vm1512_vm8, %v1438_v10 }
 0x444   : > { %1625 = vmatprep.mubr.f32.mxu0 %v11041_v43  ;;  %1679 = vmatprep.mubr.f32.mxu1 %v11041_v43 }
 0x447   : > { %6433 = vmatmul.mubr.msk.f32.gmra.mxu0 %vm1512_vm8, %v1430_v23  ;;  %6442 = vmatmul.mubr.msk.f32.gmra.mxu1 %vm1512_vm8, %v1439_v11 }
 0x448   : > { %1631 = vmatprep.mubr.f32.mxu0 %v11041_v43  ;;  %1851 = vmatprep.mubr.f32.mxu1 %v11041_v43 }
 0x44b   : > { %6434 = vmatmul.mubr.msk.f32.gmra.mxu0 %vm1512_vm8, %v1431_v60 }
 0x44c   : > { %1637 = vmatprep.mubr.f32.mxu0 %v11041_v43 }
 0x44f   : > { %6435 = vmatmul.mubr.msk.f32.gmra.mxu0 %vm1512_vm8, %v1432_v61 }
 0x450   : > { %1643 = vmatprep.mubr.f32.mxu0 %v11041_v43 }
 0x453   : > { %6436 = vmatmul.mubr.msk.f32.gmra.mxu0 %vm1512_vm8, %v1433_v62 }
 0x454   : > { %1649 = vmatprep.mubr.f32.mxu0 %v11041_v43 }
 0x457   : > { %6437 = vmatmul.mubr.msk.f32.gmra.mxu0 %vm1512_vm8, %v1434_v63 }
 0x458   : > { %1655 = vmatprep.mubr.f32.mxu0 %v11041_v43 }
 0x45b   : > { %6438 = vmatmul.mubr.msk.f32.gmra.mxu0 %vm1512_vm8, %v1435_v7 }
 0x45c   : > { %1661 = vmatprep.mubr.f32.mxu0 %v11041_v43 }
 0x45f   : > { %6439 = vmatmul.mubr.msk.f32.gmra.mxu0 %vm1512_vm8, %v1436_v12 }
 0x460   : > { %2092 = vmatprep.mubr.f32.mxu0 %v11041_v43 }
 0x4ff   : > { %v1615_v14 = vpop.f32.mrf.mxu0 }
 0x500   : > { %v1616_v20 = vadd.f32 %v1615_v14, %v8061_v13 }
 0x501   : > { %v8066_v27 = vpop.f32.mrf.mxu0 }
 0x502   : > { %11401 = vst [vmem:[#allocation16_spill] sm:$0xff] %v8066_v27  ;;  %1706 = vxpose.xlu1.b32.start.end [1/1] (short) %v1616_v20, 128 }
 0x503   : > { %v1621_v32 = vpop.f32.mrf.mxu0 }
 0x504   : > { %v1622_v16 = vadd.f32 %v1621_v32, %v8068_v28 }
 0x505   : > { %v8071_v17 = vpop.f32.mrf.mxu0 }
 0x506   : > { %11403 = vst [vmem:[#allocation18_spill] sm:$0xff] %v8071_v17  ;;  %1948 = vxpose.xlu0.b32.start.end [1/1] (short) %v1622_v16, 128 }
 0x507   : > { %v1627_v18 = vpop.f32.mrf.mxu0 }
 0x508   : > { %v1628_v5 = vadd.f32 %v1627_v18, %v8097_v8 }
 0x509   : > { %v8073_v34 = vpop.f32.mrf.mxu0 }
 0x50a   : > { %11404 = vst [vmem:[#allocation19_spill] sm:$0xff] %v8073_v34 }
 0x50b   : > { %v1633_v19 = vpop.f32.mrf.mxu0 }
 0x50c   : > { %v1634_v46 = vadd.f32 %v1633_v19, %v8095_v22 }
 0x50d   : > { %v8075_v21 = vpop.f32.mrf.mxu0 }
 0x50e   : > { %11405 = vst [vmem:[#allocation20_spill] sm:$0xff] %v8075_v21 }
 0x50f   : > { %v1639_v24 = vpop.f32.mrf.mxu0 }
 0x510   : > { %v8079_v15 = vadd.f32 %v1639_v24, %v1475_v25 }
 0x511   : > { %v1641_v26 = vpop.f32.mrf.mxu0 }
 0x512   : > { %v8077_v29 = vadd.f32 %v1641_v26, %v1475_v25  ;;  %11407 = vst [vmem:[#allocation22_spill] sm:$0xff] %v8079_v15 }
 0x513   : > { %v1645_v35 = vpop.f32.mrf.mxu0 }
 0x514   : > { %11406 = vst [vmem:[#allocation21_spill] sm:$0xff] %v8077_v29  ;;  %1817 = vmatprep.subr.mxu1 %v8077_v29  ;;  %v8085_v41 = vadd.f32 %v1645_v35, %v1480_v30 }
 0x515   : > { %v1647_v36 = vpop.f32.mrf.mxu0  ;;  %1818 = vmatpush1.msra.mxu1 %v8079_v15 }
 0x516   : > { %v8083_v31 = vadd.f32 %v1647_v36, %v1480_v30  ;;  %11409 = vst [vmem:[#allocation24_spill] sm:$0xff] %v8085_v41 }
 0x517   : > { %v1651_v19 = vpop.f32.mrf.mxu0 }
 0x518   : > { %11408 = vst [vmem:[#allocation23_spill] sm:$0xff] %v8083_v31  ;;  %2058 = vmatprep.subr.mxu0 %v8083_v31 }
 0x519   : > { %2059 = vmatpush1.msra.mxu0 %v8085_v41  ;;  %v1653_v24 = vpop.f32.mrf.mxu0 }
 0x51b   : > { %v1657_v30 = vpop.f32.mrf.mxu0 }
 0x51d   : > { %v1659_v36 = vpop.f32.mrf.mxu0 }
 0x55c   : > { %1484 = vperm.xlu1 %6691, %v1446_v33  }
 0x56b   : > { %1489 = vperm.xlu0 %6690, %v1447_v42  }
 0x57e   : > { %v1722_v9 = vpop.trf.xlu1 }
 0x57f   : > { %6443 = vmatmul.mubr.msk.f32.vlgmr.msra.gmra.mxu1 %vm1738_vm9, %v1722_v9 }
 0x580   : > { %1857 = vmatprep.mubr.f32.mxu1 %v11041_v43 }
 0x582   : > { %v1723_v38 = vpop.trf.xlu1  ;;  %v1964_v44 = vpop.trf.xlu0 }
 0x583   : > { %6444 = vmatmul.mubr.msk.f32.gmra.mxu1 %vm1738_vm9, %v1723_v38  ;;  %6459 = vmatmul.mubr.msk.f32.vlgmr.msra.gmra.mxu0 %vm1738_vm9, %v1964_v44 }
 0x584   : > { %1863 = vmatprep.mubr.f32.mxu1 %v11041_v43  ;;  %2098 = vmatprep.mubr.f32.mxu0 %v11041_v43 }
 0x585   : > { %2189 = vxpose.xlu1.b32.start.end [1/1] (short) %v1628_v5, 128 }
 0x586   : > { %v1724_v6 = vpop.trf.xlu1  ;;  %v1965_v45 = vpop.trf.xlu0 }
 0x587   : > { %6445 = vmatmul.mubr.msk.f32.gmra.mxu1 %vm1738_vm9, %v1724_v6  ;;  %6460 = vmatmul.mubr.msk.f32.gmra.mxu0 %vm1738_vm9, %v1965_v45 }
 0x588   : > { %1869 = vmatprep.mubr.f32.mxu1 %v11041_v43  ;;  %2104 = vmatprep.mubr.f32.mxu0 %v11041_v43 }
 0x589   : > { %2430 = vxpose.xlu0.b32.start.end [1/1] (short) %v1634_v46, 128 }
 0x58a   : > { %v1725_v47 = vpop.trf.xlu1  ;;  %v1966_v48 = vpop.trf.xlu0 }
 0x58b   : > { %6446 = vmatmul.mubr.msk.f32.gmra.mxu1 %vm1738_vm9, %v1725_v47  ;;  %6461 = vmatmul.mubr.msk.f32.gmra.mxu0 %vm1738_vm9, %v1966_v48 }
 0x58c   : > { %1875 = vmatprep.mubr.f32.mxu1 %v11041_v43  ;;  %2110 = vmatprep.mubr.f32.mxu0 %v11041_v43 }
 0x58e   : > { %v1726_v51 = vpop.trf.xlu1  ;;  %v1967_v52 = vpop.trf.xlu0 }
 0x58f   : > { %6447 = vmatmul.mubr.msk.f32.gmra.mxu1 %vm1738_vm9, %v1726_v51  ;;  %6462 = vmatmul.mubr.msk.f32.gmra.mxu0 %vm1738_vm9, %v1967_v52 }
 0x590   : > { %1881 = vmatprep.mubr.f32.mxu1 %v11041_v43  ;;  %2116 = vmatprep.mubr.f32.mxu0 %v11041_v43 }
 0x592   : > { %v1727_v53 = vpop.trf.xlu1  ;;  %v1968_v56 = vpop.trf.xlu0 }
 0x593   : > { %6448 = vmatmul.mubr.msk.f32.gmra.mxu1 %vm1738_vm9, %v1727_v53  ;;  %6463 = vmatmul.mubr.msk.f32.gmra.mxu0 %vm1738_vm9, %v1968_v56 }
 0x594   : > { %1887 = vmatprep.mubr.f32.mxu1 %v11041_v43  ;;  %2122 = vmatprep.mubr.f32.mxu0 %v11041_v43 }
 0x596   : > { %v1728_v4 = vpop.trf.xlu1  ;;  %v1969_v58 = vpop.trf.xlu0 }
 0x597   : > { %6449 = vmatmul.mubr.msk.f32.gmra.mxu1 %vm1738_vm9, %v1728_v4  ;;  %6464 = vmatmul.mubr.msk.f32.gmra.mxu0 %vm1738_vm9, %v1969_v58 }
 0x598   : > { %1893 = vmatprep.mubr.f32.mxu1 %v11041_v43  ;;  %2128 = vmatprep.mubr.f32.mxu0 %v11041_v43 }
 0x59a   : > { %v1729_v37 = vpop.trf.xlu1  ;;  %v1970_v59 = vpop.trf.xlu0 }
 0x59b   : > { %6450 = vmatmul.mubr.msk.f32.gmra.mxu1 %vm1738_vm9, %v1729_v37  ;;  %6465 = vmatmul.mubr.msk.f32.gmra.mxu0 %vm1738_vm9, %v1970_v59 }
 0x59c   : > { %1899 = vmatprep.mubr.f32.mxu1 %v11041_v43  ;;  %2134 = vmatprep.mubr.f32.mxu0 %v11041_v43 }
 0x59e   : > { %v1730_v1 = vpop.trf.xlu1  ;;  %v1971_v40 = vpop.trf.xlu0 }
 0x59f   : > { %6451 = vmatmul.mubr.msk.f32.gmra.mxu1 %vm1738_vm9, %v1730_v1  ;;  %6466 = vmatmul.mubr.msk.f32.gmra.mxu0 %vm1738_vm9, %v1971_v40 }
 0x5a0   : > { %1905 = vmatprep.mubr.f32.mxu1 %v11041_v43  ;;  %2140 = vmatprep.mubr.f32.mxu0 %v11041_v43 }
 0x5a2   : > { %v1731_v23 = vpop.trf.xlu1  ;;  %v1972_v60 = vpop.trf.xlu0 }
 0x5a3   : > { %6452 = vmatmul.mubr.msk.f32.gmra.mxu1 %vm1738_vm9, %v1731_v23  ;;  %6467 = vmatmul.mubr.msk.f32.gmra.mxu0 %vm1738_vm9, %v1972_v60  ;;  %v8214_v60 = vpop.f32.mrf.mxu1 }
 0x5a4   : > { %1911 = vmatprep.mubr.f32.mxu1 %v11041_v43  ;;  %2146 = vmatprep.mubr.f32.mxu0 %v11041_v43  ;;  %11416 = vst [vmem:[#allocation31_spill] sm:$0xff] %v8214_v60 }
 0x5a6   : > { %v1732_v61 = vpop.trf.xlu1  ;;  %v1973_v62 = vpop.trf.xlu0 }
 0x5a7   : > { %6453 = vmatmul.mubr.msk.f32.gmra.mxu1 %vm1738_vm9, %v1732_v61  ;;  %6468 = vmatmul.mubr.msk.f32.gmra.mxu0 %vm1738_vm9, %v1973_v62 }
 0x5a8   : > { %1917 = vmatprep.mubr.f32.mxu1 %v11041_v43  ;;  %2152 = vmatprep.mubr.f32.mxu0 %v11041_v43 }
 0x5aa   : > { %v1733_v63 = vpop.trf.xlu1  ;;  %v1974_v3 = vpop.trf.xlu0 }
 0x5ab   : > { %6454 = vmatmul.mubr.msk.f32.gmra.mxu1 %vm1738_vm9, %v1733_v63  ;;  %6469 = vmatmul.mubr.msk.f32.gmra.mxu0 %vm1738_vm9, %v1974_v3  ;;  %v8220_v63 = vpop.f32.mrf.mxu1 }
 0x5ac   : > { %1923 = vmatprep.mubr.f32.mxu1 %v11041_v43  ;;  %2158 = vmatprep.mubr.f32.mxu0 %v11041_v43  ;;  %11417 = vst [vmem:[#allocation32_spill] sm:$0xff] %v8220_v63 }
 0x5ae   : > { %v1734_v7 = vpop.trf.xlu1  ;;  %v1975_v10 = vpop.trf.xlu0 }
 0x5af   : > { %6455 = vmatmul.mubr.msk.f32.gmra.mxu1 %vm1738_vm9, %v1734_v7  ;;  %6470 = vmatmul.mubr.msk.f32.gmra.mxu0 %vm1738_vm9, %v1975_v10  ;;  %v8226_v10 = vpop.f32.mrf.mxu1 }
 0x5b0   : > { %1929 = vmatprep.mubr.f32.mxu1 %v11041_v43  ;;  %2164 = vmatprep.mubr.f32.mxu0 %v11041_v43  ;;  %11418 = vst [vmem:[#allocation33_spill] sm:$0xff] %v8226_v10 }
 0x5b2   : > { %v1735_v11 = vpop.trf.xlu1  ;;  %v1976_v12 = vpop.trf.xlu0 }
 0x5b3   : > { %6456 = vmatmul.mubr.msk.f32.gmra.mxu1 %vm1738_vm9, %v1735_v11  ;;  %6471 = vmatmul.mubr.msk.f32.gmra.mxu0 %vm1738_vm9, %v1976_v12 }
 0x5b4   : > { %1935 = vmatprep.mubr.f32.mxu1 %v11041_v43  ;;  %2170 = vmatprep.mubr.f32.mxu0 %v11041_v43 }
 0x5b6   : > { %v1736_v14 = vpop.trf.xlu1  ;;  %v1977_v20 = vpop.trf.xlu0 }
 0x5b7   : > { %6457 = vmatmul.mubr.msk.f32.gmra.mxu1 %vm1738_vm9, %v1736_v14  ;;  %6472 = vmatmul.mubr.msk.f32.gmra.mxu0 %vm1738_vm9, %v1977_v20  ;;  %v8232_v14 = vpop.f32.mrf.mxu1 }
 0x5b8   : > { %1941 = vmatprep.mubr.f32.mxu1 %v11041_v43  ;;  %2176 = vmatprep.mubr.f32.mxu0 %v11041_v43  ;;  %11419 = vst [vmem:[#allocation34_spill] sm:$0xff] %v8232_v14 }
 0x5ba   : > { %v1737_v32 = vpop.trf.xlu1  ;;  %v1978_v16 = vpop.trf.xlu0 }
 0x5bb   : > { %6458 = vmatmul.mubr.msk.f32.gmra.mxu1 %vm1738_vm9, %v1737_v32  ;;  %6473 = vmatmul.mubr.msk.f32.gmra.mxu0 %vm1738_vm9, %v1978_v16  ;;  %v8238_v16 = vpop.f32.mrf.mxu1 }
 0x5bc   : > { %2182 = vmatprep.mubr.f32.mxu0 %v11041_v43  ;;  %2333 = vmatprep.mubr.f32.mxu1 %v11041_v43  ;;  %11420 = vst [vmem:[#allocation35_spill] sm:$0xff] %v8238_v16 }
 0x5be   : > { %v1979_v18 = vpop.trf.xlu0 }
 0x5bf   : > { %6474 = vmatmul.mubr.msk.f32.gmra.mxu0 %vm1738_vm9, %v1979_v18 }
 0x5c0   : > { %2574 = vmatprep.mubr.f32.mxu0 %v11041_v43 }
 0x5d7   : > { %v1485_v25 = vpop.permute.xlu1 %1484 }
 0x5d8   : > { %v8165_v26 = vadd.f32 %v1651_v19, %v1485_v25  ;;  %v8167_v35 = vadd.f32 %v1653_v24, %v1485_v25  ;;  %v8243_v24 = vpop.f32.mrf.mxu1  ;;  %v8246_v25 = vpop.f32.mrf.mxu0 }
 0x5d9   : > { %11421 = vst [vmem:[#allocation36_spill] sm:$0xff] %v8243_v24  ;;  %11422 = vst [vmem:[#allocation37_spill] sm:$0xff] %v8246_v25 }
 0x5da   : > { %11412 = vst [vmem:[#allocation27_spill] sm:$0xff] %v8165_v26  ;;  %11413 = vst [vmem:[#allocation28_spill] sm:$0xff] %v8167_v35  ;;  %2299 = vmatprep.subr.mxu1 %v8167_v35 }
 0x5db   : > { %2300 = vmatpush1.msra.mxu1 %v8165_v26 }
 0x5e6   : > { %v1490_v33 = vpop.permute.xlu0 %1489 }
 0x5e7   : > { %v8171_v42 = vadd.f32 %v1657_v30, %v1490_v33  ;;  %v8173_v9 = vadd.f32 %v1659_v36, %v1490_v33 }
 0x5e9   : > { %11414 = vst [vmem:[#allocation29_spill] sm:$0xff] %v8171_v42  ;;  %11415 = vst [vmem:[#allocation30_spill] sm:$0xff] %v8173_v9  ;;  %2540 = vmatprep.subr.mxu0 %v8173_v9 }
 0x5ea   : > { %2541 = vmatpush1.msra.mxu0 %v8171_v42 }
 0x601   : > { %v2205_v38 = vpop.trf.xlu1 }
 0x602   : > { %6475 = vmatmul.mubr.msk.f32.vlgmr.msra.gmra.mxu1 %vm1738_vm9, %v2205_v38  ;;  %v8253_v38 = vpop.f32.mrf.mxu0 }
 0x603   : > { %2339 = vmatprep.mubr.f32.mxu1 %v11041_v43  ;;  %11424 = vst [vmem:[#allocation39_spill] sm:$0xff] %v8253_v38 }
 0x605   : > { %v2206_v44 = vpop.trf.xlu1  ;;  %v2446_v5 = vpop.trf.xlu0 }
 0x606   : > { %6476 = vmatmul.mubr.msk.f32.gmra.mxu1 %vm1738_vm9, %v2206_v44  ;;  %6491 = vmatmul.mubr.msk.f32.vlgmr.msra.gmra.mxu0 %vm1738_vm9, %v2446_v5 }
 0x607   : > { %2580 = vmatprep.mubr.f32.mxu0 %v11041_v43  ;;  %2345 = vmatprep.mubr.f32.mxu1 %v11041_v43 }
 0x609   : > { %v2447_v6 = vpop.trf.xlu0  ;;  %v2207_v45 = vpop.trf.xlu1 }
 0x60a   : > { %6492 = vmatmul.mubr.msk.f32.gmra.mxu0 %vm1738_vm9, %v2447_v6  ;;  %6477 = vmatmul.mubr.msk.f32.gmra.mxu1 %vm1738_vm9, %v2207_v45 }
 0x60b   : > { %2586 = vmatprep.mubr.f32.mxu0 %v11041_v43  ;;  %2351 = vmatprep.mubr.f32.mxu1 %v11041_v43 }
 0x60d   : > { %v2448_v46 = vpop.trf.xlu0  ;;  %v2208_v47 = vpop.trf.xlu1 }
 0x60e   : > { %6493 = vmatmul.mubr.msk.f32.gmra.mxu0 %vm1738_vm9, %v2448_v46  ;;  %6478 = vmatmul.mubr.msk.f32.gmra.mxu1 %vm1738_vm9, %v2208_v47 }
 0x60f   : > { %2592 = vmatprep.mubr.f32.mxu0 %v11041_v43  ;;  %2357 = vmatprep.mubr.f32.mxu1 %v11041_v43 }
 0x611   : > { %v2449_v48 = vpop.trf.xlu0  ;;  %v2209_v51 = vpop.trf.xlu1 }
 0x612   : > { %6494 = vmatmul.mubr.msk.f32.gmra.mxu0 %vm1738_vm9, %v2449_v48  ;;  %6479 = vmatmul.mubr.msk.f32.gmra.mxu1 %vm1738_vm9, %v2209_v51 }
 0x613   : > { %2598 = vmatprep.mubr.f32.mxu0 %v11041_v43  ;;  %2363 = vmatprep.mubr.f32.mxu1 %v11041_v43 }
 0x615   : > { %v2450_v52 = vpop.trf.xlu0  ;;  %v2210_v53 = vpop.trf.xlu1 }
 0x616   : > { %6495 = vmatmul.mubr.msk.f32.gmra.mxu0 %vm1738_vm9, %v2450_v52  ;;  %6480 = vmatmul.mubr.msk.f32.gmra.mxu1 %vm1738_vm9, %v2210_v53 }
 0x617   : > { %2604 = vmatprep.mubr.f32.mxu0 %v11041_v43  ;;  %2369 = vmatprep.mubr.f32.mxu1 %v11041_v43 }
 0x619   : > { %v2451_v56 = vpop.trf.xlu0  ;;  %v2211_v4 = vpop.trf.xlu1 }
 0x61a   : > { %6496 = vmatmul.mubr.msk.f32.gmra.mxu0 %vm1738_vm9, %v2451_v56  ;;  %6481 = vmatmul.mubr.msk.f32.gmra.mxu1 %vm1738_vm9, %v2211_v4 }
 0x61b   : > { %2610 = vmatprep.mubr.f32.mxu0 %v11041_v43  ;;  %2375 = vmatprep.mubr.f32.mxu1 %v11041_v43 }
 0x61d   : > { %v2452_v58 = vpop.trf.xlu0  ;;  %v2212_v37 = vpop.trf.xlu1 }
 0x61e   : > { %6497 = vmatmul.mubr.msk.f32.gmra.mxu0 %vm1738_vm9, %v2452_v58  ;;  %6482 = vmatmul.mubr.msk.f32.gmra.mxu1 %vm1738_vm9, %v2212_v37 }
 0x61f   : > { %2616 = vmatprep.mubr.f32.mxu0 %v11041_v43  ;;  %2381 = vmatprep.mubr.f32.mxu1 %v11041_v43 }
 0x621   : > { %v2453_v59 = vpop.trf.xlu0  ;;  %v2213_v1 = vpop.trf.xlu1 }
 0x622   : > { %6498 = vmatmul.mubr.msk.f32.gmra.mxu0 %vm1738_vm9, %v2453_v59  ;;  %6483 = vmatmul.mubr.msk.f32.gmra.mxu1 %vm1738_vm9, %v2213_v1 }
 0x623   : > { %2622 = vmatprep.mubr.f32.mxu0 %v11041_v43  ;;  %2387 = vmatprep.mubr.f32.mxu1 %v11041_v43 }
 0x625   : > { %v2454_v40 = vpop.trf.xlu0  ;;  %v2214_v23 = vpop.trf.xlu1 }
 0x626   : > { %6499 = vmatmul.mubr.msk.f32.gmra.mxu0 %vm1738_vm9, %v2454_v40  ;;  %6484 = vmatmul.mubr.msk.f32.gmra.mxu1 %vm1738_vm9, %v2214_v23 }
 0x627   : > { %2628 = vmatprep.mubr.f32.mxu0 %v11041_v43  ;;  %2393 = vmatprep.mubr.f32.mxu1 %v11041_v43 }
 0x629   : > { %v2455_v61 = vpop.trf.xlu0  ;;  %v2215_v62 = vpop.trf.xlu1 }
 0x62a   : > { %6500 = vmatmul.mubr.msk.f32.gmra.mxu0 %vm1738_vm9, %v2455_v61  ;;  %6485 = vmatmul.mubr.msk.f32.gmra.mxu1 %vm1738_vm9, %v2215_v62 }
 0x62b   : > { %2634 = vmatprep.mubr.f32.mxu0 %v11041_v43  ;;  %2399 = vmatprep.mubr.f32.mxu1 %v11041_v43 }
 0x62d   : > { %v2456_v3 = vpop.trf.xlu0  ;;  %v2216_v7 = vpop.trf.xlu1 }
 0x62e   : > { %6501 = vmatmul.mubr.msk.f32.gmra.mxu0 %vm1738_vm9, %v2456_v3  ;;  %6486 = vmatmul.mubr.msk.f32.gmra.mxu1 %vm1738_vm9, %v2216_v7 }
 0x62f   : > { %2640 = vmatprep.mubr.f32.mxu0 %v11041_v43  ;;  %2405 = vmatprep.mubr.f32.mxu1 %v11041_v43 }
 0x631   : > { %v2457_v11 = vpop.trf.xlu0  ;;  %v2217_v12 = vpop.trf.xlu1 }
 0x632   : > { %6502 = vmatmul.mubr.msk.f32.gmra.mxu0 %vm1738_vm9, %v2457_v11  ;;  %6487 = vmatmul.mubr.msk.f32.gmra.mxu1 %vm1738_vm9, %v2217_v12 }
 0x633   : > { %2646 = vmatprep.mubr.f32.mxu0 %v11041_v43  ;;  %2411 = vmatprep.mubr.f32.mxu1 %v11041_v43 }
 0x635   : > { %v2458_v20 = vpop.trf.xlu0  ;;  %v2218_v32 = vpop.trf.xlu1 }
 0x636   : > { %6503 = vmatmul.mubr.msk.f32.gmra.mxu0 %vm1738_vm9, %v2458_v20  ;;  %6488 = vmatmul.mubr.msk.f32.gmra.mxu1 %vm1738_vm9, %v2218_v32 }
 0x637   : > { %2652 = vmatprep.mubr.f32.mxu0 %v11041_v43  ;;  %2417 = vmatprep.mubr.f32.mxu1 %v11041_v43 }
 0x639   : > { %v2459_v18 = vpop.trf.xlu0  ;;  %v2219_v19 = vpop.trf.xlu1 }
 0x63a   : > { %6504 = vmatmul.mubr.msk.f32.gmra.mxu0 %vm1738_vm9, %v2459_v18  ;;  %6489 = vmatmul.mubr.msk.f32.gmra.mxu1 %vm1738_vm9, %v2219_v19 }
 0x63b   : > { %2658 = vmatprep.mubr.f32.mxu0 %v11041_v43  ;;  %2423 = vmatprep.mubr.f32.mxu1 %v11041_v43 }
 0x63d   : > { %v2460_v30 = vpop.trf.xlu0  ;;  %v2220_v36 = vpop.trf.xlu1 }
 0x63e   : > { %6505 = vmatmul.mubr.msk.f32.gmra.mxu0 %vm1738_vm9, %v2460_v30  ;;  %6490 = vmatmul.mubr.msk.f32.gmra.mxu1 %vm1738_vm9, %v2220_v36 }
 0x63f   : > { %v8251_v33 = vpop.f32.mrf.mxu1  ;;  %2664 = vmatprep.mubr.f32.mxu0 %v11041_v43 }
 0x640   : > { %11423 = vst [vmem:[#allocation38_spill] sm:$0xff] %v8251_v33 }
 0x641   : > { %v8256_v44 = vpop.f32.mrf.mxu1  ;;  %v2461_v5 = vpop.trf.xlu0 }
 0x642   : > { %11425 = vst [vmem:[#allocation40_spill] sm:$0xff] %v8256_v44  ;;  %v2671_v6 = vmax.f32 %v8251_v33, %v8256_v44  ;;  %6506 = vmatmul.mubr.msk.f32.gmra.mxu0 %vm1738_vm9, %v2461_v5 }
 0x643   : > { %v8261_v45 = vpop.f32.mrf.mxu1  ;;  %v8263_v46 = vpop.f32.mrf.mxu0 }
 0x644   : > { %11426 = vst [vmem:[#allocation41_spill] sm:$0xff] %v8263_v46  ;;  %2672 = vmax.xlane.f32.xlu1 %v2671_v6 }
 0x645   : > { %v8265_v47 = vpop.f32.mrf.mxu1  ;;  %v8267_v48 = vpop.f32.mrf.mxu0 }
 0x646   : > { %11427 = vst [vmem:[#allocation42_spill] sm:$0xff] %v8267_v48  ;;  %v2674_v51 = vmax.f32 %v8261_v45, %v8265_v47  ;;  %v2719_v52 = vmax.f32 %v8263_v46, %v8267_v48 }
 0x647   : > { %v8273_v53 = vpop.f32.mrf.mxu1  ;;  %v8275_v56 = vpop.f32.mrf.mxu0 }
 0x648   : > { %2675 = vmax.xlane.f32.xlu1 %v2674_v51  ;;  %2720 = vmax.xlane.f32.xlu0 %v2719_v52 }
 0x649   : > { %v8277_v4 = vpop.f32.mrf.mxu1  ;;  %v8279_v58 = vpop.f32.mrf.mxu0 }
 0x64a   : > { %v2677_v37 = vmax.f32 %v8273_v53, %v8277_v4  ;;  %v2722_v59 = vmax.f32 %v8275_v56, %v8279_v58 }
 0x64b   : > { %v8285_v1 = vpop.f32.mrf.mxu1  ;;  %v8287_v40 = vpop.f32.mrf.mxu0 }
 0x64c   : > { %2678 = vmax.xlane.f32.xlu1 %v2677_v37  ;;  %2723 = vmax.xlane.f32.xlu0 %v2722_v59 }
 0x64d   : > { %v8289_v23 = vpop.f32.mrf.mxu1  ;;  %v8291_v61 = vpop.f32.mrf.mxu0 }
 0x64e   : > { %v2680_v62 = vmax.f32 %v8285_v1, %v8289_v23  ;;  %v2725_v3 = vmax.f32 %v8287_v40, %v8291_v61 }
 0x64f   : > { %v8297_v7 = vpop.f32.mrf.mxu1  ;;  %v8299_v11 = vpop.f32.mrf.mxu0 }
 0x650   : > { %2681 = vmax.xlane.f32.xlu1 %v2680_v62  ;;  %2726 = vmax.xlane.f32.xlu0 %v2725_v3 }
 0x651   : > { %v8301_v12 = vpop.f32.mrf.mxu1  ;;  %v8303_v20 = vpop.f32.mrf.mxu0 }
 0x652   : > { %v2683_v32 = vmax.f32 %v8297_v7, %v8301_v12  ;;  %v2728_v18 = vmax.f32 %v8299_v11, %v8303_v20 }
 0x653   : > { %v8309_v19 = vpop.f32.mrf.mxu1  ;;  %v8311_v30 = vpop.f32.mrf.mxu0 }
 0x654   : > { %11428 = vst [vmem:[#allocation43_spill] sm:$0xff] %v8309_v19  ;;  %2684 = vmax.xlane.f32.xlu1 %v2683_v32  ;;  %2729 = vmax.xlane.f32.xlu0 %v2728_v18 }
 0x655   : > { %v8313_v36 = vpop.f32.mrf.mxu1  ;;  %v8315_v5 = vpop.f32.mrf.mxu0 }
 0x656   : > { %11429 = vst [vmem:[#allocation44_spill] sm:$0xff] %v8313_v36  ;;  %v2686_v6 = vmax.f32 %v8309_v19, %v8313_v36  ;;  %v2731_v51 = vmax.f32 %v8311_v30, %v8315_v5 }
 0x657   : > { %v8321_v52 = vpop.f32.mrf.mxu1  ;;  %v8323_v37 = vpop.f32.mrf.mxu0 }
 0x658   : > { %11430 = vst [vmem:[#allocation45_spill] sm:$0xff] %v8321_v52  ;;  %2687 = vmax.xlane.f32.xlu1 %v2686_v6  ;;  %2732 = vmax.xlane.f32.xlu0 %v2731_v51 }
 0x659   : > { %v8325_v59 = vpop.f32.mrf.mxu1  ;;  %v8327_v62 = vpop.f32.mrf.mxu0 }
 0x65a   : > { %11431 = vst [vmem:[#allocation46_spill] sm:$0xff] %v8325_v59  ;;  %v2689_v3 = vmax.f32 %v8321_v52, %v8325_v59  ;;  %v2734_v32 = vmax.f32 %v8323_v37, %v8327_v62 }
 0x65b   : > { %v8333_v18 = vpop.f32.mrf.mxu1  ;;  %v8335_v43 = vpop.f32.mrf.mxu0 }
 0x65c   : > { %2690 = vmax.xlane.f32.xlu1 %v2689_v3  ;;  %2735 = vmax.xlane.f32.xlu0 %v2734_v32 }
 0x65d   : > { %v8337_v55 = vpop.f32.mrf.mxu1  ;;  %v8339_v6 = vpop.f32.mrf.mxu0 }
 0x65e   : > { %v2692_v51 = vmax.f32 %v8333_v18, %v8337_v55  ;;  %v2737_v49 = vmax.f32 %v8335_v43, %v8339_v6 }
 0x65f   : > { %v8345_v0 = vpop.f32.mrf.mxu1  ;;  %v8347_v57 = vpop.f32.mrf.mxu0 }
 0x660   : > { %2693 = vmax.xlane.f32.xlu1 %v2692_v51  ;;  %2738 = vmax.xlane.f32.xlu0 %v2737_v49 }
 0x661   : > { %v8349_v50 = vpop.f32.mrf.mxu1  ;;  %v8351_v3 = vpop.f32.mrf.mxu0 }
 0x662   : > { %v2695_v32 = vmax.f32 %v8345_v0, %v8349_v50  ;;  %v2740_v39 = vmax.f32 %v8347_v57, %v8351_v3 }
 0x663   : > { %v8357_v54 = vpop.f32.mrf.mxu1  ;;  %v8359_v2 = vpop.f32.mrf.mxu0 }
 0x664   : > { %2696 = vmax.xlane.f32.xlu1 %v2695_v32  ;;  %2741 = vmax.xlane.f32.xlu0 %v2740_v39 }
 0x665   : > { %v8361_v26 = vpop.f32.mrf.mxu1  ;;  %v8363_v51 = vpop.f32.mrf.mxu0 }
 0x666   : > { %v2698_v49 = vmax.f32 %v8357_v54, %v8361_v26  ;;  %v2743_v35 = vmax.f32 %v8359_v2, %v8363_v51 }
 0x667   : > { %v8369_v15 = vpop.f32.mrf.mxu1  ;;  %v8371_v29 = vpop.f32.mrf.mxu0 }
 0x668   : > { %11432 = vst [vmem:[#allocation47_spill] sm:$0xff] %v8371_v29  ;;  %2699 = vmax.xlane.f32.xlu1 %v2698_v49  ;;  %2744 = vmax.xlane.f32.xlu0 %v2743_v35 }
 0x669   : > { %v8373_v42 = vpop.f32.mrf.mxu1  ;;  %v8375_v32 = vpop.f32.mrf.mxu0 }
 0x66a   : > { %11433 = vst [vmem:[#allocation48_spill] sm:$0xff] %v8373_v42  ;;  %11434 = vst [vmem:[#allocation49_spill] sm:$0xff] %v8375_v32  ;;  %v2701_v39 = vmax.f32 %v8369_v15, %v8373_v42  ;;  %v2746_v9 = vmax.f32 %v8371_v29, %v8375_v32 }
 0x66b   : > { %v8381_v10 = vpop.f32.mrf.mxu1  ;;  %v8383_v41 = vpop.f32.mrf.mxu0 }
 0x66c   : > { %11435 = vst [vmem:[#allocation50_spill] sm:$0xff] %v8381_v10  ;;  %11436 = vst [vmem:[#allocation51_spill] sm:$0xff] %v8383_v41  ;;  %2702 = vmax.xlane.f32.xlu1 %v2701_v39  ;;  %2747 = vmax.xlane.f32.xlu0 %v2746_v9 }
 0x66d   : > { %v8385_v31 = vpop.f32.mrf.mxu1  ;;  %v8387_v49 = vpop.f32.mrf.mxu0 }
 0x66e   : > { %11437 = vst [vmem:[#allocation52_spill] sm:$0xff] %v8385_v31  ;;  %11438 = vst [vmem:[#allocation53_spill] sm:$0xff] %v8387_v49  ;;  %v2704_v35 = vmax.f32 %v8381_v10, %v8385_v31  ;;  %v2749_v16 = vmax.f32 %v8383_v41, %v8387_v49 }
 0x66f   : > { %v8393_v14 = vpop.f32.mrf.mxu1  ;;  %v8395_v24 = vpop.f32.mrf.mxu0 }
 0x670   : > { %11439 = vst [vmem:[#allocation54_spill] sm:$0xff] %v8393_v14  ;;  %11440 = vst [vmem:[#allocation55_spill] sm:$0xff] %v8395_v24  ;;  %2705 = vmax.xlane.f32.xlu1 %v2704_v35  ;;  %2750 = vmax.xlane.f32.xlu0 %v2749_v16 }
 0x671   : > { %v8397_v34 = vpop.f32.mrf.mxu1  ;;  %v8399_v39 = vpop.f32.mrf.mxu0 }
 0x672   : > { %11441 = vst [vmem:[#allocation56_spill] sm:$0xff] %v8397_v34  ;;  %11442 = vst [vmem:[#allocation57_spill] sm:$0xff] %v8399_v39  ;;  %v2707_v9 = vmax.f32 %v8393_v14, %v8397_v34  ;;  %v2752_v8 = vmax.f32 %v8395_v24, %v8399_v39 }
 0x673   : > { %v8405_v21 = vpop.f32.mrf.mxu1  ;;  %v8407_v22 = vpop.f32.mrf.mxu0 }
 0x674   : > { %11443 = vst [vmem:[#allocation58_spill] sm:$0xff] %v8405_v21  ;;  %11444 = vst [vmem:[#allocation59_spill] sm:$0xff] %v8407_v22  ;;  %2708 = vmax.xlane.f32.xlu1 %v2707_v9  ;;  %2753 = vmax.xlane.f32.xlu0 %v2752_v8 }
 0x675   : > { %v8409_v17 = vpop.f32.mrf.mxu1  ;;  %v8411_v35 = vpop.f32.mrf.mxu0 }
 0x676   : > { %11445 = vst [vmem:[#allocation60_spill] sm:$0xff] %v8409_v17  ;;  %11446 = vst [vmem:[#allocation61_spill] sm:$0xff] %v8411_v35  ;;  %v2710_v16 = vmax.f32 %v8405_v21, %v8409_v17  ;;  %v2755_v28 = vmax.f32 %v8407_v22, %v8411_v35 }
 0x677   : > { %v8417_v63 = vpop.f32.mrf.mxu1  ;;  %v8419_v60 = vpop.f32.mrf.mxu0 }
 0x678   : > { %11447 = vst [vmem:[#allocation62_spill] sm:$0xff] %v8417_v63  ;;  %11448 = vst [vmem:[#allocation63_spill] sm:$0xff] %v8419_v60  ;;  %2711 = vmax.xlane.f32.xlu1 %v2710_v16  ;;  %2756 = vmax.xlane.f32.xlu0 %v2755_v28 }
 0x679   : > { %v8421_v38 = vpop.f32.mrf.mxu1  ;;  %v8423_v9 = vpop.f32.mrf.mxu0 }
 0x67a   : > { %11449 = vst [vmem:[#allocation64_spill] sm:$0xff] %v8421_v38  ;;  %11450 = vst [vmem:[#allocation65_spill] sm:$0xff] %v8423_v9  ;;  %v2713_v8 = vmax.f32 %v8417_v63, %v8421_v38  ;;  %v2758_v13 = vmax.f32 %v8419_v60, %v8423_v9 }
 0x67b   : > { %v8427_v25 = vpop.f32.mrf.mxu1  ;;  %v8429_v27 = vpop.f32.mrf.mxu0 }
 0x67c   : > { %11451 = vst [vmem:[#allocation66_spill] sm:$0xff] %v8427_v25  ;;  %11452 = vst [vmem:[#allocation67_spill] sm:$0xff] %v8429_v27  ;;  %2714 = vmax.xlane.f32.xlu0 %v2713_v8 }
 0x67d   : > { %v8433_v48 = vpop.f32.mrf.mxu1  ;;  %v8435_v46 = vpop.f32.mrf.mxu0 }
 0x67e   : > { %11453 = vst [vmem:[#allocation68_spill] sm:$0xff] %v8433_v48  ;;  %11454 = vst [vmem:[#allocation69_spill] sm:$0xff] %v8435_v46  ;;  %v2716_v28 = vmax.f32 %v8427_v25, %v8433_v48  ;;  %v2761_v38 = vmax.f32 %v8429_v27, %v8435_v46 }
 0x67f   : > { %v8439_v16 = vpop.f32.mrf.mxu0 }
 0x680   : > { %11455 = vst [vmem:[#allocation70_spill] sm:$0xff] %v8439_v16  ;;  %2717 = vmax.xlane.f32.xlu1 %v2716_v28  ;;  %2759 = vmax.xlane.f32.xlu0 %v2758_v13 }
 0x681   : > { %v8443_v63 = vpop.f32.mrf.mxu0 }
 0x682   : > { %11456 = vst [vmem:[#allocation71_spill] sm:$0xff] %v8443_v63  ;;  %v2764_v8 = vmax.f32 %v8439_v16, %v8443_v63 }
 0x684   : > { %2762 = vmax.xlane.f32.xlu0 %v2761_v38 }
 0x688   : > { %2765 = vmax.xlane.f32.xlu0 %v2764_v8 }
 0x6c2   : > { %v8447_v9 = vpop.f32.mrf.mxu1 }
 0x6c3   : > { %11457 = vst [vmem:[#allocation72_spill] sm:$0xff] %v8447_v9 }
 0x6c4   : > { %v8449_v60 = vpop.f32.mrf.mxu1 }
 0x6c5   : > { %11458 = vst [vmem:[#allocation73_spill] sm:$0xff] %v8449_v60  ;;  %v2767_v48 = vmax.f32 %v8447_v9, %v8449_v60 }
 0x6c6   : > { %v8453_v25 = vpop.f32.mrf.mxu1  ;;  %v8455_v13 = vpop.f32.mrf.mxu0 }
 0x6c7   : > { %11459 = vst [vmem:[#allocation74_spill] sm:$0xff] %v8453_v25  ;;  %11460 = vst [vmem:[#allocation75_spill] sm:$0xff] %v8455_v13  ;;  %2768 = vmax.xlane.f32.xlu1 %v2767_v48 }
 0x6c8   : > { %v8457_v28 = vpop.f32.mrf.mxu1  ;;  %v8459_v46 = vpop.f32.mrf.mxu0 }
 0x6c9   : > { %11461 = vst [vmem:[#allocation76_spill] sm:$0xff] %v8457_v28  ;;  %11462 = vst [vmem:[#allocation77_spill] sm:$0xff] %v8459_v46  ;;  %v2770_v38 = vmax.f32 %v8453_v25, %v8457_v28  ;;  %v2815_v9 = vmax.f32 %v8455_v13, %v8459_v46 }
 0x6ca   : > { %v8463_v8 = vpop.f32.mrf.mxu0  ;;  %v8465_v63 = vpop.f32.mrf.mxu1 }
 0x6cb   : > { %11463 = vst [vmem:[#allocation78_spill] sm:$0xff] %v8463_v8  ;;  %11464 = vst [vmem:[#allocation79_spill] sm:$0xff] %v8465_v63  ;;  %2771 = vmax.xlane.f32.xlu1 %v2770_v38 }
 0x6cc   : > { %v8467_v16 = vpop.f32.mrf.mxu0  ;;  %v8469_v60 = vpop.f32.mrf.mxu1 }
 0x6cd   : > { %11465 = vst [vmem:[#allocation80_spill] sm:$0xff] %v8467_v16  ;;  %11466 = vst [vmem:[#allocation81_spill] sm:$0xff] %v8469_v60  ;;  %v2773_v25 = vmax.f32 %v8465_v63, %v8469_v60  ;;  %v2818_v46 = vmax.f32 %v8463_v8, %v8467_v16  ;;  %v8495_v21 = vpop.xlane.xlu1 %2672 }
 0x6ce   : > { %v8473_v48 = vpop.f32.mrf.mxu0  ;;  %v8475_v27 = vpop.f32.mrf.mxu1  ;;  %11476 = vst [vmem:[#allocation91_spill] sm:$0xff] %v8495_v21 }
 0x6cf   : > { %11467 = vst [vmem:[#allocation82_spill] sm:$0xff] %v8473_v48  ;;  %11468 = vst [vmem:[#allocation83_spill] sm:$0xff] %v8475_v27  ;;  %2816 = vmax.xlane.f32.xlu1 %v2815_v9 }
 0x6d0   : > { %v8477_v35 = vpop.f32.mrf.mxu0  ;;  %v8479_v28 = vpop.f32.mrf.mxu1 }
 0x6d1   : > { %11469 = vst [vmem:[#allocation84_spill] sm:$0xff] %v8477_v35  ;;  %11470 = vst [vmem:[#allocation85_spill] sm:$0xff] %v8479_v28  ;;  %v2776_v63 = vmax.f32 %v8475_v27, %v8479_v28  ;;  %v2821_v8 = vmax.f32 %v8473_v48, %v8477_v35  ;;  %v8511_v34 = vpop.xlane.xlu1 %2675  ;;  %v8517_v49 = vpop.xlane.xlu0 %2720 }
 0x6d2   : > { %v8483_v38 = vpop.f32.mrf.mxu0  ;;  %v8485_v22 = vpop.f32.mrf.mxu1  ;;  %11484 = vst [vmem:[#allocation99_spill] sm:$0xff] %v8517_v49 }
 0x6d3   : > { %11471 = vst [vmem:[#allocation86_spill] sm:$0xff] %v8483_v38  ;;  %11472 = vst [vmem:[#allocation87_spill] sm:$0xff] %v8485_v22  ;;  %2774 = vmax.xlane.f32.xlu1 %v2773_v25 }
 0x6d4   : > { %v8487_v17 = vpop.f32.mrf.mxu0  ;;  %v8493_v9 = vpop.f32.mrf.mxu1 }
 0x6d5   : > { %11473 = vst [vmem:[#allocation88_spill] sm:$0xff] %v8487_v17  ;;  %11475 = vst [vmem:[#allocation90_spill] sm:$0xff] %v8493_v9  ;;  %v8527_v44 = vpop.xlane.xlu1 %2678  ;;  %v2824_v49 = vmax.f32 %v8483_v38, %v8487_v17 }
 0x6d6   : > { %v8491_v13 = vpop.f32.mrf.mxu0  ;;  %v8499_v60 = vpop.f32.mrf.mxu1 }
 0x6d7   : > { %11474 = vst [vmem:[#allocation89_spill] sm:$0xff] %v8491_v13  ;;  %2819 = vmax.xlane.f32.xlu1 %v2818_v46  ;;  %11478 = vst [vmem:[#allocation93_spill] sm:$0xff] %v8499_v60 }
 0x6d8   : > { %v8497_v39 = vpop.f32.mrf.mxu0  ;;  %v8507_v16 = vpop.f32.mrf.mxu1 }
 0x6d9   : > { %11477 = vst [vmem:[#allocation92_spill] sm:$0xff] %v8497_v39  ;;  %11481 = vst [vmem:[#allocation96_spill] sm:$0xff] %v8507_v16 }
 0x6da   : > { %v8503_v25 = vpop.f32.mrf.mxu0  ;;  %v8515_v14 = vpop.f32.mrf.mxu1 }
 0x6db   : > { %11479 = vst [vmem:[#allocation94_spill] sm:$0xff] %v8503_v25  ;;  %2777 = vmax.xlane.f32.xlu1 %v2776_v63  ;;  %11483 = vst [vmem:[#allocation98_spill] sm:$0xff] %v8515_v14  ;;  %v2779_v63 = vmax.f32 %v8485_v22, %v8493_v9  ;;  %v8541_v22 = vpop.xlane.xlu1 %2681 }
 0x6dc   : > { %v8505_v24 = vpop.f32.mrf.mxu0  ;;  %v8525_v41 = vpop.f32.mrf.mxu1 }
 0x6dd   : > { %11480 = vst [vmem:[#allocation95_spill] sm:$0xff] %v8505_v24  ;;  %11486 = vst [vmem:[#allocation101_spill] sm:$0xff] %v8525_v41 }
 0x6de   : > { %v8513_v46 = vpop.f32.mrf.mxu0  ;;  %v8531_v48 = vpop.f32.mrf.mxu1 }
 0x6df   : > { %11482 = vst [vmem:[#allocation97_spill] sm:$0xff] %v8513_v46  ;;  %2822 = vmax.xlane.f32.xlu1 %v2821_v8  ;;  %11487 = vst [vmem:[#allocation102_spill] sm:$0xff] %v8531_v48  ;;  %v2724_v8 = vpop.xlane.xlu0 %2723  ;;  %v8559_v29 = vpop.xlane.xlu1 %2684 }
 0x6e0   : > { %v8519_v28 = vpop.f32.mrf.mxu0  ;;  %v8539_v9 = vpop.f32.mrf.mxu1  ;;  %v2898_v36 = vsub.f32 %v8279_v58, %v2724_v8 }
 0x6e1   : > { %11485 = vst [vmem:[#allocation100_spill] sm:$0xff] %v8519_v28  ;;  %11488 = vst [vmem:[#allocation103_spill] sm:$0xff] %v8539_v9 }
 0x6e2   : > { %v8523_v27 = vpop.f32.mrf.mxu0  ;;  %v8547_v10 = vpop.f32.mrf.mxu1  ;;  %v3061_v42 = vmul.f32 1.442695, %v2898_v36 }
 0x6e3   : > { %2780 = vmax.xlane.f32.xlu1 %v2779_v63  ;;  %v2782_v63 = vmax.f32 %v8499_v60, %v8507_v16  ;;  %11490 = vst [vmem:[#allocation105_spill] sm:$0xff] %v8547_v10  ;;  %v2727_v59 = vpop.xlane.xlu0 %2726  ;;  %v2897_v16 = vsub.f32 %v8275_v56, %v2724_v8  ;;  %v2830_v8 = vmax.f32 %v8503_v25, %v8505_v24 }
 0x6e4   : > { %v8529_v35 = vpop.f32.mrf.mxu0  ;;  %v8557_v32 = vpop.f32.mrf.mxu1  ;;  %v2899_v56 = vsub.f32 %v8287_v40, %v2727_v59  ;;  %v2900_v58 = vsub.f32 %v8291_v61, %v2727_v59  ;;  %v2788_v25 = vmax.f32 %v8531_v48, %v8539_v9 }
 0x6e5   : > { %11492 = vst [vmem:[#allocation107_spill] sm:$0xff] %v8557_v32 }
 0x6e6   : > { %v8535_v33 = vpop.f32.mrf.mxu0  ;;  %v3063_v36 = vmul.f32 1.442695, %v2899_v56  ;;  %v3065_v24 = vmul.f32 1.442695, %v2900_v58 }
 0x6e7   : > { %2825 = vmax.xlane.f32.xlu1 %v2824_v49  ;;  %v2827_v49 = vmax.f32 %v8491_v13, %v8497_v39  ;;  %v2730_v39 = vpop.xlane.xlu0 %2729 }
 0x6e8   : > { %v8537_v21 = vpop.f32.mrf.mxu0  ;;  %v2901_v40 = vsub.f32 %v8299_v11, %v2730_v39  ;;  %v2902_v61 = vsub.f32 %v8303_v20, %v2730_v39 }
 0x6ea   : > { %v8545_v31 = vpop.f32.mrf.mxu0  ;;  %v3069_v20 = vmul.f32 1.442695, %v2902_v61  ;;  %v2791_v61 = vmax.f32 %v8547_v10, %v8557_v32 }
 0x6eb   : > { %11489 = vst [vmem:[#allocation104_spill] sm:$0xff] %v8545_v31  ;;  %2783 = vmax.xlane.f32.xlu1 %v2782_v63  ;;  %v8564_v63 = vpop.f32.mrf.mxu1 }
 0x6ec   : > { %v8549_v17 = vpop.f32.mrf.mxu0 }
 0x6ed   : > { %11491 = vst [vmem:[#allocation106_spill] sm:$0xff] %v8549_v17  ;;  %v2842_v38 = vmax.f32 %v8545_v31, %v8549_v17  ;;  %v2785_v17 = vmax.f32 %v8515_v14, %v8525_v41  ;;  %v8576_v19 = vpop.f32.mrf.mxu1  ;;  %v8581_v41 = vpop.xlane.xlu1 %2687 }
 0x6ee   : > { %v8555_v52 = vpop.f32.mrf.mxu0 }
 0x6ef   : > { %2828 = vmax.xlane.f32.xlu1 %v2827_v49  ;;  %2843 = vmax.xlane.f32.xlu0 %v2842_v38  ;;  %v3059_v38 = vmul.f32 1.442695, %v2897_v16  ;;  %v2733_v16 = vpop.xlane.xlu0 %2732 }
 0x6f0   : > { %v8562_v60 = vpop.f32.mrf.mxu0  ;;  %v2904_v56 = vsub.f32 %v8315_v5, %v2733_v16 }
 0x6f1   : > { %v2845_v31 = vmax.f32 %v8555_v52, %v8562_v60  ;;  %6696 = vpow2.f32 %v3059_v38  ;;  %v2833_v38 = vmax.f32 %v8513_v46, %v8519_v28 }
 0x6f2   : > { %v8571_v13 = vpop.f32.mrf.mxu0  ;;  %6698 = vpow2.f32 %v3061_v42  ;;  %v2903_v42 = vsub.f32 %v8311_v30, %v2733_v16 }
 0x6f3   : > { %11493 = vst [vmem:[#allocation108_spill] sm:$0xff] %v8571_v13  ;;  %2786 = vmax.xlane.f32.xlu1 %v2785_v17  ;;  %2846 = vmax.xlane.f32.xlu0 %v2845_v31  ;;  %v8587_v31 = vpop.f32.mrf.mxu1  ;;  %6700 = vpow2.f32 %v3063_v36  ;;  %v2736_v58 = vpop.xlane.xlu0 %2735  ;;  %v3073_v36 = vmul.f32 1.442695, %v2904_v56 }
 0x6f4   : > { %v8574_v49 = vpop.f32.mrf.mxu0  ;;  %6702 = vpow2.f32 %v3065_v24  ;;  %v3071_v30 = vmul.f32 1.442695, %v2903_v42  ;;  %v2905_v24 = vsub.f32 %v8323_v37, %v2736_v58  ;;  %v2906_v5 = vsub.f32 %v8327_v62, %v2736_v58 }
 0x6f5   : > { %11494 = vst [vmem:[#allocation109_spill] sm:$0xff] %v8574_v49  ;;  %v2848_v14 = vmax.f32 %v8571_v13, %v8574_v49  ;;  %v8599_v11 = vpop.f32.mrf.mxu1  ;;  %v2836_v37 = vmax.f32 %v8523_v27, %v8529_v35 }
 0x6f6   : > { %v8585_v17 = vpop.f32.mrf.mxu0  ;;  %v3077_v56 = vmul.f32 1.442695, %v2906_v5 }
 0x6f7   : > { %2831 = vmax.xlane.f32.xlu1 %v2830_v8  ;;  %2849 = vmax.xlane.f32.xlu0 %v2848_v14  ;;  %v3067_v8 = vmul.f32 1.442695, %v2901_v40  ;;  %v8601_v14 = vpop.xlane.xlu1 %2690 }
 0x6f8   : > { %v8591_v59 = vpop.f32.mrf.mxu0 }
 0x6f9   : > { %v2851_v49 = vmax.f32 %v8585_v17, %v8591_v59  ;;  %6704 = vpow2.f32 %v3067_v8 }
 0x6fa   : > { %v8597_v13 = vpop.f32.mrf.mxu0  ;;  %6706 = vpow2.f32 %v3069_v20  ;;  %v3075_v20 = vmul.f32 1.442695, %v2905_v24 }
 0x6fb   : > { %2789 = vmax.xlane.f32.xlu1 %v2788_v25  ;;  %2852 = vmax.xlane.f32.xlu0 %v2851_v49  ;;  %v8613_v25 = vpop.f32.mrf.mxu1  ;;  %v2694_v16 = vpop.xlane.xlu1 %2693  ;;  %6708 = vpow2.f32 %v3071_v30 }
 0x6fc   : > { %v8604_v39 = vpop.f32.mrf.mxu0  ;;  %v2877_v62 = vsub.f32 %v8333_v18, %v2694_v16  ;;  %6710 = vpow2.f32 %v3073_v36  ;;  %v2878_v58 = vsub.f32 %v8337_v55, %v2694_v16  ;;  %v2794_v36 = vmax.f32 %v8564_v63, %v8576_v19 }
 0x6fd   : > { %v2854_v40 = vmax.f32 %v8597_v13, %v8604_v39  ;;  %v8625_v8 = vpop.f32.mrf.mxu1  ;;  %6712 = vpow2.f32 %v3075_v20  ;;  %v2839_v20 = vmax.f32 %v8535_v33, %v8537_v21 }
 0x6fe   : > { %v8611_v9 = vpop.f32.mrf.mxu0  ;;  %v3019_v18 = vmul.f32 1.442695, %v2877_v62  ;;  %6714 = vpow2.f32 %v3077_v56  ;;  %v3021_v55 = vmul.f32 1.442695, %v2878_v58 }
 0x6ff   : > { %2834 = vmax.xlane.f32.xlu1 %v2833_v38  ;;  %2855 = vmax.xlane.f32.xlu0 %v2854_v40  ;;  %v8632_v38 = vpop.eup %6696  ;;  %v2739_v40 = vpop.xlane.xlu0 %2738 }
 0x700   : > { %v8616_v49 = vpop.f32.mrf.mxu0  ;;  %11495 = vst [vmem:[#allocation110_spill] sm:$0xff] %v8632_v38  ;;  %v8639_v30 = vpop.f32.mrf.mxu1  ;;  %v2907_v24 = vsub.f32 %v8335_v43, %v2739_v40  ;;  %v2908_v16 = vsub.f32 %v8339_v6, %v2739_v40  ;;  %6716 = vpow2.f32 %v3019_v18  ;;  %v2866_v18 = vsub.f32 %v8265_v47, %v8511_v34 }
 0x701   : > { %v2857_v48 = vmax.f32 %v8611_v9, %v8616_v49  ;;  %v2697_v32 = vpop.xlane.xlu1 %2696  ;;  %6718 = vpow2.f32 %v3021_v55 }
 0x702   : > { %v8623_v28 = vpop.f32.mrf.mxu0  ;;  %v3079_v62 = vmul.f32 1.442695, %v2907_v24  ;;  %v2879_v56 = vsub.f32 %v8345_v0, %v2697_v32  ;;  %v3081_v58 = vmul.f32 1.442695, %v2908_v16  ;;  %v2880_v40 = vsub.f32 %v8349_v50, %v2697_v32 }
 0x703   : > { %2792 = vmax.xlane.f32.xlu1 %v2791_v61  ;;  %2858 = vmax.xlane.f32.xlu0 %v2857_v48  ;;  %v8637_v48 = vpop.eup %6698 }
 0x704   : > { %v8630_v42 = vpop.f32.mrf.mxu0  ;;  %11496 = vst [vmem:[#allocation111_spill] sm:$0xff] %v8637_v48  ;;  %v8644_v5 = vpop.eup %6700  ;;  %v3298_v10 = vadd.f32 %v8637_v48, %v8632_v38  ;;  %6720 = vpow2.f32 %v3079_v62  ;;  %v3023_v0 = vmul.f32 1.442695, %v2879_v56  ;;  %v3025_v55 = vmul.f32 1.442695, %v2880_v40 }
 0x705   : > { %v2860_v61 = vmax.f32 %v8623_v28, %v8630_v42  ;;  %11497 = vst [vmem:[#allocation112_spill] sm:$0xff] %v8644_v5  ;;  %v8649_v46 = vpop.eup %6702  ;;  %6722 = vpow2.f32 %v3081_v58  ;;  %v2700_v16 = vpop.xlane.xlu1 %2699  ;;  %v2868_v62 = vsub.f32 %v8277_v4, %v8527_v44 }
 0x706   : > { %11498 = vst [vmem:[#allocation113_spill] sm:$0xff] %v8649_v46  ;;  %v8653_v43 = vpop.eup %6704  ;;  %6724 = vpow2.f32 %v3023_v0  ;;  %v2881_v40 = vsub.f32 %v8357_v54, %v2700_v16 }
 0x707   : > { %2837 = vmax.xlane.f32.xlu1 %v2836_v37  ;;  %2861 = vmax.xlane.f32.xlu0 %v2860_v61  ;;  %v8651_v37 = vpop.f32.mrf.mxu1  ;;  %11499 = vst [vmem:[#allocation114_spill] sm:$0xff] %v8653_v43  ;;  %v8658_v6 = vpop.eup %6706  ;;  %6726 = vpow2.f32 %v3025_v55  ;;  %v3001_v0 = vmul.f32 1.442695, %v2868_v62  ;;  %v2872_v62 = vsub.f32 %v8301_v12, %v8559_v29 }
 0x708   : > { %11500 = vst [vmem:[#allocation115_spill] sm:$0xff] %v8658_v6  ;;  %v2742_v61 = vpop.xlane.xlu0 %2741  ;;  %v8671_v32 = vpop.eup %6708  ;;  %v3304_v48 = vadd.f32 %v8658_v6, %v8653_v43  ;;  %v11529_v6 = vld [vmem:[#allocation51_spill] sm:$0xff] }
 0x709   : > { %v8665_v38 = vpop.f32.mrf.mxu1  ;;  %v2909_v24 = vsub.f32 %v8347_v57, %v2742_v61  ;;  %v2910_v50 = vsub.f32 %v8351_v3, %v2742_v61  ;;  %11501 = vst [vmem:[#allocation116_spill] sm:$0xff] %v8671_v32  ;;  %v2997_v3 = vmul.f32 1.442695, %v2866_v18 }
 0x70b   : > { %2795 = vmax.xlane.f32.xlu1 %v2794_v36  ;;  %3299 = vadd.xlane.f32.xlu0 %v3298_v10  ;;  %v3301_v36 = vadd.f32 %v8649_v46, %v8644_v5  ;;  %v2865_v10 = vsub.f32 %v8261_v45, %v8511_v34  ;;  %v2797_v45 = vmax.f32 %v8587_v31, %v8599_v11  ;;  %v8677_v34 = vpop.eup %6710  ;;  %v8681_v57 = vpop.f32.mrf.mxu1  ;;  %v3083_v56 = vmul.f32 1.442695, %v2909_v24 }
 0x70c   : > { %11502 = vst [vmem:[#allocation117_spill] sm:$0xff] %v8677_v34  ;;  %v3085_v58 = vmul.f32 1.442695, %v2910_v50  ;;  %v8686_v61 = vpop.eup %6712  ;;  %v3307_v18 = vadd.f32 %v8677_v34, %v8671_v32  ;;  %v3027_v24 = vmul.f32 1.442695, %v2881_v40  ;;  %v11531_v34 = vld [vmem:[#allocation53_spill] sm:$0xff] }
 0x70d   : > { %v2995_v47 = vmul.f32 1.442695, %v2865_v10  ;;  %11503 = vst [vmem:[#allocation118_spill] sm:$0xff] %v8686_v61  ;;  %v2745_v10 = vpop.xlane.xlu0 %2744  ;;  %v8697_v54 = vpop.f32.mrf.mxu1 }
 0x70e   : > { %v2911_v50 = vsub.f32 %v8359_v2, %v2745_v10  ;;  %v2912_v55 = vsub.f32 %v8363_v51, %v2745_v10  ;;  %v2871_v2 = vsub.f32 %v8297_v7, %v8559_v29  ;;  %v11508_v10 = vld [vmem:[#allocation48_spill] sm:$0xff] }
 0x70f   : > { %2840 = vmax.xlane.f32.xlu1 %v2839_v20  ;;  %3302 = vadd.xlane.f32.xlu0 %v3301_v36  ;;  %v2867_v20 = vsub.f32 %v8273_v53, %v8527_v44  ;;  %v2882_v36 = vsub.f32 %v8361_v26, %v2700_v16  ;;  %v2800_v53 = vmax.f32 %v8613_v25, %v8625_v8  ;;  %v8693_v44 = vpop.eup %6714  ;;  %6728 = vpow2.f32 %v2995_v47 }
 0x710   : > { %11504 = vst [vmem:[#allocation119_spill] sm:$0xff] %v8693_v44  ;;  %6730 = vpow2.f32 %v2997_v3  ;;  %v2870_v26 = vsub.f32 %v8289_v23, %v8541_v22  ;;  %v8703_v16 = vpop.eup %6716  ;;  %v2803_v47 = vmax.f32 %v8639_v30, %v8651_v37  ;;  %v8713_v3 = vpop.f32.mrf.mxu1  ;;  %v3007_v12 = vmul.f32 1.442695, %v2871_v2 }
 0x711   : > { %v2999_v4 = vmul.f32 1.442695, %v2867_v20  ;;  %6732 = vpow2.f32 %v3083_v56  ;;  %11505 = vst [vmem:[#allocation120_spill] sm:$0xff] %v8703_v16  ;;  %v3310_v20 = vadd.f32 %v8693_v44, %v8686_v61  ;;  %v3087_v56 = vmul.f32 1.442695, %v2911_v50  ;;  %v2748_v7 = vpop.xlane.xlu0 %2747 }
 0x712   : > { %6734 = vpow2.f32 %v3085_v58  ;;  %v3005_v51 = vmul.f32 1.442695, %v2870_v26  ;;  %v3089_v58 = vmul.f32 1.442695, %v2912_v55  ;;  %v3009_v26 = vmul.f32 1.442695, %v2872_v62 }
 0x713   : > { %2798 = vmax.xlane.f32.xlu1 %v2797_v45  ;;  %3305 = vadd.xlane.f32.xlu0 %v3304_v48  ;;  %v2869_v48 = vsub.f32 %v8285_v1, %v8541_v22  ;;  %v3029_v45 = vmul.f32 1.442695, %v2882_v36  ;;  %v2703_v1 = vpop.xlane.xlu1 %2702  ;;  %v8709_v22 = vpop.eup %6718  ;;  %6736 = vpow2.f32 %v2999_v4 }
 0x714   : > { %11506 = vst [vmem:[#allocation121_spill] sm:$0xff] %v8709_v22  ;;  %6738 = vpow2.f32 %v3001_v0  ;;  %v2883_v40 = vsub.f32 %v8369_v15, %v2703_v1  ;;  %v8718_v36 = vpop.eup %6720  ;;  %v3268_v4 = vadd.f32 %v8709_v22, %v8703_v16  ;;  %v8729_v15 = vpop.f32.mrf.mxu1 }
 0x715   : > { %v3003_v23 = vmul.f32 1.442695, %v2869_v48  ;;  %6740 = vpow2.f32 %v3027_v24  ;;  %11507 = vst [vmem:[#allocation122_spill] sm:$0xff] %v8718_v36  ;;  %v8725_v29 = vpop.eup %6722  ;;  %v11510_v48 = vld [vmem:[#allocation43_spill] sm:$0xff]  ;;  %v11511_v24 = vld [vmem:[#allocation44_spill] sm:$0xff]  ;;  %v2751_v43 = vpop.xlane.xlu0 %2750 }
 0x716   : > { %6742 = vpow2.f32 %v3029_v45  ;;  %11509 = vst [vmem:[#allocation48_spill] sm:$0xff] %v8725_v29  ;;  %v2873_v0 = vsub.f32 %v11510_v48, %v8581_v41  ;;  %v2874_v50 = vsub.f32 %v11511_v24, %v8581_v41  ;;  %v3031_v55 = vmul.f32 1.442695, %v2883_v40  ;;  %v11512_v45 = vld [vmem:[#allocation47_spill] sm:$0xff]  ;;  %v11516_v40 = vld [vmem:[#allocation45_spill] sm:$0xff] }
 0x717   : > { %2801 = vmax.xlane.f32.xlu1 %v2800_v53  ;;  %3308 = vadd.xlane.f32.xlu0 %v3307_v18  ;;  %v2884_v53 = vsub.f32 %v11508_v10, %v2703_v1  ;;  %v2806_v18 = vmax.f32 %v8665_v38, %v8681_v57  ;;  %6744 = vpow2.f32 %v3003_v23  ;;  %v2913_v1 = vsub.f32 %v11512_v45, %v2748_v7  ;;  %v8735_v23 = vpop.eup %6724  ;;  %v2706_v10 = vpop.xlane.xlu1 %2705 }
 0x718   : > { %6746 = vpow2.f32 %v3005_v51  ;;  %11514 = vst [vmem:[#allocation43_spill] sm:$0xff] %v8735_v23  ;;  %v2809_v51 = vmax.f32 %v8697_v54, %v8713_v3  ;;  %v3313_v62 = vadd.f32 %v8725_v29, %v8718_v36  ;;  %v8741_v41 = vpop.eup %6726  ;;  %v2915_v32 = vsub.f32 %v11529_v6, %v2751_v43 }
 0x719   : > { %6748 = vpow2.f32 %v3087_v56  ;;  %v3033_v2 = vmul.f32 1.442695, %v2884_v53  ;;  %11515 = vst [vmem:[#allocation44_spill] sm:$0xff] %v8741_v41  ;;  %v3011_v56 = vmul.f32 1.442695, %v2873_v0  ;;  %v11518_v53 = vld [vmem:[#allocation46_spill] sm:$0xff]  ;;  %v2916_v61 = vsub.f32 %v11531_v34, %v2751_v43 }
 0x71a   : > { %6750 = vpow2.f32 %v3089_v58  ;;  %v3013_v58 = vmul.f32 1.442695, %v2874_v50  ;;  %v2876_v48 = vsub.f32 %v11518_v53, %v8601_v14  ;;  %v3091_v45 = vmul.f32 1.442695, %v2913_v1  ;;  %v11520_v0 = vld [vmem:[#allocation50_spill] sm:$0xff] }
 0x71b   : > { %2804 = vmax.xlane.f32.xlu1 %v2803_v47  ;;  %3311 = vadd.xlane.f32.xlu0 %v3310_v20  ;;  %v11513_v47 = vld [vmem:[#allocation49_spill] sm:$0xff]  ;;  %6752 = vpow2.f32 %v3007_v12  ;;  %v11535_v43 = vld [vmem:[#allocation54_spill] sm:$0xff] }
 0x71c   : > { %v2914_v20 = vsub.f32 %v11513_v47, %v2748_v7  ;;  %v8747_v7 = vpop.eup %6728  ;;  %6754 = vpow2.f32 %v3009_v26  ;;  %v2885_v47 = vsub.f32 %v11520_v0, %v2706_v10 }
 0x71d   : > { %11517 = vst [vmem:[#allocation47_spill] sm:$0xff] %v8747_v7  ;;  %v8751_v24 = vpop.eup %6730  ;;  %6756 = vpow2.f32 %v3031_v55  ;;  %v11525_v55 = vld [vmem:[#allocation38_spill] sm:$0xff] }
 0x71e   : > { %11519 = vst [vmem:[#allocation49_spill] sm:$0xff] %v8751_v24  ;;  %v3093_v12 = vmul.f32 1.442695, %v2914_v20  ;;  %v8754_v5 = vpop.eup %6732  ;;  %6758 = vpow2.f32 %v3033_v2  ;;  %v11527_v2 = vld [vmem:[#allocation40_spill] sm:$0xff] }
 0x71f   : > { %2807 = vmax.xlane.f32.xlu1 %v2806_v18  ;;  %3269 = vadd.xlane.f32.xlu0 %v3268_v4  ;;  %v2875_v18 = vsub.f32 %v11516_v40, %v8601_v14  ;;  %v8745_v4 = vpop.f32.mrf.mxu1  ;;  %11521 = vst [vmem:[#allocation45_spill] sm:$0xff] %v8754_v5  ;;  %v11522_v40 = vld [vmem:[#allocation52_spill] sm:$0xff]  ;;  %v3271_v14 = vadd.f32 %v8741_v41, %v8735_v23  ;;  %v8761_v50 = vpop.eup %6734  ;;  %6760 = vpow2.f32 %v3011_v56 }
 0x720   : > { %v2886_v46 = vsub.f32 %v11522_v40, %v2706_v10  ;;  %v2812_v26 = vmax.f32 %v8729_v15, %v8745_v4  ;;  %11523 = vst [vmem:[#allocation46_spill] sm:$0xff] %v8761_v50  ;;  %6762 = vpow2.f32 %v3013_v58  ;;  %v3017_v10 = vmul.f32 1.442695, %v2876_v48 }
 0x721   : > { %v3015_v20 = vmul.f32 1.442695, %v2875_v18  ;;  %6764 = vpow2.f32 %v3091_v45  ;;  %v3035_v40 = vmul.f32 1.442695, %v2885_v47  ;;  %v3316_v58 = vadd.f32 %v8761_v50, %v8754_v5  ;;  %v2754_v47 = vpop.xlane.xlu0 %2753 }
 0x722   : > { %6766 = vpow2.f32 %v3093_v12  ;;  %v3037_v18 = vmul.f32 1.442695, %v2886_v46  ;;  %v3095_v46 = vmul.f32 1.442695, %v2915_v32 }
 0x723   : > { %2810 = vmax.xlane.f32.xlu1 %v2809_v51  ;;  %3314 = vadd.xlane.f32.xlu0 %v3313_v62  ;;  %v11524_v51 = vld [vmem:[#allocation91_spill] sm:$0xff]  ;;  %v8765_v62 = vpop.eup %6736  ;;  %6768 = vpow2.f32 %v3015_v20  ;;  %v11537_v20 = vld [vmem:[#allocation56_spill] sm:$0xff] }
 0x724   : > { %v2863_v1 = vsub.f32 %v11525_v55, %v11524_v51  ;;  %11526 = vst [vmem:[#allocation50_spill] sm:$0xff] %v8765_v62  ;;  %v2864_v53 = vsub.f32 %v11527_v2, %v11524_v51  ;;  %v8769_v0 = vpop.eup %6738  ;;  %v3250_v55 = vadd.f32 %v8751_v24, %v8747_v7  ;;  %v2709_v51 = vpop.xlane.xlu1 %2708  ;;  %6770 = vpow2.f32 %v3017_v10 }
 0x725   : > { %11528 = vst [vmem:[#allocation52_spill] sm:$0xff] %v8769_v0  ;;  %v8774_v56 = vpop.eup %6740  ;;  %6772 = vpow2.f32 %v3035_v40  ;;  %v2887_v34 = vsub.f32 %v11535_v43, %v2709_v51  ;;  %v3253_v12 = vadd.f32 %v8769_v0, %v8765_v62  ;;  %v2888_v7 = vsub.f32 %v11537_v20, %v2709_v51  ;;  %v11543_v20 = vld [vmem:[#allocation57_spill] sm:$0xff]  ;;  %v2757_v62 = vpop.xlane.xlu0 %2756  ;;  %v11549_v0 = vld [vmem:[#allocation60_spill] sm:$0xff] }
 0x726   : > { %11530 = vst [vmem:[#allocation91_spill] sm:$0xff] %v8774_v56  ;;  %v8779_v48 = vpop.eup %6742  ;;  %v2993_v6 = vmul.f32 1.442695, %v2864_v53  ;;  %6774 = vpow2.f32 %v3037_v18 }
 0x727   : > { %2813 = vmax.xlane.f32.xlu1 %v2812_v26  ;;  %3272 = vadd.xlane.f32.xlu0 %v3271_v14  ;;  %11532 = vst [vmem:[#allocation38_spill] sm:$0xff] %v8779_v48  ;;  %v2991_v26 = vmul.f32 1.442695, %v2863_v1  ;;  %v8781_v45 = vpop.eup %6744  ;;  %v3097_v1 = vmul.f32 1.442695, %v2916_v61  ;;  %v3274_v53 = vadd.f32 %v8779_v48, %v8774_v56 }
 0x728   : > { %11533 = vst [vmem:[#allocation40_spill] sm:$0xff] %v8781_v45  ;;  %v8783_v14 = vpop.eup %6746  ;;  %v3039_v40 = vmul.f32 1.442695, %v2887_v34  ;;  %v3041_v43 = vmul.f32 1.442695, %v2888_v7  ;;  %v2712_v24 = vpop.xlane.xlu1 %2711 }
 0x729   : > { %11534 = vst [vmem:[#allocation51_spill] sm:$0xff] %v8783_v14  ;;  %v8788_v2 = vpop.eup %6748  ;;  %6776 = vpow2.f32 %v2991_v26  ;;  %v3256_v61 = vadd.f32 %v8783_v14, %v8781_v45  ;;  %v2918_v26 = vsub.f32 %v11543_v20, %v2754_v47  ;;  %v2890_v45 = vsub.f32 %v11549_v0, %v2712_v24  ;;  %v11553_v14 = vld [vmem:[#allocation59_spill] sm:$0xff] }
 0x72a   : > { %11536 = vst [vmem:[#allocation53_spill] sm:$0xff] %v8788_v2  ;;  %v8793_v10 = vpop.eup %6750  ;;  %6778 = vpow2.f32 %v2993_v6  ;;  %v2919_v36 = vsub.f32 %v11553_v14, %v2757_v62 }
 0x72b   : > { %3251 = vadd.xlane.f32.xlu1 %v3250_v55  ;;  %3317 = vadd.xlane.f32.xlu0 %v3316_v58  ;;  %11538 = vst [vmem:[#allocation54_spill] sm:$0xff] %v8793_v10  ;;  %v8795_v55 = vpop.eup %6752  ;;  %6780 = vpow2.f32 %v3095_v46  ;;  %v11541_v58 = vld [vmem:[#allocation55_spill] sm:$0xff]  ;;  %v3319_v6 = vadd.f32 %v8793_v10, %v8788_v2  ;;  %v3101_v20 = vmul.f32 1.442695, %v2918_v26  ;;  %v3045_v0 = vmul.f32 1.442695, %v2890_v45 }
 0x72c   : > { %11539 = vst [vmem:[#allocation56_spill] sm:$0xff] %v8795_v55  ;;  %v8797_v32 = vpop.eup %6754  ;;  %v2917_v18 = vsub.f32 %v11541_v58, %v2754_v47  ;;  %6782 = vpow2.f32 %v3097_v1  ;;  %v11547_v58 = vld [vmem:[#allocation58_spill] sm:$0xff]  ;;  %v11555_v26 = vld [vmem:[#allocation61_spill] sm:$0xff]  ;;  %v3103_v14 = vmul.f32 1.442695, %v2919_v36 }
 0x72d   : > { %11540 = vst [vmem:[#allocation123_spill] sm:$0xff] %v8797_v32  ;;  %v8802_v51 = vpop.eup %6756  ;;  %6784 = vpow2.f32 %v3039_v40  ;;  %v2889_v1 = vsub.f32 %v11547_v58, %v2712_v24  ;;  %v3259_v7 = vadd.f32 %v8797_v32, %v8795_v55  ;;  %v2715_v40 = vpop.xlane.xlu0 %2714  ;;  %v2920_v55 = vsub.f32 %v11555_v26, %v2757_v62  ;;  %v11561_v26 = vld [vmem:[#allocation64_spill] sm:$0xff] }
 0x72e   : > { %11542 = vst [vmem:[#allocation55_spill] sm:$0xff] %v8802_v51  ;;  %6786 = vpow2.f32 %v3041_v43  ;;  %v2892_v5 = vsub.f32 %v11561_v26, %v2715_v40 }
 0x72f   : > { %3254 = vadd.xlane.f32.xlu1 %v3253_v12  ;;  %3275 = vadd.xlane.f32.xlu0 %v3274_v53  ;;  %v8807_v12 = vpop.eup %6758  ;;  %v3099_v53 = vmul.f32 1.442695, %v2917_v18  ;;  %v3043_v58 = vmul.f32 1.442695, %v2889_v1  ;;  %v11559_v1 = vld [vmem:[#allocation62_spill] sm:$0xff] }
 0x730   : > { %11544 = vst [vmem:[#allocation57_spill] sm:$0xff] %v8807_v12  ;;  %v8809_v46 = vpop.eup %6760  ;;  %v3277_v44 = vadd.f32 %v8807_v12, %v8802_v51  ;;  %v2891_v32 = vsub.f32 %v11559_v1, %v2715_v40  ;;  %v3105_v62 = vmul.f32 1.442695, %v2920_v55  ;;  %v3049_v55 = vmul.f32 1.442695, %v2892_v5  ;;  %v2718_v40 = vpop.xlane.xlu1 %2717 }
 0x731   : > { %11545 = vst [vmem:[#allocation124_spill] sm:$0xff] %v8809_v46  ;;  %v8811_v34 = vpop.eup %6762  ;;  %6788 = vpow2.f32 %v3099_v53 }
 0x732   : > { %11546 = vst [vmem:[#allocation125_spill] sm:$0xff] %v8811_v34  ;;  %v8816_v47 = vpop.eup %6764  ;;  %v3262_v43 = vadd.f32 %v8811_v34, %v8809_v46  ;;  %6790 = vpow2.f32 %v3101_v20  ;;  %v2760_v46 = vpop.xlane.xlu0 %2759  ;;  %v3047_v36 = vmul.f32 1.442695, %v2891_v32  ;;  %v11567_v32 = vld [vmem:[#allocation66_spill] sm:$0xff] }
 0x733   : > { %3257 = vadd.xlane.f32.xlu1 %v3256_v61  ;;  %3320 = vadd.xlane.f32.xlu0 %v3319_v6  ;;  %11548 = vst [vmem:[#allocation58_spill] sm:$0xff] %v8816_v47  ;;  %v8821_v61 = vpop.eup %6766  ;;  %6792 = vpow2.f32 %v3043_v58  ;;  %v11563_v58 = vld [vmem:[#allocation63_spill] sm:$0xff] }
 0x734   : > { %11550 = vst [vmem:[#allocation60_spill] sm:$0xff] %v8821_v61  ;;  %v8823_v6 = vpop.eup %6768  ;;  %v3322_v29 = vadd.f32 %v8821_v61, %v8816_v47  ;;  %6794 = vpow2.f32 %v3045_v0  ;;  %v2921_v1 = vsub.f32 %v11563_v58, %v2760_v46  ;;  %v11565_v0 = vld [vmem:[#allocation65_spill] sm:$0xff] }
 0x735   : > { %11551 = vst [vmem:[#allocation126_spill] sm:$0xff] %v8823_v6  ;;  %v8825_v18 = vpop.eup %6770  ;;  %6796 = vpow2.f32 %v3103_v14  ;;  %v2922_v26 = vsub.f32 %v11565_v0, %v2760_v46  ;;  %v2893_v14 = vsub.f32 %v11567_v32, %v2718_v40  ;;  %v11578_v47 = vld [vmem:[#allocation41_spill] sm:$0xff] }
 0x736   : > { %11552 = vst [vmem:[#allocation127_spill] sm:$0xff] %v8825_v18  ;;  %v8830_v24 = vpop.eup %6772  ;;  %v3265_v45 = vadd.f32 %v8825_v18, %v8823_v6  ;;  %6798 = vpow2.f32 %v3105_v62  ;;  %v11569_v62 = vld [vmem:[#allocation68_spill] sm:$0xff]  ;;  %v11575_v18 = vld [vmem:[#allocation71_spill] sm:$0xff] }
 0x737   : > { %3260 = vadd.xlane.f32.xlu1 %v3259_v7  ;;  %3278 = vadd.xlane.f32.xlu0 %v3277_v44  ;;  %11554 = vst [vmem:[#allocation59_spill] sm:$0xff] %v8830_v24  ;;  %v8835_v7 = vpop.eup %6774  ;;  %6800 = vpow2.f32 %v3047_v36  ;;  %v2894_v5 = vsub.f32 %v11569_v62, %v2718_v40 }
 0x738   : > { %11556 = vst [vmem:[#allocation61_spill] sm:$0xff] %v8835_v7  ;;  %v8837_v44 = vpop.eup %6776  ;;  %6802 = vpow2.f32 %v3049_v55 }
 0x739   : > { %11557 = vst [vmem:[#allocation128_spill] sm:$0xff] %v8837_v44  ;;  %v8839_v53 = vpop.eup %6778  ;;  %v3053_v32 = vmul.f32 1.442695, %v2894_v5 }
 0x73a   : > { %11558 = vst [vmem:[#allocation129_spill] sm:$0xff] %v8839_v53  ;;  %v8844_v20 = vpop.eup %6780  ;;  %v3247_v50 = vadd.f32 %v8839_v53, %v8837_v44  ;;  %v3109_v44 = vmul.f32 1.442695, %v2922_v26  ;;  %v3051_v53 = vmul.f32 1.442695, %v2893_v14 }
 0x73b   : > { %3263 = vadd.xlane.f32.xlu1 %v3262_v43  ;;  %3323 = vadd.xlane.f32.xlu0 %v3322_v29  ;;  %11560 = vst [vmem:[#allocation62_spill] sm:$0xff] %v8844_v20  ;;  %v3280_v43 = vadd.f32 %v8835_v7, %v8830_v24  ;;  %v8849_v29 = vpop.eup %6782 }
 0x73c   : > { %11562 = vst [vmem:[#allocation64_spill] sm:$0xff] %v8849_v29  ;;  %v8854_v34 = vpop.eup %6784  ;;  %v3325_v2 = vadd.f32 %v8849_v29, %v8844_v20 }
 0x73d   : > { %11564 = vst [vmem:[#allocation63_spill] sm:$0xff] %v8854_v34  ;;  %v8859_v6 = vpop.eup %6786 }
 0x73e   : > { %11566 = vst [vmem:[#allocation65_spill] sm:$0xff] %v8859_v6  ;;  %v8862_v58 = vpop.eup %6788  ;;  %v3283_v46 = vadd.f32 %v8859_v6, %v8854_v34 }
 0x73f   : > { %3266 = vadd.xlane.f32.xlu1 %v3265_v45  ;;  %3281 = vadd.xlane.f32.xlu0 %v3280_v43  ;;  %v2763_v45 = vpop.xlane.xlu0 %2762  ;;  %v3107_v43 = vmul.f32 1.442695, %v2921_v1  ;;  %11568 = vst [vmem:[#allocation66_spill] sm:$0xff] %v8862_v58  ;;  %v8867_v0 = vpop.eup %6790  ;;  %v11572_v1 = vld [vmem:[#allocation69_spill] sm:$0xff] }
 0x740   : > { %11570 = vst [vmem:[#allocation68_spill] sm:$0xff] %v8867_v0  ;;  %v8870_v36 = vpop.eup %6792  ;;  %v2924_v10 = vsub.f32 %v11572_v1, %v2763_v45  ;;  %v3328_v40 = vadd.f32 %v8867_v0, %v8862_v58  ;;  %v11577_v1 = vld [vmem:[#allocation99_spill] sm:$0xff] }
 0x741   : > { %6804 = vpow2.f32 %v3107_v43  ;;  %v8875_v26 = vpop.eup %6794  ;;  %v2895_v16 = vsub.f32 %v11578_v47, %v11577_v1 }
 0x742   : > { %6806 = vpow2.f32 %v3109_v44  ;;  %v8878_v43 = vpop.eup %6796  ;;  %v3286_v44 = vadd.f32 %v8875_v26, %v8870_v36 }
 0x743   : > { %3248 = vadd.xlane.f32.xlu1 %v3247_v50  ;;  %3326 = vadd.xlane.f32.xlu0 %v3325_v2  ;;  %v11571_v50 = vld [vmem:[#allocation67_spill] sm:$0xff]  ;;  %v2766_v55 = vpop.xlane.xlu0 %2765  ;;  %6808 = vpow2.f32 %v3051_v53 }
 0x744   : > { %v2923_v2 = vsub.f32 %v11571_v50, %v2763_v45  ;;  %11574 = vst [vmem:[#allocation67_spill] sm:$0xff] %v8878_v43  ;;  %6810 = vpow2.f32 %v3053_v32  ;;  %v3113_v50 = vmul.f32 1.442695, %v2924_v10  ;;  %v2926_v5 = vsub.f32 %v11575_v18, %v2766_v55  ;;  %v8883_v45 = vpop.eup %6798  ;;  %v11580_v32 = vld [vmem:[#allocation42_spill] sm:$0xff] }
 0x745   : > { %11576 = vst [vmem:[#allocation69_spill] sm:$0xff] %v8883_v45  ;;  %v2896_v10 = vsub.f32 %v11580_v32, %v11577_v1 }
 0x746   : > { %v3111_v62 = vmul.f32 1.442695, %v2923_v2  ;;  %v3117_v18 = vmul.f32 1.442695, %v2926_v5 }
 0x747   : > { %3284 = vadd.xlane.f32.xlu0 %v3283_v46  ;;  %v11573_v46 = vld [vmem:[#allocation70_spill] sm:$0xff] }
 0x748   : > { %v2925_v14 = vsub.f32 %v11573_v46, %v2766_v55  ;;  %6812 = vpow2.f32 %v3111_v62  ;;  %v3331_v55 = vadd.f32 %v8883_v45, %v8878_v43 }
 0x749   : > { %6814 = vpow2.f32 %v3113_v50 }
 0x74a   : > { %v3115_v53 = vmul.f32 1.442695, %v2925_v14  ;;  %v3057_v14 = vmul.f32 1.442695, %v2896_v10 }
 0x74b   : > { %3329 = vadd.xlane.f32.xlu0 %v3328_v40  ;;  %v8889_v40 = vpop.eup %6800 }
 0x74c   : > { %v8895_v46 = vpop.eup %6802  ;;  %6816 = vpow2.f32 %v3115_v53 }
 0x74d   : > { %6818 = vpow2.f32 %v3117_v18  ;;  %v3289_v61 = vadd.f32 %v8895_v46, %v8889_v40 }
 0x74e   : > { %v8899_v62 = vpop.eup %6804 }
 0x74f   : > { %3287 = vadd.xlane.f32.xlu0 %v3286_v44  ;;  %v3055_v44 = vmul.f32 1.442695, %v2895_v16  ;;  %11582 = vst [vmem:[#allocation99_spill] sm:$0xff] %v8899_v62  ;;  %v8903_v1 = vpop.eup %6806 }
 0x750   : > { %v8887_v2 = vpop.xlane.xlu1 %2768  ;;  %11583 = vst [vmem:[#allocation41_spill] sm:$0xff] %v8903_v1  ;;  %v8907_v5 = vpop.eup %6808  ;;  %v3334_v16 = vadd.f32 %v8903_v1, %v8899_v62  ;;  %v11588_v62 = vld [vmem:[#allocation108_spill] sm:$0xff] }
 0x751   : > { %11579 = vst [vmem:[#allocation70_spill] sm:$0xff] %v8887_v2  ;;  %6820 = vpow2.f32 %v3055_v44  ;;  %v8911_v53 = vpop.eup %6810  ;;  %v11589_v2 = vld [vmem:[#allocation109_spill] sm:$0xff] }
 0x752   : > { %6822 = vpow2.f32 %v3057_v14  ;;  %v3292_v18 = vadd.f32 %v8911_v53, %v8907_v5 }
 0x753   : > { %3332 = vadd.xlane.f32.xlu0 %v3331_v55 }
 0x754   : > { %v8897_v47 = vpop.xlane.xlu1 %2771 }
 0x755   : > { %11581 = vst [vmem:[#allocation71_spill] sm:$0xff] %v8897_v47  ;;  %v8915_v10 = vpop.eup %6812 }
 0x756   : > { %11584 = vst [vmem:[#allocation42_spill] sm:$0xff] %v8915_v10 }
 0x757   : > { %3290 = vadd.xlane.f32.xlu0 %v3289_v61  ;;  %v8919_v61 = vpop.eup %6814 }
 0x758   : > { %v8905_v50 = vpop.xlane.xlu1 %2816  ;;  %11585 = vst [vmem:[#allocation130_spill] sm:$0xff] %v8919_v61  ;;  %v3337_v14 = vadd.f32 %v8919_v61, %v8915_v10 }
 0x759   : > { %v8923_v44 = vpop.eup %6816 }
 0x75a   : > { %v8927_v22 = vpop.eup %6818 }
 0x75b   : > { %3335 = vadd.xlane.f32.xlu0 %v3334_v16  ;;  %v3340_v23 = vadd.f32 %v8927_v22, %v8923_v44 }
 0x75c   : > { %v8913_v32 = vpop.xlane.xlu1 %2774 }
 0x75e   : > { %v8931_v20 = vpop.eup %6820 }
 0x75f   : > { %3293 = vadd.xlane.f32.xlu0 %v3292_v18  ;;  %11586 = vst [vmem:[#allocation131_spill] sm:$0xff] %v8931_v20  ;;  %v8935_v29 = vpop.eup %6822 }
 0x760   : > { %v8921_v55 = vpop.xlane.xlu1 %2819  ;;  %11587 = vst [vmem:[#allocation132_spill] sm:$0xff] %v8935_v29  ;;  %v3295_v41 = vadd.f32 %v8935_v29, %v8931_v20 }
 0x763   : > { %3338 = vadd.xlane.f32.xlu0 %v3337_v14 }
 0x764   : > { %v8929_v16 = vpop.xlane.xlu1 %2777 }
 0x767   : > { %3341 = vadd.xlane.f32.xlu0 %v3340_v23 }
 0x768   : > { %v8937_v18 = vpop.xlane.xlu1 %2822 }
 0x76b   : > { %3296 = vadd.xlane.f32.xlu0 %v3295_v41 }
 0x76c   : > { %v8941_v58 = vpop.xlane.xlu1 %2780 }
 0x770   : > { %v8943_v56 = vpop.xlane.xlu1 %2825 }
 0x774   : > { %v8945_v14 = vpop.xlane.xlu1 %2783 }
 0x778   : > { %v8947_v0 = vpop.xlane.xlu1 %2828  ;;  %v8949_v48 = vpop.xlane.xlu0 %2843 }
 0x77c   : > { %v8951_v43 = vpop.xlane.xlu1 %2786  ;;  %v2847_v51 = vpop.xlane.xlu0 %2846 }
 0x77d   : > { %v2979_v23 = vsub.f32 %v8555_v52, %v2847_v51  ;;  %v2980_v45 = vsub.f32 %v8562_v60, %v2847_v51 }
 0x77f   : > { %v3223_v12 = vmul.f32 1.442695, %v2979_v23  ;;  %v3225_v20 = vmul.f32 1.442695, %v2980_v45 }
 0x780   : > { %v8955_v41 = vpop.xlane.xlu1 %2831  ;;  %v2850_v29 = vpop.xlane.xlu0 %2849 }
 0x781   : > { %v2981_v24 = vsub.f32 %v11588_v62, %v2850_v29  ;;  %v2982_v1 = vsub.f32 %v11589_v2, %v2850_v29  ;;  %6824 = vpow2.f32 %v3223_v12 }
 0x782   : > { %6826 = vpow2.f32 %v3225_v20 }
 0x783   : > { %v3227_v7 = vmul.f32 1.442695, %v2981_v24  ;;  %v3229_v10 = vmul.f32 1.442695, %v2982_v1 }
 0x784   : > { %v8959_v34 = vpop.xlane.xlu1 %2789  ;;  %v2853_v47 = vpop.xlane.xlu0 %2852 }
 0x785   : > { %v2983_v52 = vsub.f32 %v8585_v17, %v2853_v47  ;;  %v2984_v60 = vsub.f32 %v8591_v59, %v2853_v47  ;;  %6828 = vpow2.f32 %v3227_v7 }
 0x786   : > { %6830 = vpow2.f32 %v3229_v10 }
 0x787   : > { %v3231_v51 = vmul.f32 1.442695, %v2983_v52  ;;  %v3233_v45 = vmul.f32 1.442695, %v2984_v60 }
 0x788   : > { %v8963_v23 = vpop.xlane.xlu1 %2834  ;;  %v2856_v62 = vpop.xlane.xlu0 %2855 }
 0x789   : > { %v2985_v29 = vsub.f32 %v8597_v13, %v2856_v62  ;;  %v2986_v12 = vsub.f32 %v8604_v39, %v2856_v62  ;;  %6832 = vpow2.f32 %v3231_v51 }
 0x78a   : > { %6834 = vpow2.f32 %v3233_v45 }
 0x78b   : > { %v3235_v24 = vmul.f32 1.442695, %v2985_v29  ;;  %v3237_v20 = vmul.f32 1.442695, %v2986_v12 }
 0x78c   : > { %v8967_v2 = vpop.xlane.xlu1 %2792  ;;  %v2859_v17 = vpop.xlane.xlu0 %2858 }
 0x78d   : > { %6836 = vpow2.f32 %v3235_v24 }
 0x78e   : > { %v8969_v59 = vpop.eup %6824  ;;  %6838 = vpow2.f32 %v3237_v20  ;;  %v2987_v20 = vsub.f32 %v8611_v9, %v2859_v17 }
 0x78f   : > { %11590 = vst [vmem:[#allocation108_spill] sm:$0xff] %v8969_v59  ;;  %v8973_v1 = vpop.eup %6826 }
 0x790   : > { %v8971_v7 = vpop.xlane.xlu1 %2837  ;;  %v2862_v47 = vpop.xlane.xlu0 %2861  ;;  %11591 = vst [vmem:[#allocation109_spill] sm:$0xff] %v8973_v1  ;;  %v3421_v13 = vadd.f32 %v8973_v1, %v8969_v59  ;;  %v2988_v59 = vsub.f32 %v8616_v49, %v2859_v17 }
 0x791   : > { %v2989_v9 = vsub.f32 %v8623_v28, %v2862_v47  ;;  %v2990_v49 = vsub.f32 %v8630_v42, %v2862_v47 }
 0x792   : > { %v8977_v39 = vpop.eup %6828  ;;  %3422 = vadd.xlane.f32.xlu0 %v3421_v13  ;;  %v3241_v6 = vmul.f32 1.442695, %v2988_v59 }
 0x793   : > { %11592 = vst [vmem:[#allocation133_spill] sm:$0xff] %v8977_v39  ;;  %v8983_v60 = vpop.eup %6830  ;;  %v3245_v28 = vmul.f32 1.442695, %v2990_v49 }
 0x794   : > { %v8979_v10 = vpop.xlane.xlu1 %2795  ;;  %v8981_v52 = vpop.xlane.xlu0 %3299  ;;  %11594 = vst [vmem:[#allocation135_spill] sm:$0xff] %v8983_v60  ;;  %v3424_v51 = vadd.f32 %v8983_v60, %v8977_v39 }
 0x795   : > { %11593 = vst [vmem:[#allocation134_spill] sm:$0xff] %v8981_v52 }
 0x796   : > { %v8987_v45 = vpop.eup %6832  ;;  %3425 = vadd.xlane.f32.xlu0 %v3424_v51 }
 0x797   : > { %11595 = vst [vmem:[#allocation136_spill] sm:$0xff] %v8987_v45  ;;  %v8993_v12 = vpop.eup %6834 }
 0x798   : > { %v8989_v62 = vpop.xlane.xlu1 %2840  ;;  %v8991_v29 = vpop.xlane.xlu0 %3302  ;;  %11597 = vst [vmem:[#allocation138_spill] sm:$0xff] %v8993_v12  ;;  %v3427_v24 = vadd.f32 %v8993_v12, %v8987_v45  ;;  %v3239_v45 = vmul.f32 1.442695, %v2987_v20 }
 0x799   : > { %11596 = vst [vmem:[#allocation137_spill] sm:$0xff] %v8991_v29 }
 0x79a   : > { %v8998_v13 = vpop.eup %6836  ;;  %3428 = vadd.xlane.f32.xlu0 %v3427_v24 }
 0x79b   : > { %11598 = vst [vmem:[#allocation139_spill] sm:$0xff] %v8998_v13  ;;  %v9003_v51 = vpop.eup %6838 }
 0x79c   : > { %v2799_v1 = vpop.xlane.xlu1 %2798  ;;  %v9001_v39 = vpop.xlane.xlu0 %3305  ;;  %11599 = vst [vmem:[#allocation140_spill] sm:$0xff] %v9003_v51  ;;  %v3430_v29 = vadd.f32 %v9003_v51, %v8998_v13 }
 0x79d   : > { %v2947_v60 = vsub.f32 %v8587_v31, %v2799_v1  ;;  %v2948_v52 = vsub.f32 %v8599_v11, %v2799_v1  ;;  %v3243_v1 = vmul.f32 1.442695, %v2989_v9 }
 0x79e   : > { %3431 = vadd.xlane.f32.xlu0 %v3430_v29 }
 0x79f   : > { %v3159_v12 = vmul.f32 1.442695, %v2947_v60  ;;  %v3161_v61 = vmul.f32 1.442695, %v2948_v52 }
 0x7a0   : > { %v2802_v17 = vpop.xlane.xlu1 %2801  ;;  %v9011_v24 = vpop.xlane.xlu0 %3308 }
 0x7a1   : > { %6840 = vpow2.f32 %v3159_v12  ;;  %v2949_v31 = vsub.f32 %v8613_v25, %v2802_v17  ;;  %v2950_v11 = vsub.f32 %v8625_v8, %v2802_v17 }
 0x7a2   : > { %6842 = vpow2.f32 %v3161_v61 }
 0x7a3   : > { %6844 = vpow2.f32 %v3239_v45  ;;  %v3163_v20 = vmul.f32 1.442695, %v2949_v31  ;;  %v3165_v13 = vmul.f32 1.442695, %v2950_v11 }
 0x7a4   : > { %6846 = vpow2.f32 %v3241_v6  ;;  %v2805_v52 = vpop.xlane.xlu1 %2804  ;;  %v9015_v59 = vpop.xlane.xlu0 %3311 }
 0x7a5   : > { %6848 = vpow2.f32 %v3163_v20  ;;  %v2951_v42 = vsub.f32 %v8639_v30, %v2805_v52  ;;  %v2952_v47 = vsub.f32 %v8651_v37, %v2805_v52 }
 0x7a6   : > { %6850 = vpow2.f32 %v3165_v13 }
 0x7a7   : > { %6852 = vpow2.f32 %v3243_v1  ;;  %v3167_v25 = vmul.f32 1.442695, %v2951_v42  ;;  %v3169_v60 = vmul.f32 1.442695, %v2952_v47 }
 0x7a8   : > { %6854 = vpow2.f32 %v3245_v28  ;;  %v2808_v8 = vpop.xlane.xlu1 %2807  ;;  %v9019_v61 = vpop.xlane.xlu0 %3269 }
 0x7a9   : > { %6856 = vpow2.f32 %v3167_v25  ;;  %v2953_v6 = vsub.f32 %v8665_v38, %v2808_v8  ;;  %v2954_v45 = vsub.f32 %v8681_v57, %v2808_v8 }
 0x7aa   : > { %6858 = vpow2.f32 %v3169_v60 }
 0x7ab   : > { %v3171_v29 = vmul.f32 1.442695, %v2953_v6  ;;  %v3173_v12 = vmul.f32 1.442695, %v2954_v45 }
 0x7ac   : > { %v2811_v9 = vpop.xlane.xlu1 %2810  ;;  %v9023_v30 = vpop.xlane.xlu0 %3314 }
 0x7ad   : > { %6860 = vpow2.f32 %v3171_v29  ;;  %v2955_v37 = vsub.f32 %v8697_v54, %v2811_v9  ;;  %v2956_v13 = vsub.f32 %v8713_v3, %v2811_v9 }
 0x7ae   : > { %v9027_v49 = vpop.eup %6840  ;;  %6862 = vpow2.f32 %v3173_v12 }
 0x7af   : > { %11600 = vst [vmem:[#allocation141_spill] sm:$0xff] %v9027_v49  ;;  %v9029_v17 = vpop.eup %6842  ;;  %v3175_v31 = vmul.f32 1.442695, %v2955_v37  ;;  %v3177_v38 = vmul.f32 1.442695, %v2956_v13 }
 0x7b0   : > { %11601 = vst [vmem:[#allocation142_spill] sm:$0xff] %v9029_v17  ;;  %v9031_v11 = vpop.eup %6844  ;;  %v2814_v57 = vpop.xlane.xlu1 %2813  ;;  %v3373_v20 = vadd.f32 %v9029_v17, %v9027_v49  ;;  %v11614_v49 = vld [vmem:[#allocation75_spill] sm:$0xff] }
 0x7b1   : > { %11602 = vst [vmem:[#allocation143_spill] sm:$0xff] %v9031_v11  ;;  %v9033_v1 = vpop.xlane.xlu0 %3272  ;;  %v9037_v28 = vpop.eup %6846  ;;  %6864 = vpow2.f32 %v3175_v31  ;;  %v2957_v54 = vsub.f32 %v8729_v15, %v2814_v57  ;;  %v2958_v3 = vsub.f32 %v8745_v4, %v2814_v57  ;;  %v2959_v17 = vsub.f32 %v11614_v49, %v8905_v50 }
 0x7b2   : > { %11603 = vst [vmem:[#allocation144_spill] sm:$0xff] %v9037_v28  ;;  %v9041_v52 = vpop.eup %6848  ;;  %6866 = vpow2.f32 %v3177_v38  ;;  %3374 = vadd.xlane.f32.xlu0 %v3373_v20  ;;  %v3433_v15 = vadd.f32 %v9037_v28, %v9031_v11 }
 0x7b3   : > { %11604 = vst [vmem:[#allocation145_spill] sm:$0xff] %v9041_v52  ;;  %v9043_v42 = vpop.eup %6850  ;;  %v3179_v47 = vmul.f32 1.442695, %v2957_v54  ;;  %v3181_v25 = vmul.f32 1.442695, %v2958_v3 }
 0x7b4   : > { %11605 = vst [vmem:[#allocation146_spill] sm:$0xff] %v9043_v42  ;;  %v9045_v60 = vpop.eup %6852  ;;  %v3376_v6 = vadd.f32 %v9043_v42, %v9041_v52  ;;  %v1448_v52 = vld [vmem:[%s11037_s4 + $0x40] sm:$0xff] }
 0x7b5   : > { %v9047_v8 = vpop.xlane.xlu0 %3317  ;;  %v9053_v45 = vpop.eup %6854  ;;  %6868 = vpow2.f32 %v3179_v47 }
 0x7b6   : > { %v9055_v4 = vpop.eup %6856  ;;  %6870 = vpow2.f32 %v3181_v25  ;;  %3377 = vadd.xlane.f32.xlu1 %v3376_v6  ;;  %3434 = vadd.xlane.f32.xlu0 %v3433_v15  ;;  %v3436_v37 = vadd.f32 %v9053_v45, %v9045_v60 }
 0x7b7   : > { %11606 = vst [vmem:[#allocation147_spill] sm:$0xff] %v9055_v4  ;;  %v9057_v29 = vpop.eup %6858 }
 0x7b8   : > { %11607 = vst [vmem:[#allocation148_spill] sm:$0xff] %v9057_v29  ;;  %v3379_v9 = vadd.f32 %v9057_v29, %v9055_v4  ;;  %v11616_v4 = vld [vmem:[#allocation78_spill] sm:$0xff] }
 0x7b9   : > { %v9059_v12 = vpop.xlane.xlu0 %3275  ;;  %v2961_v29 = vsub.f32 %v11616_v4, %v8921_v55  ;;  %v2945_v4 = vsub.f32 %v8564_v63, %v8979_v10  ;;  %v11622_v63 = vld [vmem:[#allocation89_spill] sm:$0xff] }
 0x7ba   : > { %v9065_v13 = vpop.eup %6860  ;;  %3380 = vadd.xlane.f32.xlu1 %v3379_v9  ;;  %3437 = vadd.xlane.f32.xlu0 %v3436_v37 }
 0x7bb   : > { %11608 = vst [vmem:[#allocation149_spill] sm:$0xff] %v9065_v13  ;;  %v9067_v31 = vpop.eup %6862  ;;  %v3187_v11 = vmul.f32 1.442695, %v2961_v29  ;;  %v11621_v29 = vld [vmem:[#allocation88_spill] sm:$0xff] }
 0x7bc   : > { %11609 = vst [vmem:[#allocation150_spill] sm:$0xff] %v9067_v31  ;;  %v3382_v57 = vadd.f32 %v9067_v31, %v9065_v13  ;;  %v11617_v13 = vld [vmem:[#allocation80_spill] sm:$0xff] }
 0x7bd   : > { %v9069_v38 = vpop.xlane.xlu0 %3320 }
 0x7be   : > { %v9073_v20 = vpop.eup %6864  ;;  %3383 = vadd.xlane.f32.xlu1 %v3382_v57 }
 0x7bf   : > { %11610 = vst [vmem:[#allocation151_spill] sm:$0xff] %v9073_v20  ;;  %v9075_v54 = vpop.eup %6866 }
 0x7c0   : > { %11611 = vst [vmem:[#allocation152_spill] sm:$0xff] %v9075_v54  ;;  %v3385_v47 = vadd.f32 %v9075_v54, %v9073_v20  ;;  %v3183_v20 = vmul.f32 1.442695, %v2959_v17  ;;  %v11618_v54 = vld [vmem:[#allocation82_spill] sm:$0xff]  ;;  %v1449_v17 = vld [vmem:[%s11037_s4 + $0x48] sm:$0xff] }
 0x7c1   : > { %v9077_v3 = vpop.xlane.xlu0 %3278  ;;  %v2963_v49 = vsub.f32 %v11618_v54, %v8937_v18 }
 0x7c2   : > { %v9081_v25 = vpop.eup %6868  ;;  %3386 = vadd.xlane.f32.xlu1 %v3385_v47  ;;  %v11615_v47 = vld [vmem:[#allocation77_spill] sm:$0xff]  ;;  %6872 = vpow2.f32 %v3183_v20  ;;  %v3155_v20 = vmul.f32 1.442695, %v2945_v4 }
 0x7c3   : > { %11612 = vst [vmem:[#allocation153_spill] sm:$0xff] %v9081_v25  ;;  %v9083_v6 = vpop.eup %6870  ;;  %v2960_v42 = vsub.f32 %v11615_v47, %v8905_v50  ;;  %v11620_v50 = vld [vmem:[#allocation86_spill] sm:$0xff] }
 0x7c4   : > { %11613 = vst [vmem:[#allocation154_spill] sm:$0xff] %v9083_v6  ;;  %v3388_v9 = vadd.f32 %v9083_v6, %v9081_v25  ;;  %v11619_v6 = vld [vmem:[#allocation84_spill] sm:$0xff]  ;;  %v2965_v47 = vsub.f32 %v11620_v50, %v8943_v56 }
 0x7c5   : > { %v9085_v15 = vpop.xlane.xlu0 %3323  ;;  %v3185_v25 = vmul.f32 1.442695, %v2960_v42  ;;  %v2964_v51 = vsub.f32 %v11619_v6, %v8937_v18  ;;  %v2946_v42 = vsub.f32 %v8576_v19, %v8979_v10  ;;  %v2967_v6 = vsub.f32 %v11622_v63, %v8947_v0  ;;  %v11629_v63 = vld [vmem:[#allocation95_spill] sm:$0xff] }
 0x7c6   : > { %3389 = vadd.xlane.f32.xlu1 %v3388_v9  ;;  %v2962_v9 = vsub.f32 %v11617_v13, %v8921_v55  ;;  %v2966_v13 = vsub.f32 %v11621_v29, %v8943_v56  ;;  %v3195_v54 = vmul.f32 1.442695, %v2965_v47  ;;  %v2974_v19 = vsub.f32 %v8529_v35, %v8971_v7  ;;  %v11626_v35 = vld [vmem:[#allocation100_spill] sm:$0xff] }
 0x7c7   : > { %6874 = vpow2.f32 %v3185_v25  ;;  %v3193_v18 = vmul.f32 1.442695, %v2964_v51  ;;  %v3157_v10 = vmul.f32 1.442695, %v2946_v42  ;;  %v11623_v51 = vld [vmem:[#allocation92_spill] sm:$0xff] }
 0x7c8   : > { %v3189_v28 = vmul.f32 1.442695, %v2962_v9  ;;  %6876 = vpow2.f32 %v3187_v11  ;;  %v2973_v9 = vsub.f32 %v8523_v27, %v8971_v7  ;;  %v3197_v56 = vmul.f32 1.442695, %v2966_v13  ;;  %v11625_v27 = vld [vmem:[#allocation97_spill] sm:$0xff]  ;;  %v11628_v13 = vld [vmem:[#allocation94_spill] sm:$0xff] }
 0x7c9   : > { %v9089_v37 = vpop.xlane.xlu0 %3281  ;;  %v2968_v11 = vsub.f32 %v11623_v51, %v8947_v0  ;;  %v3199_v25 = vmul.f32 1.442695, %v2967_v6  ;;  %v2971_v47 = vsub.f32 %v11625_v27, %v8963_v23  ;;  %v2972_v7 = vsub.f32 %v11626_v35, %v8963_v23  ;;  %v11627_v0 = vld [vmem:[#allocation106_spill] sm:$0xff] }
 0x7ca   : > { %6878 = vpow2.f32 %v3189_v28  ;;  %v11624_v28 = vld [vmem:[#allocation104_spill] sm:$0xff]  ;;  %v3211_v4 = vmul.f32 1.442695, %v2973_v9  ;;  %v2970_v6 = vsub.f32 %v11629_v63, %v8955_v41  ;;  %v11632_v63 = vld [vmem:[#allocation102_spill] sm:$0xff] }
 0x7cb   : > { %v2977_v50 = vsub.f32 %v11624_v28, %v8949_v48  ;;  %v3201_v42 = vmul.f32 1.442695, %v2968_v11  ;;  %v3207_v9 = vmul.f32 1.442695, %v2971_v47  ;;  %v3209_v51 = vmul.f32 1.442695, %v2972_v7 }
 0x7cc   : > { %v3205_v28 = vmul.f32 1.442695, %v2970_v6  ;;  %v2976_v47 = vsub.f32 %v8537_v21, %v8989_v62  ;;  %v11631_v7 = vld [vmem:[#allocation107_spill] sm:$0xff] }
 0x7cd   : > { %v9091_v57 = vpop.xlane.xlu0 %3326  ;;  %v3219_v29 = vmul.f32 1.442695, %v2977_v50 }
 0x7ce   : > { %v3217_v21 = vmul.f32 1.442695, %v2976_v47  ;;  %v11636_v47 = vld [vmem:[#allocation98_spill] sm:$0xff] }
 0x7cf   : > { %v9147_v23 = vpop.eup %6872 }
 0x7d0   : > { %1494 = vperm.xlu0 %6690, %v1448_v52   ;;  %v3191_v52 = vmul.f32 1.442695, %v2963_v49 }
 0x7d1   : > { %v9104_v31 = vpop.xlane.xlu0 %3284 }
 0x7d2   : > { %6880 = vpow2.f32 %v3191_v52  ;;  %v3213_v52 = vmul.f32 1.442695, %v2974_v19 }
 0x7d3   : > { %6882 = vpow2.f32 %v3193_v18  ;;  %v2978_v18 = vsub.f32 %v11627_v0, %v8949_v48 }
 0x7d4   : > { %6884 = vpow2.f32 %v3195_v54  ;;  %v2969_v54 = vsub.f32 %v11628_v13, %v8955_v41  ;;  %v2975_v41 = vsub.f32 %v8535_v33, %v8989_v62 }
 0x7d5   : > { %v9114_v55 = vpop.xlane.xlu0 %3329  ;;  %6886 = vpow2.f32 %v3155_v20  ;;  %v3221_v19 = vmul.f32 1.442695, %v2978_v18  ;;  %v9171_v18 = vpop.xlane.xlu1 %3251 }
 0x7d6   : > { %6888 = vpow2.f32 %v3157_v10  ;;  %v9149_v10 = vpop.eup %6874  ;;  %v3203_v48 = vmul.f32 1.442695, %v2969_v54  ;;  %v3215_v33 = vmul.f32 1.442695, %v2975_v41 }
 0x7d7   : > { %1499 = vperm.xlu1 %6691, %v1449_v17   ;;  %6890 = vpow2.f32 %v3197_v56  ;;  %v11630_v56 = vld [vmem:[#allocation105_spill] sm:$0xff] }
 0x7d8   : > { %6892 = vpow2.f32 %v3199_v25  ;;  %v2943_v11 = vsub.f32 %v11630_v56, %v8967_v2  ;;  %v9153_v25 = vpop.eup %6876 }
 0x7d9   : > { %v9127_v49 = vpop.xlane.xlu0 %3287  ;;  %6894 = vpow2.f32 %v3211_v4  ;;  %v9159_v27 = vpop.eup %6878 }
 0x7da   : > { %6896 = vpow2.f32 %v3213_v52  ;;  %v2944_v52 = vsub.f32 %v11631_v7, %v8967_v2  ;;  %v2941_v2 = vsub.f32 %v11632_v63, %v8959_v34  ;;  %v2939_v7 = vsub.f32 %v11636_v47, %v8951_v43 }
 0x7db   : > { %6898 = vpow2.f32 %v3201_v42  ;;  %v3151_v42 = vmul.f32 1.442695, %v2943_v11 }
 0x7dc   : > { %6900 = vpow2.f32 %v3219_v29  ;;  %v3153_v6 = vmul.f32 1.442695, %v2944_v52  ;;  %v3143_v47 = vmul.f32 1.442695, %v2939_v7  ;;  %v11642_v7 = vld [vmem:[#allocation87_spill] sm:$0xff] }
 0x7dd   : > { %v9137_v17 = vpop.xlane.xlu0 %3332  ;;  %6902 = vpow2.f32 %v3207_v9 }
 0x7de   : > { %6904 = vpow2.f32 %v3209_v51  ;;  %v11633_v51 = vld [vmem:[#allocation103_spill] sm:$0xff] }
 0x7df   : > { %v9163_v4 = vpop.eup %6880  ;;  %6906 = vpow2.f32 %v3221_v19  ;;  %v2942_v19 = vsub.f32 %v11633_v51, %v8959_v34  ;;  %v3147_v34 = vmul.f32 1.442695, %v2941_v2 }
 0x7e0   : > { %v9165_v35 = vpop.eup %6882  ;;  %6908 = vpow2.f32 %v3203_v48 }
 0x7e1   : > { %v3291_v20 = vpop.xlane.xlu0 %3290  ;;  %v9169_v0 = vpop.eup %6884  ;;  %6910 = vpow2.f32 %v3205_v28 }
 0x7e2   : > { %v9173_v13 = vpop.eup %6886  ;;  %v9191_v28 = vpop.xlane.xlu1 %3254 }
 0x7e3   : > { %v9175_v62 = vpop.eup %6888 }
 0x7e4   : > { %v9177_v54 = vpop.eup %6890 }
 0x7e5   : > { %v9157_v50 = vpop.xlane.xlu0 %3335  ;;  %v9181_v9 = vpop.eup %6892 }
 0x7e6   : > { %v9185_v56 = vpop.eup %6894 }
 0x7e7   : > { %11634 = vst [vmem:[#allocation75_spill] sm:$0xff] %v9185_v56  ;;  %v9189_v11 = vpop.eup %6896 }
 0x7e8   : > { %11635 = vst [vmem:[#allocation77_spill] sm:$0xff] %v9189_v11  ;;  %v9194_v41 = vpop.eup %6898 }
 0x7e9   : > { %v3294_v29 = vpop.xlane.xlu0 %3293  ;;  %v9198_v52 = vpop.eup %6900 }
 0x7ea   : > { %6912 = vrcp.f32 %v3294_v29  ;;  %v3149_v29 = vmul.f32 1.442695, %v2942_v19  ;;  %v9203_v63 = vpop.eup %6902 }
 0x7eb   : > { %6914 = vrcp.f32 %v3291_v20  ;;  %v3370_v20 = vadd.f32 %v9175_v62, %v9173_v13  ;;  %11638 = vst [vmem:[#allocation78_spill] sm:$0xff] %v9203_v63  ;;  %v9207_v51 = vpop.eup %6904 }
 0x7ec   : > { %6916 = vpow2.f32 %v3151_v42  ;;  %v11637_v42 = vld [vmem:[#allocation101_spill] sm:$0xff]  ;;  %11639 = vst [vmem:[#allocation80_spill] sm:$0xff] %v9207_v51  ;;  %v9209_v2 = vpop.eup %6906 }
 0x7ed   : > { %6918 = vpow2.f32 %v3215_v33  ;;  %v3339_v48 = vpop.xlane.xlu0 %3338  ;;  %v2940_v33 = vsub.f32 %v11637_v42, %v8951_v43  ;;  %v9213_v43 = vpop.eup %6908 }
 0x7ee   : > { %6920 = vpow2.f32 %v3217_v21 }
 0x7ef   : > { %6922 = vrcp.f32 %v9127_v49  ;;  %3371 = vadd.xlane.f32.xlu0 %v3370_v20  ;;  %v3412_v49 = vadd.f32 %v9189_v11, %v9185_v56  ;;  %v3145_v42 = vmul.f32 1.442695, %v2940_v33  ;;  %v9219_v56 = vpop.eup %6910 }
 0x7f0   : > { %6924 = vpow2.f32 %v3153_v6  ;;  %v11640_v6 = vld [vmem:[#allocation93_spill] sm:$0xff] }
 0x7f1   : > { %6926 = vrcp.f32 %v9104_v31  ;;  %v3342_v21 = vpop.xlane.xlu0 %3341  ;;  %v2937_v20 = vsub.f32 %v11640_v6, %v8945_v14  ;;  %v11641_v31 = vld [vmem:[#allocation96_spill] sm:$0xff] }
 0x7f2   : > { %6928 = vrcp.f32 %v3342_v21  ;;  %v2938_v19 = vsub.f32 %v11641_v31, %v8945_v14  ;;  %v9217_v21 = vpop.xlane.xlu1 %3257 }
 0x7f3   : > { %6930 = vrcp.f32 %v3339_v48  ;;  %3413 = vadd.xlane.f32.xlu0 %v3412_v49  ;;  %v3409_v48 = vadd.f32 %v9207_v51, %v9203_v63  ;;  %v3139_v11 = vmul.f32 1.442695, %v2937_v20 }
 0x7f4   : > { %6932 = vpow2.f32 %v3147_v34  ;;  %v2935_v34 = vsub.f32 %v11642_v7, %v8941_v58  ;;  %v3141_v63 = vmul.f32 1.442695, %v2938_v19  ;;  %v11644_v19 = vld [vmem:[#allocation83_spill] sm:$0xff] }
 0x7f5   : > { %6934 = vpow2.f32 %v3149_v29 }
 0x7f6   : > { %6936 = vrcp.f32 %v9089_v37  ;;  %v11643_v37 = vld [vmem:[#allocation90_spill] sm:$0xff] }
 0x7f7   : > { %v6913_v6 = vpop.eup %6912  ;;  %6938 = vrcp.f32 %v9157_v50  ;;  %3410 = vadd.xlane.f32.xlu0 %v3409_v48  ;;  %v2936_v31 = vsub.f32 %v11643_v37, %v8941_v58  ;;  %v3418_v50 = vadd.f32 %v9209_v2, %v9198_v52  ;;  %v11646_v37 = vld [vmem:[#allocation79_spill] sm:$0xff] }
 0x7f8   : > { %v6915_v49 = vpop.eup %6914  ;;  %6940 = vpow2.f32 %v3143_v47  ;;  %v3534_v14 = vmul.f32 %v6913_v6, %v8911_v53  ;;  %v3533_v33 = vmul.f32 %v6913_v6, %v8907_v5  ;;  %v3406_v53 = vadd.f32 %v9219_v56, %v9213_v43  ;;  %v9242_v5 = vpop.xlane.xlu1 %3260  ;;  %v11645_v6 = vld [vmem:[#allocation85_spill] sm:$0xff] }
 0x7f9   : > { %v9229_v29 = vpop.eup %6916  ;;  %6942 = vpow2.f32 %v3145_v42  ;;  %v3532_v58 = vmul.f32 %v6915_v49, %v8895_v46  ;;  %v3135_v42 = vmul.f32 1.442695, %v2935_v34  ;;  %v2934_v7 = vsub.f32 %v11645_v6, %v8929_v16 }
 0x7fa   : > { %v9233_v51 = vpop.eup %6918  ;;  %6944 = vrcp.f32 %v9077_v3  ;;  %3631 = vmatprep.subr.mxu1 %v3534_v14  ;;  %v2933_v3 = vsub.f32 %v11644_v19, %v8929_v16  ;;  %v3137_v14 = vmul.f32 1.442695, %v2936_v31 }
 0x7fb   : > { %v9240_v20 = vpop.eup %6920  ;;  %6946 = vrcp.f32 %v9137_v17  ;;  %3632 = vmatpush1.xpose.msra.mxu1 %v3533_v33  ;;  %3419 = vadd.xlane.f32.xlu1 %v3418_v50  ;;  %v3531_v17 = vmul.f32 %v6915_v49, %v8889_v40  ;;  %v2931_v50 = vsub.f32 %v11646_v37, %v8913_v32  ;;  %v3133_v19 = vmul.f32 1.442695, %v2934_v7  ;;  %v11649_v7 = vld [vmem:[#allocation130_spill] sm:$0xff] }
 0x7fc   : > { %v6923_v47 = vpop.eup %6922  ;;  %6948 = vpow2.f32 %v3139_v11  ;;  %3407 = vadd.xlane.f32.xlu0 %v3406_v53  ;;  %3633 = vmatprep.subr.mxu1 %v3532_v58  ;;  %v3415_v46 = vadd.f32 %v9240_v20, %v9233_v51  ;;  %v3403_v11 = vadd.f32 %v9194_v41, %v9181_v9  ;;  %v3131_v40 = vmul.f32 1.442695, %v2933_v3  ;;  %v11647_v53 = vld [vmem:[#allocation81_spill] sm:$0xff] }
 0x7fd   : > { %v9248_v48 = vpop.eup %6924  ;;  %6950 = vpow2.f32 %v3141_v63  ;;  %v3530_v16 = vmul.f32 %v6923_v47, %v8875_v26  ;;  %v2932_v58 = vsub.f32 %v11647_v53, %v8913_v32  ;;  %v3529_v26 = vmul.f32 %v6923_v47, %v8870_v36  ;;  %v11648_v32 = vld [vmem:[#allocation65_spill] sm:$0xff] }
 0x7fe   : > { %v6927_v33 = vpop.eup %6926  ;;  %6952 = vrcp.f32 %v9059_v12 }
 0x7ff   : > { %v6929_v34 = vpop.eup %6928  ;;  %6954 = vrcp.f32 %v9114_v55  ;;  %3634 = vmatpush1.xpose.msra.mxu1 %v3531_v17  ;;  %3416 = vadd.xlane.f32.xlu1 %v3415_v46  ;;  %v9268_v55 = vpop.xlane.xlu1 %3263  ;;  %v3528_v6 = vmul.f32 %v6927_v33, %v11648_v32  ;;  %v11651_v17 = vld [vmem:[#allocation74_spill] sm:$0xff]  ;;  %v11652_v46 = vld [vmem:[#allocation76_spill] sm:$0xff] }
 0x800   : > { %v6931_v63 = vpop.eup %6930  ;;  %6956 = vpow2.f32 %v3135_v42  ;;  %3404 = vadd.xlane.f32.xlu0 %v3403_v11  ;;  %v3566_v12 = vmul.f32 %v6929_v34, %v8927_v22  ;;  %v3565_v49 = vmul.f32 %v6929_v34, %v8923_v44  ;;  %3635 = vmatprep.subr.mxu1 %v3530_v16  ;;  %v3367_v22 = vadd.f32 %v9248_v48, %v9229_v29  ;;  %v11653_v16 = vld [vmem:[#allocation63_spill] sm:$0xff] }
 0x801   : > { %v9264_v31 = vpop.eup %6932  ;;  %6958 = vpow2.f32 %v3137_v14  ;;  %v3400_v44 = vadd.f32 %v9177_v54, %v9169_v0  ;;  %v3564_v36 = vmul.f32 %v6931_v63, %v11649_v7  ;;  %v11650_v14 = vld [vmem:[#allocation71_spill] sm:$0xff]  ;;  %v3127_v34 = vmul.f32 1.442695, %v2931_v50  ;;  %v11658_v7 = vld [vmem:[#allocation72_spill] sm:$0xff] }
 0x802   : > { %v9271_v3 = vpop.eup %6934  ;;  %6960 = vrcp.f32 %v9033_v1  ;;  %3701 = vmatprep.subr.mxu0 %v3566_v12  ;;  %v2929_v1 = vsub.f32 %v11651_v17, %v11650_v14  ;;  %v2930_v11 = vsub.f32 %v11652_v46, %v11650_v14  ;;  %v3527_v12 = vmul.f32 %v6927_v33, %v11653_v16  ;;  %v11660_v16 = vld [vmem:[#allocation59_spill] sm:$0xff] }
 0x803   : > { %v6937_v42 = vpop.eup %6936  ;;  %6962 = vrcp.f32 %v9091_v57  ;;  %3636 = vmatpush1.xpose.msra.mxu1 %v3529_v26  ;;  %3702 = vmatpush1.xpose.msra.mxu0 %v3565_v49  ;;  %v3129_v57 = vmul.f32 1.442695, %v2932_v58  ;;  %v11654_v49 = vld [vmem:[#allocation42_spill] sm:$0xff]  ;;  %v3364_v50 = vadd.f32 %v9271_v3, %v9264_v31  ;;  %v3267_v58 = vpop.xlane.xlu1 %3266 }
 0x804   : > { %v6939_v47 = vpop.eup %6938  ;;  %6964 = vpow2.f32 %v3131_v40  ;;  %3368 = vadd.xlane.f32.xlu1 %v3367_v22  ;;  %3401 = vadd.xlane.f32.xlu0 %v3400_v44  ;;  %v3563_v53 = vmul.f32 %v6931_v63, %v11654_v49  ;;  %v3397_v40 = vadd.f32 %v9165_v35, %v9163_v4  ;;  %v11656_v44 = vld [vmem:[#allocation41_spill] sm:$0xff]  ;;  %v3123_v17 = vmul.f32 1.442695, %v2929_v1  ;;  %v11661_v49 = vld [vmem:[#allocation99_spill] sm:$0xff] }
 0x805   : > { %v9285_v37 = vpop.eup %6940  ;;  %6966 = vpow2.f32 %v3133_v19  ;;  %3637 = vmatprep.subr.mxu1 %v3528_v6  ;;  %3703 = vmatprep.subr.mxu0 %v3564_v36  ;;  %v11655_v19 = vld [vmem:[#allocation61_spill] sm:$0xff]  ;;  %v3562_v63 = vmul.f32 %v6939_v47, %v11656_v44  ;;  %v11657_v6 = vld [vmem:[#allocation70_spill] sm:$0xff]  ;;  %v3394_v1 = vadd.f32 %v9159_v27, %v9153_v25 }
 0x806   : > { %v9289_v26 = vpop.eup %6942  ;;  %6968 = vrcp.f32 %v9019_v61  ;;  %v3526_v33 = vmul.f32 %v6937_v42, %v11655_v19  ;;  %v2927_v61 = vsub.f32 %v11658_v7, %v11657_v6  ;;  %v11659_v36 = vld [vmem:[#allocation73_spill] sm:$0xff] }
 0x807   : > { %v6945_v22 = vpop.eup %6944  ;;  %6970 = vrcp.f32 %v9085_v15  ;;  %3638 = vmatpush1.xpose.msra.mxu1 %v3527_v12  ;;  %3704 = vmatpush1.xpose.msra.mxu0 %v3563_v53  ;;  %v2928_v14 = vsub.f32 %v11659_v36, %v11657_v6  ;;  %v3125_v15 = vmul.f32 1.442695, %v2930_v11  ;;  %v3525_v12 = vmul.f32 %v6937_v42, %v11660_v16  ;;  %v11662_v11 = vld [vmem:[#allocation57_spill] sm:$0xff] }
 0x808   : > { %v6947_v32 = vpop.eup %6946  ;;  %6972 = vpow2.f32 %v3127_v34  ;;  %3365 = vadd.xlane.f32.xlu1 %v3364_v50  ;;  %3398 = vadd.xlane.f32.xlu0 %v3397_v40  ;;  %v3561_v53 = vmul.f32 %v6939_v47, %v11661_v49  ;;  %v3361_v44 = vadd.f32 %v9289_v26, %v9285_v37  ;;  %v11663_v50 = vld [vmem:[#allocation69_spill] sm:$0xff]  ;;  %v3119_v47 = vmul.f32 1.442695, %v2927_v61  ;;  %v11668_v49 = vld [vmem:[#allocation91_spill] sm:$0xff] }
 0x809   : > { %v9303_v46 = vpop.eup %6948  ;;  %6974 = vpow2.f32 %v3129_v57  ;;  %3639 = vmatprep.subr.mxu1 %v3526_v33  ;;  %3705 = vmatprep.subr.mxu0 %v3562_v63  ;;  %v3524_v57 = vmul.f32 %v6945_v22, %v11662_v11  ;;  %v3560_v42 = vmul.f32 %v6947_v32, %v11663_v50  ;;  %v3121_v33 = vmul.f32 1.442695, %v2928_v14  ;;  %v11664_v63 = vld [vmem:[#allocation55_spill] sm:$0xff]  ;;  %v11666_v14 = vld [vmem:[#allocation38_spill] sm:$0xff] }
 0x80a   : > { %v9307_v19 = vpop.eup %6950  ;;  %6976 = vrcp.f32 %v3267_v58  ;;  %v3523_v6 = vmul.f32 %v6945_v22, %v11664_v63  ;;  %v11667_v22 = vld [vmem:[#allocation68_spill] sm:$0xff] }
 0x80b   : > { %v6953_v34 = vpop.eup %6952  ;;  %6978 = vrcp.f32 %v9069_v38  ;;  %3640 = vmatpush1.xpose.msra.mxu1 %v3525_v12  ;;  %3706 = vmatpush1.xpose.msra.mxu0 %v3561_v53  ;;  %v11665_v38 = vld [vmem:[#allocation67_spill] sm:$0xff]  ;;  %v3358_v61 = vadd.f32 %v9307_v19, %v9303_v46 }
 0x80c   : > { %v6955_v40 = vpop.eup %6954  ;;  %6980 = vpow2.f32 %v3123_v17  ;;  %3362 = vadd.xlane.f32.xlu1 %v3361_v44  ;;  %3395 = vadd.xlane.f32.xlu0 %v3394_v1  ;;  %v3559_v7 = vmul.f32 %v6947_v32, %v11665_v38  ;;  %v3391_v17 = vadd.f32 %v9149_v10, %v9147_v23  ;;  %v3521_v53 = vmul.f32 %v6953_v34, %v11668_v49  ;;  %v11669_v44 = vld [vmem:[#allocation66_spill] sm:$0xff] }
 0x80d   : > { %v9316_v58 = vpop.eup %6956  ;;  %6982 = vpow2.f32 %v3125_v15  ;;  %3641 = vmatprep.subr.mxu1 %v3524_v57  ;;  %3707 = vmatprep.subr.mxu0 %v3560_v42  ;;  %v3522_v15 = vmul.f32 %v6953_v34, %v11666_v14  ;;  %v3558_v12 = vmul.f32 %v6955_v40, %v11667_v22  ;;  %v3557_v1 = vmul.f32 %v6955_v40, %v11669_v44  ;;  %v11670_v57 = vld [vmem:[#allocation44_spill] sm:$0xff] }
 0x80e   : > { %v9320_v36 = vpop.eup %6958  ;;  %6984 = vrcp.f32 %v9268_v55 }
 0x80f   : > { %v6961_v16 = vpop.eup %6960  ;;  %6986 = vrcp.f32 %v9047_v8  ;;  %3642 = vmatpush1.xpose.msra.mxu1 %v3523_v6  ;;  %3708 = vmatpush1.xpose.msra.mxu0 %v3559_v7  ;;  %v3355_v11 = vadd.f32 %v9320_v36, %v9316_v58  ;;  %v11673_v6 = vld [vmem:[#allocation62_spill] sm:$0xff] }
 0x810   : > { %v6963_v32 = vpop.eup %6962  ;;  %6988 = vpow2.f32 %v3119_v47  ;;  %3359 = vadd.xlane.f32.xlu1 %v3358_v61  ;;  %3392 = vadd.xlane.f32.xlu0 %v3391_v17  ;;  %v3520_v50 = vmul.f32 %v6961_v16, %v11670_v57  ;;  %v11671_v47 = vld [vmem:[#allocation64_spill] sm:$0xff]  ;;  %v11674_v61 = vld [vmem:[#allocation121_spill] sm:$0xff] }
 0x811   : > { %v9330_v55 = vpop.eup %6964  ;;  %6990 = vpow2.f32 %v3121_v33  ;;  %3643 = vmatprep.subr.mxu1 %v3522_v15  ;;  %3709 = vmatprep.subr.mxu0 %v3558_v12  ;;  %v3556_v33 = vmul.f32 %v6963_v32, %v11671_v47  ;;  %v3555_v38 = vmul.f32 %v6963_v32, %v11673_v6  ;;  %v11675_v15 = vld [vmem:[#allocation60_spill] sm:$0xff]  ;;  %v11677_v32 = vld [vmem:[#allocation58_spill] sm:$0xff] }
 0x812   : > { %v9334_v8 = vpop.eup %6966  ;;  %6992 = vrcp.f32 %v9242_v5  ;;  %v11672_v5 = vld [vmem:[#allocation43_spill] sm:$0xff]  ;;  %v11676_v12 = vld [vmem:[#allocation120_spill] sm:$0xff] }
 0x813   : > { %v6969_v42 = vpop.eup %6968  ;;  %6994 = vrcp.f32 %v9023_v30  ;;  %3644 = vmatpush1.xpose.msra.mxu1 %v3521_v53  ;;  %3710 = vmatpush1.xpose.msra.mxu0 %v3557_v1  ;;  %v3519_v40 = vmul.f32 %v6961_v16, %v11672_v5  ;;  %v3352_v30 = vadd.f32 %v9334_v8, %v9330_v55  ;;  %v11678_v1 = vld [vmem:[#allocation127_spill] sm:$0xff] }
 0x814   : > { %v6971_v63 = vpop.eup %6970  ;;  %3356 = vadd.xlane.f32.xlu1 %v3355_v11  ;;  %3645 = vmatprep.subr.mxu1 %v3520_v50  ;;  %6996 = vrcp.f32 %v9015_v59  ;;  %v3518_v17 = vmul.f32 %v6969_v42, %v11674_v61  ;;  %v11679_v50 = vld [vmem:[#allocation54_spill] sm:$0xff] }
 0x815   : > { %v9342_v34 = vpop.eup %6972  ;;  %3711 = vmatprep.subr.mxu0 %v3556_v33  ;;  %6998 = vrcp.f32 %v9217_v21  ;;  %v3554_v22 = vmul.f32 %v6971_v63, %v11675_v15  ;;  %v3517_v21 = vmul.f32 %v6969_v42, %v11676_v12  ;;  %v3553_v49 = vmul.f32 %v6971_v63, %v11677_v32  ;;  %v11680_v33 = vld [vmem:[#allocation126_spill] sm:$0xff]  ;;  %v11681_v63 = vld [vmem:[#allocation53_spill] sm:$0xff] }
 0x816   : > { %v9347_v7 = vpop.eup %6974  ;;  %7000 = vrcp.f32 %v9011_v24  ;;  %v11683_v15 = vld [vmem:[#allocation46_spill] sm:$0xff] }
 0x817   : > { %v6977_v14 = vpop.eup %6976  ;;  %3646 = vmatpush1.xpose.msra.mxu1 %v3519_v40  ;;  %3712 = vmatpush1.xpose.msra.mxu0 %v3555_v38  ;;  %7002 = vrcp.f32 %v9191_v28  ;;  %v3349_v44 = vadd.f32 %v9347_v7, %v9342_v34  ;;  %v11682_v38 = vld [vmem:[#allocation125_spill] sm:$0xff] }
 0x818   : > { %v6979_v59 = vpop.eup %6978  ;;  %3353 = vadd.xlane.f32.xlu1 %v3352_v30  ;;  %3647 = vmatprep.subr.mxu1 %v3518_v17  ;;  %v3516_v11 = vmul.f32 %v6977_v14, %v11678_v1  ;;  %7004 = vrcp.f32 %v9001_v39  ;;  %v3515_v28 = vmul.f32 %v6977_v14, %v11680_v33  ;;  %v3249_v17 = vpop.xlane.xlu1 %3248  ;;  %v11684_v14 = vld [vmem:[#allocation137_spill] sm:$0xff]  ;;  %v11687_v1 = vld [vmem:[#allocation123_spill] sm:$0xff] }
 0x819   : > { %v9354_v16 = vpop.eup %6980  ;;  %3713 = vmatprep.subr.mxu0 %v3554_v22  ;;  %v3552_v47 = vmul.f32 %v6979_v59, %v11679_v50  ;;  %v3551_v5 = vmul.f32 %v6979_v59, %v11681_v63  ;;  %7006 = vrcp.f32 %v9171_v18  ;;  %v11685_v59 = vld [vmem:[#allocation124_spill] sm:$0xff]  ;;  %v11686_v18 = vld [vmem:[#allocation45_spill] sm:$0xff]  ;;  %v11690_v63 = vld [vmem:[#allocation122_spill] sm:$0xff] }
 0x81a   : > { %v9359_v53 = vpop.eup %6982  ;;  %7008 = vrcp.f32 %v11684_v14 }
 0x81b   : > { %v6985_v57 = vpop.eup %6984  ;;  %3648 = vmatpush1.xpose.msra.mxu1 %v3517_v21  ;;  %3714 = vmatpush1.xpose.msra.mxu0 %v3553_v49  ;;  %v3346_v6 = vadd.f32 %v9359_v53, %v9354_v16  ;;  %7010 = vrcp.f32 %v3249_v17  ;;  %v3297_v49 = vpop.xlane.xlu0 %3296  ;;  %v11692_v17 = vld [vmem:[#allocation51_spill] sm:$0xff] }
 0x81c   : > { %v6987_v24 = vpop.eup %6986  ;;  %3350 = vadd.xlane.f32.xlu1 %v3349_v44  ;;  %3649 = vmatprep.subr.mxu1 %v3516_v11  ;;  %v3514_v30 = vmul.f32 %v6985_v57, %v11682_v38  ;;  %v3513_v12 = vmul.f32 %v6985_v57, %v11685_v59  ;;  %v11689_v57 = vld [vmem:[#allocation56_spill] sm:$0xff]  ;;  %v11691_v38 = vld [vmem:[#allocation134_spill] sm:$0xff] }
 0x81d   : > { %v9366_v42 = vpop.eup %6988  ;;  %3715 = vmatprep.subr.mxu0 %v3552_v47  ;;  %v3550_v39 = vmul.f32 %v6987_v24, %v11683_v15  ;;  %v3549_v21 = vmul.f32 %v6987_v24, %v11686_v18  ;;  %v11688_v47 = vld [vmem:[#allocation48_spill] sm:$0xff]  ;;  %7012 = vrcp.f32 %v11691_v38 }
 0x81e   : > { %v9371_v40 = vpop.eup %6990  ;;  %7014 = vrcp.f32 %v3297_v49 }
 0x81f   : > { %v6993_v61 = vpop.eup %6992  ;;  %3650 = vmatpush1.xpose.msra.mxu1 %v3515_v28  ;;  %3716 = vmatpush1.xpose.msra.mxu0 %v3551_v5  ;;  %v3343_v44 = vadd.f32 %v9371_v40, %v9366_v42  ;;  %v1451_v28 = vld [vmem:[%s11037_s4 + $0x58] sm:$0xff] }
 0x820   : > { %v6995_v22 = vpop.eup %6994  ;;  %3347 = vadd.xlane.f32.xlu1 %v3346_v6  ;;  %3651 = vmatprep.subr.mxu1 %v3514_v30  ;;  %v3512_v11 = vmul.f32 %v6993_v61, %v11687_v1  ;;  %v3511_v24 = vmul.f32 %v6993_v61, %v11689_v57  ;;  %v9391_v30 = vpop.xlane.xlu0 %3422  ;;  %v11695_v61 = vld [vmem:[#allocation118_spill] sm:$0xff] }
 0x821   : > { %3717 = vmatprep.subr.mxu0 %v3550_v39  ;;  %v6997_v32 = vpop.eup %6996  ;;  %v3548_v33 = vmul.f32 %v6995_v22, %v11688_v47  ;;  %v3547_v5 = vmul.f32 %v6995_v22, %v11690_v63  ;;  %v11693_v39 = vld [vmem:[#allocation119_spill] sm:$0xff]  ;;  %v11698_v57 = vld [vmem:[#allocation50_spill] sm:$0xff]  ;;  %v11699_v63 = vld [vmem:[#allocation116_spill] sm:$0xff] }
 0x822   : > { %v6999_v50 = vpop.eup %6998  ;;  %v3546_v14 = vmul.f32 %v6997_v32, %v11693_v39  ;;  %v11702_v39 = vld [vmem:[#allocation47_spill] sm:$0xff] }
 0x823   : > { %3652 = vmatpush1.xpose.msra.mxu1 %v3513_v12  ;;  %3718 = vmatpush1.xpose.msra.mxu0 %v3549_v21  ;;  %v7001_v6 = vpop.eup %7000  ;;  %v3510_v15 = vmul.f32 %v6999_v50, %v11692_v17  ;;  %v11694_v12 = vld [vmem:[#allocation40_spill] sm:$0xff]  ;;  %v3545_v21 = vmul.f32 %v6997_v32, %v11695_v61  ;;  %v11701_v32 = vld [vmem:[#allocation115_spill] sm:$0xff] }
 0x824   : > { %3344 = vadd.xlane.f32.xlu1 %v3343_v44  ;;  %3653 = vmatprep.subr.mxu1 %v3512_v11  ;;  %v7003_v59 = vpop.eup %7002  ;;  %v3509_v18 = vmul.f32 %v6999_v50, %v11694_v12  ;;  %v11696_v44 = vld [vmem:[#allocation52_spill] sm:$0xff]  ;;  %v11697_v11 = vld [vmem:[#allocation117_spill] sm:$0xff]  ;;  %v11703_v12 = vld [vmem:[#allocation114_spill] sm:$0xff] }
 0x825   : > { %3719 = vmatprep.subr.mxu0 %v3548_v33  ;;  %v7005_v22 = vpop.eup %7004  ;;  %v3508_v1 = vmul.f32 %v7003_v59, %v11696_v44  ;;  %v3544_v47 = vmul.f32 %v7001_v6, %v11697_v11  ;;  %v11700_v50 = vld [vmem:[#allocation49_spill] sm:$0xff] }
 0x826   : > { %1509 = vperm.xlu0 %6690, %v1451_v28   ;;  %v7007_v33 = vpop.eup %7006  ;;  %v3426_v28 = vpop.xlane.xlu0 %3425  ;;  %v11705_v44 = vld [vmem:[#allocation113_spill] sm:$0xff] }
 0x827   : > { %3654 = vmatpush1.xpose.msra.mxu1 %v3511_v24  ;;  %3720 = vmatpush1.xpose.msra.mxu0 %v3547_v5  ;;  %v3507_v24 = vmul.f32 %v7003_v59, %v11698_v57  ;;  %v3543_v5 = vmul.f32 %v7001_v6, %v11699_v63  ;;  %v7009_v38 = vpop.eup %7008  ;;  %v3506_v17 = vmul.f32 %v7007_v33, %v11700_v50  ;;  %v1450_v59 = vld [vmem:[%s11037_s4 + $0x50] sm:$0xff] }
 0x828   : > { %3655 = vmatprep.subr.mxu1 %v3510_v15  ;;  %3721 = vmatprep.subr.mxu0 %v3546_v14  ;;  %v3542_v15 = vmul.f32 %v7005_v22, %v11701_v32  ;;  %v7011_v49 = vpop.eup %7010  ;;  %v3505_v14 = vmul.f32 %v7007_v33, %v11702_v39  ;;  %v11704_v6 = vld [vmem:[#allocation129_spill] sm:$0xff]  ;;  %v11707_v33 = vld [vmem:[#allocation112_spill] sm:$0xff] }
 0x82a   : > { %v3429_v61 = vpop.xlane.xlu0 %3428  ;;  %v7013_v11 = vpop.eup %7012 }
 0x82b   : > { %3656 = vmatpush1.xpose.msra.mxu1 %v3509_v18  ;;  %3722 = vmatpush1.xpose.msra.mxu0 %v3545_v21  ;;  %v3541_v18 = vmul.f32 %v7005_v22, %v11703_v12  ;;  %v3504_v21 = vmul.f32 %v7011_v49, %v11704_v6  ;;  %v11708_v22 = vld [vmem:[#allocation111_spill] sm:$0xff]  ;;  %v11713_v6 = vld [vmem:[#allocation16_spill] sm:$0xff] }
 0x82c   : > { %3657 = vmatprep.subr.mxu1 %v3508_v1  ;;  %3723 = vmatprep.subr.mxu0 %v3544_v47  ;;  %v3540_v1 = vmul.f32 %v7009_v38, %v11705_v44  ;;  %v11706_v47 = vld [vmem:[#allocation128_spill] sm:$0xff]  ;;  %v3538_v63 = vmul.f32 %v7013_v11, %v11708_v22  ;;  %v11711_v12 = vld [vmem:[#allocation131_spill] sm:$0xff] }
 0x82d   : > { %v3503_v57 = vmul.f32 %v7011_v49, %v11706_v47  ;;  %v11716_v22 = vld [vmem:[#allocation39_spill] sm:$0xff] }
 0x82e   : > { %v3432_v50 = vpop.xlane.xlu0 %3431 }
 0x82f   : > { %3658 = vmatpush1.xpose.msra.mxu1 %v3507_v24  ;;  %3724 = vmatpush1.xpose.msra.mxu0 %v3543_v5  ;;  %v3539_v24 = vmul.f32 %v7009_v38, %v11707_v33  ;;  %v7015_v5 = vpop.eup %7014  ;;  %v11712_v38 = vld [vmem:[#allocation15_spill] sm:$0xff]  ;;  %v11714_v33 = vld [vmem:[#allocation37_spill] sm:$0xff] }
 0x830   : > { %3659 = vmatprep.subr.mxu1 %v3506_v17  ;;  %3725 = vmatprep.subr.mxu0 %v3542_v15  ;;  %v11709_v17 = vld [vmem:[#allocation110_spill] sm:$0xff]  ;;  %v11710_v15 = vld [vmem:[#allocation132_spill] sm:$0xff] }
 0x831   : > { %v3537_v32 = vmul.f32 %v7013_v11, %v11709_v17  ;;  %v3536_v39 = vmul.f32 %v7015_v5, %v11710_v15 }
 0x833   : > { %3660 = vmatpush1.xpose.msra.mxu1 %v3505_v14  ;;  %3726 = vmatpush1.xpose.msra.mxu0 %v3541_v18  ;;  %v3535_v18 = vmul.f32 %v7015_v5, %v11711_v12 }
 0x834   : > { %3661 = vmatprep.subr.mxu1 %v3504_v21  ;;  %3727 = vmatprep.subr.mxu0 %v3540_v1  ;;  %v1618_v21 = vadd.f32 %v11713_v6, %v11712_v38  ;;  %v11721_v6 = vld [vmem:[#allocation143_spill] sm:$0xff] }
 0x835   : > { %1504 = vperm.xlu1 %6691, %v1450_v59  }
 0x837   : > { %3662 = vmatpush1.xpose.msra.mxu1 %v3503_v57  ;;  %3728 = vmatpush1.xpose.msra.mxu0 %v3539_v24 }
 0x838   : > { %3729 = vmatprep.subr.mxu0 %v3538_v63 }
 0x83b   : > { %3730 = vmatpush1.xpose.msra.mxu0 %v3537_v32  ;;  %v3375_v14 = vpop.xlane.xlu0 %3374 }
 0x83c   : > { %3731 = vmatprep.subr.mxu0 %v3536_v39  ;;  %v11717_v39 = vld [vmem:[#allocation31_spill] sm:$0xff] }
 0x83f   : > { %3732 = vmatpush1.xpose.msra.mxu0 %v3535_v18  ;;  %v3378_v49 = vpop.xlane.xlu1 %3377  ;;  %v3435_v59 = vpop.xlane.xlu0 %3434  ;;  %v11719_v18 = vld [vmem:[#allocation32_spill] sm:$0xff] }
 0x843   : > { %v3381_v44 = vpop.xlane.xlu1 %3380  ;;  %v3438_v1 = vpop.xlane.xlu0 %3437 }
 0x844   : > { %4045 = vxpose.xlu0.b32.start.end [1/1] (short) %v1618_v21, 128  ;;  %7016 = vrcp.f32 %v3438_v1 }
 0x845   : > { %7018 = vrcp.f32 %v3435_v59 }
 0x846   : > { %7020 = vrcp.f32 %v3432_v50 }
 0x847   : > { %v3384_v47 = vpop.xlane.xlu1 %3383  ;;  %7022 = vrcp.f32 %v3429_v61 }
 0x84b   : > { %v3387_v11 = vpop.xlane.xlu1 %3386  ;;  %v1495_v57 = vpop.permute.xlu0 %1494 }
 0x84c   : > { %v9419_v24 = vadd.f32 %v11714_v33, %v1495_v57  ;;  %v9422_v63 = vadd.f32 %v11716_v22, %v1495_v57  ;;  %7024 = vrcp.f32 %v3387_v11  ;;  %v11723_v11 = vld [vmem:[#allocation18_spill] sm:$0xff]  ;;  %v11724_v33 = vld [vmem:[#allocation140_spill] sm:$0xff] }
 0x84e   : > { %11715 = vst [vmem:[#allocation82_spill] sm:$0xff] %v9419_v24  ;;  %3695 = vmatprep.mubr.f32.mxu1 %v9422_v63 }
 0x84f   : > { %v3390_v5 = vpop.xlane.xlu1 %3389  ;;  %3696 = vmatmul.mubr.f32.vlgmr.msra.gmra.mxu1 %v9419_v24 }
 0x850   : > { %7026 = vrcp.f32 %v3390_v5 }
 0x851   : > { %v7017_v17 = vpop.eup %7016  ;;  %7028 = vrcp.f32 %v3426_v28  ;;  %v11720_v28 = vld [vmem:[#allocation144_spill] sm:$0xff] }
 0x852   : > { %v3630_v50 = vmul.f32 %v7017_v17, %v9053_v45  ;;  %v7019_v15 = vpop.eup %7018  ;;  %7030 = vrcp.f32 %v3384_v47  ;;  %v3629_v61 = vmul.f32 %v7017_v17, %v9045_v60  ;;  %v11722_v47 = vld [vmem:[#allocation17_spill] sm:$0xff] }
 0x853   : > { %v1500_v32 = vpop.permute.xlu1 %1499  ;;  %7032 = vrcp.f32 %v9391_v30  ;;  %v3628_v38 = vmul.f32 %v7019_v15, %v11720_v28  ;;  %v7021_v45 = vpop.eup %7020  ;;  %v3627_v21 = vmul.f32 %v7019_v15, %v11721_v6  ;;  %v1624_v57 = vadd.f32 %v11723_v11, %v11722_v47  ;;  %v11725_v30 = vld [vmem:[#allocation139_spill] sm:$0xff]  ;;  %v11729_v28 = vld [vmem:[#allocation152_spill] sm:$0xff] }
 0x854   : > { %v9428_v12 = vadd.f32 %v11717_v39, %v1500_v32  ;;  %v9431_v59 = vadd.f32 %v11719_v18, %v1500_v32  ;;  %3841 = vmatprep.subr.mxu0 %v3630_v50  ;;  %7034 = vrcp.f32 %v3381_v44  ;;  %v7023_v1 = vpop.eup %7022  ;;  %v3626_v22 = vmul.f32 %v7021_v45, %v11724_v33  ;;  %v11726_v32 = vld [vmem:[#allocation154_spill] sm:$0xff]  ;;  %v11727_v50 = vld [vmem:[#allocation153_spill] sm:$0xff]  ;;  %v11731_v47 = vld [vmem:[#allocation135_spill] sm:$0xff] }
 0x855   : > { %7036 = vrcp.f32 %v3378_v49  ;;  %v3625_v17 = vmul.f32 %v7021_v45, %v11725_v30  ;;  %v11728_v18 = vld [vmem:[#allocation138_spill] sm:$0xff]  ;;  %v11730_v49 = vld [vmem:[#allocation136_spill] sm:$0xff]  ;;  %v11732_v11 = vld [vmem:[#allocation151_spill] sm:$0xff] }
 0x856   : > { %11718 = vst [vmem:[#allocation84_spill] sm:$0xff] %v9428_v12  ;;  %3765 = vmatprep.mubr.f32.mxu0 %v9431_v59  ;;  %v3624_v15 = vmul.f32 %v7023_v1, %v11728_v18  ;;  %7038 = vrcp.f32 %v3375_v14  ;;  %v11734_v14 = vld [vmem:[#allocation133_spill] sm:$0xff] }
 0x857   : > { %3766 = vmatmul.mubr.f32.vlgmr.msra.gmra.mxu0 %v9428_v12 }
 0x858   : > { %3842 = vmatpush1.xpose.msra.mxu0 %v3629_v61 }
 0x859   : > { %3843 = vmatprep.subr.mxu0 %v3628_v38  ;;  %v7025_v5 = vpop.eup %7024 }
 0x85a   : > { %v3596_v38 = vmul.f32 %v7025_v5, %v11729_v28 }
 0x85c   : > { %3844 = vmatpush1.xpose.msra.mxu0 %v3627_v21  ;;  %v3623_v21 = vmul.f32 %v7023_v1, %v11730_v49  ;;  %v11737_v1 = vld [vmem:[#allocation148_spill] sm:$0xff] }
 0x85d   : > { %v7027_v60 = vpop.eup %7026  ;;  %3845 = vmatprep.subr.mxu0 %v3626_v22  ;;  %v11733_v22 = vld [vmem:[#allocation150_spill] sm:$0xff] }
 0x85e   : > { %4286 = vxpose.xlu1.b32.start.end [1/1] (short) %v1624_v57, 128  ;;  %v3598_v44 = vmul.f32 %v7027_v60, %v11726_v32  ;;  %v3597_v39 = vmul.f32 %v7027_v60, %v11727_v50  ;;  %v7029_v61 = vpop.eup %7028  ;;  %v3595_v57 = vmul.f32 %v7025_v5, %v11732_v11  ;;  %v11735_v32 = vld [vmem:[#allocation109_spill] sm:$0xff]  ;;  %v11738_v5 = vld [vmem:[#allocation108_spill] sm:$0xff] }
 0x85f   : > { %v7031_v6 = vpop.eup %7030  ;;  %v3622_v45 = vmul.f32 %v7029_v61, %v11731_v47  ;;  %v11736_v50 = vld [vmem:[#allocation149_spill] sm:$0xff] }
 0x860   : > { %3846 = vmatpush1.xpose.msra.mxu0 %v3625_v17  ;;  %3771 = vmatprep.subr.mxu1 %v3598_v44  ;;  %v7033_v33 = vpop.eup %7032  ;;  %v3594_v60 = vmul.f32 %v7031_v6, %v11733_v22  ;;  %v3621_v17 = vmul.f32 %v7029_v61, %v11734_v14  ;;  %v11741_v61 = vld [vmem:[#allocation145_spill] sm:$0xff] }
 0x861   : > { %3847 = vmatprep.subr.mxu0 %v3624_v15  ;;  %3772 = vmatpush1.xpose.msra.mxu1 %v3597_v39  ;;  %v7035_v30 = vpop.eup %7034  ;;  %v3620_v44 = vmul.f32 %v7033_v33, %v11735_v32  ;;  %v3593_v39 = vmul.f32 %v7031_v6, %v11736_v50  ;;  %v3619_v28 = vmul.f32 %v7033_v33, %v11738_v5  ;;  %v11742_v6 = vld [vmem:[#allocation142_spill] sm:$0xff]  ;;  %v11743_v22 = vld [vmem:[#allocation141_spill] sm:$0xff] }
 0x862   : > { %3773 = vmatprep.subr.mxu1 %v3596_v38  ;;  %v3592_v18 = vmul.f32 %v7035_v30, %v11737_v1  ;;  %v7037_v15 = vpop.eup %7036  ;;  %v11739_v38 = vld [vmem:[#allocation147_spill] sm:$0xff] }
 0x863   : > { %v3591_v49 = vmul.f32 %v7035_v30, %v11739_v38  ;;  %v3589_v11 = vmul.f32 %v7037_v15, %v11741_v61  ;;  %v11745_v30 = vld [vmem:[#allocation20_spill] sm:$0xff] }
 0x864   : > { %3848 = vmatpush1.xpose.msra.mxu0 %v3623_v21  ;;  %v11740_v21 = vld [vmem:[#allocation146_spill] sm:$0xff] }
 0x865   : > { %3849 = vmatprep.subr.mxu0 %v3622_v45  ;;  %3774 = vmatpush1.xpose.msra.mxu1 %v3595_v57  ;;  %v3590_v47 = vmul.f32 %v7037_v15, %v11740_v21  ;;  %v7039_v45 = vpop.eup %7038 }
 0x866   : > { %3775 = vmatprep.subr.mxu1 %v3594_v60  ;;  %v3588_v57 = vmul.f32 %v7039_v45, %v11742_v6  ;;  %v3587_v60 = vmul.f32 %v7039_v45, %v11743_v22 }
 0x868   : > { %3850 = vmatpush1.xpose.msra.mxu0 %v3621_v17  ;;  %v11744_v17 = vld [vmem:[#allocation25_spill] sm:$0xff] }
 0x869   : > { %3851 = vmatprep.subr.mxu0 %v3620_v44  ;;  %3776 = vmatpush1.xpose.msra.mxu1 %v3593_v39  ;;  %v1636_v32 = vadd.f32 %v11745_v30, %v11744_v17 }
 0x86a   : > { %3777 = vmatprep.subr.mxu1 %v3592_v18 }
 0x86c   : > { %3852 = vmatpush1.xpose.msra.mxu0 %v3619_v28 }
 0x86d   : > { %3778 = vmatpush1.xpose.msra.mxu1 %v3591_v49 }
 0x86e   : > { %3779 = vmatprep.subr.mxu1 %v3590_v47 }
 0x871   : > { %3780 = vmatpush1.xpose.msra.mxu1 %v3589_v11 }
 0x872   : > { %3781 = vmatprep.subr.mxu1 %v3588_v57 }
 0x875   : > { %3782 = vmatpush1.xpose.msra.mxu1 %v3587_v60 }
 0x878   : > { %v3372_v14 = vpop.xlane.xlu0 %3371 }
 0x879   : > { %7040 = vrcp.f32 %v3372_v14  ;;  %v11746_v14 = vld [vmem:[#allocation26_spill] sm:$0xff] }
 0x87c   : > { %v3414_v33 = vpop.xlane.xlu0 %3413 }
 0x880   : > { %v3411_v44 = vpop.xlane.xlu0 %3410 }
 0x881   : > { %4768 = vxpose.xlu0.b32.start.end [1/1] (short) %v1636_v32, 128 }
 0x884   : > { %v3420_v50 = vpop.xlane.xlu1 %3419 }
 0x885   : > { %v3408_v39 = vpop.xlane.xlu0 %3407  ;;  %7042 = vrcp.f32 %v3420_v50 }
 0x886   : > { %v7041_v1 = vpop.eup %7040  ;;  %7044 = vrcp.f32 %v3414_v33  ;;  %v11747_v33 = vld [vmem:[#allocation19_spill] sm:$0xff] }
 0x887   : > { %v3586_v18 = vmul.f32 %v7041_v1, %v9175_v62  ;;  %v3585_v15 = vmul.f32 %v7041_v1, %v9173_v13  ;;  %v1630_v17 = vadd.f32 %v11747_v33, %v11746_v14  ;;  %v11749_v1 = vld [vmem:[#allocation75_spill] sm:$0xff] }
 0x888   : > { %v3417_v5 = vpop.xlane.xlu1 %3416 }
 0x889   : > { %v3405_v28 = vpop.xlane.xlu0 %3404  ;;  %7046 = vrcp.f32 %v3417_v5  ;;  %3783 = vmatprep.subr.mxu1 %v3586_v18  ;;  %v11750_v5 = vld [vmem:[#allocation80_spill] sm:$0xff] }
 0x88a   : > { %3784 = vmatpush1.xpose.msra.mxu1 %v3585_v15  ;;  %7048 = vrcp.f32 %v3411_v44 }
 0x88d   : > { %v3369_v38 = vpop.xlane.xlu1 %3368  ;;  %v3402_v49 = vpop.xlane.xlu0 %3401 }
 0x88e   : > { %7050 = vrcp.f32 %v3369_v38 }
 0x88f   : > { %7052 = vrcp.f32 %v3408_v39 }
 0x891   : > { %v3366_v21 = vpop.xlane.xlu1 %3365  ;;  %v3399_v47 = vpop.xlane.xlu0 %3398 }
 0x892   : > { %7054 = vrcp.f32 %v3366_v21  ;;  %v7043_v45 = vpop.eup %7042 }
 0x893   : > { %v3618_v61 = vmul.f32 %v7043_v45, %v9209_v2  ;;  %v3617_v62 = vmul.f32 %v7043_v45, %v9198_v52  ;;  %7056 = vrcp.f32 %v3405_v28  ;;  %v7045_v11 = vpop.eup %7044  ;;  %v11748_v52 = vld [vmem:[#allocation77_spill] sm:$0xff] }
 0x894   : > { %v3614_v32 = vmul.f32 %v7045_v11, %v11748_v52  ;;  %v3613_v18 = vmul.f32 %v7045_v11, %v11749_v1 }
 0x895   : > { %v3363_v13 = vpop.xlane.xlu1 %3362  ;;  %3853 = vmatprep.subr.mxu0 %v3618_v61  ;;  %v3396_v57 = vpop.xlane.xlu0 %3395 }
 0x896   : > { %7058 = vrcp.f32 %v3363_v13  ;;  %v7047_v6 = vpop.eup %7046  ;;  %3854 = vmatpush1.xpose.msra.mxu0 %v3617_v62  ;;  %v11752_v62 = vld [vmem:[#allocation36_spill] sm:$0xff] }
 0x897   : > { %v3616_v22 = vmul.f32 %v7047_v6, %v9240_v20  ;;  %v3615_v60 = vmul.f32 %v7047_v6, %v9233_v51  ;;  %7060 = vrcp.f32 %v3402_v49  ;;  %v7049_v2 = vpop.eup %7048 }
 0x898   : > { %v3612_v28 = vmul.f32 %v7049_v2, %v11750_v5 }
 0x899   : > { %v3360_v30 = vpop.xlane.xlu1 %3359  ;;  %3855 = vmatprep.subr.mxu0 %v3616_v22  ;;  %v3393_v51 = vpop.xlane.xlu0 %3392 }
 0x89a   : > { %7062 = vrcp.f32 %v3360_v30  ;;  %3856 = vmatpush1.xpose.msra.mxu0 %v3615_v60 }
 0x89b   : > { %v7051_v44 = vpop.eup %7050  ;;  %4527 = vxpose.xlu1.b32.start.end [1/1] (short) %v1630_v17, 128  ;;  %3857 = vmatprep.subr.mxu0 %v3614_v32  ;;  %7064 = vrcp.f32 %v3399_v47  ;;  %v11751_v47 = vld [vmem:[#allocation78_spill] sm:$0xff] }
 0x89c   : > { %v3584_v50 = vmul.f32 %v7051_v44, %v9248_v48  ;;  %v3583_v20 = vmul.f32 %v7051_v44, %v9229_v29  ;;  %v7053_v15 = vpop.eup %7052  ;;  %v3611_v45 = vmul.f32 %v7049_v2, %v11751_v47 }
 0x89d   : > { %v3357_v39 = vpop.xlane.xlu1 %3356  ;;  %v3610_v11 = vmul.f32 %v7053_v15, %v9219_v56  ;;  %v3609_v22 = vmul.f32 %v7053_v15, %v9213_v43 }
 0x89e   : > { %7066 = vrcp.f32 %v3357_v39  ;;  %3785 = vmatprep.subr.mxu1 %v3584_v50  ;;  %3858 = vmatpush1.xpose.msra.mxu0 %v3613_v18 }
 0x89f   : > { %v7055_v38 = vpop.eup %7054  ;;  %3786 = vmatpush1.xpose.msra.mxu1 %v3583_v20  ;;  %3859 = vmatprep.subr.mxu0 %v3612_v28  ;;  %7068 = vrcp.f32 %v3396_v57 }
 0x8a0   : > { %v3582_v49 = vmul.f32 %v7055_v38, %v9271_v3  ;;  %v3581_v48 = vmul.f32 %v7055_v38, %v9264_v31  ;;  %v7057_v61 = vpop.eup %7056 }
 0x8a1   : > { %v3354_v29 = vpop.xlane.xlu1 %3353  ;;  %v9478_v21 = vpop.permute.xlu0 %1509  ;;  %v3608_v14 = vmul.f32 %v7057_v61, %v9194_v41 }
 0x8a2   : > { %7070 = vrcp.f32 %v3354_v29  ;;  %v9483_v13 = vadd.f32 %v11752_v62, %v9478_v21  ;;  %3787 = vmatprep.subr.mxu1 %v3582_v49  ;;  %3860 = vmatpush1.xpose.msra.mxu0 %v3611_v45  ;;  %v11762_v49 = vld [vmem:[#allocation30_spill] sm:$0xff] }
 0x8a3   : > { %v7059_v6 = vpop.eup %7058  ;;  %3788 = vmatpush1.xpose.msra.mxu1 %v3581_v48  ;;  %3861 = vmatprep.subr.mxu0 %v3610_v11  ;;  %7072 = vrcp.f32 %v3393_v51  ;;  %v11754_v51 = vld [vmem:[#allocation34_spill] sm:$0xff]  ;;  %v11763_v48 = vmov 0.0   ;;  %v11764_v11 = vld [vmem:[#allocation29_spill] sm:$0xff] }
 0x8a4   : > { %11753 = vst [vmem:[#allocation86_spill] sm:$0xff] %v9483_v13  ;;  %3905 = vmatprep.mubr.f32.mxu0 %v9483_v13  ;;  %v3580_v31 = vmul.f32 %v7059_v6, %v9289_v26  ;;  %v3579_v3 = vmul.f32 %v7059_v6, %v9285_v37  ;;  %v7061_v60 = vpop.eup %7060  ;;  %v3607_v37 = vmul.f32 %v7057_v61, %v9181_v9 }
 0x8a5   : > { %v3351_v57 = vpop.xlane.xlu1 %3350  ;;  %v3606_v43 = vmul.f32 %v7061_v60, %v9177_v54 }
 0x8a6   : > { %7074 = vrcp.f32 %v3351_v57  ;;  %3789 = vmatprep.subr.mxu1 %v3580_v31  ;;  %3862 = vmatpush1.xpose.msra.mxu0 %v3609_v22 }
 0x8a7   : > { %v7063_v56 = vpop.eup %7062  ;;  %3790 = vmatpush1.xpose.msra.mxu1 %v3579_v3  ;;  %3863 = vmatprep.subr.mxu0 %v3608_v14 }
 0x8a8   : > { %v3578_v33 = vmul.f32 %v7063_v56, %v9307_v19  ;;  %v3577_v17 = vmul.f32 %v7063_v56, %v9303_v46  ;;  %v7065_v30 = vpop.eup %7064  ;;  %v3605_v19 = vmul.f32 %v7061_v60, %v9169_v0 }
 0x8a9   : > { %v3348_v26 = vpop.xlane.xlu1 %3347  ;;  %v3604_v9 = vmul.f32 %v7065_v30, %v9165_v35 }
 0x8aa   : > { %7076 = vrcp.f32 %v3348_v26  ;;  %3791 = vmatprep.subr.mxu1 %v3578_v33  ;;  %3864 = vmatpush1.xpose.msra.mxu0 %v3607_v37 }
 0x8ab   : > { %v7067_v2 = vpop.eup %7066  ;;  %3792 = vmatpush1.xpose.msra.mxu1 %v3577_v17  ;;  %3865 = vmatprep.subr.mxu0 %v3606_v43 }
 0x8ac   : > { %v3576_v41 = vmul.f32 %v7067_v2, %v9320_v36  ;;  %v3575_v52 = vmul.f32 %v7067_v2, %v9316_v58  ;;  %v7069_v46 = vpop.eup %7068  ;;  %v3603_v36 = vmul.f32 %v7065_v30, %v9163_v4 }
 0x8ad   : > { %v3345_v32 = vpop.xlane.xlu1 %3344  ;;  %v3602_v0 = vmul.f32 %v7069_v46, %v9159_v27 }
 0x8ae   : > { %7078 = vrcp.f32 %v3345_v32  ;;  %3793 = vmatprep.subr.mxu1 %v3576_v41  ;;  %3866 = vmatpush1.xpose.msra.mxu0 %v3605_v19 }
 0x8af   : > { %v7071_v44 = vpop.eup %7070  ;;  %3794 = vmatpush1.xpose.msra.mxu1 %v3575_v52  ;;  %3867 = vmatprep.subr.mxu0 %v3604_v9 }
 0x8b0   : > { %v3574_v54 = vmul.f32 %v7071_v44, %v9334_v8  ;;  %v3573_v50 = vmul.f32 %v7071_v44, %v9330_v55  ;;  %v7073_v58 = vpop.eup %7072  ;;  %v3601_v8 = vmul.f32 %v7069_v46, %v9153_v25 }
 0x8b1   : > { %v1505_v20 = vpop.permute.xlu1 %1504  ;;  %v3600_v4 = vmul.f32 %v7073_v58, %v9149_v10  ;;  %v3599_v5 = vmul.f32 %v7073_v58, %v9147_v23  ;;  %v11760_v23 = vld [vmem:[#allocation33_spill] sm:$0xff] }
 0x8b2   : > { %v9503_v39 = vadd.f32 %v11754_v51, %v1505_v20  ;;  %3795 = vmatprep.subr.mxu1 %v3574_v54  ;;  %3868 = vmatpush1.xpose.msra.mxu0 %v3603_v36 }
 0x8b3   : > { %v7075_v1 = vpop.eup %7074  ;;  %3796 = vmatpush1.xpose.msra.mxu1 %v3573_v50  ;;  %3869 = vmatprep.subr.mxu0 %v3602_v0  ;;  %v1694_v50 = vld [vmem:[%s11038_s5] sm:$0xff] }
 0x8b4   : > { %11755 = vst [vmem:[#allocation88_spill] sm:$0xff] %v9503_v39  ;;  %3835 = vmatprep.mubr.f32.mxu1 %v9503_v39  ;;  %v3572_v35 = vmul.f32 %v7075_v1, %v9347_v7  ;;  %v3571_v55 = vmul.f32 %v7075_v1, %v9342_v34  ;;  %v11756_v34 = vld [vmem:[#allocation35_spill] sm:$0xff] }
 0x8b5   : > { %v9516_v25 = vadd.f32 %v11756_v34, %v9478_v21  ;;  %v11758_v7 = vld [vmem:[#allocation23_spill] sm:$0xff] }
 0x8b6   : > { %3797 = vmatprep.subr.mxu1 %v3572_v35  ;;  %3870 = vmatpush1.xpose.msra.mxu0 %v3601_v8 }
 0x8b7   : > { %v7077_v18 = vpop.eup %7076  ;;  %3798 = vmatpush1.xpose.msra.mxu1 %v3571_v55  ;;  %3871 = vmatprep.subr.mxu0 %v3600_v4  ;;  %11757 = vst [vmem:[#allocation89_spill] sm:$0xff] %v9516_v25 }
 0x8b8   : > { %v3570_v27 = vmul.f32 %v7077_v18, %v9359_v53  ;;  %v3569_v15 = vmul.f32 %v7077_v18, %v9354_v16  ;;  %v11759_v16 = vld [vmem:[#allocation24_spill] sm:$0xff]  ;;  %v9524_v53 = vadd.f32 %v11760_v23, %v1505_v20 }
 0x8ba   : > { %3799 = vmatprep.subr.mxu1 %v3570_v27  ;;  %3872 = vmatpush1.xpose.msra.mxu0 %v3599_v5  ;;  %11761 = vst [vmem:[#allocation92_spill] sm:$0xff] %v9524_v53 }
 0x8bb   : > { %v7079_v28 = vpop.eup %7078  ;;  %3800 = vmatpush1.xpose.msra.mxu1 %v3569_v15  ;;  %4396 = vmatprep.subr.mxu0 %v11758_v7 }
 0x8bc   : > { %v3568_v10 = vmul.f32 %v7079_v28, %v9371_v40  ;;  %v3567_v38 = vmul.f32 %v7079_v28, %v9366_v42 }
 0x8bd   : > { %3906 = vmatmul.mubr.f32.vlgmr.msra.gmra.mxu0 %v9516_v25 }
 0x8be   : > { %3801 = vmatprep.subr.mxu1 %v3568_v10  ;;  %4397 = vmatpush1.msra.mxu0 %v11759_v16 }
 0x8bf   : > { %3802 = vmatpush1.xpose.msra.mxu1 %v3567_v38  ;;  %4878 = vmatprep.subr.mxu0 %v11762_v49 }
 0x8c0   : > { %4430 = vmatprep.mubr.f32.mxu0 %v11763_v48  ;;  %v9528_v29 = vpop.trf.xlu0 }
 0x8c2   : > { %3836 = vmatmul.mubr.f32.vlgmr.msra.gmra.mxu1 %v9524_v53 }
 0x8c3   : > { %6614 = vmatprep.mubr.msk.f32.mxu1 %vm1512_vm8, %v1694_v50 }
 0x8c4   : > { %v9531_v40 = vpop.trf.xlu0 }
 0x8c8   : > { %v9533_v42 = vpop.trf.xlu0 }
 0x8cc   : > { %v9535_v21 = vpop.trf.xlu0 }
 0x8d0   : > { %v9537_v47 = vpop.trf.xlu0 }
 0x8d4   : > { %v9539_v45 = vpop.trf.xlu0 }
 0x8d8   : > { %v9541_v61 = vpop.trf.xlu0 }
 0x8da   : > { %v4302_v62 = vpop.trf.xlu1 }
 0x8db   : > { %6527 = vmatmul.mubr.msk.f32.vlgmr.msra.gmra.mxu0 %vm1738_vm9, %v4302_v62 }
 0x8dc   : > { %4879 = vmatpush1.msra.mxu0 %v11764_v11  ;;  %4436 = vmatprep.mubr.f32.mxu0 %v11763_v48  ;;  %v9546_v6 = vpop.trf.xlu0 }
 0x8de   : > { %v4303_v31 = vpop.trf.xlu1 }
 0x8df   : > { %6528 = vmatmul.mubr.msk.f32.gmra.mxu0 %vm1738_vm9, %v4303_v31 }
 0x8e0   : > { %4442 = vmatprep.mubr.f32.mxu0 %v11763_v48  ;;  %v9550_v3 = vpop.trf.xlu0 }
 0x8e2   : > { %v4304_v57 = vpop.trf.xlu1 }
 0x8e3   : > { %6529 = vmatmul.mubr.msk.f32.gmra.mxu0 %vm1738_vm9, %v4304_v57  ;;  %v1695_v57 = vld [vmem:[%s11038_s5 + $0x8] sm:$0xff] }
 0x8e4   : > { %4448 = vmatprep.mubr.f32.mxu0 %v11763_v48  ;;  %v9554_v22 = vpop.trf.xlu0 }
 0x8e6   : > { %v4305_v60 = vpop.trf.xlu1 }
 0x8e7   : > { %6530 = vmatmul.mubr.msk.f32.gmra.mxu0 %vm1738_vm9, %v4305_v60  ;;  %v11765_v60 = vld [vmem:[#allocation21_spill] sm:$0xff] }
 0x8e8   : > { %4454 = vmatprep.mubr.f32.mxu0 %v11763_v48  ;;  %v9558_v14 = vpop.trf.xlu0 }
 0x8ea   : > { %v4306_v56 = vpop.trf.xlu1 }
 0x8eb   : > { %6531 = vmatmul.mubr.msk.f32.gmra.mxu0 %vm1738_vm9, %v4306_v56  ;;  %v11766_v56 = vld [vmem:[#allocation22_spill] sm:$0xff] }
 0x8ec   : > { %4460 = vmatprep.mubr.f32.mxu0 %v11763_v48  ;;  %v9562_v33 = vpop.trf.xlu0 }
 0x8ee   : > { %v4307_v17 = vpop.trf.xlu1 }
 0x8ef   : > { %6532 = vmatmul.mubr.msk.f32.gmra.mxu0 %vm1738_vm9, %v4307_v17  ;;  %v1697_v17 = vld [vmem:[%s11038_s5 + $0x18] sm:$0xff] }
 0x8f0   : > { %4466 = vmatprep.mubr.f32.mxu0 %v11763_v48  ;;  %v9566_v26 = vpop.trf.xlu0 }
 0x8f2   : > { %v4308_v37 = vpop.trf.xlu1 }
 0x8f3   : > { %6533 = vmatmul.mubr.msk.f32.gmra.mxu0 %vm1738_vm9, %v4308_v37  ;;  %v11767_v37 = vld [vmem:[#allocation28_spill] sm:$0xff] }
 0x8f4   : > { %4472 = vmatprep.mubr.f32.mxu0 %v11763_v48  ;;  %v9570_v30 = vpop.trf.xlu0 }
 0x8f6   : > { %v4309_v43 = vpop.trf.xlu1 }
 0x8f7   : > { %6534 = vmatmul.mubr.msk.f32.gmra.mxu0 %vm1738_vm9, %v4309_v43  ;;  %v11768_v43 = vld [vmem:[#allocation27_spill] sm:$0xff] }
 0x8f8   : > { %4478 = vmatprep.mubr.f32.mxu0 %v11763_v48  ;;  %v9574_v2 = vpop.trf.xlu0 }
 0x8fa   : > { %v4310_v41 = vpop.trf.xlu1 }
 0x8fb   : > { %6535 = vmatmul.mubr.msk.f32.gmra.mxu0 %vm1738_vm9, %v4310_v41 }
 0x8fc   : > { %4484 = vmatprep.mubr.f32.mxu0 %v11763_v48  ;;  %v9578_v52 = vpop.trf.xlu0 }
 0x8fe   : > { %v4311_v32 = vpop.trf.xlu1 }
 0x8ff   : > { %6536 = vmatmul.mubr.msk.f32.gmra.mxu0 %vm1738_vm9, %v4311_v32 }
 0x900   : > { %4490 = vmatprep.mubr.f32.mxu0 %v11763_v48  ;;  %v4784_v19 = vpop.trf.xlu0 }
 0x902   : > { %v4312_v46 = vpop.trf.xlu1 }
 0x903   : > { %6537 = vmatmul.mubr.msk.f32.gmra.mxu0 %vm1738_vm9, %v4312_v46 }
 0x904   : > { %4496 = vmatprep.mubr.f32.mxu0 %v11763_v48  ;;  %v4785_v9 = vpop.trf.xlu0 }
 0x906   : > { %v4313_v44 = vpop.trf.xlu1 }
 0x907   : > { %6538 = vmatmul.mubr.msk.f32.gmra.mxu0 %vm1738_vm9, %v4313_v44 }
 0x908   : > { %4502 = vmatprep.mubr.f32.mxu0 %v11763_v48  ;;  %v4786_v54 = vpop.trf.xlu0 }
 0x90a   : > { %v4314_v20 = vpop.trf.xlu1 }
 0x90b   : > { %6539 = vmatmul.mubr.msk.f32.gmra.mxu0 %vm1738_vm9, %v4314_v20 }
 0x90c   : > { %4508 = vmatprep.mubr.f32.mxu0 %v11763_v48  ;;  %v4787_v36 = vpop.trf.xlu0 }
 0x90e   : > { %v4315_v58 = vpop.trf.xlu1 }
 0x90f   : > { %6540 = vmatmul.mubr.msk.f32.gmra.mxu0 %vm1738_vm9, %v4315_v58  ;;  %v9593_v51 = vpop.f32.mrf.mxu1 }
 0x910   : > { %4514 = vmatprep.mubr.f32.mxu0 %v11763_v48  ;;  %v4788_v0 = vpop.trf.xlu0 }
 0x911   : > { %v3699_v35 = vpop.f32.mrf.mxu1 }
 0x912   : > { %v4316_v1 = vpop.trf.xlu1 }
 0x913   : > { %6541 = vmatmul.mubr.msk.f32.gmra.mxu0 %vm1738_vm9, %v4316_v1 }
 0x914   : > { %4520 = vmatprep.mubr.f32.mxu0 %v11763_v48  ;;  %v4789_v4 = vpop.trf.xlu0 }
 0x916   : > { %v4317_v55 = vpop.trf.xlu1 }
 0x917   : > { %6542 = vmatmul.mubr.msk.f32.gmra.mxu0 %vm1738_vm9, %v4317_v55  ;;  %v3767_v8 = vpop.f32.mrf.mxu0 }
 0x918   : > { %4912 = vmatprep.mubr.f32.mxu0 %v11763_v48  ;;  %v4790_v27 = vpop.trf.xlu0 }
 0x919   : > { %v3769_v18 = vpop.f32.mrf.mxu0 }
 0x91a   : > { %v4543_v44 = vpop.trf.xlu1 }
 0x91b   : > { %6559 = vmatmul.mubr.msk.f32.vlgmr.msra.gmra.mxu0 %vm1738_vm9, %v4784_v19 }
 0x91c   : > { %4918 = vmatprep.mubr.f32.mxu0 %v11763_v48  ;;  %v4791_v15 = vpop.trf.xlu0 }
 0x91e   : > { %v4544_v20 = vpop.trf.xlu1 }
 0x91f   : > { %6560 = vmatmul.mubr.msk.f32.gmra.mxu0 %vm1738_vm9, %v4785_v9 }
 0x920   : > { %4924 = vmatprep.mubr.f32.mxu0 %v11763_v48  ;;  %v4792_v5 = vpop.trf.xlu0 }
 0x923   : > { %6561 = vmatmul.mubr.msk.f32.gmra.mxu0 %vm1738_vm9, %v4786_v54 }
 0x924   : > { %4930 = vmatprep.mubr.f32.mxu0 %v11763_v48  ;;  %v4793_v28 = vpop.trf.xlu0 }
 0x927   : > { %6562 = vmatmul.mubr.msk.f32.gmra.mxu0 %vm1738_vm9, %v4787_v36 }
 0x928   : > { %4936 = vmatprep.mubr.f32.mxu0 %v11763_v48  ;;  %v4794_v34 = vpop.trf.xlu0 }
 0x92b   : > { %6563 = vmatmul.mubr.msk.f32.gmra.mxu0 %vm1738_vm9, %v4788_v0 }
 0x92c   : > { %4942 = vmatprep.mubr.f32.mxu0 %v11763_v48  ;;  %v4795_v7 = vpop.trf.xlu0 }
 0x92f   : > { %6564 = vmatmul.mubr.msk.f32.gmra.mxu0 %vm1738_vm9, %v4789_v4 }
 0x930   : > { %4948 = vmatprep.mubr.f32.mxu0 %v11763_v48  ;;  %v4796_v10 = vpop.trf.xlu0 }
 0x933   : > { %6565 = vmatmul.mubr.msk.f32.gmra.mxu0 %vm1738_vm9, %v4790_v27 }
 0x934   : > { %4954 = vmatprep.mubr.f32.mxu0 %v11763_v48  ;;  %v4797_v38 = vpop.trf.xlu0 }
 0x937   : > { %6566 = vmatmul.mubr.msk.f32.gmra.mxu0 %vm1738_vm9, %v4791_v15 }
 0x938   : > { %4960 = vmatprep.mubr.f32.mxu0 %v11763_v48  ;;  %v4798_v16 = vpop.trf.xlu0 }
 0x93b   : > { %6567 = vmatmul.mubr.msk.f32.gmra.mxu0 %vm1738_vm9, %v4792_v5 }
 0x93c   : > { %4966 = vmatprep.mubr.f32.mxu0 %v11763_v48  ;;  %v4799_v23 = vpop.trf.xlu0 }
 0x93f   : > { %6568 = vmatmul.mubr.msk.f32.gmra.mxu0 %vm1738_vm9, %v4793_v28 }
 0x940   : > { %4972 = vmatprep.mubr.f32.mxu0 %v11763_v48 }
 0x943   : > { %6569 = vmatmul.mubr.msk.f32.gmra.mxu0 %vm1738_vm9, %v4794_v34 }
 0x944   : > { %4978 = vmatprep.mubr.f32.mxu0 %v11763_v48 }
 0x947   : > { %6570 = vmatmul.mubr.msk.f32.gmra.mxu0 %vm1738_vm9, %v4795_v7 }
 0x948   : > { %4984 = vmatprep.mubr.f32.mxu0 %v11763_v48 }
 0x94b   : > { %6571 = vmatmul.mubr.msk.f32.gmra.mxu0 %vm1738_vm9, %v4796_v10 }
 0x94c   : > { %4990 = vmatprep.mubr.f32.mxu0 %v11763_v48 }
 0x94f   : > { %6572 = vmatmul.mubr.msk.f32.gmra.mxu0 %vm1738_vm9, %v4797_v38 }
 0x950   : > { %4996 = vmatprep.mubr.f32.mxu0 %v11763_v48 }
 0x953   : > { %6573 = vmatmul.mubr.msk.f32.gmra.mxu0 %vm1738_vm9, %v4798_v16 }
 0x954   : > { %5002 = vmatprep.mubr.f32.mxu0 %v11763_v48 }
 0x957   : > { %6574 = vmatmul.mubr.msk.f32.gmra.mxu0 %vm1738_vm9, %v4799_v23 }
 0x958   : > { %6103 = vmatprep.mubr.f32.mxu0 %v9431_v59  ;;  %v1696_v59 = vld [vmem:[%s11038_s5 + $0x10] sm:$0xff] }
 0x97d   : > { %v3907_v49 = vpop.f32.mrf.mxu0 }
 0x97e   : > { %6606 = vmatprep.subr.mxu1 %v3907_v49 }
 0x97f   : > { %v3909_v62 = vpop.f32.mrf.mxu0  ;;  %6607 = vmatpush3.msra.mxu1 %v3907_v49 }
 0x982   : > { %v3837_v11 = vpop.f32.mrf.mxu1 }
 0x983   : > { %6608 = vmatprep.subr.mxu1 %v3837_v11 }
 0x984   : > { %v3839_v31 = vpop.f32.mrf.mxu1  ;;  %6609 = vmatpush3.msra.mxu1 %v3837_v11 }
 0x985   : > { %6610 = vmatprep.subr.mxu1 %v3767_v8 }
 0x986   : > { %6611 = vmatpush3.msra.mxu1 %v3767_v8 }
 0x987   : > { %6612 = vmatprep.subr.mxu1 %v9593_v51 }
 0x988   : > { %6613 = vmatpush3.msra.mxu1 %v9593_v51  ;;  %v4545_v51 = vpop.trf.xlu1 }
 0x989   : > { %6615 = vmatmul.mubr.msk.f32.vlgmr.msra.gmra.mxu1 %vm1512_vm8, %v1695_v57  ;;  %4155 = vmatprep.subr.mxu1 %v11765_v60 }
 0x98a   : > { %4156 = vmatpush1.msra.mxu1 %v11766_v56  ;;  %6617 = vmatprep.mubr.msk.f32.mxu1 %vm1512_vm8, %v1696_v59 }
 0x98b   : > { %4637 = vmatprep.subr.mxu1 %v11767_v37 }
 0x98d   : > { %6618 = vmatmul.mubr.msk.f32.gmra.mxu1 %vm1512_vm8, %v1697_v17 }
 0x98e   : > { %4189 = vmatprep.mubr.f32.mxu1 %v11763_v48 }
 0x991   : > { %6511 = vmatmul.mubr.msk.f32.vlgmr.msra.gmra.mxu1 %vm1738_vm9, %v9528_v29 }
 0x992   : > { %4638 = vmatpush1.msra.mxu1 %v11768_v43  ;;  %4195 = vmatprep.mubr.f32.mxu1 %v11763_v48 }
 0x995   : > { %6512 = vmatmul.mubr.msk.f32.gmra.mxu1 %vm1738_vm9, %v9531_v40 }
 0x996   : > { %4201 = vmatprep.mubr.f32.mxu1 %v11763_v48 }
 0x999   : > { %6513 = vmatmul.mubr.msk.f32.gmra.mxu1 %vm1738_vm9, %v9533_v42 }
 0x99a   : > { %4207 = vmatprep.mubr.f32.mxu1 %v11763_v48 }
 0x99b   : > { %v9660_v41 = vpop.f32.mrf.mxu0 }
 0x99c   : > { %11769 = vst [vmem:[#allocation104_spill] sm:$0xff] %v9660_v41 }
 0x99d   : > { %6514 = vmatmul.mubr.msk.f32.gmra.mxu1 %vm1738_vm9, %v9535_v21  ;;  %v9664_v29 = vpop.f32.mrf.mxu0 }
 0x99e   : > { %11770 = vst [vmem:[#allocation97_spill] sm:$0xff] %v9664_v29  ;;  %4213 = vmatprep.mubr.f32.mxu1 %v11763_v48 }
 0x99f   : > { %v9667_v32 = vpop.f32.mrf.mxu0 }
 0x9a0   : > { %11771 = vst [vmem:[#allocation100_spill] sm:$0xff] %v9667_v32 }
 0x9a1   : > { %6515 = vmatmul.mubr.msk.f32.gmra.mxu1 %vm1738_vm9, %v9537_v47  ;;  %v9671_v40 = vpop.f32.mrf.mxu0 }
 0x9a2   : > { %11772 = vst [vmem:[#allocation106_spill] sm:$0xff] %v9671_v40  ;;  %4219 = vmatprep.mubr.f32.mxu1 %v11763_v48 }
 0x9a3   : > { %v9674_v42 = vpop.f32.mrf.mxu0 }
 0x9a4   : > { %11773 = vst [vmem:[#allocation94_spill] sm:$0xff] %v9674_v42 }
 0x9a5   : > { %6516 = vmatmul.mubr.msk.f32.gmra.mxu1 %vm1738_vm9, %v9539_v45  ;;  %v9678_v19 = vpop.f32.mrf.mxu0 }
 0x9a6   : > { %11774 = vst [vmem:[#allocation95_spill] sm:$0xff] %v9678_v19  ;;  %4225 = vmatprep.mubr.f32.mxu1 %v11763_v48 }
 0x9a7   : > { %v9681_v21 = vpop.f32.mrf.mxu0 }
 0x9a8   : > { %11775 = vst [vmem:[#allocation105_spill] sm:$0xff] %v9681_v21 }
 0x9a9   : > { %6517 = vmatmul.mubr.msk.f32.gmra.mxu1 %vm1738_vm9, %v9541_v61  ;;  %v9685_v46 = vpop.f32.mrf.mxu0 }
 0x9aa   : > { %11776 = vst [vmem:[#allocation107_spill] sm:$0xff] %v9685_v46  ;;  %4231 = vmatprep.mubr.f32.mxu1 %v11763_v48 }
 0x9ab   : > { %v9688_v47 = vpop.f32.mrf.mxu0 }
 0x9ac   : > { %11777 = vst [vmem:[#allocation102_spill] sm:$0xff] %v9688_v47 }
 0x9ad   : > { %6518 = vmatmul.mubr.msk.f32.gmra.mxu1 %vm1738_vm9, %v9546_v6  ;;  %v9692_v9 = vpop.f32.mrf.mxu0 }
 0x9ae   : > { %11778 = vst [vmem:[#allocation103_spill] sm:$0xff] %v9692_v9  ;;  %4237 = vmatprep.mubr.f32.mxu1 %v11763_v48  ;;  %v5069_v37 = vmax.f32 %v9688_v47, %v9692_v9 }
 0x9af   : > { %v9695_v45 = vpop.f32.mrf.mxu0 }
 0x9b0   : > { %11779 = vst [vmem:[#allocation98_spill] sm:$0xff] %v9695_v45 }
 0x9b1   : > { %6519 = vmatmul.mubr.msk.f32.gmra.mxu1 %vm1738_vm9, %v9550_v3  ;;  %v9699_v61 = vpop.f32.mrf.mxu0 }
 0x9b2   : > { %11780 = vst [vmem:[#allocation101_spill] sm:$0xff] %v9699_v61  ;;  %4243 = vmatprep.mubr.f32.mxu1 %v11763_v48  ;;  %v5072_v60 = vmax.f32 %v9695_v45, %v9699_v61 }
 0x9b3   : > { %v9702_v54 = vpop.f32.mrf.mxu0 }
 0x9b4   : > { %11781 = vst [vmem:[#allocation93_spill] sm:$0xff] %v9702_v54 }
 0x9b5   : > { %6520 = vmatmul.mubr.msk.f32.gmra.mxu1 %vm1738_vm9, %v9554_v22  ;;  %v9706_v6 = vpop.f32.mrf.mxu0 }
 0x9b6   : > { %11782 = vst [vmem:[#allocation96_spill] sm:$0xff] %v9706_v6  ;;  %v5075_v50 = vmax.f32 %v9702_v54, %v9706_v6  ;;  %4249 = vmatprep.mubr.f32.mxu1 %v11763_v48 }
 0x9b7   : > { %v9711_v36 = vpop.f32.mrf.mxu0 }
 0x9b8   : > { %11783 = vst [vmem:[#allocation87_spill] sm:$0xff] %v9711_v36  ;;  %5076 = vmax.xlane.f32.xlu0 %v5075_v50 }
 0x9b9   : > { %6521 = vmatmul.mubr.msk.f32.gmra.mxu1 %vm1738_vm9, %v9558_v14  ;;  %v9715_v3 = vpop.f32.mrf.mxu0 }
 0x9ba   : > { %11784 = vst [vmem:[#allocation90_spill] sm:$0xff] %v9715_v3  ;;  %v5078_v58 = vmax.f32 %v9711_v36, %v9715_v3  ;;  %4255 = vmatprep.mubr.f32.mxu1 %v11763_v48 }
 0x9bb   : > { %v9720_v22 = vpop.f32.mrf.mxu0 }
 0x9bc   : > { %11785 = vst [vmem:[#allocation83_spill] sm:$0xff] %v9720_v22  ;;  %5079 = vmax.xlane.f32.xlu0 %v5078_v58 }
 0x9bd   : > { %6522 = vmatmul.mubr.msk.f32.gmra.mxu1 %vm1738_vm9, %v9562_v33  ;;  %v9724_v0 = vpop.f32.mrf.mxu0  ;;  %v4546_v33 = vpop.trf.xlu1 }
 0x9be   : > { %11786 = vst [vmem:[#allocation85_spill] sm:$0xff] %v9724_v0  ;;  %v5081_v1 = vmax.f32 %v9720_v22, %v9724_v0  ;;  %4261 = vmatprep.mubr.f32.mxu1 %v11763_v48 }
 0x9bf   : > { %v9729_v14 = vpop.f32.mrf.mxu0 }
 0x9c0   : > { %11787 = vst [vmem:[#allocation79_spill] sm:$0xff] %v9729_v14  ;;  %5082 = vmax.xlane.f32.xlu0 %v5081_v1 }
 0x9c1   : > { %6523 = vmatmul.mubr.msk.f32.gmra.mxu1 %vm1738_vm9, %v9566_v26  ;;  %v9733_v35 = vpop.f32.mrf.mxu0  ;;  %v4547_v27 = vpop.trf.xlu1 }
 0x9c2   : > { %11788 = vst [vmem:[#allocation81_spill] sm:$0xff] %v9733_v35  ;;  %v5084_v55 = vmax.f32 %v9729_v14, %v9733_v35  ;;  %4267 = vmatprep.mubr.f32.mxu1 %v11763_v48 }
 0x9c3   : > { %v9738_v8 = vpop.f32.mrf.mxu0 }
 0x9c4   : > { %5085 = vmax.xlane.f32.xlu0 %v5084_v55  ;;  %v5063_v55 = vmax.f32 %v9674_v42, %v9678_v19 }
 0x9c5   : > { %6524 = vmatmul.mubr.msk.f32.gmra.mxu1 %vm1738_vm9, %v9570_v30  ;;  %v9742_v4 = vpop.f32.mrf.mxu0 }
 0x9c6   : > { %v5087_v18 = vmax.f32 %v9738_v8, %v9742_v4  ;;  %4273 = vmatprep.mubr.f32.mxu1 %v11763_v48 }
 0x9c7   : > { %v9747_v26 = vpop.f32.mrf.mxu0 }
 0x9c8   : > { %5088 = vmax.xlane.f32.xlu0 %v5087_v18 }
 0x9c9   : > { %6525 = vmatmul.mubr.msk.f32.gmra.mxu1 %vm1738_vm9, %v9574_v2  ;;  %v9751_v15 = vpop.f32.mrf.mxu0  ;;  %v4548_v2 = vpop.trf.xlu1 }
 0x9ca   : > { %v5090_v5 = vmax.f32 %v9747_v26, %v9751_v15  ;;  %4279 = vmatprep.mubr.f32.mxu1 %v11763_v48 }
 0x9cb   : > { %v9756_v30 = vpop.f32.mrf.mxu0 }
 0x9cc   : > { %5091 = vmax.xlane.f32.xlu0 %v5090_v5 }
 0x9cd   : > { %6526 = vmatmul.mubr.msk.f32.gmra.mxu1 %vm1738_vm9, %v9578_v52  ;;  %v9760_v28 = vpop.f32.mrf.mxu0  ;;  %v4549_v16 = vpop.trf.xlu1 }
 0x9ce   : > { %v5093_v34 = vmax.f32 %v9756_v30, %v9760_v28  ;;  %4671 = vmatprep.mubr.f32.mxu1 %v11763_v48 }
 0x9cf   : > { %v9765_v7 = vpop.f32.mrf.mxu0 }
 0x9d0   : > { %5094 = vmax.xlane.f32.xlu0 %v5093_v34 }
 0x9d1   : > { %v9767_v10 = vpop.f32.mrf.mxu0  ;;  %6543 = vmatmul.mubr.msk.f32.vlgmr.msra.gmra.mxu1 %vm1738_vm9, %v4543_v44  ;;  %v4550_v57 = vpop.trf.xlu1 }
 0x9d2   : > { %v5096_v38 = vmax.f32 %v9765_v7, %v9767_v10  ;;  %4677 = vmatprep.mubr.f32.mxu1 %v11763_v48 }
 0x9d3   : > { %v9773_v52 = vpop.f32.mrf.mxu0 }
 0x9d4   : > { %5097 = vmax.xlane.f32.xlu0 %v5096_v38  ;;  %v5057_v38 = vmax.f32 %v9660_v41, %v9664_v29 }
 0x9d5   : > { %v9775_v23 = vpop.f32.mrf.mxu0  ;;  %6544 = vmatmul.mubr.msk.f32.gmra.mxu1 %vm1738_vm9, %v4544_v20  ;;  %v4551_v43 = vpop.trf.xlu1  ;;  %v5066_v20 = vmax.f32 %v9681_v21, %v9685_v46 }
 0x9d6   : > { %v5099_v49 = vmax.f32 %v9773_v52, %v9775_v23  ;;  %4683 = vmatprep.mubr.f32.mxu1 %v11763_v48 }
 0x9d7   : > { %v9781_v62 = vpop.f32.mrf.mxu0 }
 0x9d8   : > { %5100 = vmax.xlane.f32.xlu0 %v5099_v49 }
 0x9d9   : > { %v9783_v11 = vpop.f32.mrf.mxu0  ;;  %6545 = vmatmul.mubr.msk.f32.gmra.mxu1 %vm1738_vm9, %v4545_v51  ;;  %v4552_v51 = vpop.trf.xlu1 }
 0x9da   : > { %v5102_v31 = vmax.f32 %v9781_v62, %v9783_v11  ;;  %4689 = vmatprep.mubr.f32.mxu1 %v11763_v48 }
 0x9db   : > { %v9789_v59 = vpop.f32.mrf.mxu0 }
 0x9dc   : > { %11789 = vst [vmem:[#allocation65_spill] sm:$0xff] %v9789_v59  ;;  %5103 = vmax.xlane.f32.xlu0 %v5102_v31 }
 0x9dd   : > { %6546 = vmatmul.mubr.msk.f32.gmra.mxu1 %vm1738_vm9, %v4546_v33  ;;  %v9794_v56 = vpop.f32.mrf.mxu0  ;;  %v4553_v5 = vpop.trf.xlu1 }
 0x9de   : > { %11790 = vst [vmem:[#allocation130_spill] sm:$0xff] %v9794_v56  ;;  %4695 = vmatprep.mubr.f32.mxu1 %v11763_v48 }
 0x9df   : > { %v9797_v17 = vpop.f32.mrf.mxu0 }
 0x9e0   : > { %11791 = vst [vmem:[#allocation71_spill] sm:$0xff] %v9797_v17  ;;  %5073 = vmax.xlane.f32.xlu0 %v5072_v60 }
 0x9e1   : > { %6547 = vmatmul.mubr.msk.f32.gmra.mxu1 %vm1738_vm9, %v4547_v27  ;;  %v9802_v44 = vpop.f32.mrf.mxu0  ;;  %v5060_v27 = vmax.f32 %v9667_v32, %v9671_v40  ;;  %v4554_v49 = vpop.trf.xlu1 }
 0x9e2   : > { %11792 = vst [vmem:[#allocation74_spill] sm:$0xff] %v9802_v44  ;;  %4701 = vmatprep.mubr.f32.mxu1 %v11763_v48 }
 0x9e3   : > { %v9805_v50 = vpop.f32.mrf.mxu0 }
 0x9e4   : > { %5070 = vmax.xlane.f32.xlu0 %v5069_v37 }
 0x9e5   : > { %6548 = vmatmul.mubr.msk.f32.gmra.mxu1 %vm1738_vm9, %v4548_v2  ;;  %v9810_v58 = vpop.f32.mrf.mxu0  ;;  %v4555_v37 = vpop.trf.xlu1 }
 0x9e6   : > { %11793 = vst [vmem:[#allocation76_spill] sm:$0xff] %v9810_v58  ;;  %4707 = vmatprep.mubr.f32.mxu1 %v11763_v48 }
 0x9e7   : > { %v9813_v1 = vpop.f32.mrf.mxu0 }
 0x9e8   : > { %5067 = vmax.xlane.f32.xlu0 %v5066_v20 }
 0x9e9   : > { %6549 = vmatmul.mubr.msk.f32.gmra.mxu1 %vm1738_vm9, %v4549_v16  ;;  %v9818_v33 = vpop.f32.mrf.mxu0 }
 0x9ea   : > { %11794 = vst [vmem:[#allocation63_spill] sm:$0xff] %v9818_v33  ;;  %4713 = vmatprep.mubr.f32.mxu1 %v11763_v48 }
 0x9eb   : > { %v9821_v18 = vpop.f32.mrf.mxu0 }
 0x9ec   : > { %11795 = vst [vmem:[#allocation42_spill] sm:$0xff] %v9821_v18  ;;  %5064 = vmax.xlane.f32.xlu0 %v5063_v55 }
 0x9ed   : > { %6550 = vmatmul.mubr.msk.f32.gmra.mxu1 %vm1738_vm9, %v4550_v57  ;;  %v9826_v34 = vpop.f32.mrf.mxu0 }
 0x9ee   : > { %11796 = vst [vmem:[#allocation61_spill] sm:$0xff] %v9826_v34  ;;  %4719 = vmatprep.mubr.f32.mxu1 %v11763_v48 }
 0x9ef   : > { %v9829_v2 = vpop.f32.mrf.mxu0 }
 0x9f0   : > { %5061 = vmax.xlane.f32.xlu0 %v5060_v27 }
 0x9f1   : > { %6551 = vmatmul.mubr.msk.f32.gmra.mxu1 %vm1738_vm9, %v4551_v43  ;;  %v9834_v16 = vpop.f32.mrf.mxu0 }
 0x9f2   : > { %11797 = vst [vmem:[#allocation41_spill] sm:$0xff] %v9834_v16  ;;  %4725 = vmatprep.mubr.f32.mxu1 %v11763_v48 }
 0x9f3   : > { %v9837_v31 = vpop.f32.mrf.mxu0 }
 0x9f4   : > { %5058 = vmax.xlane.f32.xlu0 %v5057_v38 }
 0x9f5   : > { %6552 = vmatmul.mubr.msk.f32.gmra.mxu1 %vm1738_vm9, %v4552_v51  ;;  %v9840_v57 = vpop.f32.mrf.mxu0  ;;  %v4556_v51 = vpop.trf.xlu1 }
 0x9f6   : > { %11798 = vst [vmem:[#allocation70_spill] sm:$0xff] %v9840_v57  ;;  %4731 = vmatprep.mubr.f32.mxu1 %v11763_v48 }
 0x9f7   : > { %v9843_v60 = vpop.f32.mrf.mxu0 }
 0x9f8   : > { %11799 = vst [vmem:[#allocation72_spill] sm:$0xff] %v9843_v60 }
 0x9f9   : > { %6553 = vmatmul.mubr.msk.f32.gmra.mxu1 %vm1738_vm9, %v4553_v5  ;;  %v9846_v43 = vpop.f32.mrf.mxu0  ;;  %v4557_v25 = vpop.trf.xlu1 }
 0x9fa   : > { %11800 = vst [vmem:[#allocation73_spill] sm:$0xff] %v9846_v43  ;;  %4737 = vmatprep.mubr.f32.mxu1 %v11763_v48 }
 0x9fb   : > { %v9849_v20 = vpop.f32.mrf.mxu0 }
 0x9fc   : > { %11801 = vst [vmem:[#allocation59_spill] sm:$0xff] %v9849_v20 }
 0x9fd   : > { %6554 = vmatmul.mubr.msk.f32.gmra.mxu1 %vm1738_vm9, %v4554_v49  ;;  %v9852_v55 = vpop.f32.mrf.mxu0 }
 0x9fe   : > { %11802 = vst [vmem:[#allocation99_spill] sm:$0xff] %v9852_v55  ;;  %4743 = vmatprep.mubr.f32.mxu1 %v11763_v48 }
 0x9ff   : > { %v9855_v27 = vpop.f32.mrf.mxu0 }
 0xa00   : > { %11803 = vst [vmem:[#allocation57_spill] sm:$0xff] %v9855_v27 }
 0xa01   : > { %6555 = vmatmul.mubr.msk.f32.gmra.mxu1 %vm1738_vm9, %v4555_v37  ;;  %v9858_v38 = vpop.f32.mrf.mxu0  ;;  %v4558_v37 = vpop.trf.xlu1 }
 0xa02   : > { %11804 = vst [vmem:[#allocation69_spill] sm:$0xff] %v9858_v38  ;;  %4749 = vmatprep.mubr.f32.mxu1 %v11763_v48 }
 0xa03   : > { %v9861_v5 = vpop.f32.mrf.mxu0 }
 0xa04   : > { %11805 = vst [vmem:[#allocation55_spill] sm:$0xff] %v9861_v5 }
 0xa05   : > { %6556 = vmatmul.mubr.msk.f32.gmra.mxu1 %vm1738_vm9, %v4556_v51  ;;  %v9864_v53 = vpop.f32.mrf.mxu0 }
 0xa06   : > { %11806 = vst [vmem:[#allocation67_spill] sm:$0xff] %v9864_v53  ;;  %4755 = vmatprep.mubr.f32.mxu1 %v11763_v48  ;;  %v5183_v42 = vmax.f32 %v9861_v5, %v9864_v53 }
 0xa07   : > { %v9867_v49 = vpop.f32.mrf.mxu0 }
 0xa08   : > { %11807 = vst [vmem:[#allocation38_spill] sm:$0xff] %v9867_v49 }
 0xa09   : > { %6557 = vmatmul.mubr.msk.f32.gmra.mxu1 %vm1738_vm9, %v4557_v25  ;;  %v9870_v13 = vpop.f32.mrf.mxu0 }
 0xa0a   : > { %11808 = vst [vmem:[#allocation68_spill] sm:$0xff] %v9870_v13  ;;  %4761 = vmatprep.mubr.f32.mxu1 %v11763_v48  ;;  %v5186_v19 = vmax.f32 %v9867_v49, %v9870_v13 }
 0xa0b   : > { %v9873_v39 = vpop.f32.mrf.mxu0 }
 0xa0c   : > { %11809 = vst [vmem:[#allocation91_spill] sm:$0xff] %v9873_v39 }
 0xa0d   : > { %6558 = vmatmul.mubr.msk.f32.gmra.mxu1 %vm1738_vm9, %v4558_v37  ;;  %v9876_v12 = vpop.f32.mrf.mxu0 }
 0xa0e   : > { %11810 = vst [vmem:[#allocation66_spill] sm:$0xff] %v9876_v12  ;;  %6033 = vmatprep.mubr.f32.mxu1 %v9422_v63  ;;  %v5189_v32 = vmax.f32 %v9873_v39, %v9876_v12 }
 0xa0f   : > { %v9879_v51 = vpop.f32.mrf.mxu0 }
 0xa10   : > { %11811 = vst [vmem:[#allocation44_spill] sm:$0xff] %v9879_v51 }
 0xa11   : > { %v9881_v24 = vpop.f32.mrf.mxu0 }
 0xa12   : > { %11812 = vst [vmem:[#allocation64_spill] sm:$0xff] %v9881_v24  ;;  %v5192_v63 = vmax.f32 %v9879_v51, %v9881_v24 }
 0xa13   : > { %v9883_v29 = vpop.f32.mrf.mxu0 }
 0xa14   : > { %11813 = vst [vmem:[#allocation43_spill] sm:$0xff] %v9883_v29 }
 0xa15   : > { %v9885_v25 = vpop.f32.mrf.mxu0 }
 0xa16   : > { %11814 = vst [vmem:[#allocation62_spill] sm:$0xff] %v9885_v25  ;;  %v5195_v37 = vmax.f32 %v9883_v29, %v9885_v25  ;;  %v5180_v25 = vmax.f32 %v9855_v27, %v9858_v38 }
 0xa17   : > { %v9887_v41 = vpop.f32.mrf.mxu0 }
 0xa18   : > { %11815 = vst [vmem:[#allocation121_spill] sm:$0xff] %v9887_v41 }
 0xa19   : > { %v9889_v40 = vpop.f32.mrf.mxu0 }
 0xa1a   : > { %11816 = vst [vmem:[#allocation60_spill] sm:$0xff] %v9889_v40  ;;  %v5198_v48 = vmax.f32 %v9887_v41, %v9889_v40 }
 0xa1c   : > { %5199 = vmax.xlane.f32.xlu0 %v5198_v48 }
 0xa20   : > { %5196 = vmax.xlane.f32.xlu0 %v5195_v37 }
 0xa24   : > { %5193 = vmax.xlane.f32.xlu0 %v5192_v63 }
 0xa28   : > { %5190 = vmax.xlane.f32.xlu0 %v5189_v32 }
 0xa2c   : > { %5187 = vmax.xlane.f32.xlu0 %v5186_v19 }
 0xa30   : > { %5184 = vmax.xlane.f32.xlu0 %v5183_v42 }
 0xa34   : > { %5181 = vmax.xlane.f32.xlu0 %v5180_v25 }
 0xa41   : > { %v9905_v48 = vpop.xlane.xlu0 %5076 }
 0xa42   : > { %11817 = vst [vmem:[#allocation120_spill] sm:$0xff] %v9905_v48 }
 0xa45   : > { %v9907_v37 = vpop.xlane.xlu0 %5079 }
 0xa46   : > { %11818 = vst [vmem:[#allocation58_spill] sm:$0xff] %v9907_v37 }
 0xa49   : > { %v9909_v24 = vpop.f32.mrf.mxu1  ;;  %v9911_v63 = vpop.xlane.xlu0 %5082 }
 0xa4a   : > { %11819 = vst [vmem:[#allocation127_spill] sm:$0xff] %v9909_v24  ;;  %11820 = vst [vmem:[#allocation54_spill] sm:$0xff] %v9911_v63 }
 0xa4b   : > { %v9913_v12 = vpop.f32.mrf.mxu1 }
 0xa4c   : > { %11821 = vst [vmem:[#allocation126_spill] sm:$0xff] %v9913_v12 }
 0xa4d   : > { %v9915_v32 = vpop.f32.mrf.mxu1  ;;  %v9917_v13 = vpop.xlane.xlu0 %5085 }
 0xa4e   : > { %11822 = vst [vmem:[#allocation53_spill] sm:$0xff] %v9915_v32  ;;  %11823 = vst [vmem:[#allocation125_spill] sm:$0xff] %v9917_v13 }
 0xa4f   : > { %v9919_v19 = vpop.f32.mrf.mxu1 }
 0xa50   : > { %11824 = vst [vmem:[#allocation46_spill] sm:$0xff] %v9919_v19 }
 0xa51   : > { %v9921_v53 = vpop.f32.mrf.mxu1  ;;  %v9923_v42 = vpop.xlane.xlu0 %5088 }
 0xa52   : > { %11825 = vst [vmem:[#allocation137_spill] sm:$0xff] %v9921_v53 }
 0xa53   : > { %v9925_v25 = vpop.f32.mrf.mxu1 }
 0xa54   : > { %11826 = vst [vmem:[#allocation124_spill] sm:$0xff] %v9925_v25 }
 0xa55   : > { %v9927_v38 = vpop.f32.mrf.mxu1  ;;  %v5092_v27 = vpop.xlane.xlu0 %5091 }
 0xa56   : > { %11827 = vst [vmem:[#allocation45_spill] sm:$0xff] %v9927_v38 }
 0xa57   : > { %v9929_v24 = vpop.f32.mrf.mxu1 }
 0xa58   : > { %11828 = vst [vmem:[#allocation123_spill] sm:$0xff] %v9929_v24 }
 0xa59   : > { %v9931_v5 = vpop.f32.mrf.mxu1  ;;  %v5095_v12 = vpop.xlane.xlu0 %5094 }
 0xa5a   : > { %11829 = vst [vmem:[#allocation48_spill] sm:$0xff] %v9931_v5 }
 0xa5b   : > { %v9933_v49 = vpop.f32.mrf.mxu1 }
 0xa5c   : > { %11830 = vst [vmem:[#allocation56_spill] sm:$0xff] %v9933_v49 }
 0xa5d   : > { %v9935_v32 = vpop.f32.mrf.mxu1  ;;  %v5098_v39 = vpop.xlane.xlu0 %5097 }
 0xa5e   : > { %11831 = vst [vmem:[#allocation122_spill] sm:$0xff] %v9935_v32  ;;  %v5259_v6 = vsub.f32 %v9765_v7, %v5098_v39  ;;  %v5260_v36 = vsub.f32 %v9767_v10, %v5098_v39 }
 0xa5f   : > { %v9937_v19 = vpop.f32.mrf.mxu1 }
 0xa60   : > { %11832 = vst [vmem:[#allocation134_spill] sm:$0xff] %v9937_v19 }
 0xa61   : > { %v9939_v51 = vpop.f32.mrf.mxu1  ;;  %v5101_v29 = vpop.xlane.xlu0 %5100 }
 0xa62   : > { %11833 = vst [vmem:[#allocation51_spill] sm:$0xff] %v9939_v51  ;;  %v5261_v41 = vsub.f32 %v9773_v52, %v5101_v29  ;;  %v5262_v46 = vsub.f32 %v9775_v23, %v5101_v29  ;;  %v5257_v23 = vsub.f32 %v9756_v30, %v5095_v12 }
 0xa63   : > { %v9941_v40 = vpop.f32.mrf.mxu1 }
 0xa64   : > { %11834 = vst [vmem:[#allocation119_spill] sm:$0xff] %v9941_v40  ;;  %v5449_v54 = vmul.f32 1.442695, %v5261_v41  ;;  %v5451_v37 = vmul.f32 1.442695, %v5262_v46  ;;  %v5258_v41 = vsub.f32 %v9760_v28, %v5095_v12  ;;  %v5255_v46 = vsub.f32 %v9747_v26, %v5092_v27 }
 0xa65   : > { %v9945_v21 = vpop.f32.mrf.mxu1  ;;  %v5104_v9 = vpop.xlane.xlu0 %5103 }
 0xa66   : > { %11835 = vst [vmem:[#allocation40_spill] sm:$0xff] %v9945_v21  ;;  %v5263_v47 = vsub.f32 %v9781_v62, %v5104_v9  ;;  %v5264_v61 = vsub.f32 %v9783_v11, %v5104_v9  ;;  %v5445_v62 = vmul.f32 1.442695, %v5259_v6  ;;  %v5443_v30 = vmul.f32 1.442695, %v5258_v41 }
 0xa67   : > { %v9949_v45 = vpop.f32.mrf.mxu1 }
 0xa68   : > { %11836 = vst [vmem:[#allocation118_spill] sm:$0xff] %v9949_v45  ;;  %v5453_v48 = vmul.f32 1.442695, %v5263_v47  ;;  %v5455_v3 = vmul.f32 1.442695, %v5264_v61 }
 0xa69   : > { %v9953_v52 = vpop.f32.mrf.mxu1  ;;  %v5447_v47 = vmul.f32 1.442695, %v5260_v36  ;;  %v5437_v36 = vmul.f32 1.442695, %v5255_v46 }
 0xa6a   : > { %7080 = vpow2.f32 %v5453_v48 }
 0xa6b   : > { %7082 = vpow2.f32 %v5455_v3  ;;  %v9955_v29 = vpop.f32.mrf.mxu1  ;;  %v5441_v3 = vmul.f32 1.442695, %v5257_v23 }
 0xa6c   : > { %7084 = vpow2.f32 %v5449_v54  ;;  %v5027_v9 = vmax.f32 %v9953_v52, %v9955_v29  ;;  %v5256_v54 = vsub.f32 %v9751_v15, %v5092_v27 }
 0xa6d   : > { %7086 = vpow2.f32 %v5451_v37  ;;  %v9961_v61 = vpop.f32.mrf.mxu1 }
 0xa6e   : > { %11837 = vst [vmem:[#allocation52_spill] sm:$0xff] %v9961_v61  ;;  %5028 = vmax.xlane.f32.xlu1 %v5027_v9  ;;  %7088 = vpow2.f32 %v5445_v62  ;;  %v5439_v26 = vmul.f32 1.442695, %v5256_v54 }
 0xa6f   : > { %v9963_v39 = vpop.f32.mrf.mxu1  ;;  %7090 = vpow2.f32 %v5447_v47 }
 0xa70   : > { %11838 = vst [vmem:[#allocation117_spill] sm:$0xff] %v9963_v39  ;;  %v5030_v6 = vmax.f32 %v9961_v61, %v9963_v39  ;;  %7092 = vpow2.f32 %v5441_v3 }
 0xa71   : > { %v9969_v7 = vpop.f32.mrf.mxu1  ;;  %7094 = vpow2.f32 %v5443_v30 }
 0xa72   : > { %11839 = vst [vmem:[#allocation50_spill] sm:$0xff] %v9969_v7  ;;  %5031 = vmax.xlane.f32.xlu1 %v5030_v6  ;;  %7096 = vpow2.f32 %v5437_v36 }
 0xa73   : > { %v9971_v12 = vpop.f32.mrf.mxu1  ;;  %7098 = vpow2.f32 %v5439_v26 }
 0xa74   : > { %11840 = vst [vmem:[#allocation116_spill] sm:$0xff] %v9971_v12  ;;  %v5033_v28 = vmax.f32 %v9969_v7, %v9971_v12 }
 0xa75   : > { %v9975_v10 = vpop.f32.mrf.mxu1 }
 0xa76   : > { %11841 = vst [vmem:[#allocation49_spill] sm:$0xff] %v9975_v10  ;;  %5034 = vmax.xlane.f32.xlu1 %v5033_v28 }
 0xa77   : > { %v9977_v11 = vpop.eup %7080  ;;  %v9979_v15 = vpop.f32.mrf.mxu1 }
 0xa78   : > { %11842 = vst [vmem:[#allocation115_spill] sm:$0xff] %v9979_v15  ;;  %v9981_v27 = vpop.eup %7082  ;;  %v5036_v48 = vmax.f32 %v9975_v10, %v9979_v15 }
 0xa79   : > { %v9985_v37 = vpop.eup %7084  ;;  %v9987_v23 = vpop.f32.mrf.mxu1  ;;  %v5678_v62 = vadd.f32 %v9981_v27, %v9977_v11 }
 0xa7a   : > { %v9991_v9 = vpop.eup %7086  ;;  %5037 = vmax.xlane.f32.xlu1 %v5036_v48 }
 0xa7b   : > { %5679 = vadd.xlane.f32.xlu0 %v5678_v62  ;;  %v9993_v41 = vpop.f32.mrf.mxu1  ;;  %v9997_v46 = vpop.eup %7088  ;;  %v5675_v6 = vadd.f32 %v9991_v9, %v9985_v37 }
 0xa7c   : > { %v5039_v47 = vmax.f32 %v9987_v23, %v9993_v41  ;;  %v10003_v54 = vpop.eup %7090 }
 0xa7d   : > { %v9999_v3 = vpop.f32.mrf.mxu1  ;;  %v10009_v28 = vpop.eup %7092  ;;  %v5672_v48 = vadd.f32 %v10003_v54, %v9997_v46 }
 0xa7e   : > { %5040 = vmax.xlane.f32.xlu1 %v5039_v47  ;;  %11843 = vst [vmem:[#allocation47_spill] sm:$0xff] %v10009_v28  ;;  %v10015_v62 = vpop.eup %7094 }
 0xa7f   : > { %5676 = vadd.xlane.f32.xlu0 %v5675_v6  ;;  %v10005_v30 = vpop.f32.mrf.mxu1  ;;  %11844 = vst [vmem:[#allocation114_spill] sm:$0xff] %v10015_v62  ;;  %v10021_v6 = vpop.eup %7096  ;;  %v5669_v12 = vadd.f32 %v10015_v62, %v10009_v28 }
 0xa80   : > { %v5042_v36 = vmax.f32 %v9999_v3, %v10005_v30  ;;  %11845 = vst [vmem:[#allocation129_spill] sm:$0xff] %v10021_v6  ;;  %v10027_v7 = vpop.eup %7098 }
 0xa81   : > { %v10011_v26 = vpop.f32.mrf.mxu1  ;;  %11846 = vst [vmem:[#allocation113_spill] sm:$0xff] %v10027_v7  ;;  %v5666_v22 = vadd.f32 %v10027_v7, %v10021_v6 }
 0xa82   : > { %5043 = vmax.xlane.f32.xlu1 %v5042_v36 }
 0xa83   : > { %5673 = vadd.xlane.f32.xlu0 %v5672_v48  ;;  %v10017_v39 = vpop.f32.mrf.mxu1 }
 0xa84   : > { %v5045_v47 = vmax.f32 %v10011_v26, %v10017_v39 }
 0xa85   : > { %v10023_v61 = vpop.f32.mrf.mxu1 }
 0xa86   : > { %5046 = vmax.xlane.f32.xlu1 %v5045_v47 }
 0xa87   : > { %5670 = vadd.xlane.f32.xlu0 %v5669_v12  ;;  %v10029_v0 = vpop.f32.mrf.mxu1 }
 0xa88   : > { %v5048_v36 = vmax.f32 %v10023_v61, %v10029_v0 }
 0xa89   : > { %v10033_v48 = vpop.f32.mrf.mxu1 }
 0xa8a   : > { %5049 = vmax.xlane.f32.xlu1 %v5048_v36 }
 0xa8b   : > { %5667 = vadd.xlane.f32.xlu0 %v5666_v22  ;;  %v10037_v63 = vpop.f32.mrf.mxu1  ;;  %v5024_v22 = vmax.f32 %v9945_v21, %v9949_v45  ;;  %v10109_v21 = vpop.xlane.xlu0 %5073 }
 0xa8c   : > { %v5051_v15 = vmax.f32 %v10033_v48, %v10037_v63  ;;  %11859 = vst [vmem:[#allocation144_spill] sm:$0xff] %v10109_v21 }
 0xa8d   : > { %v10041_v10 = vpop.f32.mrf.mxu1 }
 0xa8e   : > { %5052 = vmax.xlane.f32.xlu1 %v5051_v15  ;;  %v5021_v15 = vmax.f32 %v9939_v51, %v9941_v40 }
 0xa8f   : > { %v10043_v12 = vpop.f32.mrf.mxu1 }
 0xa90   : > { %v5054_v47 = vmax.f32 %v10041_v10, %v10043_v12 }
 0xa91   : > { %v10047_v35 = vpop.f32.mrf.mxu1 }
 0xa92   : > { %5055 = vmax.xlane.f32.xlu1 %v5054_v47  ;;  %v5018_v47 = vmax.f32 %v9935_v32, %v9937_v19 }
 0xa93   : > { %v10049_v28 = vpop.f32.mrf.mxu1 }
 0xa94   : > { %11847 = vst [vmem:[#allocation128_spill] sm:$0xff] %v10049_v28 }
 0xa95   : > { %v10053_v36 = vpop.f32.mrf.mxu1 }
 0xa96   : > { %11848 = vst [vmem:[#allocation112_spill] sm:$0xff] %v10053_v36  ;;  %5025 = vmax.xlane.f32.xlu1 %v5024_v22  ;;  %v5015_v22 = vmax.f32 %v9931_v5, %v9933_v49  ;;  %v5177_v49 = vmax.f32 %v9849_v20, %v9852_v55 }
 0xa97   : > { %v10055_v6 = vpop.f32.mrf.mxu1 }
 0xa98   : > { %11849 = vst [vmem:[#allocation111_spill] sm:$0xff] %v10055_v6 }
 0xa99   : > { %v10059_v7 = vpop.f32.mrf.mxu1 }
 0xa9a   : > { %5022 = vmax.xlane.f32.xlu1 %v5021_v15  ;;  %v5012_v15 = vmax.f32 %v9927_v38, %v9929_v24 }
 0xa9b   : > { %v10061_v14 = vpop.f32.mrf.mxu1 }
 0xa9d   : > { %v10065_v13 = vpop.f32.mrf.mxu1 }
 0xa9e   : > { %5019 = vmax.xlane.f32.xlu1 %v5018_v47  ;;  %v5009_v47 = vmax.f32 %v9921_v53, %v9925_v25 }
 0xa9f   : > { %v10067_v62 = vpop.f32.mrf.mxu1 }
 0xaa0   : > { %11850 = vst [vmem:[#allocation110_spill] sm:$0xff] %v10067_v62 }
 0xaa1   : > { %v10071_v45 = vpop.f32.mrf.mxu1 }
 0xaa2   : > { %11851 = vst [vmem:[#allocation132_spill] sm:$0xff] %v10071_v45  ;;  %5016 = vmax.xlane.f32.xlu1 %v5015_v22 }
 0xaa3   : > { %v10073_v40 = vpop.f32.mrf.mxu1 }
 0xaa4   : > { %11852 = vst [vmem:[#allocation131_spill] sm:$0xff] %v10073_v40 }
 0xaa5   : > { %v10077_v51 = vpop.f32.mrf.mxu1 }
 0xaa6   : > { %5013 = vmax.xlane.f32.xlu1 %v5012_v15  ;;  %v5174_v15 = vmax.f32 %v9843_v60, %v9846_v43 }
 0xaa7   : > { %v10079_v19 = vpop.f32.mrf.mxu1 }
 0xaa9   : > { %v10083_v32 = vpop.f32.mrf.mxu1 }
 0xaaa   : > { %5010 = vmax.xlane.f32.xlu1 %v5009_v47 }
 0xaab   : > { %v10087_v22 = vpop.f32.mrf.mxu1 }
 0xaac   : > { %11853 = vst [vmem:[#allocation15_spill] sm:$0xff] %v10087_v22 }
 0xaad   : > { %v10089_v5 = vpop.f32.mrf.mxu1 }
 0xaae   : > { %5178 = vmax.xlane.f32.xlu1 %v5177_v49 }
 0xaaf   : > { %v10091_v24 = vpop.f32.mrf.mxu1 }
 0xab1   : > { %v10095_v38 = vpop.f32.mrf.mxu1 }
 0xab2   : > { %11854 = vst [vmem:[#allocation16_spill] sm:$0xff] %v10095_v38  ;;  %5175 = vmax.xlane.f32.xlu1 %v5174_v15 }
 0xab3   : > { %v10097_v25 = vpop.f32.mrf.mxu1 }
 0xab4   : > { %11855 = vst [vmem:[#allocation37_spill] sm:$0xff] %v10097_v25  ;;  %v5129_v53 = vmax.f32 %v10095_v38, %v10097_v25 }
 0xab5   : > { %v10101_v55 = vpop.f32.mrf.mxu1 }
 0xab6   : > { %11856 = vst [vmem:[#allocation39_spill] sm:$0xff] %v10101_v55  ;;  %5130 = vmax.xlane.f32.xlu1 %v5129_v53  ;;  %v10119_v53 = vpop.xlane.xlu0 %5070 }
 0xab7   : > { %v10103_v47 = vpop.f32.mrf.mxu1  ;;  %11863 = vst [vmem:[#allocation140_spill] sm:$0xff] %v10119_v53 }
 0xab8   : > { %11857 = vst [vmem:[#allocation31_spill] sm:$0xff] %v10103_v47  ;;  %v5132_v49 = vmax.f32 %v10101_v55, %v10103_v47 }
 0xab9   : > { %v10107_v20 = vpop.f32.mrf.mxu1 }
 0xaba   : > { %11858 = vst [vmem:[#allocation32_spill] sm:$0xff] %v10107_v20  ;;  %5133 = vmax.xlane.f32.xlu1 %v5132_v49 }
 0xabb   : > { %v10111_v43 = vpop.f32.mrf.mxu1 }
 0xabc   : > { %11860 = vst [vmem:[#allocation143_spill] sm:$0xff] %v10111_v43  ;;  %v5135_v15 = vmax.f32 %v10107_v20, %v10111_v43  ;;  %v10131_v43 = vpop.xlane.xlu0 %5067 }
 0xabd   : > { %v10115_v60 = vpop.f32.mrf.mxu1  ;;  %11867 = vst [vmem:[#allocation138_spill] sm:$0xff] %v10131_v43 }
 0xabe   : > { %11861 = vst [vmem:[#allocation17_spill] sm:$0xff] %v10115_v60  ;;  %5136 = vmax.xlane.f32.xlu1 %v5135_v15 }
 0xabf   : > { %v10117_v25 = vpop.f32.mrf.mxu1 }
 0xac0   : > { %11862 = vst [vmem:[#allocation18_spill] sm:$0xff] %v10117_v25  ;;  %v5138_v38 = vmax.f32 %v10115_v60, %v10117_v25 }
 0xac1   : > { %v10123_v47 = vpop.f32.mrf.mxu1 }
 0xac2   : > { %11864 = vst [vmem:[#allocation139_spill] sm:$0xff] %v10123_v47  ;;  %5139 = vmax.xlane.f32.xlu1 %v5138_v38  ;;  %v10141_v38 = vpop.xlane.xlu0 %5064 }
 0xac3   : > { %v10125_v55 = vpop.f32.mrf.mxu1 }
 0xac4   : > { %11865 = vst [vmem:[#allocation154_spill] sm:$0xff] %v10125_v55  ;;  %v5141_v49 = vmax.f32 %v10123_v47, %v10125_v55 }
 0xac5   : > { %v10129_v21 = vpop.f32.mrf.mxu1 }
 0xac6   : > { %11866 = vst [vmem:[#allocation153_spill] sm:$0xff] %v10129_v21  ;;  %5142 = vmax.xlane.f32.xlu1 %v5141_v49  ;;  %v10151_v43 = vpop.xlane.xlu0 %5061 }
 0xac7   : > { %v10133_v15 = vpop.f32.mrf.mxu1 }
 0xac8   : > { %11868 = vst [vmem:[#allocation152_spill] sm:$0xff] %v10133_v15  ;;  %v5144_v20 = vmax.f32 %v10129_v21, %v10133_v15  ;;  %v5171_v15 = vmax.f32 %v9837_v31, %v9840_v57  ;;  %v5165_v57 = vmax.f32 %v9821_v18, %v9826_v34 }
 0xac9   : > { %v10137_v53 = vpop.f32.mrf.mxu1 }
 0xaca   : > { %5145 = vmax.xlane.f32.xlu1 %v5144_v20  ;;  %v5126_v20 = vmax.f32 %v10089_v5, %v10091_v24  ;;  %v10157_v21 = vpop.xlane.xlu0 %5058 }
 0xacb   : > { %v10139_v25 = vpop.f32.mrf.mxu1 }
 0xacc   : > { %11869 = vst [vmem:[#allocation136_spill] sm:$0xff] %v10139_v25  ;;  %v5147_v60 = vmax.f32 %v10137_v53, %v10139_v25 }
 0xacd   : > { %v10145_v55 = vpop.f32.mrf.mxu1 }
 0xace   : > { %5148 = vmax.xlane.f32.xlu1 %v5147_v60  ;;  %v5123_v60 = vmax.f32 %v10083_v32, %v10087_v22  ;;  %v10161_v25 = vpop.xlane.xlu0 %5199  ;;  %v5117_v22 = vmax.f32 %v10071_v45, %v10073_v40 }
 0xacf   : > { %v10147_v47 = vpop.f32.mrf.mxu1 }
 0xad0   : > { %11870 = vst [vmem:[#allocation135_spill] sm:$0xff] %v10147_v47  ;;  %v5150_v49 = vmax.f32 %v10145_v55, %v10147_v47  ;;  %v5168_v47 = vmax.f32 %v9829_v2, %v9834_v16  ;;  %v5162_v16 = vmax.f32 %v9813_v1, %v9818_v33 }
 0xad2   : > { %5151 = vmax.xlane.f32.xlu1 %v5150_v49  ;;  %v10165_v49 = vpop.xlane.xlu0 %5196 }
 0xad6   : > { %5127 = vmax.xlane.f32.xlu1 %v5126_v20  ;;  %v5120_v20 = vmax.f32 %v10077_v51, %v10079_v19 }
 0xada   : > { %5172 = vmax.xlane.f32.xlu1 %v5171_v15  ;;  %v10171_v15 = vpop.xlane.xlu0 %5193 }
 0xade   : > { %5124 = vmax.xlane.f32.xlu1 %v5123_v60  ;;  %v10175_v60 = vpop.xlane.xlu0 %5190 }
 0xae2   : > { %5169 = vmax.xlane.f32.xlu1 %v5168_v47  ;;  %v5114_v47 = vmax.f32 %v10065_v13, %v10067_v62 }
 0xae6   : > { %5121 = vmax.xlane.f32.xlu1 %v5120_v20  ;;  %v10181_v20 = vpop.xlane.xlu0 %5187 }
 0xaea   : > { %5166 = vmax.xlane.f32.xlu1 %v5165_v57  ;;  %v5159_v57 = vmax.f32 %v9805_v50, %v9810_v58  ;;  %v10187_v45 = vpop.xlane.xlu0 %5184  ;;  %v5156_v58 = vmax.f32 %v9797_v17, %v9802_v44 }
 0xaee   : > { %5118 = vmax.xlane.f32.xlu1 %v5117_v22 }
 0xaf2   : > { %5163 = vmax.xlane.f32.xlu1 %v5162_v16  ;;  %v5111_v16 = vmax.f32 %v10059_v7, %v10061_v14 }
 0xaf6   : > { %5115 = vmax.xlane.f32.xlu1 %v5114_v47 }
 0xaf7   : > { %v5029_v34 = vpop.xlane.xlu1 %5028 }
 0xaf8   : > { %v5213_v18 = vsub.f32 %v9953_v52, %v5029_v34  ;;  %v5214_v40 = vsub.f32 %v9955_v29, %v5029_v34  ;;  %v10197_v52 = vpop.xlane.xlu0 %5181 }
 0xafa   : > { %5160 = vmax.xlane.f32.xlu1 %v5159_v57  ;;  %v5353_v22 = vmul.f32 1.442695, %v5213_v18  ;;  %v5355_v62 = vmul.f32 1.442695, %v5214_v40  ;;  %v5108_v18 = vmax.f32 %v10053_v36, %v10055_v6  ;;  %v5153_v57 = vmax.f32 %v9789_v59, %v9794_v56 }
 0xafb   : > { %v10189_v33 = vpop.xlane.xlu1 %5031 }
 0xafc   : > { %7100 = vpow2.f32 %v5353_v22 }
 0xafd   : > { %7102 = vpow2.f32 %v5355_v62 }
 0xafe   : > { %5112 = vmax.xlane.f32.xlu1 %v5111_v16 }
 0xaff   : > { %v10193_v47 = vpop.xlane.xlu1 %5034 }
 0xb02   : > { %5157 = vmax.xlane.f32.xlu1 %v5156_v58  ;;  %v5105_v58 = vmax.f32 %v10047_v35, %v10049_v28 }
 0xb03   : > { %v10199_v34 = vpop.xlane.xlu1 %5037 }
 0xb04   : > { %v5680_v29 = vpop.xlane.xlu0 %5679 }
 0xb05   : > { %7104 = vrcp.f32 %v5680_v29 }
 0xb06   : > { %5109 = vmax.xlane.f32.xlu1 %v5108_v18 }
 0xb07   : > { %v10203_v40 = vpop.xlane.xlu1 %5040 }
 0xb08   : > { %v5677_v22 = vpop.xlane.xlu0 %5676 }
 0xb09   : > { %7106 = vrcp.f32 %v5677_v22  ;;  %v10207_v44 = vpop.eup %7100 }
 0xb0a   : > { %5154 = vmax.xlane.f32.xlu1 %v5153_v57  ;;  %11871 = vst [vmem:[#allocation151_spill] sm:$0xff] %v10207_v44  ;;  %v10213_v18 = vpop.eup %7102 }
 0xb0b   : > { %v5044_v16 = vpop.xlane.xlu1 %5043  ;;  %11872 = vst [vmem:[#allocation150_spill] sm:$0xff] %v10213_v18  ;;  %v5603_v28 = vadd.f32 %v10213_v18, %v10207_v44 }
 0xb0c   : > { %v5223_v62 = vsub.f32 %v9999_v3, %v5044_v16  ;;  %v5224_v6 = vsub.f32 %v10005_v30, %v5044_v16  ;;  %v5674_v29 = vpop.xlane.xlu0 %5673 }
 0xb0d   : > { %7108 = vrcp.f32 %v5674_v29 }
 0xb0e   : > { %v5373_v36 = vmul.f32 1.442695, %v5223_v62  ;;  %v5375_v17 = vmul.f32 1.442695, %v5224_v6  ;;  %5106 = vmax.xlane.f32.xlu1 %v5105_v58 }
 0xb0f   : > { %v5047_v56 = vpop.xlane.xlu1 %5046 }
 0xb10   : > { %7110 = vpow2.f32 %v5373_v36  ;;  %v5225_v57 = vsub.f32 %v10011_v26, %v5047_v56  ;;  %v5226_v22 = vsub.f32 %v10017_v39, %v5047_v56  ;;  %v5671_v59 = vpop.xlane.xlu0 %5670 }
 0xb11   : > { %7112 = vpow2.f32 %v5375_v17 }
 0xb12   : > { %v5377_v3 = vmul.f32 1.442695, %v5225_v57  ;;  %v5379_v30 = vmul.f32 1.442695, %v5226_v22  ;;  %7114 = vrcp.f32 %v5671_v59  ;;  %5604 = vadd.xlane.f32.xlu1 %v5603_v28  ;;  %v7105_v16 = vpop.eup %7104 }
 0xb13   : > { %v5050_v62 = vpop.xlane.xlu1 %5049  ;;  %v5904_v26 = vmul.f32 %v7105_v16, %v9981_v27  ;;  %v5903_v56 = vmul.f32 %v7105_v16, %v9977_v11  ;;  %v5253_v11 = vsub.f32 %v9738_v8, %v9923_v42 }
 0xb14   : > { %7116 = vpow2.f32 %v5377_v3  ;;  %v5227_v6 = vsub.f32 %v10023_v61, %v5050_v62  ;;  %v5228_v36 = vsub.f32 %v10029_v0, %v5050_v62  ;;  %v5668_v58 = vpop.xlane.xlu0 %5667 }
 0xb15   : > { %7118 = vpow2.f32 %v5379_v30  ;;  %6039 = vmatprep.subr.mxu0 %v5904_v26  ;;  %v5254_v30 = vsub.f32 %v9742_v4, %v9923_v42  ;;  %v5221_v4 = vsub.f32 %v9987_v23, %v10203_v40 }
 0xb16   : > { %v5381_v39 = vmul.f32 1.442695, %v5227_v6  ;;  %v5383_v29 = vmul.f32 1.442695, %v5228_v36  ;;  %7120 = vrcp.f32 %v5668_v58  ;;  %v7107_v17 = vpop.eup %7106  ;;  %6040 = vmatpush1.xpose.msra.mxu0 %v5903_v56  ;;  %v5433_v6 = vmul.f32 1.442695, %v5253_v11 }
 0xb17   : > { %v5053_v59 = vpop.xlane.xlu1 %5052  ;;  %v5902_v0 = vmul.f32 %v7107_v17, %v9991_v9  ;;  %v5901_v27 = vmul.f32 %v7107_v17, %v9985_v37  ;;  %v11876_v17 = vld [vmem:[#allocation114_spill] sm:$0xff]  ;;  %v5369_v11 = vmul.f32 1.442695, %v5221_v4  ;;  %v11883_v4 = vld [vmem:[#allocation113_spill] sm:$0xff] }
 0xb18   : > { %7122 = vpow2.f32 %v5381_v39  ;;  %v5229_v28 = vsub.f32 %v10033_v48, %v5053_v59  ;;  %v5230_v61 = vsub.f32 %v10037_v63, %v5053_v59  ;;  %v11875_v39 = vld [vmem:[#allocation118_spill] sm:$0xff] }
 0xb19   : > { %7124 = vpow2.f32 %v5383_v29  ;;  %6041 = vmatprep.subr.mxu0 %v5902_v0 }
 0xb1a   : > { %v5385_v57 = vmul.f32 1.442695, %v5229_v28  ;;  %v5387_v22 = vmul.f32 1.442695, %v5230_v61  ;;  %v7109_v3 = vpop.eup %7108  ;;  %6042 = vmatpush1.xpose.msra.mxu0 %v5901_v27  ;;  %v11877_v28 = vld [vmem:[#allocation125_spill] sm:$0xff]  ;;  %v11878_v61 = vld [vmem:[#allocation79_spill] sm:$0xff] }
 0xb1b   : > { %v5056_v16 = vpop.xlane.xlu1 %5055  ;;  %v5900_v48 = vmul.f32 %v7109_v3, %v10003_v54  ;;  %v5899_v8 = vmul.f32 %v7109_v3, %v9997_v46  ;;  %v11874_v46 = vld [vmem:[#allocation40_spill] sm:$0xff]  ;;  %v5251_v0 = vsub.f32 %v11878_v61, %v11877_v28 }
 0xb1c   : > { %7126 = vpow2.f32 %v5385_v57  ;;  %v5231_v63 = vsub.f32 %v10041_v10, %v5056_v16  ;;  %v5232_v9 = vsub.f32 %v10043_v12, %v5056_v16  ;;  %v5435_v10 = vmul.f32 1.442695, %v5254_v30  ;;  %v11880_v30 = vld [vmem:[#allocation81_spill] sm:$0xff] }
 0xb1d   : > { %v10234_v37 = vpop.eup %7110  ;;  %7128 = vpow2.f32 %v5387_v22  ;;  %6043 = vmatprep.subr.mxu0 %v5900_v48  ;;  %v5222_v12 = vsub.f32 %v9993_v41, %v10203_v40  ;;  %v11879_v41 = vld [vmem:[#allocation47_spill] sm:$0xff]  ;;  %v5252_v16 = vsub.f32 %v11880_v30, %v11877_v28 }
 0xb1e   : > { %11873 = vst [vmem:[#allocation133_spill] sm:$0xff] %v10234_v37  ;;  %v10237_v62 = vpop.eup %7112  ;;  %v5389_v42 = vmul.f32 1.442695, %v5231_v63  ;;  %v5391_v36 = vmul.f32 1.442695, %v5232_v9  ;;  %6044 = vmatpush1.xpose.msra.mxu0 %v5899_v8  ;;  %v11881_v8 = vld [vmem:[#allocation51_spill] sm:$0xff] }
 0xb1f   : > { %v7115_v58 = vpop.eup %7114  ;;  %v5026_v54 = vpop.xlane.xlu1 %5025  ;;  %v5618_v26 = vadd.f32 %v10237_v62, %v10234_v37  ;;  %v5371_v63 = vmul.f32 1.442695, %v5222_v12  ;;  %v11886_v28 = vld [vmem:[#allocation115_spill] sm:$0xff] }
 0xb20   : > { %7130 = vpow2.f32 %v5389_v42  ;;  %v5211_v56 = vsub.f32 %v11874_v46, %v5026_v54  ;;  %v5212_v29 = vsub.f32 %v11875_v39, %v5026_v54  ;;  %v5898_v23 = vmul.f32 %v7115_v58, %v11876_v17  ;;  %v11884_v46 = vld [vmem:[#allocation129_spill] sm:$0xff] }
 0xb21   : > { %v10248_v59 = vpop.eup %7116  ;;  %7132 = vpow2.f32 %v5391_v36  ;;  %5619 = vadd.xlane.f32.xlu0 %v5618_v26  ;;  %v5897_v40 = vmul.f32 %v7115_v58, %v11879_v41  ;;  %v11882_v36 = vld [vmem:[#allocation119_spill] sm:$0xff]  ;;  %v5429_v26 = vmul.f32 1.442695, %v5251_v0  ;;  %v5220_v61 = vsub.f32 %v11886_v28, %v10199_v34  ;;  %v11894_v28 = vld [vmem:[#allocation50_spill] sm:$0xff] }
 0xb22   : > { %v10253_v27 = vpop.eup %7118  ;;  %7134 = vpow2.f32 %v5433_v6  ;;  %v5349_v57 = vmul.f32 1.442695, %v5211_v56  ;;  %v5351_v22 = vmul.f32 1.442695, %v5212_v29  ;;  %6045 = vmatprep.subr.mxu0 %v5898_v23  ;;  %v11885_v56 = vld [vmem:[#allocation49_spill] sm:$0xff] }
 0xb23   : > { %v7121_v3 = vpop.eup %7120  ;;  %7136 = vpow2.f32 %v5435_v10  ;;  %6046 = vmatpush1.xpose.msra.mxu0 %v5897_v40  ;;  %v5023_v9 = vpop.xlane.xlu1 %5022  ;;  %v5621_v48 = vadd.f32 %v10253_v27, %v10248_v59  ;;  %v5219_v39 = vsub.f32 %v11885_v56, %v10199_v34  ;;  %v5431_v23 = vmul.f32 1.442695, %v5252_v16  ;;  %v11887_v40 = vld [vmem:[#allocation122_spill] sm:$0xff]  ;;  %v11893_v56 = vld [vmem:[#allocation56_spill] sm:$0xff] }
 0xb24   : > { %7138 = vpow2.f32 %v5349_v57  ;;  %v5209_v42 = vsub.f32 %v11881_v8, %v5023_v9  ;;  %v5210_v6 = vsub.f32 %v11882_v36, %v5023_v9  ;;  %v5896_v58 = vmul.f32 %v7121_v3, %v11883_v4  ;;  %v11890_v9 = vld [vmem:[#allocation83_spill] sm:$0xff] }
 0xb25   : > { %v10262_v54 = vpop.eup %7122  ;;  %7140 = vpow2.f32 %v5351_v22  ;;  %5622 = vadd.xlane.f32.xlu0 %v5621_v48  ;;  %v5895_v10 = vmul.f32 %v7121_v3, %v11884_v46  ;;  %v11888_v22 = vld [vmem:[#allocation134_spill] sm:$0xff]  ;;  %v5365_v34 = vmul.f32 1.442695, %v5219_v39  ;;  %v11892_v46 = vld [vmem:[#allocation48_spill] sm:$0xff] }
 0xb26   : > { %v10265_v12 = vpop.eup %7124  ;;  %7142 = vpow2.f32 %v5369_v11  ;;  %v5345_v29 = vmul.f32 1.442695, %v5209_v42  ;;  %v5347_v17 = vmul.f32 1.442695, %v5210_v6  ;;  %6047 = vmatprep.subr.mxu0 %v5896_v58  ;;  %v11889_v11 = vld [vmem:[#allocation54_spill] sm:$0xff]  ;;  %v11891_v42 = vld [vmem:[#allocation85_spill] sm:$0xff] }
 0xb27   : > { %7144 = vpow2.f32 %v5371_v63  ;;  %6048 = vmatpush1.xpose.msra.mxu0 %v5895_v10  ;;  %v5020_v0 = vpop.xlane.xlu1 %5019  ;;  %v5624_v41 = vadd.f32 %v10265_v12, %v10262_v54  ;;  %v5249_v48 = vsub.f32 %v11890_v9, %v11889_v11  ;;  %v5250_v36 = vsub.f32 %v11891_v42, %v11889_v11 }
 0xb28   : > { %7146 = vpow2.f32 %v5345_v29  ;;  %v5207_v57 = vsub.f32 %v11887_v40, %v5020_v0  ;;  %v5208_v3 = vsub.f32 %v11888_v22, %v5020_v0  ;;  %v5367_v6 = vmul.f32 1.442695, %v5220_v61 }
 0xb29   : > { %v10275_v30 = vpop.eup %7126  ;;  %7148 = vpow2.f32 %v5347_v17  ;;  %5625 = vadd.xlane.f32.xlu0 %v5624_v41  ;;  %v5427_v40 = vmul.f32 1.442695, %v5250_v36 }
 0xb2a   : > { %v10279_v16 = vpop.eup %7128  ;;  %7150 = vpow2.f32 %v5429_v26  ;;  %v5341_v63 = vmul.f32 1.442695, %v5207_v57  ;;  %v5343_v8 = vmul.f32 1.442695, %v5208_v3  ;;  %v5425_v26 = vmul.f32 1.442695, %v5249_v48 }
 0xb2b   : > { %7152 = vpow2.f32 %v5431_v23  ;;  %v5017_v4 = vpop.xlane.xlu1 %5016  ;;  %v5627_v58 = vadd.f32 %v10279_v16, %v10275_v30  ;;  %v5217_v23 = vsub.f32 %v11894_v28, %v10193_v47  ;;  %v11895_v57 = vld [vmem:[#allocation116_spill] sm:$0xff]  ;;  %v11896_v48 = vld [vmem:[#allocation45_spill] sm:$0xff] }
 0xb2c   : > { %7154 = vpow2.f32 %v5341_v63  ;;  %v5205_v10 = vsub.f32 %v11892_v46, %v5017_v4  ;;  %v5206_v29 = vsub.f32 %v11893_v56, %v5017_v4  ;;  %v5218_v22 = vsub.f32 %v11895_v57, %v10193_v47  ;;  %v11899_v4 = vld [vmem:[#allocation58_spill] sm:$0xff] }
 0xb2d   : > { %v10287_v17 = vpop.eup %7130  ;;  %7156 = vpow2.f32 %v5343_v8  ;;  %5628 = vadd.xlane.f32.xlu0 %v5627_v58  ;;  %v11897_v8 = vld [vmem:[#allocation123_spill] sm:$0xff]  ;;  %v11901_v46 = vld [vmem:[#allocation90_spill] sm:$0xff] }
 0xb2e   : > { %v10289_v39 = vpop.eup %7132  ;;  %7158 = vpow2.f32 %v5365_v34  ;;  %v5337_v61 = vmul.f32 1.442695, %v5205_v10  ;;  %v5339_v0 = vmul.f32 1.442695, %v5206_v29  ;;  %v11900_v58 = vld [vmem:[#allocation87_spill] sm:$0xff]  ;;  %v5248_v47 = vsub.f32 %v11901_v46, %v11899_v4 }
 0xb2f   : > { %v10293_v41 = vpop.eup %7134  ;;  %7160 = vpow2.f32 %v5367_v6  ;;  %v5014_v3 = vpop.xlane.xlu1 %5013  ;;  %v5630_v11 = vadd.f32 %v10289_v39, %v10287_v17  ;;  %v5247_v36 = vsub.f32 %v11900_v58, %v11899_v4  ;;  %v5361_v10 = vmul.f32 1.442695, %v5217_v23 }
 0xb30   : > { %v10299_v9 = vpop.eup %7136  ;;  %7162 = vpow2.f32 %v5337_v61  ;;  %v5203_v63 = vsub.f32 %v11896_v48, %v5014_v3  ;;  %v5204_v34 = vsub.f32 %v11897_v8, %v5014_v3  ;;  %v5363_v61 = vmul.f32 1.442695, %v5218_v22  ;;  %v11909_v22 = vld [vmem:[#allocation52_spill] sm:$0xff] }
 0xb31   : > { %v10303_v42 = vpop.eup %7138  ;;  %7164 = vpow2.f32 %v5339_v0  ;;  %5631 = vadd.xlane.f32.xlu0 %v5630_v11  ;;  %v5663_v48 = vadd.f32 %v10299_v9, %v10293_v41  ;;  %v11905_v0 = vld [vmem:[#allocation137_spill] sm:$0xff]  ;;  %v5423_v4 = vmul.f32 1.442695, %v5248_v47  ;;  %v5215_v58 = vsub.f32 %v11909_v22, %v10189_v33 }
 0xb32   : > { %11898 = vst [vmem:[#allocation109_spill] sm:$0xff] %v10303_v42  ;;  %v10309_v6 = vpop.eup %7140  ;;  %7166 = vpow2.f32 %v5425_v26  ;;  %v5333_v56 = vmul.f32 1.442695, %v5203_v63  ;;  %v5335_v29 = vmul.f32 1.442695, %v5204_v34  ;;  %v11906_v26 = vld [vmem:[#allocation124_spill] sm:$0xff] }
 0xb33   : > { %11902 = vst [vmem:[#allocation149_spill] sm:$0xff] %v10309_v6  ;;  %v10311_v28 = vpop.eup %7142  ;;  %7168 = vpow2.f32 %v5427_v40  ;;  %v5011_v57 = vpop.xlane.xlu1 %5010  ;;  %v5600_v3 = vadd.f32 %v10309_v6, %v10303_v42  ;;  %v5421_v34 = vmul.f32 1.442695, %v5247_v36  ;;  %v5357_v22 = vmul.f32 1.442695, %v5215_v58 }
 0xb34   : > { %11903 = vst [vmem:[#allocation148_spill] sm:$0xff] %v10311_v28  ;;  %v10317_v8 = vpop.eup %7144  ;;  %7170 = vpow2.f32 %v5333_v56  ;;  %v5201_v11 = vsub.f32 %v11905_v0, %v5011_v57  ;;  %v5202_v23 = vsub.f32 %v11906_v26, %v5011_v57  ;;  %v11910_v0 = vld [vmem:[#allocation117_spill] sm:$0xff] }
 0xb35   : > { %11904 = vst [vmem:[#allocation108_spill] sm:$0xff] %v10317_v8  ;;  %v10321_v63 = vpop.eup %7146  ;;  %7172 = vpow2.f32 %v5335_v29  ;;  %5601 = vadd.xlane.f32.xlu1 %v5600_v3  ;;  %5664 = vadd.xlane.f32.xlu0 %v5663_v48  ;;  %v5216_v57 = vsub.f32 %v11910_v0, %v10189_v33  ;;  %v5615_v47 = vadd.f32 %v10317_v8, %v10311_v28  ;;  %v11913_v33 = vld [vmem:[#allocation120_spill] sm:$0xff] }
 0xb36   : > { %11907 = vst [vmem:[#allocation147_spill] sm:$0xff] %v10321_v63  ;;  %v10323_v40 = vpop.eup %7148  ;;  %7174 = vpow2.f32 %v5361_v10  ;;  %v5329_v46 = vmul.f32 1.442695, %v5201_v11  ;;  %v5331_v42 = vmul.f32 1.442695, %v5202_v23  ;;  %v11915_v11 = vld [vmem:[#allocation96_spill] sm:$0xff] }
 0xb37   : > { %11908 = vst [vmem:[#allocation146_spill] sm:$0xff] %v10323_v40  ;;  %v10327_v56 = vpop.eup %7150  ;;  %7176 = vpow2.f32 %v5363_v61  ;;  %v10331_v26 = vpop.xlane.xlu1 %5178  ;;  %v5597_v36 = vadd.f32 %v10323_v40, %v10321_v63  ;;  %v11914_v61 = vld [vmem:[#allocation93_spill] sm:$0xff]  ;;  %v5246_v23 = vsub.f32 %v11915_v11, %v11913_v33  ;;  %v5359_v63 = vmul.f32 1.442695, %v5216_v57  ;;  %v11919_v40 = vld [vmem:[#allocation144_spill] sm:$0xff] }
 0xb38   : > { %v10337_v29 = vpop.eup %7152  ;;  %7178 = vpow2.f32 %v5329_v46  ;;  %v5245_v48 = vsub.f32 %v11914_v61, %v11913_v33  ;;  %v11920_v33 = vld [vmem:[#allocation98_spill] sm:$0xff]  ;;  %v11922_v57 = vld [vmem:[#allocation101_spill] sm:$0xff] }
 0xb39   : > { %v10339_v10 = vpop.eup %7154  ;;  %7180 = vpow2.f32 %v5331_v42  ;;  %5598 = vadd.xlane.f32.xlu1 %v5597_v36  ;;  %5616 = vadd.xlane.f32.xlu0 %v5615_v47  ;;  %v5660_v36 = vadd.f32 %v10337_v29, %v10327_v56  ;;  %v5244_v11 = vsub.f32 %v11922_v57, %v11919_v40 }
 0xb3a   : > { %11911 = vst [vmem:[#allocation145_spill] sm:$0xff] %v10339_v10  ;;  %v10341_v3 = vpop.eup %7156  ;;  %7182 = vpow2.f32 %v5421_v34  ;;  %v5243_v34 = vsub.f32 %v11920_v33, %v11919_v40 }
 0xb3b   : > { %11912 = vst [vmem:[#allocation142_spill] sm:$0xff] %v10341_v3  ;;  %v10347_v0 = vpop.eup %7158  ;;  %7184 = vpow2.f32 %v5423_v4  ;;  %v10349_v46 = vpop.xlane.xlu1 %5175  ;;  %v5594_v42 = vadd.f32 %v10341_v3, %v10339_v10  ;;  %v5417_v4 = vmul.f32 1.442695, %v5245_v48  ;;  %v5419_v3 = vmul.f32 1.442695, %v5246_v23 }
 0xb3c   : > { %11916 = vst [vmem:[#allocation141_spill] sm:$0xff] %v10347_v0  ;;  %v10355_v47 = vpop.eup %7160  ;;  %7186 = vpow2.f32 %v5357_v22  ;;  %v5413_v48 = vmul.f32 1.442695, %v5243_v34  ;;  %v5415_v23 = vmul.f32 1.442695, %v5244_v11  ;;  %v11928_v22 = vld [vmem:[#allocation102_spill] sm:$0xff] }
 0xb3d   : > { %11917 = vst [vmem:[#allocation25_spill] sm:$0xff] %v10355_v47  ;;  %v10357_v61 = vpop.eup %7162  ;;  %5595 = vadd.xlane.f32.xlu1 %v5594_v42  ;;  %5661 = vadd.xlane.f32.xlu0 %v5660_v36  ;;  %7188 = vpow2.f32 %v5359_v63  ;;  %v5612_v42 = vadd.f32 %v10355_v47, %v10347_v0  ;;  %v11927_v63 = vld [vmem:[#allocation140_spill] sm:$0xff] }
 0xb3e   : > { %11918 = vst [vmem:[#allocation20_spill] sm:$0xff] %v10357_v61  ;;  %v10361_v58 = vpop.eup %7164  ;;  %7190 = vpow2.f32 %v5417_v4  ;;  %v5241_v57 = vsub.f32 %v11928_v22, %v11927_v63 }
 0xb3f   : > { %11921 = vst [vmem:[#allocation26_spill] sm:$0xff] %v10361_v58  ;;  %v10365_v10 = vpop.eup %7166  ;;  %v10367_v6 = vpop.xlane.xlu1 %5130  ;;  %v5591_v44 = vadd.f32 %v10361_v58, %v10357_v61  ;;  %7192 = vpow2.f32 %v5419_v3  ;;  %v11930_v61 = vld [vmem:[#allocation103_spill] sm:$0xff] }
 0xb40   : > { %11923 = vst [vmem:[#allocation19_spill] sm:$0xff] %v10365_v10  ;;  %v10373_v36 = vpop.eup %7168  ;;  %v5242_v58 = vsub.f32 %v11930_v61, %v11927_v63  ;;  %7194 = vpow2.f32 %v5413_v48  ;;  %v5409_v3 = vmul.f32 1.442695, %v5241_v57  ;;  %v11934_v61 = vld [vmem:[#allocation138_spill] sm:$0xff]  ;;  %v11935_v63 = vld [vmem:[#allocation105_spill] sm:$0xff] }
 0xb41   : > { %11924 = vst [vmem:[#allocation77_spill] sm:$0xff] %v10373_v36  ;;  %v10375_v33 = vpop.eup %7170  ;;  %5592 = vadd.xlane.f32.xlu1 %v5591_v44  ;;  %5613 = vadd.xlane.f32.xlu0 %v5612_v42  ;;  %v5657_v44 = vadd.f32 %v10373_v36, %v10365_v10  ;;  %7196 = vpow2.f32 %v5415_v23  ;;  %v5239_v22 = vsub.f32 %v11935_v63, %v11934_v61  ;;  %v11939_v57 = vld [vmem:[#allocation94_spill] sm:$0xff] }
 0xb42   : > { %11925 = vst [vmem:[#allocation75_spill] sm:$0xff] %v10375_v33  ;;  %v10377_v40 = vpop.eup %7172  ;;  %7198 = vpow2.f32 %v5409_v3 }
 0xb43   : > { %11926 = vst [vmem:[#allocation80_spill] sm:$0xff] %v10377_v40  ;;  %v10381_v18 = vpop.eup %7174  ;;  %v10385_v0 = vpop.xlane.xlu1 %5133  ;;  %v5588_v34 = vadd.f32 %v10377_v40, %v10375_v33  ;;  %v5411_v33 = vmul.f32 1.442695, %v5242_v58  ;;  %v11937_v40 = vld [vmem:[#allocation107_spill] sm:$0xff]  ;;  %v5405_v23 = vmul.f32 1.442695, %v5239_v22  ;;  %v5237_v58 = vsub.f32 %v11939_v57, %v10141_v38 }
 0xb44   : > { %11929 = vst [vmem:[#allocation78_spill] sm:$0xff] %v10381_v18  ;;  %v10391_v42 = vpop.eup %7176  ;;  %v5240_v10 = vsub.f32 %v11937_v40, %v11934_v61  ;;  %v11941_v61 = vld [vmem:[#allocation95_spill] sm:$0xff]  ;;  %v11943_v22 = vld [vmem:[#allocation100_spill] sm:$0xff] }
 0xb45   : > { %11931 = vst [vmem:[#allocation36_spill] sm:$0xff] %v10391_v42  ;;  %v10393_v4 = vpop.eup %7178  ;;  %5589 = vadd.xlane.f32.xlu1 %v5588_v34  ;;  %5658 = vadd.xlane.f32.xlu0 %v5657_v44  ;;  %v5609_v34 = vadd.f32 %v10391_v42, %v10381_v18  ;;  %7200 = vpow2.f32 %v5411_v33  ;;  %v5238_v36 = vsub.f32 %v11941_v61, %v10141_v38  ;;  %v5401_v3 = vmul.f32 1.442695, %v5237_v58  ;;  %v11945_v33 = vld [vmem:[#allocation106_spill] sm:$0xff] }
 0xb46   : > { %11932 = vst [vmem:[#allocation34_spill] sm:$0xff] %v10393_v4  ;;  %v10395_v11 = vpop.eup %7180  ;;  %v5407_v40 = vmul.f32 1.442695, %v5240_v10  ;;  %7202 = vpow2.f32 %v5405_v23  ;;  %v5236_v38 = vsub.f32 %v11945_v33, %v10151_v43  ;;  %v11951_v33 = vld [vmem:[#allocation121_spill] sm:$0xff] }
 0xb47   : > { %11933 = vst [vmem:[#allocation35_spill] sm:$0xff] %v10395_v11  ;;  %v10399_v47 = vpop.eup %7182  ;;  %v10403_v28 = vpop.xlane.xlu1 %5136  ;;  %v5585_v48 = vadd.f32 %v10395_v11, %v10393_v4  ;;  %v5403_v10 = vmul.f32 1.442695, %v5238_v36  ;;  %v11949_v36 = vld [vmem:[#allocation97_spill] sm:$0xff] }
 0xb48   : > { %11936 = vst [vmem:[#allocation23_spill] sm:$0xff] %v10399_v47  ;;  %v10409_v44 = vpop.eup %7184  ;;  %7204 = vpow2.f32 %v5407_v40  ;;  %v5234_v40 = vsub.f32 %v11949_v36, %v10157_v21 }
 0xb49   : > { %11938 = vst [vmem:[#allocation24_spill] sm:$0xff] %v10409_v44  ;;  %5586 = vadd.xlane.f32.xlu1 %v5585_v48  ;;  %5610 = vadd.xlane.f32.xlu0 %v5609_v34  ;;  %v10413_v63 = vpop.eup %7186  ;;  %v5654_v11 = vadd.f32 %v10409_v44, %v10399_v47  ;;  %v5235_v48 = vsub.f32 %v11943_v22, %v10151_v43  ;;  %7206 = vpow2.f32 %v5401_v3  ;;  %v5399_v43 = vmul.f32 1.442695, %v5236_v38  ;;  %v11953_v3 = vld [vmem:[#allocation43_spill] sm:$0xff]  ;;  %v11955_v38 = vld [vmem:[#allocation62_spill] sm:$0xff] }
 0xb4a   : > { %11940 = vst [vmem:[#allocation33_spill] sm:$0xff] %v10413_v63  ;;  %v10421_v18 = vpop.eup %7188  ;;  %7208 = vpow2.f32 %v5403_v10 }
 0xb4b   : > { %v10417_v4 = vpop.xlane.xlu1 %5139  ;;  %11942 = vst [vmem:[#allocation30_spill] sm:$0xff] %v10421_v18  ;;  %v10425_v34 = vpop.eup %7190  ;;  %v5606_v61 = vadd.f32 %v10421_v18, %v10413_v63  ;;  %v5397_v22 = vmul.f32 1.442695, %v5235_v48  ;;  %v5327_v63 = vsub.f32 %v11951_v33, %v10161_v25  ;;  %v5325_v48 = vsub.f32 %v11953_v3, %v10165_v49 }
 0xb4c   : > { %11944 = vst [vmem:[#allocation29_spill] sm:$0xff] %v10425_v34  ;;  %v10433_v47 = vpop.eup %7192  ;;  %v5326_v33 = vsub.f32 %v11955_v38, %v10165_v49 }
 0xb4d   : > { %5655 = vadd.xlane.f32.xlu0 %v5654_v11  ;;  %11946 = vst [vmem:[#allocation21_spill] sm:$0xff] %v10433_v47  ;;  %v11947_v11 = vld [vmem:[#allocation104_spill] sm:$0xff]  ;;  %v10437_v58 = vpop.eup %7194  ;;  %v5651_v42 = vadd.f32 %v10433_v47, %v10425_v34  ;;  %7210 = vpow2.f32 %v5397_v22  ;;  %v5581_v10 = vmul.f32 1.442695, %v5327_v63 }
 0xb4e   : > { %v5233_v23 = vsub.f32 %v11947_v11, %v10157_v21  ;;  %11948 = vst [vmem:[#allocation22_spill] sm:$0xff] %v10437_v58  ;;  %v10441_v44 = vpop.eup %7196  ;;  %v5395_v21 = vmul.f32 1.442695, %v5234_v40  ;;  %7212 = vpow2.f32 %v5399_v43  ;;  %v5579_v63 = vmul.f32 1.442695, %v5326_v33  ;;  %v11957_v40 = vld [vmem:[#allocation136_spill] sm:$0xff] }
 0xb4f   : > { %v10429_v57 = vpop.xlane.xlu1 %5142  ;;  %11950 = vst [vmem:[#allocation28_spill] sm:$0xff] %v10441_v44  ;;  %v10451_v36 = vpop.eup %7198  ;;  %v5648_v34 = vadd.f32 %v10441_v44, %v10437_v58 }
 0xb50   : > { %v5393_v8 = vmul.f32 1.442695, %v5233_v23  ;;  %11954 = vst [vmem:[#allocation27_spill] sm:$0xff] %v10451_v36  ;;  %v5577_v23 = vmul.f32 1.442695, %v5325_v48  ;;  %v11959_v48 = vld [vmem:[#allocation135_spill] sm:$0xff] }
 0xb51   : > { %5607 = vadd.xlane.f32.xlu0 %v5606_v61  ;;  %v11952_v61 = vld [vmem:[#allocation60_spill] sm:$0xff] }
 0xb52   : > { %v5328_v11 = vsub.f32 %v11952_v61, %v10161_v25  ;;  %v10457_v47 = vpop.eup %7200  ;;  %7214 = vpow2.f32 %v5393_v8  ;;  %v11958_v8 = vld [vmem:[#allocation44_spill] sm:$0xff] }
 0xb53   : > { %v5146_v18 = vpop.xlane.xlu1 %5145  ;;  %11956 = vst [vmem:[#allocation40_spill] sm:$0xff] %v10457_v47  ;;  %7216 = vpow2.f32 %v5395_v21  ;;  %v10460_v22 = vpop.eup %7202  ;;  %v5645_v61 = vadd.f32 %v10457_v47, %v10451_v36  ;;  %v11960_v21 = vld [vmem:[#allocation64_spill] sm:$0xff] }
 0xb54   : > { %v5583_v25 = vmul.f32 1.442695, %v5328_v11  ;;  %7218 = vpow2.f32 %v5581_v10  ;;  %v5323_v11 = vsub.f32 %v11958_v8, %v10171_v15  ;;  %v5324_v10 = vsub.f32 %v11960_v21, %v10171_v15  ;;  %v11967_v21 = vld [vmem:[#allocation154_spill] sm:$0xff] }
 0xb55   : > { %5652 = vadd.xlane.f32.xlu0 %v5651_v42  ;;  %v10465_v3 = vpop.eup %7204 }
 0xb56   : > { %7220 = vpow2.f32 %v5583_v25  ;;  %v10474_v47 = vpop.eup %7206  ;;  %v11962_v25 = vld [vmem:[#allocation152_spill] sm:$0xff]  ;;  %v5573_v15 = vmul.f32 1.442695, %v5323_v11  ;;  %v5290_v11 = vsub.f32 %v11967_v21, %v10429_v57 }
 0xb57   : > { %v5149_v37 = vpop.xlane.xlu1 %5148  ;;  %7222 = vpow2.f32 %v5577_v23  ;;  %v5292_v58 = vsub.f32 %v11962_v25, %v5146_v18  ;;  %v10481_v23 = vpop.eup %7208 }
 0xb58   : > { %v5293_v42 = vsub.f32 %v10137_v53, %v5149_v37  ;;  %v5294_v43 = vsub.f32 %v11957_v40, %v5149_v37  ;;  %v11961_v37 = vld [vmem:[#allocation153_spill] sm:$0xff]  ;;  %7224 = vpow2.f32 %v5579_v63  ;;  %v5507_v21 = vmul.f32 1.442695, %v5290_v11 }
 0xb59   : > { %5649 = vadd.xlane.f32.xlu0 %v5648_v34  ;;  %v5291_v38 = vsub.f32 %v11961_v37, %v5146_v18  ;;  %v11965_v18 = vld [vmem:[#allocation139_spill] sm:$0xff]  ;;  %v5511_v37 = vmul.f32 1.442695, %v5292_v58  ;;  %v11972_v58 = vld [vmem:[#allocation17_spill] sm:$0xff] }
 0xb5a   : > { %v5513_v33 = vmul.f32 1.442695, %v5293_v42  ;;  %v5515_v8 = vmul.f32 1.442695, %v5294_v43  ;;  %v5575_v42 = vmul.f32 1.442695, %v5324_v10  ;;  %v5289_v63 = vsub.f32 %v11965_v18, %v10429_v57 }
 0xb5b   : > { %v5152_v49 = vpop.xlane.xlu1 %5151  ;;  %v5509_v43 = vmul.f32 1.442695, %v5291_v38  ;;  %v5639_v10 = vadd.f32 %v10481_v23, %v10474_v47 }
 0xb5c   : > { %v5295_v34 = vsub.f32 %v10145_v55, %v5152_v49  ;;  %v5296_v53 = vsub.f32 %v11959_v48, %v5152_v49  ;;  %v5642_v55 = vadd.f32 %v10465_v3, %v10460_v22  ;;  %v11963_v49 = vld [vmem:[#allocation91_spill] sm:$0xff] }
 0xb5d   : > { %5646 = vadd.xlane.f32.xlu0 %v5645_v61  ;;  %v5321_v61 = vsub.f32 %v11963_v49, %v10175_v60 }
 0xb5e   : > { %v5517_v40 = vmul.f32 1.442695, %v5295_v34  ;;  %v5519_v36 = vmul.f32 1.442695, %v5296_v53  ;;  %v11964_v34 = vld [vmem:[#allocation66_spill] sm:$0xff]  ;;  %v10489_v53 = vpop.eup %7210 }
 0xb5f   : > { %v10477_v44 = vpop.xlane.xlu1 %5127  ;;  %v5322_v48 = vsub.f32 %v11964_v34, %v10175_v60  ;;  %11966 = vst [vmem:[#allocation118_spill] sm:$0xff] %v10489_v53  ;;  %v10497_v60 = vpop.eup %7212  ;;  %v5505_v34 = vmul.f32 1.442695, %v5289_v63 }
 0xb60   : > { %7226 = vpow2.f32 %v5517_v40  ;;  %11968 = vst [vmem:[#allocation114_spill] sm:$0xff] %v10497_v60  ;;  %v11969_v40 = vld [vmem:[#allocation38_spill] sm:$0xff]  ;;  %v10503_v57 = vpop.eup %7214 }
 0xb61   : > { %7228 = vpow2.f32 %v5519_v36  ;;  %5643 = vadd.xlane.f32.xlu0 %v5642_v55  ;;  %v5569_v36 = vmul.f32 1.442695, %v5321_v61  ;;  %v5319_v38 = vsub.f32 %v11969_v40, %v10181_v20  ;;  %v11970_v55 = vld [vmem:[#allocation68_spill] sm:$0xff]  ;;  %11971 = vst [vmem:[#allocation125_spill] sm:$0xff] %v10503_v57  ;;  %v10507_v18 = vpop.eup %7216  ;;  %v11976_v40 = vld [vmem:[#allocation55_spill] sm:$0xff] }
 0xb62   : > { %7230 = vpow2.f32 %v5513_v33  ;;  %v5571_v33 = vmul.f32 1.442695, %v5322_v48  ;;  %v5320_v49 = vsub.f32 %v11970_v55, %v10181_v20  ;;  %11973 = vst [vmem:[#allocation79_spill] sm:$0xff] %v10507_v18  ;;  %v5636_v20 = vadd.f32 %v10497_v60, %v10489_v53  ;;  %v10515_v48 = vpop.eup %7218 }
 0xb63   : > { %7232 = vpow2.f32 %v5515_v8  ;;  %v10493_v25 = vpop.xlane.xlu1 %5172  ;;  %v5287_v8 = vsub.f32 %v11972_v58, %v10417_v4  ;;  %11975 = vst [vmem:[#allocation47_spill] sm:$0xff] %v10515_v48  ;;  %v5317_v63 = vsub.f32 %v11976_v40, %v10187_v45  ;;  %v11980_v58 = vld [vmem:[#allocation32_spill] sm:$0xff] }
 0xb64   : > { %7234 = vpow2.f32 %v5573_v15  ;;  %v11974_v15 = vld [vmem:[#allocation18_spill] sm:$0xff]  ;;  %v5567_v55 = vmul.f32 1.442695, %v5320_v49 }
 0xb65   : > { %7236 = vpow2.f32 %v5575_v42  ;;  %5640 = vadd.xlane.f32.xlu0 %v5639_v10  ;;  %v5288_v61 = vsub.f32 %v11974_v15, %v10417_v4  ;;  %v5565_v10 = vmul.f32 1.442695, %v5319_v38  ;;  %v11978_v4 = vld [vmem:[#allocation67_spill] sm:$0xff]  ;;  %v5285_v15 = vsub.f32 %v11980_v58, %v10403_v28 }
 0xb66   : > { %7238 = vpow2.f32 %v5509_v43  ;;  %v10519_v43 = vpop.eup %7220  ;;  %v5318_v11 = vsub.f32 %v11978_v4, %v10187_v45  ;;  %v5501_v53 = vmul.f32 1.442695, %v5287_v8  ;;  %v5561_v45 = vmul.f32 1.442695, %v5317_v63 }
 0xb67   : > { %7240 = vpow2.f32 %v5511_v37  ;;  %v10511_v42 = vpop.xlane.xlu1 %5124  ;;  %11977 = vst [vmem:[#allocation81_spill] sm:$0xff] %v10519_v43  ;;  %v10523_v37 = vpop.eup %7222  ;;  %v5503_v60 = vmul.f32 1.442695, %v5288_v61 }
 0xb68   : > { %7242 = vpow2.f32 %v5569_v36  ;;  %11979 = vst [vmem:[#allocation51_spill] sm:$0xff] %v10523_v37  ;;  %v11981_v36 = vld [vmem:[#allocation143_spill] sm:$0xff]  ;;  %v10533_v49 = vpop.eup %7224  ;;  %v5563_v8 = vmul.f32 1.442695, %v5318_v11 }
 0xb69   : > { %7244 = vpow2.f32 %v5571_v33  ;;  %5637 = vadd.xlane.f32.xlu0 %v5636_v20  ;;  %v5286_v38 = vsub.f32 %v11981_v36, %v10403_v28  ;;  %v5633_v33 = vadd.f32 %v10507_v18, %v10503_v57  ;;  %11982 = vst [vmem:[#allocation119_spill] sm:$0xff] %v10533_v49  ;;  %v11983_v20 = vld [vmem:[#allocation57_spill] sm:$0xff]  ;;  %v5497_v57 = vmul.f32 1.442695, %v5285_v15 }
 0xb6a   : > { %7246 = vpow2.f32 %v5505_v34  ;;  %v5315_v4 = vsub.f32 %v11983_v20, %v10197_v52  ;;  %v11985_v28 = vld [vmem:[#allocation69_spill] sm:$0xff]  ;;  %v11987_v20 = vld [vmem:[#allocation31_spill] sm:$0xff] }
 0xb6b   : > { %7248 = vpow2.f32 %v5507_v21  ;;  %v10529_v40 = vpop.xlane.xlu1 %5169  ;;  %v5316_v34 = vsub.f32 %v11985_v28, %v10197_v52  ;;  %v11986_v21 = vld [vmem:[#allocation39_spill] sm:$0xff]  ;;  %v5499_v11 = vmul.f32 1.442695, %v5286_v38 }
 0xb6c   : > { %7250 = vpow2.f32 %v5565_v10  ;;  %v5283_v36 = vsub.f32 %v11986_v21, %v10385_v0  ;;  %v5774_v10 = vadd.f32 %v10519_v43, %v10515_v48  ;;  %v5557_v15 = vmul.f32 1.442695, %v5315_v4 }
 0xb6d   : > { %v10537_v58 = vpop.eup %7226  ;;  %7252 = vpow2.f32 %v5567_v55  ;;  %5634 = vadd.xlane.f32.xlu0 %v5633_v33  ;;  %v5284_v55 = vsub.f32 %v11987_v20, %v10385_v0  ;;  %v5559_v48 = vmul.f32 1.442695, %v5316_v34  ;;  %v11989_v0 = vld [vmem:[#allocation99_spill] sm:$0xff]  ;;  %v11990_v20 = vld [vmem:[#allocation16_spill] sm:$0xff] }
 0xb6e   : > { %11984 = vst [vmem:[#allocation113_spill] sm:$0xff] %v10537_v58  ;;  %v10541_v61 = vpop.eup %7228  ;;  %7254 = vpow2.f32 %v5501_v53  ;;  %v11988_v53 = vld [vmem:[#allocation59_spill] sm:$0xff]  ;;  %v5314_v38 = vsub.f32 %v11989_v0, %v10331_v26  ;;  %v5281_v43 = vsub.f32 %v11990_v20, %v10367_v6 }
 0xb6f   : > { %v10547_v63 = vpop.eup %7230  ;;  %7256 = vpow2.f32 %v5503_v60  ;;  %v10551_v18 = vpop.xlane.xlu1 %5121  ;;  %v5726_v52 = vadd.f32 %v10541_v61, %v10537_v58  ;;  %v5313_v28 = vsub.f32 %v11988_v53, %v10331_v26  ;;  %v5493_v58 = vmul.f32 1.442695, %v5283_v36 }
 0xb70   : > { %v10555_v33 = vpop.eup %7232  ;;  %7258 = vpow2.f32 %v5561_v45  ;;  %v5771_v45 = vadd.f32 %v10533_v49, %v10523_v37  ;;  %v5495_v53 = vmul.f32 1.442695, %v5284_v55  ;;  %v5555_v37 = vmul.f32 1.442695, %v5314_v38 }
 0xb71   : > { %v10559_v21 = vpop.eup %7234  ;;  %7260 = vpow2.f32 %v5563_v8  ;;  %5727 = vadd.xlane.f32.xlu1 %v5726_v52  ;;  %5775 = vadd.xlane.f32.xlu0 %v5774_v10  ;;  %v11991_v8 = vld [vmem:[#allocation37_spill] sm:$0xff]  ;;  %v5723_v10 = vadd.f32 %v10555_v33, %v10547_v63  ;;  %v5553_v36 = vmul.f32 1.442695, %v5313_v28 }
 0xb72   : > { %v10563_v60 = vpop.eup %7236  ;;  %7262 = vpow2.f32 %v5497_v57  ;;  %v5282_v34 = vsub.f32 %v11991_v8, %v10367_v6  ;;  %v11992_v57 = vld [vmem:[#allocation72_spill] sm:$0xff]  ;;  %v11993_v6 = vld [vmem:[#allocation73_spill] sm:$0xff]  ;;  %v5489_v8 = vmul.f32 1.442695, %v5281_v43 }
 0xb73   : > { %v10569_v4 = vpop.eup %7238  ;;  %7264 = vpow2.f32 %v5499_v11  ;;  %v10573_v26 = vpop.xlane.xlu1 %5166  ;;  %v5311_v0 = vsub.f32 %v11992_v57, %v10349_v46  ;;  %v5312_v55 = vsub.f32 %v11993_v6, %v10349_v46  ;;  %v5768_v28 = vadd.f32 %v10563_v60, %v10559_v21  ;;  %v11998_v6 = vld [vmem:[#allocation15_spill] sm:$0xff] }
 0xb74   : > { %v10577_v52 = vpop.eup %7240  ;;  %7266 = vpow2.f32 %v5557_v15  ;;  %v5279_v15 = vsub.f32 %v10089_v5, %v10477_v44  ;;  %v5491_v49 = vmul.f32 1.442695, %v5282_v34  ;;  %v5309_v5 = vsub.f32 %v9837_v31, %v10493_v25 }
 0xb75   : > { %v10581_v20 = vpop.eup %7242  ;;  %7268 = vpow2.f32 %v5559_v48  ;;  %5724 = vadd.xlane.f32.xlu1 %v5723_v10  ;;  %5772 = vadd.xlane.f32.xlu0 %v5771_v45  ;;  %v5280_v48 = vsub.f32 %v10091_v24, %v10477_v44  ;;  %v5720_v38 = vadd.f32 %v10577_v52, %v10569_v4  ;;  %v5551_v34 = vmul.f32 1.442695, %v5312_v55 }
 0xb76   : > { %v10585_v11 = vpop.eup %7244  ;;  %7270 = vpow2.f32 %v5493_v58  ;;  %v5549_v58 = vmul.f32 1.442695, %v5311_v0  ;;  %v5485_v44 = vmul.f32 1.442695, %v5279_v15  ;;  %v5278_v55 = vsub.f32 %v11998_v6, %v10511_v42 }
 0xb77   : > { %v10591_v57 = vpop.eup %7246  ;;  %7272 = vpow2.f32 %v5495_v53  ;;  %v10595_v46 = vpop.xlane.xlu1 %5118  ;;  %v11995_v53 = vld [vmem:[#allocation70_spill] sm:$0xff]  ;;  %v5765_v0 = vadd.f32 %v10585_v11, %v10581_v20  ;;  %v5545_v15 = vmul.f32 1.442695, %v5309_v5 }
 0xb78   : > { %v10599_v43 = vpop.eup %7248  ;;  %7274 = vpow2.f32 %v5553_v36  ;;  %v5310_v10 = vsub.f32 %v11995_v53, %v10493_v25  ;;  %v5277_v36 = vsub.f32 %v10083_v32, %v10511_v42  ;;  %v5307_v32 = vsub.f32 %v9829_v2, %v10529_v40 }
 0xb79   : > { %v10603_v45 = vpop.eup %7250  ;;  %7276 = vpow2.f32 %v5555_v37  ;;  %5721 = vadd.xlane.f32.xlu1 %v5720_v38  ;;  %5769 = vadd.xlane.f32.xlu0 %v5768_v28  ;;  %v5487_v37 = vmul.f32 1.442695, %v5280_v48  ;;  %v5717_v28 = vadd.f32 %v10599_v43, %v10591_v57  ;;  %v12000_v48 = vld [vmem:[#allocation41_spill] sm:$0xff] }
 0xb7a   : > { %11994 = vst [vmem:[#allocation129_spill] sm:$0xff] %v10603_v45  ;;  %v10607_v24 = vpop.eup %7252  ;;  %7278 = vpow2.f32 %v5489_v8  ;;  %v5308_v53 = vsub.f32 %v12000_v48, %v10529_v40  ;;  %v5481_v6 = vmul.f32 1.442695, %v5277_v36 }
 0xb7b   : > { %11996 = vst [vmem:[#allocation49_spill] sm:$0xff] %v10607_v24  ;;  %v10613_v31 = vpop.eup %7254  ;;  %7280 = vpow2.f32 %v5491_v49  ;;  %v10617_v25 = vpop.xlane.xlu1 %5163  ;;  %v5547_v49 = vmul.f32 1.442695, %v5310_v10  ;;  %v5762_v5 = vadd.f32 %v10607_v24, %v10603_v45  ;;  %v5276_v10 = vsub.f32 %v10079_v19, %v10551_v18  ;;  %v12005_v24 = vld [vmem:[#allocation132_spill] sm:$0xff] }
 0xb7c   : > { %11997 = vst [vmem:[#allocation115_spill] sm:$0xff] %v10613_v31  ;;  %v10621_v8 = vpop.eup %7256  ;;  %7282 = vpow2.f32 %v5549_v58  ;;  %v5275_v58 = vsub.f32 %v10077_v51, %v10551_v18  ;;  %v12002_v51 = vld [vmem:[#allocation42_spill] sm:$0xff]  ;;  %v5543_v45 = vmul.f32 1.442695, %v5308_v53  ;;  %v12006_v53 = vld [vmem:[#allocation131_spill] sm:$0xff] }
 0xb7d   : > { %v10625_v38 = vpop.eup %7258  ;;  %7284 = vpow2.f32 %v5551_v34  ;;  %5718 = vadd.xlane.f32.xlu1 %v5717_v28  ;;  %5766 = vadd.xlane.f32.xlu0 %v5765_v0  ;;  %v5483_v34 = vmul.f32 1.442695, %v5278_v55  ;;  %v5714_v0 = vadd.f32 %v10621_v8, %v10613_v31  ;;  %v5305_v36 = vsub.f32 %v12002_v51, %v10573_v26 }
 0xb7e   : > { %11999 = vst [vmem:[#allocation122_spill] sm:$0xff] %v10625_v38  ;;  %v10629_v42 = vpop.eup %7260  ;;  %7286 = vpow2.f32 %v5485_v44  ;;  %v5541_v44 = vmul.f32 1.442695, %v5307_v32  ;;  %v5477_v18 = vmul.f32 1.442695, %v5275_v58  ;;  %v5274_v31 = vsub.f32 %v12006_v53, %v10595_v46 }
 0xb7f   : > { %12001 = vst [vmem:[#allocation134_spill] sm:$0xff] %v10629_v42  ;;  %v10635_v2 = vpop.eup %7262  ;;  %7288 = vpow2.f32 %v5487_v37  ;;  %v5116_v40 = vpop.xlane.xlu1 %5115  ;;  %v12004_v37 = vld [vmem:[#allocation61_spill] sm:$0xff]  ;;  %v5759_v32 = vadd.f32 %v10629_v42, %v10625_v38 }
 0xb80   : > { %v10641_v28 = vpop.eup %7264  ;;  %7290 = vpow2.f32 %v5545_v15  ;;  %v5306_v55 = vsub.f32 %v12004_v37, %v10573_v26  ;;  %v5273_v15 = vsub.f32 %v12005_v24, %v10595_v46  ;;  %v5303_v24 = vsub.f32 %v9813_v1, %v10617_v25 }
 0xb81   : > { %v10645_v48 = vpop.eup %7266  ;;  %7292 = vpow2.f32 %v5547_v49  ;;  %5715 = vadd.xlane.f32.xlu1 %v5714_v0  ;;  %5763 = vadd.xlane.f32.xlu0 %v5762_v5  ;;  %v5479_v49 = vmul.f32 1.442695, %v5276_v10  ;;  %v5711_v5 = vadd.f32 %v10641_v28, %v10635_v2  ;;  %v5271_v38 = vsub.f32 %v10065_v13, %v5116_v40 }
 0xb82   : > { %12003 = vst [vmem:[#allocation54_spill] sm:$0xff] %v10645_v48  ;;  %v10649_v19 = vpop.eup %7268  ;;  %7294 = vpow2.f32 %v5481_v6  ;;  %v5537_v6 = vmul.f32 1.442695, %v5305_v36  ;;  %v5539_v37 = vmul.f32 1.442695, %v5306_v55 }
 0xb83   : > { %v10655_v51 = vpop.eup %7270  ;;  %7296 = vpow2.f32 %v5483_v34  ;;  %v5161_v26 = vpop.xlane.xlu1 %5160  ;;  %v12008_v34 = vld [vmem:[#allocation63_spill] sm:$0xff]  ;;  %v5473_v53 = vmul.f32 1.442695, %v5273_v15  ;;  %v5475_v1 = vmul.f32 1.442695, %v5274_v31 }
 0xb84   : > { %v10661_v0 = vpop.eup %7272  ;;  %7298 = vpow2.f32 %v5541_v44  ;;  %v5304_v10 = vsub.f32 %v12008_v34, %v10617_v25  ;;  %v5756_v44 = vadd.f32 %v10649_v19, %v10645_v48  ;;  %v5301_v15 = vsub.f32 %v9805_v50, %v5161_v26  ;;  %v12011_v34 = vld [vmem:[#allocation76_spill] sm:$0xff] }
 0xb85   : > { %v10665_v58 = vpop.eup %7274  ;;  %7300 = vpow2.f32 %v5543_v45  ;;  %5712 = vadd.xlane.f32.xlu1 %v5711_v5  ;;  %5760 = vadd.xlane.f32.xlu0 %v5759_v32  ;;  %v12009_v45 = vld [vmem:[#allocation110_spill] sm:$0xff]  ;;  %v5708_v25 = vadd.f32 %v10661_v0, %v10655_v51  ;;  %v5302_v48 = vsub.f32 %v12011_v34, %v5161_v26 }
 0xb86   : > { %12007 = vst [vmem:[#allocation83_spill] sm:$0xff] %v10665_v58  ;;  %v10669_v46 = vpop.eup %7276  ;;  %7302 = vpow2.f32 %v5477_v18  ;;  %v5272_v55 = vsub.f32 %v12009_v45, %v5116_v40  ;;  %v5533_v18 = vmul.f32 1.442695, %v5303_v24  ;;  %v5535_v5 = vmul.f32 1.442695, %v5304_v10  ;;  %v12015_v34 = vld [vmem:[#allocation74_spill] sm:$0xff] }
 0xb87   : > { %v10674_v36 = vpop.eup %7278  ;;  %7304 = vpow2.f32 %v5479_v49  ;;  %v5113_v42 = vpop.xlane.xlu1 %5112  ;;  %v5469_v40 = vmul.f32 1.442695, %v5271_v38  ;;  %v12013_v38 = vld [vmem:[#allocation71_spill] sm:$0xff] }
 0xb88   : > { %v10679_v32 = vpop.eup %7280  ;;  %7306 = vpow2.f32 %v5537_v6  ;;  %v5269_v49 = vsub.f32 %v10059_v7, %v5113_v42  ;;  %v5753_v6 = vadd.f32 %v10669_v46, %v10665_v58  ;;  %v5471_v50 = vmul.f32 1.442695, %v5272_v55 }
 0xb89   : > { %v10682_v13 = vpop.eup %7282  ;;  %7308 = vpow2.f32 %v5539_v37  ;;  %5709 = vadd.xlane.f32.xlu1 %v5708_v25  ;;  %5757 = vadd.xlane.f32.xlu0 %v5756_v44  ;;  %v5270_v37 = vsub.f32 %v10061_v14, %v5113_v42  ;;  %v5705_v26 = vadd.f32 %v10679_v32, %v10674_v36  ;;  %v5531_v25 = vmul.f32 1.442695, %v5302_v48 }
 0xb8a   : > { %12010 = vst [vmem:[#allocation85_spill] sm:$0xff] %v10682_v13  ;;  %v10685_v31 = vpop.eup %7284  ;;  %7310 = vpow2.f32 %v5473_v53  ;;  %v5529_v53 = vmul.f32 1.442695, %v5301_v15  ;;  %v5465_v14 = vmul.f32 1.442695, %v5269_v49 }
 0xb8b   : > { %v10690_v24 = vpop.eup %7286  ;;  %7312 = vpow2.f32 %v5475_v1  ;;  %v5158_v10 = vpop.xlane.xlu1 %5157  ;;  %v5467_v55 = vmul.f32 1.442695, %v5270_v37 }
 0xb8c   : > { %12012 = vst [vmem:[#allocation48_spill] sm:$0xff] %v10690_v24  ;;  %v10695_v44 = vpop.eup %7288  ;;  %7314 = vpow2.f32 %v5533_v18  ;;  %v5299_v45 = vsub.f32 %v12013_v38, %v5158_v10  ;;  %v5300_v58 = vsub.f32 %v12015_v34, %v5158_v10  ;;  %v12017_v38 = vld [vmem:[#allocation111_spill] sm:$0xff] }
 0xb8d   : > { %v10698_v7 = vpop.eup %7290  ;;  %7316 = vpow2.f32 %v5535_v5  ;;  %5706 = vadd.xlane.f32.xlu1 %v5705_v26  ;;  %5754 = vadd.xlane.f32.xlu0 %v5753_v6  ;;  %v5702_v15 = vadd.f32 %v10695_v44, %v10690_v24  ;;  %v5750_v5 = vadd.f32 %v10685_v31, %v10682_v13  ;;  %v12016_v6 = vld [vmem:[#allocation112_spill] sm:$0xff] }
 0xb8e   : > { %12014 = vst [vmem:[#allocation56_spill] sm:$0xff] %v10698_v7  ;;  %v10701_v1 = vpop.eup %7292  ;;  %7318 = vpow2.f32 %v5469_v40  ;;  %v5525_v10 = vmul.f32 1.442695, %v5299_v45 }
 0xb8f   : > { %v10703_v42 = vpop.eup %7294  ;;  %7320 = vpow2.f32 %v5471_v50  ;;  %v5110_v18 = vpop.xlane.xlu1 %5109  ;;  %v5527_v50 = vmul.f32 1.442695, %v5300_v58  ;;  %v12020_v58 = vld [vmem:[#allocation65_spill] sm:$0xff] }
 0xb90   : > { %v10709_v48 = vpop.eup %7296  ;;  %7322 = vpow2.f32 %v5529_v53  ;;  %v5267_v26 = vsub.f32 %v12016_v6, %v5110_v18  ;;  %v5268_v40 = vsub.f32 %v12017_v38, %v5110_v18  ;;  %v5747_v18 = vadd.f32 %v10701_v1, %v10698_v7 }
 0xb91   : > { %v10713_v49 = vpop.eup %7298  ;;  %7324 = vpow2.f32 %v5531_v25  ;;  %5703 = vadd.xlane.f32.xlu1 %v5702_v15  ;;  %5751 = vadd.xlane.f32.xlu0 %v5750_v5  ;;  %v5699_v45 = vadd.f32 %v10709_v48, %v10703_v42  ;;  %v12021_v15 = vld [vmem:[#allocation130_spill] sm:$0xff] }
 0xb92   : > { %12018 = vst [vmem:[#allocation50_spill] sm:$0xff] %v10713_v49  ;;  %v10715_v37 = vpop.eup %7300  ;;  %7326 = vpow2.f32 %v5465_v14  ;;  %v5461_v34 = vmul.f32 1.442695, %v5267_v26  ;;  %v5463_v13 = vmul.f32 1.442695, %v5268_v40 }
 0xb93   : > { %12019 = vst [vmem:[#allocation116_spill] sm:$0xff] %v10715_v37  ;;  %v10717_v24 = vpop.eup %7302  ;;  %7328 = vpow2.f32 %v5467_v55  ;;  %v5155_v53 = vpop.xlane.xlu1 %5154 }
 0xb94   : > { %v10723_v6 = vpop.eup %7304  ;;  %7330 = vpow2.f32 %v5525_v10  ;;  %v5297_v25 = vsub.f32 %v12020_v58, %v5155_v53  ;;  %v5298_v5 = vsub.f32 %v12021_v15, %v5155_v53  ;;  %v5744_v53 = vadd.f32 %v10715_v37, %v10713_v49 }
 0xb95   : > { %v10727_v14 = vpop.eup %7306  ;;  %7332 = vpow2.f32 %v5527_v50  ;;  %5700 = vadd.xlane.f32.xlu1 %v5699_v45  ;;  %5748 = vadd.xlane.f32.xlu0 %v5747_v18  ;;  %v5696_v10 = vadd.f32 %v10723_v6, %v10717_v24  ;;  %v12022_v45 = vld [vmem:[#allocation128_spill] sm:$0xff] }
 0xb96   : > { %v10729_v55 = vpop.eup %7308  ;;  %7334 = vpow2.f32 %v5461_v34  ;;  %v5521_v26 = vmul.f32 1.442695, %v5297_v25  ;;  %v5523_v40 = vmul.f32 1.442695, %v5298_v5 }
 0xb97   : > { %v10731_v38 = vpop.eup %7310  ;;  %7336 = vpow2.f32 %v5463_v13  ;;  %v5107_v7 = vpop.xlane.xlu1 %5106 }
 0xb98   : > { %v10737_v58 = vpop.eup %7312  ;;  %v5265_v50 = vsub.f32 %v10047_v35, %v5107_v7  ;;  %v5266_v18 = vsub.f32 %v12022_v45, %v5107_v7  ;;  %7338 = vpow2.f32 %v5521_v26  ;;  %v5741_v35 = vadd.f32 %v10729_v55, %v10727_v14 }
 0xb99   : > { %v10741_v15 = vpop.eup %7314  ;;  %5697 = vadd.xlane.f32.xlu1 %v5696_v10  ;;  %5745 = vadd.xlane.f32.xlu0 %v5744_v53  ;;  %7340 = vpow2.f32 %v5523_v40  ;;  %v5693_v49 = vadd.f32 %v10737_v58, %v10731_v38 }
 0xb9a   : > { %12023 = vst [vmem:[#allocation45_spill] sm:$0xff] %v10741_v15  ;;  %v10743_v34 = vpop.eup %7316  ;;  %v5457_v13 = vmul.f32 1.442695, %v5265_v50  ;;  %v5459_v25 = vmul.f32 1.442695, %v5266_v18 }
 0xb9b   : > { %12024 = vst [vmem:[#allocation123_spill] sm:$0xff] %v10743_v34  ;;  %v10745_v5 = vpop.eup %7318  ;;  %v5738_v53 = vadd.f32 %v10743_v34, %v10741_v15 }
 0xb9c   : > { %12025 = vst [vmem:[#allocation58_spill] sm:$0xff] %v10745_v5  ;;  %v10751_v37 = vpop.eup %7320  ;;  %7342 = vpow2.f32 %v5457_v13 }
 0xb9d   : > { %v10753_v7 = vpop.eup %7322  ;;  %7344 = vpow2.f32 %v5459_v25  ;;  %5694 = vadd.xlane.f32.xlu1 %v5693_v49  ;;  %5742 = vadd.xlane.f32.xlu0 %v5741_v35  ;;  %v5690_v40 = vadd.f32 %v10751_v37, %v10745_v5 }
 0xb9e   : > { %12026 = vst [vmem:[#allocation87_spill] sm:$0xff] %v10753_v7  ;;  %v10755_v26 = vpop.eup %7324 }
 0xb9f   : > { %12027 = vst [vmem:[#allocation90_spill] sm:$0xff] %v10755_v26  ;;  %v10757_v10 = vpop.eup %7326  ;;  %v5735_v25 = vadd.f32 %v10755_v26, %v10753_v7 }
 0xba0   : > { %12028 = vst [vmem:[#allocation137_spill] sm:$0xff] %v10757_v10  ;;  %v10763_v50 = vpop.eup %7328 }
 0xba1   : > { %v10765_v45 = vpop.eup %7330  ;;  %5691 = vadd.xlane.f32.xlu1 %v5690_v40  ;;  %5739 = vadd.xlane.f32.xlu0 %v5738_v53  ;;  %v5687_v13 = vadd.f32 %v10763_v50, %v10757_v10 }
 0xba2   : > { %12029 = vst [vmem:[#allocation124_spill] sm:$0xff] %v10765_v45  ;;  %v10767_v18 = vpop.eup %7332 }
 0xba3   : > { %12030 = vst [vmem:[#allocation52_spill] sm:$0xff] %v10767_v18  ;;  %v10769_v49 = vpop.eup %7334  ;;  %v5732_v53 = vadd.f32 %v10767_v18, %v10765_v45 }
 0xba4   : > { %12031 = vst [vmem:[#allocation117_spill] sm:$0xff] %v10769_v49  ;;  %v10775_v35 = vpop.eup %7336 }
 0xba5   : > { %12032 = vst [vmem:[#allocation120_spill] sm:$0xff] %v10775_v35  ;;  %5688 = vadd.xlane.f32.xlu1 %v5687_v13  ;;  %5736 = vadd.xlane.f32.xlu0 %v5735_v25  ;;  %v10777_v15 = vpop.eup %7338  ;;  %v5684_v40 = vadd.f32 %v10775_v35, %v10769_v49 }
 0xba6   : > { %12033 = vst [vmem:[#allocation93_spill] sm:$0xff] %v10777_v15  ;;  %v10783_v34 = vpop.eup %7340 }
 0xba7   : > { %12034 = vst [vmem:[#allocation96_spill] sm:$0xff] %v10783_v34  ;;  %v5729_v25 = vadd.f32 %v10783_v34, %v10777_v15 }
 0xba9   : > { %v10785_v5 = vpop.eup %7342  ;;  %5685 = vadd.xlane.f32.xlu1 %v5684_v40  ;;  %5733 = vadd.xlane.f32.xlu0 %v5732_v53  ;;  %v1699_v40 = vld [vmem:[%s11039_s6 + $0x8] sm:$0xff] }
 0xbaa   : > { %12035 = vst [vmem:[#allocation144_spill] sm:$0xff] %v10785_v5  ;;  %v10787_v10 = vpop.eup %7344  ;;  %v5620_v7 = vpop.xlane.xlu0 %5619 }
 0xbab   : > { %12036 = vst [vmem:[#allocation98_spill] sm:$0xff] %v10787_v10  ;;  %v5681_v13 = vadd.f32 %v10787_v10, %v10785_v5  ;;  %v1700_v5 = vld [vmem:[%s11039_s6 + $0x10] sm:$0xff]  ;;  %v5605_v10 = vpop.xlane.xlu1 %5604 }
 0xbad   : > { %5682 = vadd.xlane.f32.xlu1 %v5681_v13  ;;  %5730 = vadd.xlane.f32.xlu0 %v5729_v25  ;;  %v1698_v13 = vld [vmem:[%s11039_s6] sm:$0xff] }
 0xbae   : > { %v5623_v49 = vpop.xlane.xlu0 %5622 }
 0xbb2   : > { %v5626_v35 = vpop.xlane.xlu0 %5625 }
 0xbb6   : > { %v5629_v45 = vpop.xlane.xlu0 %5628 }
 0xbb7   : > { %7346 = vrcp.f32 %v5629_v45 }
 0xbba   : > { %v5632_v18 = vpop.xlane.xlu0 %5631 }
 0xbbb   : > { %7348 = vrcp.f32 %v5632_v18  ;;  %v1701_v18 = vld [vmem:[%s11039_s6 + $0x18] sm:$0xff] }
 0xbbc   : > { %7350 = vrcp.f32 %v5626_v35 }
 0xbbe   : > { %3918 = vperm.xlu1 %6691, %v1699_v40   ;;  %v5665_v53 = vpop.xlane.xlu0 %5664 }
 0xbbf   : > { %7352 = vrcp.f32 %v5665_v53 }
 0xbc0   : > { %7354 = vrcp.f32 %v5623_v49 }
 0xbc1   : > { %7356 = vrcp.f32 %v5620_v7 }
 0xbc2   : > { %3923 = vperm.xlu1 %6691, %v1700_v5   ;;  %v5617_v45 = vpop.xlane.xlu0 %5616 }
 0xbc3   : > { %3913 = vperm.xlu0 %6690, %v1698_v13  }
 0xbc4   : > { %v7347_v40 = vpop.eup %7346 }
 0xbc5   : > { %v5870_v5 = vmul.f32 %v7347_v40, %v10279_v16  ;;  %v5602_v16 = vpop.xlane.xlu1 %5601 }
 0xbc6   : > { %v5662_v25 = vpop.xlane.xlu0 %5661 }
 0xbc7   : > { %3928 = vperm.xlu0 %6690, %v1701_v18   ;;  %7358 = vrcp.f32 %v5662_v25  ;;  %v5869_v18 = vmul.f32 %v7347_v40, %v10275_v30 }
 0xbc8   : > { %v7349_v35 = vpop.eup %7348  ;;  %7360 = vrcp.f32 %v5617_v45 }
 0xbc9   : > { %v5872_v53 = vmul.f32 %v7349_v35, %v10289_v39  ;;  %v5871_v15 = vmul.f32 %v7349_v35, %v10287_v17  ;;  %v7351_v49 = vpop.eup %7350  ;;  %v5599_v40 = vpop.xlane.xlu1 %5598 }
 0xbca   : > { %v5614_v34 = vpop.xlane.xlu0 %5613  ;;  %v5868_v17 = vmul.f32 %v7351_v49, %v10265_v12  ;;  %v5867_v45 = vmul.f32 %v7351_v49, %v10262_v54  ;;  %v12037_v54 = vld [vmem:[#allocation133_spill] sm:$0xff] }
 0xbcb   : > { %5969 = vmatprep.subr.mxu1 %v5872_v53  ;;  %7362 = vrcp.f32 %v5614_v34 }
 0xbcc   : > { %5970 = vmatpush1.xpose.msra.mxu1 %v5871_v15  ;;  %v7353_v13 = vpop.eup %7352 }
 0xbcd   : > { %5971 = vmatprep.subr.mxu1 %v5870_v5  ;;  %v5894_v7 = vmul.f32 %v7353_v13, %v10299_v9  ;;  %v5893_v25 = vmul.f32 %v7353_v13, %v10293_v41  ;;  %v7355_v39 = vpop.eup %7354  ;;  %v12038_v13 = vld [vmem:[#allocation108_spill] sm:$0xff] }
 0xbce   : > { %v5659_v26 = vpop.xlane.xlu0 %5658  ;;  %v5866_v35 = vmul.f32 %v7355_v39, %v10253_v27  ;;  %v7357_v9 = vpop.eup %7356  ;;  %v5865_v34 = vmul.f32 %v7355_v39, %v10248_v59 }
 0xbcf   : > { %7364 = vrcp.f32 %v5659_v26  ;;  %6049 = vmatprep.subr.mxu0 %v5894_v7  ;;  %v5864_v53 = vmul.f32 %v7357_v9, %v10237_v62  ;;  %v5863_v49 = vmul.f32 %v7357_v9, %v12037_v54  ;;  %v12039_v62 = vld [vmem:[#allocation77_spill] sm:$0xff]  ;;  %v12046_v54 = vld [vmem:[#allocation23_spill] sm:$0xff] }
 0xbd0   : > { %5972 = vmatpush1.xpose.msra.mxu1 %v5869_v18  ;;  %6050 = vmatpush1.xpose.msra.mxu0 %v5893_v25 }
 0xbd1   : > { %5973 = vmatprep.subr.mxu1 %v5868_v17  ;;  %v12040_v17 = vld [vmem:[#allocation148_spill] sm:$0xff] }
 0xbd2   : > { %v5611_v15 = vpop.xlane.xlu0 %5610 }
 0xbd3   : > { %7366 = vrcp.f32 %v5611_v15  ;;  %v12041_v15 = vld [vmem:[#allocation19_spill] sm:$0xff] }
 0xbd4   : > { %5974 = vmatpush1.xpose.msra.mxu1 %v5867_v45  ;;  %v7359_v30 = vpop.eup %7358 }
 0xbd5   : > { %5975 = vmatprep.subr.mxu1 %v5866_v35  ;;  %v5892_v12 = vmul.f32 %v7359_v30, %v10337_v29  ;;  %v5891_v26 = vmul.f32 %v7359_v30, %v10327_v56  ;;  %v7361_v5 = vpop.eup %7360  ;;  %v5596_v56 = vpop.xlane.xlu1 %5595 }
 0xbd6   : > { %v5656_v41 = vpop.xlane.xlu0 %5655  ;;  %v5862_v29 = vmul.f32 %v7361_v5, %v12038_v13  ;;  %v5861_v39 = vmul.f32 %v7361_v5, %v12040_v17  ;;  %v12045_v5 = vld [vmem:[#allocation24_spill] sm:$0xff]  ;;  %v12049_v17 = vld [vmem:[#allocation33_spill] sm:$0xff] }
 0xbd7   : > { %7368 = vrcp.f32 %v5656_v41  ;;  %6051 = vmatprep.subr.mxu0 %v5892_v12  ;;  %v12043_v41 = vld [vmem:[#allocation141_spill] sm:$0xff] }
 0xbd8   : > { %5976 = vmatpush1.xpose.msra.mxu1 %v5865_v34  ;;  %6052 = vmatpush1.xpose.msra.mxu0 %v5891_v26  ;;  %7370 = vrcp.f32 %v5605_v10  ;;  %v7363_v7 = vpop.eup %7362  ;;  %v12042_v10 = vld [vmem:[#allocation25_spill] sm:$0xff]  ;;  %v12044_v34 = vld [vmem:[#allocation36_spill] sm:$0xff] }
 0xbd9   : > { %5977 = vmatprep.subr.mxu1 %v5864_v53  ;;  %v5860_v35 = vmul.f32 %v7363_v7, %v12042_v10  ;;  %v5859_v12 = vmul.f32 %v7363_v7, %v12043_v41  ;;  %v12052_v41 = vld [vmem:[#allocation29_spill] sm:$0xff] }
 0xbda   : > { %v5608_v27 = vpop.xlane.xlu0 %5607 }
 0xbdb   : > { %7372 = vrcp.f32 %v5608_v27 }
 0xbdc   : > { %5978 = vmatpush1.xpose.msra.mxu1 %v5863_v49  ;;  %v7365_v59 = vpop.eup %7364  ;;  %7374 = vrcp.f32 %v5602_v16  ;;  %v5593_v16 = vpop.xlane.xlu1 %5592 }
 0xbdd   : > { %5979 = vmatprep.subr.mxu1 %v5862_v29  ;;  %v5890_v25 = vmul.f32 %v7365_v59, %v12039_v62  ;;  %v5889_v45 = vmul.f32 %v7365_v59, %v12041_v15  ;;  %v12047_v29 = vld [vmem:[#allocation78_spill] sm:$0xff] }
 0xbde   : > { %v5653_v18 = vpop.xlane.xlu0 %5652  ;;  %v12048_v62 = vld [vmem:[#allocation30_spill] sm:$0xff] }
 0xbdf   : > { %7376 = vrcp.f32 %v5653_v18  ;;  %6053 = vmatprep.subr.mxu0 %v5890_v25 }
 0xbe0   : > { %5980 = vmatpush1.xpose.msra.mxu1 %v5861_v39  ;;  %v7367_v9 = vpop.eup %7366  ;;  %6054 = vmatpush1.xpose.msra.mxu0 %v5889_v45  ;;  %7378 = vrcp.f32 %v5599_v40  ;;  %v5590_v7 = vpop.xlane.xlu1 %5589 }
 0xbe1   : > { %5981 = vmatprep.subr.mxu1 %v5860_v35  ;;  %v5858_v26 = vmul.f32 %v7367_v9, %v12044_v34  ;;  %v5857_v59 = vmul.f32 %v7367_v9, %v12047_v29  ;;  %v12051_v9 = vld [vmem:[#allocation21_spill] sm:$0xff] }
 0xbe2   : > { %v5650_v30 = vpop.xlane.xlu0 %5649 }
 0xbe3   : > { %7380 = vrcp.f32 %v5650_v30 }
 0xbe4   : > { %v7369_v53 = vpop.eup %7368  ;;  %5982 = vmatpush1.xpose.msra.mxu1 %v5859_v12  ;;  %7382 = vrcp.f32 %v5596_v56  ;;  %v12050_v56 = vld [vmem:[#allocation150_spill] sm:$0xff] }
 0xbe5   : > { %5983 = vmatprep.subr.mxu1 %v5858_v26  ;;  %v5888_v27 = vmul.f32 %v7369_v53, %v12045_v5  ;;  %v5887_v49 = vmul.f32 %v7369_v53, %v12046_v54  ;;  %v7371_v18 = vpop.eup %7370  ;;  %v12053_v26 = vld [vmem:[#allocation151_spill] sm:$0xff] }
 0xbe6   : > { %v5647_v13 = vpop.xlane.xlu0 %5646  ;;  %v5854_v10 = vmul.f32 %v7371_v18, %v12050_v56  ;;  %v5853_v53 = vmul.f32 %v7371_v18, %v12053_v26  ;;  %v12058_v18 = vld [vmem:[#allocation146_spill] sm:$0xff]  ;;  %v12059_v56 = vld [vmem:[#allocation40_spill] sm:$0xff] }
 0xbe7   : > { %7384 = vrcp.f32 %v5647_v13  ;;  %6055 = vmatprep.subr.mxu0 %v5888_v27  ;;  %v5587_v27 = vpop.xlane.xlu1 %5586  ;;  %v12055_v13 = vld [vmem:[#allocation28_spill] sm:$0xff] }
 0xbe8   : > { %v7373_v40 = vpop.eup %7372  ;;  %5984 = vmatpush1.xpose.msra.mxu1 %v5857_v59  ;;  %6056 = vmatpush1.xpose.msra.mxu0 %v5887_v49  ;;  %7386 = vrcp.f32 %v5593_v16  ;;  %v12054_v16 = vld [vmem:[#allocation149_spill] sm:$0xff]  ;;  %v12056_v59 = vld [vmem:[#allocation22_spill] sm:$0xff] }
 0xbe9   : > { %v5856_v25 = vmul.f32 %v7373_v40, %v12048_v62  ;;  %v5855_v39 = vmul.f32 %v7373_v40, %v12049_v17  ;;  %v7375_v45 = vpop.eup %7374 }
 0xbea   : > { %v5644_v15 = vpop.xlane.xlu0 %5643  ;;  %v5852_v54 = vmul.f32 %v7375_v45, %v12054_v16 }
 0xbeb   : > { %7388 = vrcp.f32 %v5644_v15  ;;  %5985 = vmatprep.subr.mxu1 %v5856_v25 }
 0xbec   : > { %v7377_v35 = vpop.eup %7376  ;;  %5986 = vmatpush1.xpose.msra.mxu1 %v5855_v39  ;;  %7390 = vrcp.f32 %v5590_v7  ;;  %v12057_v7 = vld [vmem:[#allocation109_spill] sm:$0xff] }
 0xbed   : > { %5987 = vmatprep.subr.mxu1 %v5854_v10  ;;  %v5886_v30 = vmul.f32 %v7377_v35, %v12051_v9  ;;  %v5885_v12 = vmul.f32 %v7377_v35, %v12052_v41  ;;  %v7379_v5 = vpop.eup %7378  ;;  %v5851_v25 = vmul.f32 %v7375_v45, %v12057_v7  ;;  %v12060_v35 = vld [vmem:[#allocation27_spill] sm:$0xff]  ;;  %v12062_v45 = vld [vmem:[#allocation142_spill] sm:$0xff] }
 0xbee   : > { %v5641_v34 = vpop.xlane.xlu0 %5640  ;;  %v5850_v39 = vmul.f32 %v7379_v5, %v12058_v18  ;;  %v12061_v41 = vld [vmem:[#allocation147_spill] sm:$0xff]  ;;  %v12065_v18 = vld [vmem:[#allocation20_spill] sm:$0xff] }
 0xbef   : > { %7392 = vrcp.f32 %v5641_v34  ;;  %6057 = vmatprep.subr.mxu0 %v5886_v30 }
 0xbf0   : > { %v7381_v49 = vpop.eup %7380  ;;  %5988 = vmatpush1.xpose.msra.mxu1 %v5853_v53  ;;  %6058 = vmatpush1.xpose.msra.mxu0 %v5885_v12  ;;  %7394 = vrcp.f32 %v5587_v27  ;;  %v5849_v12 = vmul.f32 %v7379_v5, %v12061_v41  ;;  %v12064_v5 = vld [vmem:[#allocation26_spill] sm:$0xff] }
 0xbf1   : > { %5989 = vmatprep.subr.mxu1 %v5852_v54  ;;  %v5884_v29 = vmul.f32 %v7381_v49, %v12055_v13  ;;  %v5883_v40 = vmul.f32 %v7381_v49, %v12056_v59  ;;  %v7383_v17 = vpop.eup %7382  ;;  %v12063_v13 = vld [vmem:[#allocation145_spill] sm:$0xff] }
 0xbf2   : > { %v5638_v62 = vpop.xlane.xlu0 %5637  ;;  %v5848_v26 = vmul.f32 %v7383_v17, %v12062_v45 }
 0xbf3   : > { %7396 = vrcp.f32 %v5638_v62  ;;  %6059 = vmatprep.subr.mxu0 %v5884_v29  ;;  %v5847_v29 = vmul.f32 %v7383_v17, %v12063_v13  ;;  %v12066_v17 = vld [vmem:[#allocation80_spill] sm:$0xff] }
 0xbf4   : > { %v7385_v15 = vpop.eup %7384  ;;  %5990 = vmatpush1.xpose.msra.mxu1 %v5851_v25  ;;  %6060 = vmatpush1.xpose.msra.mxu0 %v5883_v40 }
 0xbf5   : > { %5991 = vmatprep.subr.mxu1 %v5850_v39  ;;  %v5882_v10 = vmul.f32 %v7385_v15, %v12059_v56  ;;  %v5881_v9 = vmul.f32 %v7385_v15, %v12060_v35  ;;  %v7387_v34 = vpop.eup %7386  ;;  %v12067_v35 = vld [vmem:[#allocation114_spill] sm:$0xff] }
 0xbf6   : > { %v5635_v30 = vpop.xlane.xlu0 %5634  ;;  %v5846_v40 = vmul.f32 %v7387_v34, %v12064_v5  ;;  %v5845_v39 = vmul.f32 %v7387_v34, %v12065_v18  ;;  %v12070_v34 = vld [vmem:[#allocation35_spill] sm:$0xff]  ;;  %v12073_v5 = vld [vmem:[#allocation34_spill] sm:$0xff] }
 0xbf7   : > { %7398 = vrcp.f32 %v5635_v30  ;;  %6061 = vmatprep.subr.mxu0 %v5882_v10  ;;  %v12068_v30 = vld [vmem:[#allocation118_spill] sm:$0xff] }
 0xbf8   : > { %v7389_v53 = vpop.eup %7388  ;;  %5992 = vmatpush1.xpose.msra.mxu1 %v5849_v12  ;;  %6062 = vmatpush1.xpose.msra.mxu0 %v5881_v9  ;;  %v12069_v12 = vld [vmem:[#allocation75_spill] sm:$0xff] }
 0xbf9   : > { %5993 = vmatprep.subr.mxu1 %v5848_v26  ;;  %v5880_v27 = vmul.f32 %v7389_v53, %v10465_v3  ;;  %v5879_v16 = vmul.f32 %v7389_v53, %v10460_v22  ;;  %v7391_v59 = vpop.eup %7390 }
 0xbfa   : > { %v5728_v54 = vpop.xlane.xlu1 %5727  ;;  %v5776_v49 = vpop.xlane.xlu0 %5775  ;;  %v5844_v56 = vmul.f32 %v7391_v59, %v12066_v17  ;;  %v5843_v45 = vmul.f32 %v7391_v59, %v12069_v12 }
 0xbfb   : > { %7400 = vrcp.f32 %v5728_v54  ;;  %6063 = vmatprep.subr.mxu0 %v5880_v27  ;;  %v12071_v27 = vld [vmem:[#allocation79_spill] sm:$0xff]  ;;  %v12072_v54 = vld [vmem:[#allocation125_spill] sm:$0xff] }
 0xbfc   : > { %v7393_v62 = vpop.eup %7392  ;;  %7402 = vrcp.f32 %v5776_v49  ;;  %5994 = vmatpush1.xpose.msra.mxu1 %v5847_v29  ;;  %6064 = vmatpush1.xpose.msra.mxu0 %v5879_v16 }
 0xbfd   : > { %5995 = vmatprep.subr.mxu1 %v5846_v40  ;;  %v5878_v7 = vmul.f32 %v7393_v62, %v10481_v23  ;;  %v5877_v3 = vmul.f32 %v7393_v62, %v10474_v47  ;;  %v7395_v15 = vpop.eup %7394 }
 0xbfe   : > { %v5725_v25 = vpop.xlane.xlu1 %5724  ;;  %v5773_v22 = vpop.xlane.xlu0 %5772  ;;  %v5842_v26 = vmul.f32 %v7395_v15, %v12070_v34  ;;  %v5841_v40 = vmul.f32 %v7395_v15, %v12073_v5  ;;  %v12078_v15 = vld [vmem:[#allocation84_spill] sm:$0xff]  ;;  %v12081_v34 = vld [vmem:[#allocation119_spill] sm:$0xff] }
 0xbff   : > { %7404 = vrcp.f32 %v5725_v25  ;;  %6065 = vmatprep.subr.mxu0 %v5878_v7 }
 0xc00   : > { %v7397_v10 = vpop.eup %7396  ;;  %7406 = vrcp.f32 %v5773_v22  ;;  %5996 = vmatpush1.xpose.msra.mxu1 %v5845_v39  ;;  %6066 = vmatpush1.xpose.msra.mxu0 %v5877_v3  ;;  %v12074_v3 = vld [vmem:[#allocation113_spill] sm:$0xff] }
 0xc01   : > { %5997 = vmatprep.subr.mxu1 %v5844_v56  ;;  %v5876_v9 = vmul.f32 %v7397_v10, %v12067_v35  ;;  %v5875_v23 = vmul.f32 %v7397_v10, %v12068_v30  ;;  %v12075_v39 = vld [vmem:[#allocation81_spill] sm:$0xff]  ;;  %v12076_v56 = vld [vmem:[#allocation47_spill] sm:$0xff]  ;;  %v12077_v35 = vld [vmem:[#allocation82_spill] sm:$0xff] }
 0xc02   : > { %v5722_v41 = vpop.xlane.xlu1 %5721  ;;  %v5770_v47 = vpop.xlane.xlu0 %5769 }
 0xc03   : > { %7408 = vrcp.f32 %v5722_v41  ;;  %6067 = vmatprep.subr.mxu0 %v5876_v9 }
 0xc04   : > { %v7399_v53 = vpop.eup %7398  ;;  %7410 = vrcp.f32 %v5770_v47  ;;  %5998 = vmatpush1.xpose.msra.mxu1 %v5843_v45  ;;  %6068 = vmatpush1.xpose.msra.mxu0 %v5875_v23  ;;  %v12080_v47 = vld [vmem:[#allocation86_spill] sm:$0xff] }
 0xc05   : > { %5999 = vmatprep.subr.mxu1 %v5842_v26  ;;  %v5874_v16 = vmul.f32 %v7399_v53, %v12071_v27  ;;  %v5873_v49 = vmul.f32 %v7399_v53, %v12072_v54  ;;  %v12082_v53 = vld [vmem:[#allocation51_spill] sm:$0xff] }
 0xc06   : > { %v5719_v13 = vpop.xlane.xlu1 %5718  ;;  %v5767_v29 = vpop.xlane.xlu0 %5766 }
 0xc07   : > { %7412 = vrcp.f32 %v5719_v13  ;;  %6069 = vmatprep.subr.mxu0 %v5874_v16 }
 0xc08   : > { %v7401_v59 = vpop.eup %7400  ;;  %7414 = vrcp.f32 %v5767_v29  ;;  %6000 = vmatpush1.xpose.msra.mxu1 %v5841_v40  ;;  %6070 = vmatpush1.xpose.msra.mxu0 %v5873_v49 }
 0xc09   : > { %v7403_v62 = vpop.eup %7402  ;;  %v5936_v7 = vmul.f32 %v7401_v59, %v10541_v61  ;;  %v5935_v25 = vmul.f32 %v7401_v59, %v12074_v3  ;;  %v12079_v61 = vld [vmem:[#allocation88_spill] sm:$0xff] }
 0xc0a   : > { %v5716_v22 = vpop.xlane.xlu1 %5715  ;;  %v5764_v18 = vpop.xlane.xlu0 %5763  ;;  %v5968_v17 = vmul.f32 %v7403_v62, %v12075_v39  ;;  %v5967_v10 = vmul.f32 %v7403_v62, %v12076_v56 }
 0xc0b   : > { %7416 = vrcp.f32 %v5716_v22  ;;  %6034 = vmatmul.mubr.f32.vlgmr.msra.gmra.mxu1 %v12077_v35  ;;  %6104 = vmatmul.mubr.f32.vlgmr.msra.gmra.mxu0 %v12078_v15 }
 0xc0c   : > { %v7405_v9 = vpop.eup %7404  ;;  %7418 = vrcp.f32 %v5764_v18  ;;  %6109 = vmatprep.subr.mxu1 %v5936_v7  ;;  %6179 = vmatprep.subr.mxu0 %v5968_v17  ;;  %v12083_v18 = vld [vmem:[#allocation115_spill] sm:$0xff]  ;;  %v12084_v17 = vld [vmem:[#allocation49_spill] sm:$0xff] }
 0xc0d   : > { %v7407_v30 = vpop.eup %7406  ;;  %6110 = vmatpush1.xpose.msra.mxu1 %v5935_v25  ;;  %6173 = vmatprep.mubr.f32.mxu1 %v12079_v61  ;;  %v5934_v23 = vmul.f32 %v7405_v9, %v10555_v33  ;;  %v5933_v41 = vmul.f32 %v7405_v9, %v10547_v63  ;;  %v12086_v61 = vld [vmem:[#allocation134_spill] sm:$0xff] }
 0xc0e   : > { %6180 = vmatpush1.xpose.msra.mxu0 %v5967_v10  ;;  %6243 = vmatprep.mubr.f32.mxu0 %v12080_v47  ;;  %v5713_v12 = vpop.xlane.xlu1 %5712  ;;  %v5761_v45 = vpop.xlane.xlu0 %5760  ;;  %v5966_v26 = vmul.f32 %v7407_v30, %v12081_v34  ;;  %v5965_v27 = vmul.f32 %v7407_v30, %v12082_v53  ;;  %v12085_v10 = vld [vmem:[#allocation129_spill] sm:$0xff] }
 0xc0f   : > { %7420 = vrcp.f32 %v5713_v12  ;;  %6111 = vmatprep.subr.mxu1 %v5934_v23 }
 0xc10   : > { %v7409_v16 = vpop.eup %7408  ;;  %7422 = vrcp.f32 %v5761_v45  ;;  %6181 = vmatprep.subr.mxu0 %v5966_v26 }
 0xc11   : > { %v7411_v54 = vpop.eup %7410  ;;  %6112 = vmatpush1.xpose.msra.mxu1 %v5933_v41  ;;  %v5932_v33 = vmul.f32 %v7409_v16, %v10577_v52  ;;  %v5931_v63 = vmul.f32 %v7409_v16, %v10569_v4  ;;  %v12087_v41 = vld [vmem:[#allocation122_spill] sm:$0xff] }
 0xc12   : > { %6182 = vmatpush1.xpose.msra.mxu0 %v5965_v27  ;;  %v5710_v49 = vpop.xlane.xlu1 %5709  ;;  %v5758_v13 = vpop.xlane.xlu0 %5757  ;;  %v5964_v29 = vmul.f32 %v7411_v54, %v10563_v60  ;;  %v5963_v5 = vmul.f32 %v7411_v54, %v10559_v21  ;;  %v12088_v27 = vld [vmem:[#allocation54_spill] sm:$0xff] }
 0xc13   : > { %7424 = vrcp.f32 %v5710_v49  ;;  %6113 = vmatprep.subr.mxu1 %v5932_v33 }
 0xc14   : > { %v7413_v40 = vpop.eup %7412  ;;  %7426 = vrcp.f32 %v5758_v13  ;;  %6183 = vmatprep.subr.mxu0 %v5964_v29  ;;  %v12089_v29 = vld [vmem:[#allocation83_spill] sm:$0xff] }
 0xc15   : > { %v7415_v59 = vpop.eup %7414  ;;  %6114 = vmatpush1.xpose.msra.mxu1 %v5931_v63  ;;  %v5930_v62 = vmul.f32 %v7413_v40, %v10599_v43  ;;  %v5929_v52 = vmul.f32 %v7413_v40, %v10591_v57 }
 0xc16   : > { %6184 = vmatpush1.xpose.msra.mxu0 %v5963_v5  ;;  %v5707_v4 = vpop.xlane.xlu1 %5706  ;;  %v5755_v7 = vpop.xlane.xlu0 %5754  ;;  %v5962_v3 = vmul.f32 %v7415_v59, %v10585_v11  ;;  %v5961_v60 = vmul.f32 %v7415_v59, %v10581_v20 }
 0xc17   : > { %7428 = vrcp.f32 %v5707_v4  ;;  %6115 = vmatprep.subr.mxu1 %v5930_v62  ;;  %v12090_v62 = vld [vmem:[#allocation48_spill] sm:$0xff] }
 0xc18   : > { %v7417_v21 = vpop.eup %7416  ;;  %7430 = vrcp.f32 %v5755_v7  ;;  %6185 = vmatprep.subr.mxu0 %v5962_v3  ;;  %v12091_v7 = vld [vmem:[#allocation85_spill] sm:$0xff] }
 0xc19   : > { %v7419_v25 = vpop.eup %7418  ;;  %6116 = vmatpush1.xpose.msra.mxu1 %v5929_v52  ;;  %v5928_v22 = vmul.f32 %v7417_v21, %v10621_v8  ;;  %v5927_v43 = vmul.f32 %v7417_v21, %v12083_v18 }
 0xc1a   : > { %6186 = vmatpush1.xpose.msra.mxu0 %v5961_v60  ;;  %v5704_v57 = vpop.xlane.xlu1 %5703  ;;  %v5752_v39 = vpop.xlane.xlu0 %5751  ;;  %v5960_v56 = vmul.f32 %v7419_v25, %v12084_v17  ;;  %v5959_v11 = vmul.f32 %v7419_v25, %v12085_v10  ;;  %v12093_v10 = vld [vmem:[#allocation116_spill] sm:$0xff] }
 0xc1b   : > { %7432 = vrcp.f32 %v5704_v57  ;;  %6117 = vmatprep.subr.mxu1 %v5928_v22 }
 0xc1c   : > { %v7421_v20 = vpop.eup %7420  ;;  %7434 = vrcp.f32 %v5752_v39  ;;  %6187 = vmatprep.subr.mxu0 %v5960_v56 }
 0xc1d   : > { %v7423_v35 = vpop.eup %7422  ;;  %6118 = vmatpush1.xpose.msra.mxu1 %v5927_v43  ;;  %v5926_v15 = vmul.f32 %v7421_v20, %v10641_v28  ;;  %v5925_v8 = vmul.f32 %v7421_v20, %v10635_v2  ;;  %v12092_v43 = vld [vmem:[#allocation56_spill] sm:$0xff]  ;;  %v12094_v20 = vld [vmem:[#allocation50_spill] sm:$0xff] }
 0xc1e   : > { %6188 = vmatpush1.xpose.msra.mxu0 %v5959_v11  ;;  %v5701_v9 = vpop.xlane.xlu1 %5700  ;;  %v5749_v30 = vpop.xlane.xlu0 %5748  ;;  %v5958_v23 = vmul.f32 %v7423_v35, %v12086_v61  ;;  %v5957_v47 = vmul.f32 %v7423_v35, %v12087_v41 }
 0xc1f   : > { %7436 = vrcp.f32 %v5701_v9  ;;  %6119 = vmatprep.subr.mxu1 %v5926_v15 }
 0xc20   : > { %v7425_v12 = vpop.eup %7424  ;;  %7438 = vrcp.f32 %v5749_v30  ;;  %6189 = vmatprep.subr.mxu0 %v5958_v23 }
 0xc21   : > { %v7427_v45 = vpop.eup %7426  ;;  %6120 = vmatpush1.xpose.msra.mxu1 %v5925_v8  ;;  %v5924_v34 = vmul.f32 %v7425_v12, %v10661_v0  ;;  %v5923_v28 = vmul.f32 %v7425_v12, %v10655_v51 }
 0xc22   : > { %6190 = vmatpush1.xpose.msra.mxu0 %v5957_v47  ;;  %v5698_v2 = vpop.xlane.xlu1 %5697  ;;  %v5746_v26 = vpop.xlane.xlu0 %5745  ;;  %v5956_v53 = vmul.f32 %v7427_v45, %v10649_v19  ;;  %v5955_v16 = vmul.f32 %v7427_v45, %v12088_v27  ;;  %v12099_v27 = vld [vmem:[#allocation12_spill] sm:$0xff] }
 0xc23   : > { %7440 = vrcp.f32 %v5698_v2  ;;  %6121 = vmatprep.subr.mxu1 %v5924_v34 }
 0xc24   : > { %v7429_v54 = vpop.eup %7428  ;;  %7442 = vrcp.f32 %v5746_v26  ;;  %6191 = vmatprep.subr.mxu0 %v5956_v53 }
 0xc25   : > { %v7431_v33 = vpop.eup %7430  ;;  %6122 = vmatpush1.xpose.msra.mxu1 %v5923_v28  ;;  %v5922_v63 = vmul.f32 %v7429_v54, %v10679_v32  ;;  %v5921_v0 = vmul.f32 %v7429_v54, %v10674_v36  ;;  %v12098_v28 = vld [vmem:[#allocation127_spill] sm:$0xff]  ;;  %v12100_v54 = vld [vmem:[#allocation137_spill] sm:$0xff] }
 0xc26   : > { %6192 = vmatpush1.xpose.msra.mxu0 %v5955_v16  ;;  %v5695_v51 = vpop.xlane.xlu1 %5694  ;;  %v5743_v49 = vpop.xlane.xlu0 %5742  ;;  %v5954_v13 = vmul.f32 %v7431_v33, %v10669_v46  ;;  %v5953_v19 = vmul.f32 %v7431_v33, %v12089_v29 }
 0xc27   : > { %7444 = vrcp.f32 %v5695_v51  ;;  %6123 = vmatprep.subr.mxu1 %v5922_v63  ;;  %v12101_v51 = vld [vmem:[#allocation90_spill] sm:$0xff] }
 0xc28   : > { %v7433_v5 = vpop.eup %7432  ;;  %7446 = vrcp.f32 %v5743_v49  ;;  %6193 = vmatprep.subr.mxu0 %v5954_v13  ;;  %v12102_v13 = vld [vmem:[#allocation87_spill] sm:$0xff] }
 0xc29   : > { %v7435_v40 = vpop.eup %7434  ;;  %6124 = vmatpush1.xpose.msra.mxu1 %v5921_v0  ;;  %v5920_v59 = vmul.f32 %v7433_v5, %v10695_v44  ;;  %v5919_v32 = vmul.f32 %v7433_v5, %v12090_v62 }
 0xc2a   : > { %6194 = vmatpush1.xpose.msra.mxu0 %v5953_v19  ;;  %v5692_v36 = vpop.xlane.xlu1 %5691  ;;  %v5740_v52 = vpop.xlane.xlu0 %5739  ;;  %v5952_v4 = vmul.f32 %v7435_v40, %v10685_v31  ;;  %v5951_v46 = vmul.f32 %v7435_v40, %v12091_v7  ;;  %v12103_v19 = vld [vmem:[#allocation46_spill] sm:$0xff]  ;;  %v12107_v7 = vld [vmem:[#allocation120_spill] sm:$0xff] }
 0xc2b   : > { %7448 = vrcp.f32 %v5692_v36  ;;  %6125 = vmatprep.subr.mxu1 %v5920_v59 }
 0xc2c   : > { %v7437_v3 = vpop.eup %7436  ;;  %7450 = vrcp.f32 %v5740_v52  ;;  %6195 = vmatprep.subr.mxu0 %v5952_v4  ;;  %v12106_v52 = vld [vmem:[#allocation13_spill] sm:$0xff] }
 0xc2d   : > { %v7439_v60 = vpop.eup %7438  ;;  %6126 = vmatpush1.xpose.msra.mxu1 %v5919_v32  ;;  %v5918_v21 = vmul.f32 %v7437_v3, %v10709_v48  ;;  %v5917_v44 = vmul.f32 %v7437_v3, %v10703_v42  ;;  %v12105_v32 = vld [vmem:[#allocation10_spill] sm:$0xff]  ;;  %v12108_v3 = vld [vmem:[#allocation117_spill] sm:$0xff] }
 0xc2e   : > { %6196 = vmatpush1.xpose.msra.mxu0 %v5951_v46  ;;  %v5689_v25 = vpop.xlane.xlu1 %5688  ;;  %v5737_v22 = vpop.xlane.xlu0 %5736  ;;  %v5950_v18 = vmul.f32 %v7439_v60, %v10701_v1  ;;  %v5949_v31 = vmul.f32 %v7439_v60, %v12092_v43  ;;  %v12111_v43 = vld [vmem:[#allocation53_spill] sm:$0xff] }
 0xc2f   : > { %7452 = vrcp.f32 %v5689_v25  ;;  %6127 = vmatprep.subr.mxu1 %v5918_v21 }
 0xc30   : > { %v7441_v57 = vpop.eup %7440  ;;  %7454 = vrcp.f32 %v5737_v22  ;;  %6197 = vmatprep.subr.mxu0 %v5950_v18  ;;  %v12110_v22 = vld [vmem:[#allocation124_spill] sm:$0xff] }
 0xc31   : > { %v7443_v39 = vpop.eup %7442  ;;  %6128 = vmatpush1.xpose.msra.mxu1 %v5917_v44  ;;  %v5916_v17 = vmul.f32 %v7441_v57, %v10723_v6  ;;  %v5915_v48 = vmul.f32 %v7441_v57, %v10717_v24  ;;  %v12109_v44 = vld [vmem:[#allocation52_spill] sm:$0xff] }
 0xc32   : > { %6198 = vmatpush1.xpose.msra.mxu0 %v5949_v31  ;;  %v5686_v42 = vpop.xlane.xlu1 %5685  ;;  %v5734_v56 = vpop.xlane.xlu0 %5733  ;;  %v5948_v11 = vmul.f32 %v7443_v39, %v12093_v10  ;;  %v5947_v1 = vmul.f32 %v7443_v39, %v12094_v20  ;;  %v12114_v10 = vld [vmem:[#allocation144_spill] sm:$0xff] }
 0xc33   : > { %7456 = vrcp.f32 %v5686_v42  ;;  %6129 = vmatprep.subr.mxu1 %v5916_v17  ;;  %v12112_v17 = vld [vmem:[#allocation8_spill] sm:$0xff]  ;;  %v12113_v42 = vld [vmem:[#allocation98_spill] sm:$0xff] }
 0xc34   : > { %v7445_v35 = vpop.eup %7444  ;;  %7458 = vrcp.f32 %v5734_v56  ;;  %6199 = vmatprep.subr.mxu0 %v5948_v11  ;;  %v12115_v20 = vld [vmem:[#allocation96_spill] sm:$0xff] }
 0xc35   : > { %v7447_v15 = vpop.eup %7446  ;;  %6130 = vmatpush1.xpose.msra.mxu1 %v5915_v48  ;;  %v5914_v6 = vmul.f32 %v7445_v35, %v10737_v58  ;;  %v5913_v24 = vmul.f32 %v7445_v35, %v10731_v38  ;;  %v12095_v38 = vld [vmem:[#allocation58_spill] sm:$0xff]  ;;  %v12116_v35 = vld [vmem:[#allocation93_spill] sm:$0xff] }
 0xc36   : > { %6200 = vmatpush1.xpose.msra.mxu0 %v5947_v1  ;;  %v5683_v8 = vpop.xlane.xlu1 %5682  ;;  %v5731_v9 = vpop.xlane.xlu0 %5730  ;;  %v5946_v30 = vmul.f32 %v7447_v15, %v10729_v55  ;;  %v5945_v61 = vmul.f32 %v7447_v15, %v10727_v14  ;;  %v12096_v55 = vld [vmem:[#allocation123_spill] sm:$0xff]  ;;  %v12097_v14 = vld [vmem:[#allocation45_spill] sm:$0xff] }
 0xc37   : > { %7460 = vrcp.f32 %v5683_v8  ;;  %6131 = vmatprep.subr.mxu1 %v5914_v6  ;;  %v12117_v6 = vld [vmem:[#allocation92_spill] sm:$0xff]  ;;  %v7464_v8 = vld [vmem:[%s11038_s5] sm:$0xff] }
 0xc38   : > { %v7449_v23 = vpop.eup %7448  ;;  %7462 = vrcp.f32 %v5731_v9  ;;  %6201 = vmatprep.subr.mxu0 %v5946_v30 }
 0xc39   : > { %v7451_v41 = vpop.eup %7450  ;;  %6132 = vmatpush1.xpose.msra.mxu1 %v5913_v24  ;;  %v5912_v58 = vmul.f32 %v7449_v23, %v10751_v37  ;;  %v5911_v47 = vmul.f32 %v7449_v23, %v12095_v38  ;;  %v12118_v24 = vld [vmem:[#allocation89_spill] sm:$0xff] }
 0xc3a   : > { %6202 = vmatpush1.xpose.msra.mxu0 %v5945_v61  ;;  %v10916_v12 = vpop.permute.xlu1 %3918  ;;  %v5944_v45 = vmul.f32 %v7451_v41, %v12096_v55  ;;  %v5943_v34 = vmul.f32 %v7451_v41, %v12097_v14  ;;  %v7465_v55 = vld [vmem:[%s11038_s5 + $0x8] sm:$0xff]  ;;  %v7467_v14 = vld [vmem:[%s11038_s5 + $0x18] sm:$0xff] }
 0xc3b   : > { %v4015_v2 = vadd.f32 %v12098_v28, %v10916_v12  ;;  %6133 = vmatprep.subr.mxu1 %v5912_v58 }
 0xc3c   : > { %v7453_v26 = vpop.eup %7452  ;;  %6203 = vmatprep.subr.mxu0 %v5944_v45  ;;  %v7466_v45 = vld [vmem:[%s11038_s5 + $0x10] sm:$0xff] }
 0xc3d   : > { %v7455_v53 = vpop.eup %7454  ;;  %v4033_v16 = vadd.f32 %v4015_v2, %v12099_v27  ;;  %6134 = vmatpush1.xpose.msra.mxu1 %v5911_v47  ;;  %v5910_v37 = vmul.f32 %v7453_v26, %v10763_v50  ;;  %v5909_v33 = vmul.f32 %v7453_v26, %v12100_v54  ;;  %v12104_v50 = vld [vmem:[#allocation126_spill] sm:$0xff]  ;;  %v12119_v26 = vld [vmem:[#allocation11_spill] sm:$0xff] }
 0xc3e   : > { %6204 = vmatpush1.xpose.msra.mxu0 %v5943_v34  ;;  %v10925_v63 = vpop.permute.xlu1 %3923  ;;  %v10927_v0 = vpop.permute.xlu0 %3913  ;;  %v5942_v49 = vmul.f32 %v7455_v53, %v12101_v51  ;;  %v5941_v29 = vmul.f32 %v7455_v53, %v12102_v13 }
 0xc3f   : > { %4037 = vst [vmem:[%s10931_s16 + $0x10] sm:$0xff] %v4033_v16  ;;  %v4020_v5 = vadd.f32 %v12103_v19, %v10925_v63  ;;  %v4010_v40 = vadd.f32 %v12104_v50, %v10927_v0  ;;  %6135 = vmatprep.subr.mxu1 %v5910_v37  ;;  %v12120_v37 = vld [vmem:[#allocation14_spill] sm:$0xff] }
 0xc40   : > { %v7457_v59 = vpop.eup %7456  ;;  %6205 = vmatprep.subr.mxu0 %v5942_v49  ;;  %v12121_v49 = vld [vmem:[#allocation7_spill] sm:$0xff] }
 0xc41   : > { %v7459_v62 = vpop.eup %7458  ;;  %v4034_v36 = vadd.f32 %v4020_v5, %v12105_v32  ;;  %v4032_v4 = vadd.f32 %v4010_v40, %v12106_v52  ;;  %6136 = vmatpush1.xpose.msra.mxu1 %v5909_v33  ;;  %v5908_v46 = vmul.f32 %v7457_v59, %v12107_v7  ;;  %v5907_v60 = vmul.f32 %v7457_v59, %v12108_v3 }
 0xc42   : > { %6206 = vmatpush1.xpose.msra.mxu0 %v5941_v29  ;;  %v3929_v21 = vpop.permute.xlu0 %3928  ;;  %v5940_v25 = vmul.f32 %v7459_v62, %v12109_v44  ;;  %v5939_v18 = vmul.f32 %v7459_v62, %v12110_v22 }
 0xc43   : > { %4038 = vst [vmem:[%s10931_s16 + $0x20] sm:$0xff] %v4034_v36  ;;  %4036 = vst [vmem:[%s10931_s16] sm:$0xff] %v4032_v4  ;;  %v4025_v31 = vadd.f32 %v12111_v43, %v3929_v21  ;;  %6137 = vmatprep.subr.mxu1 %v5908_v46 }
 0xc44   : > { %v7461_v57 = vpop.eup %7460  ;;  %6207 = vmatprep.subr.mxu0 %v5940_v25 }
 0xc45   : > { %v7463_v39 = vpop.eup %7462  ;;  %v4035_v48 = vadd.f32 %v4025_v31, %v12112_v17  ;;  %6138 = vmatpush1.xpose.msra.mxu1 %v5907_v60  ;;  %v5906_v56 = vmul.f32 %v7461_v57, %v12113_v42  ;;  %v5905_v11 = vmul.f32 %v7461_v57, %v12114_v10 }
 0xc46   : > { %6208 = vmatpush1.xpose.msra.mxu0 %v5939_v18  ;;  %v5938_v1 = vmul.f32 %v7463_v39, %v12115_v20  ;;  %v5937_v15 = vmul.f32 %v7463_v39, %v12116_v35 }
 0xc47   : > { %4039 = vst [vmem:[%s10931_s16 + $0x30] sm:$0xff] %v4035_v48  ;;  %6139 = vmatprep.subr.mxu1 %v5906_v56 }
 0xc48   : > { %6209 = vmatprep.subr.mxu0 %v5938_v1 }
 0xc49   : > { %6140 = vmatpush1.xpose.msra.mxu1 %v5905_v11 }
 0xc4a   : > { %6210 = vmatpush1.xpose.msra.mxu0 %v5937_v15 }
 0xc4c   : > { %6174 = vmatmul.mubr.f32.vlgmr.msra.gmra.mxu1 %v12117_v6 }
 0xc4d   : > { %6244 = vmatmul.mubr.f32.vlgmr.msra.gmra.mxu0 %v12118_v24  ;;  %6628 = vmatprep.mubr.msk.f32.mxu1 %vm1512_vm8, %v7464_v8 }
 0xccb   : > { %v6035_v9 = vpop.f32.mrf.mxu1  ;;  %v6105_v30 = vpop.f32.mrf.mxu0 }
 0xccd   : > { %v6037_v61 = vpop.f32.mrf.mxu1  ;;  %v6107_v23 = vpop.f32.mrf.mxu0 }
 0xd0c   : > { %v6175_v41 = vpop.f32.mrf.mxu1 }
 0xd0d   : > { %v6245_v58 = vpop.f32.mrf.mxu0 }
 0xd0e   : > { %6620 = vmatprep.subr.mxu1 %v6245_v58  ;;  %v6177_v38 = vpop.f32.mrf.mxu1 }
 0xd0f   : > { %v6247_v47 = vpop.f32.mrf.mxu0  ;;  %6621 = vmatpush3.msra.mxu1 %v6245_v58 }
 0xd10   : > { %6622 = vmatprep.subr.mxu1 %v6175_v41 }
 0xd11   : > { %6623 = vmatpush3.msra.mxu1 %v6175_v41 }
 0xd12   : > { %6624 = vmatprep.subr.mxu1 %v6105_v30 }
 0xd13   : > { %6625 = vmatpush3.msra.mxu1 %v6105_v30 }
 0xd14   : > { %6626 = vmatprep.subr.mxu1 %v6035_v9 }
 0xd15   : > { %6627 = vmatpush3.msra.mxu1 %v6035_v9 }
 0xd16   : > { %6629 = vmatmul.mubr.msk.f32.vlgmr.msra.gmra.mxu1 %vm1512_vm8, %v7465_v55 }
 0xd17   : > { %6631 = vmatprep.mubr.msk.f32.mxu1 %vm1512_vm8, %v7466_v45 }
 0xd1a   : > { %6632 = vmatmul.mubr.msk.f32.gmra.mxu1 %vm1512_vm8, %v7467_v14 }
 0xdd6   : > { %v6630_v34 = vpop.f32.mrf.mxu1 }
 0xdd7   : > { %v6321_v28 = vadd.f32 %v6630_v34, %v10916_v12 }
 0xdd8   : > { %v6315_v2 = vpop.f32.mrf.mxu1 }
 0xdd9   : > { %v6340_v53 = vadd.f32 %v6321_v28, %v12119_v26  ;;  %v6316_v27 = vadd.f32 %v6315_v2, %v10927_v0  ;;  %v12122_v0 = vld [vmem:[#allocation9_spill] sm:$0xff] }
 0xdda   : > { %v6633_v16 = vpop.f32.mrf.mxu1 }
 0xddb   : > { %6580 = vst [vmem:[%s10931_s16 + $0x18] sm:$0xff] %v6340_v53  ;;  %v6339_v54 = vadd.f32 %v6316_v27, %v12120_v37  ;;  %v6331_v33 = vadd.f32 %v6633_v16, %v3929_v21 }
 0xddc   : > { %v6325_v51 = vpop.f32.mrf.mxu1 }
 0xddd   : > { %6579 = vst [vmem:[%s10931_s16 + $0x8] sm:$0xff] %v6339_v54  ;;  %v6342_v12 = vadd.f32 %v6331_v33, %v12121_v49  ;;  %v6326_v13 = vadd.f32 %v6325_v51, %v10925_v63 }
 0xddf   : > { %6582 = vst [vmem:[%s10931_s16 + $0x38] sm:$0xff] %v6342_v12  ;;  %v6341_v29 = vadd.f32 %v6326_v13, %v12122_v0 }
 0xde1   : > { %6581 = vst [vmem:[%s10931_s16 + $0x28] sm:$0xff] %v6341_v29 }
 0xde2   : > { %7481 = shalt.err (!%p7478_p3)
}
 0xde3   : > { %s7482_s14 = scalar_lea.hbm %s10984_s17, 1024  ;;  %s7486_s23 = scalar_lea.hbm %s11040_s7, 2048 }
 0xde4   : > { %p7483_p4 = scmp.ne.s32.totalorder %s10984_s17, %s7482_s14  ;;  %p7487_p9 = scmp.lt.s32.totalorder %s10984_s17, %s11040_s7 }
 0xde5   : > { %p7488_p10 = scmp.lt.s32.totalorder %s7486_s23, %s7482_s14 }
 0xde6   : > { %p7484_p7 = pnand %p7483_p4, %p7618_p5 }
 0xde7   : > { %p7489_p11 = por %p7488_p10, %p7487_p9 }
 0xde8   : > { %p7485_p8 = pneg %p7484_p7 }
 0xdea   : > { %p7490_p12 = pnand %p7489_p11, %p7485_p8 }
 0xdec   : > { %7493 = shalt.err (!%p7490_p12)
}
 0xded   : > { %s7538_s13 = smov 256   ;;  %s7539_s15 = smov 16  }
 0xdee   : > { %6642 = dma.vmem_to_hbm [thread:$0]  (%p7618_p5), %s10986_s9, 1024, %s10984_s17, %s10993_s28, %s7538_s13, %s7538_s13, %s7539_s15  }
 0xdef PF: > { %p6648_p13 = scmp.ge.s32.totalorder %s7528_s27, 2  ;;  %s6377_s18 = sand.u32 1, %s7516_s24  }
 0xdf0   : > { %s6378_s19 = scalar_lea.sflag [#allocation5], %s6377_s18 }
 0xdf1   : > { %p6645_p0 = pnand %p6648_p13, %p7622_p6 }
 0xdf3   : > { %p6646_p1 = pneg %p6645_p0 }
 0xdf5   : > { %7511 = dma.done.wait (%p6646_p1), %s6378_s19, 1024  }
 0xdf6   : > { %7513 = vsyncadd (%p6646_p1), %s6378_s19, 4294966272  ;;  %p17_p2 = scmp.ge.s32.totalorder %s7605_s30, 4   ;;  %s12123_s24 = smov %s7520_s25 }
 0xdf7   : > { %s12124_s25 = smov %s7524_s26  ;;  %s12125_s26 = smov %s7616_s10 }
 0xdf8   : > { %s12126_s27 = smov %s7605_s30  ;;  %19 = sbr.rel (!%p17_p2) target bundleno = 3 (0x3), region = 86 }
 0xdfd   :  { %6383 = vsyncpa [#allocation5], 1 }
 0xdfe   :  { %6385 = vsyncpa [#allocation5 + $0x1], 1 }

</bundles_post_ra>
